<compile_context>
chip_gen: v7x
topology: tpu7x:2x2x1
jax: 0.10.0
libtpu: 0.0.40
codegen_flags: <defaults>
</compile_context>

<pallas_src>
import functools

import jax
import jax.numpy as jnp
from jax import lax
from jax.experimental import pallas as pl
from jax.experimental.pallas import tpu as pltpu

FC_IN = 1544   # fc_in_dim in the PyTorch module
FC_HID = 1024
FC_OUT = 512   # self.fc_out_dim
LANE = 128
SUBLANE = 8
FC_IN_PAD = ((FC_IN + LANE - 1) // LANE) * LANE   # 1664 = 13 * 128


def _round_up(x, m):
    return ((x + m - 1) // m) * m


# ----------------------------------------------------------------------------- kernel
def _proto_fused_kernel(alpha_ref, labels_ref, x_ref, w1_ref, b1_ref, w2_ref,
                        b2_ref, o_ref, *, num_classes_pad, ns_pad, nq_pad):
    """Fused fc -> prototypes -> -squared-euclidean logits (all padded/aligned).

    x_ref holds [support ; zero rows ; query ; zero rows] so the fc weights are
    read exactly once and every slice boundary is sublane-aligned.
    """
    # ---- fc on all rows in one shot (bf16 MXU, f32 accumulation) --------------
    h = jnp.dot(x_ref[...], w1_ref[...],
                preferred_element_type=jnp.float32) + b1_ref[...]
    a = alpha_ref[0]                                       # shared PReLU slope
    h = jnp.where(h >= 0.0, h, a * h)                      # PReLU
    # Dropout(0.1): identity at inference time.
    z = jnp.dot(h.astype(jnp.bfloat16), w2_ref[...],
                preferred_element_type=jnp.float32) + b2_ref[...]

    s = z[:ns_pad]                                         # (ns_pad, D) support (+ zero rows)
    q = z[ns_pad:ns_pad + nq_pad]                          # (nq_pad, D) query (+ pad rows)

    # ---- class prototypes: one-hot mean, one-hot built in-kernel --------------
    labels = labels_ref[...]                               # (1, ns_pad) int32, pads = -1
    classes = lax.broadcasted_iota(jnp.int32, (num_classes_pad, ns_pad), 0)
    onehot = (labels == classes).astype(jnp.float32)       # (C_pad, ns_pad); pad cols/rows are 0
    counts = jnp.sum(onehot, axis=1, keepdims=True)        # (C_pad, 1)
    protos = jnp.dot(onehot, s, preferred_element_type=jnp.float32)
    protos = protos / jnp.maximum(counts, 1.0)             # (C_pad, D); pad classes -> 0

    # ---- logits[i,c] = -||q_i - p_c||^2 = 2 q_i.p_c - ||q_i||^2 - ||p_c||^2 ----
    q_sq = jnp.sum(q * q, axis=1, keepdims=True)           # (nq_pad, 1)
    p_sq = jnp.sum(protos * protos, axis=1, keepdims=True) # (C_pad, 1)
    gram = lax.dot_general(q, protos, (((1,), (1,)), ((), ())),
                           preferred_element_type=jnp.float32)   # (nq_pad, C_pad)
    # (nq_pad, 128) lane-dense, unmasked store; wrapper slices valid rows/cols.
    o_ref[...] = 2.0 * gram - q_sq - p_sq.T


# ----------------------------------------------------------------------------- wrapper
class Config:
    distance_metric = "euclidean"


def prototypical_network_forward(params, batch, num_classes, config=Config()):
    """JAX/Pallas equivalent of PrototypicalNetwork.forward (euclidean branch)."""
    support_features, support_target, query_features, _query_target = batch
    w1, b1, w2, b2, alpha = params

    if config.distance_metric == "mahalanobis":
        # TODO(synk): mahalanobis branch (torch.inverse + data-dependent per-class
        # covariance gather) has no clean Pallas equivalent; not ported.
        raise NotImplementedError("mahalanobis branch not ported")

    ns = support_features.shape[0]
    nq = query_features.shape[0]
    ns_pad = _round_up(ns, SUBLANE)
    nq_pad = _round_up(nq, SUBLANE)
    c_pad = _round_up(num_classes, LANE)
    col_pad = FC_IN_PAD - FC_IN

    # One fc pass over [support ; zero rows ; query ; zero rows]; zero-padding the
    # feature axis (and the matching W1 rows) is numerically a no-op.
    x_all = jnp.concatenate(
        [support_features,
         jnp.zeros((ns_pad - ns, FC_IN), support_features.dtype),
         query_features,
         jnp.zeros((nq_pad - nq, FC_IN), query_features.dtype)], axis=0)
    x_all = jnp.pad(x_all, ((0, 0), (0, col_pad))).astype(jnp.bfloat16)
    w1p = jnp.pad(w1, ((0, col_pad), (0, 0))).astype(jnp.bfloat16)
    w2b = w2.astype(jnp.bfloat16)

    # Support labels padded with -1 (never matches a class id) -> (1, ns_pad).
    labels = jnp.full((1, ns_pad), -1, jnp.int32).at[0, :ns].set(
        support_target.astype(jnp.int32))

    kernel = functools.partial(_proto_fused_kernel, num_classes_pad=c_pad,
                               ns_pad=ns_pad, nq_pad=nq_pad)
    vmem = pl.BlockSpec(memory_space=pltpu.MemorySpace.VMEM)
    smem = pl.BlockSpec(memory_space=pltpu.MemorySpace.SMEM)
    logits_pad = pl.pallas_call(
        kernel,
        out_shape=jax.ShapeDtypeStruct((nq_pad, c_pad), jnp.float32),
        in_specs=[smem, vmem, vmem, vmem, vmem, vmem, vmem],
        out_specs=vmem,
        compiler_params=pltpu.CompilerParams(vmem_limit_bytes=32 << 20),
    )(alpha, labels, x_all, w1p, b1, w2b, b2)
    return logits_pad[:nq, :num_classes]


# ----------------------------------------------------------------------------- reference
def _ref_forward(params, batch, num_classes):
    """Pure-JAX reference with the same bf16 weight/activation quantization."""
    support_features, support_target, query_features, _ = batch
    w1, b1, w2, b2, alpha = params
    f32, bf16 = jnp.float32, jnp.bfloat16
    w1q = w1.astype(bf16).astype(f32)
    w2q = w2.astype(bf16).astype(f32)

    def fc(x):
        xq = x.astype(bf16).astype(f32)
        h = xq @ w1q + b1
        h = jnp.where(h >= 0.0, h, alpha[0] * h)
        hq = h.astype(bf16).astype(f32)
        return hq @ w2q + b2

    s = fc(support_features)
    q = fc(query_features)
    onehot = (support_target[None, :] == jnp.arange(num_classes)[:, None]).astype(f32)
    cnt = jnp.maximum(jnp.sum(onehot, axis=1, keepdims=True), 1.0)
    protos = (onehot @ s) / cnt
    d = q[:, None, :] - protos[None, :, :]
    return -jnp.sum(d * d, axis=2)


# ----------------------------------------------------------------------------- main
if __name__ == "__main__":
    key = jax.random.PRNGKey(0)
    k1, k2, k3, k4, k5, k6 = jax.random.split(key, 6)

    # Deterministic synthetic parameters (shapes dictated by the module's __init__).
    w1 = jax.random.normal(k1, (FC_IN, FC_HID), jnp.float32) * (1.0 / jnp.sqrt(FC_IN))
    b1 = jax.random.normal(k2, (1, FC_HID), jnp.float32) * 0.01
    w2 = jax.random.normal(k3, (FC_HID, FC_OUT), jnp.float32) * (1.0 / jnp.sqrt(FC_HID))
    b2 = jax.random.normal(k4, (1, FC_OUT), jnp.float32) * 0.01
    alpha = jnp.array([0.25], jnp.float32)            # nn.PReLU() default slope
    params = (w1, b1, w2, b2, alpha)

    # Small 5-way / 2-shot episode with 6 query examples.
    num_classes = 5
    support_target = jnp.array([0, 0, 1, 1, 2, 2, 3, 3, 4, 4], jnp.int32)
    query_target = jnp.array([0, 1, 2, 3, 4, 0], jnp.int32)
    support_features = jax.random.normal(k5, (10, FC_IN), jnp.float32)
    query_features = jax.random.normal(k6, (6, FC_IN), jnp.float32)
    batch = (support_features, support_target, query_features, query_target)

    logits = prototypical_network_forward(params, batch, num_classes)
    logits = jax.block_until_ready(logits)

    ref = _ref_forward(params, batch, num_classes)
    assert logits.shape == (6, num_classes), logits.shape
    assert jnp.allclose(logits, ref, rtol=2e-3, atol=1e-1), (
        "mismatch vs reference:\n%s\n%s" % (logits, ref))

    print("KERNEL_OK")
</pallas_src>

<mosaic_0001>
module attributes {stable_mosaic.version = 11 : i64} {
  func.func @_proto_fused_kernel(%arg0: memref<1xf32, #tpu.memory_space<smem>>, %arg1: memref<1x16xi32, #tpu.memory_space<vmem>>, %arg2: memref<24x1664xbf16, #tpu.memory_space<vmem>>, %arg3: memref<1664x1024xbf16, #tpu.memory_space<vmem>>, %arg4: memref<1x1024xf32, #tpu.memory_space<vmem>>, %arg5: memref<1024x512xbf16, #tpu.memory_space<vmem>>, %arg6: memref<1x512xf32, #tpu.memory_space<vmem>>, %arg7: memref<8x128xf32, #tpu.memory_space<vmem>>) attributes {dimension_semantics = [], scalar_prefetch = 0 : i64, scratch_operands = 0 : i64, tpu.core_type = #tpu.core_type<tc>} {
    %c0 = arith.constant 0 : index
    %c0_0 = arith.constant 0 : index
    %0 = vector.load %arg2[%c0, %c0_0] : memref<24x1664xbf16, #tpu.memory_space<vmem>>, vector<24x1664xbf16>
    %c0_1 = arith.constant 0 : index
    %c0_2 = arith.constant 0 : index
    %1 = vector.load %arg3[%c0_1, %c0_2] : memref<1664x1024xbf16, #tpu.memory_space<vmem>>, vector<1664x1024xbf16>
    %cst = arith.constant dense<0.000000e+00> : vector<24x1024xf32>
    %2 = tpu.matmul %0, %1, %cst {dimension_numbers = #tpu.dot_dimension_numbers<[1], [0], [0], [1], [0, 0, 1, 1], [], []>} : vector<24x1664xbf16>, vector<1664x1024xbf16>, vector<24x1024xf32> -> vector<24x1024xf32>
    %c0_3 = arith.constant 0 : index
    %c0_4 = arith.constant 0 : index
    %3 = vector.load %arg4[%c0_3, %c0_4] : memref<1x1024xf32, #tpu.memory_space<vmem>>, vector<1x1024xf32>
    %4 = vector.broadcast %3 : vector<1x1024xf32> to vector<24x1024xf32>
    %5 = arith.addf %2, %4 : vector<24x1024xf32>
    %c0_5 = arith.constant 0 : index
    %6 = memref.load %arg0[%c0_5] : memref<1xf32, #tpu.memory_space<smem>>
    %cst_6 = arith.constant 0.000000e+00 : f32
    %7 = vector.broadcast %cst_6 : f32 to vector<24x1024xf32>
    %8 = arith.cmpf oge, %5, %7 : vector<24x1024xf32>
    %9 = vector.broadcast %6 : f32 to vector<24x1024xf32>
    %10 = arith.mulf %9, %5 : vector<24x1024xf32>
    %11 = arith.select %8, %5, %10 : vector<24x1024xi1>, vector<24x1024xf32>
    %12 = arith.truncf %11 : vector<24x1024xf32> to vector<24x1024xbf16>
    %c0_7 = arith.constant 0 : index
    %c0_8 = arith.constant 0 : index
    %13 = vector.load %arg5[%c0_7, %c0_8] : memref<1024x512xbf16, #tpu.memory_space<vmem>>, vector<1024x512xbf16>
    %cst_9 = arith.constant dense<0.000000e+00> : vector<24x512xf32>
    %14 = tpu.matmul %12, %13, %cst_9 {dimension_numbers = #tpu.dot_dimension_numbers<[1], [0], [0], [1], [0, 0, 1, 1], [], []>} : vector<24x1024xbf16>, vector<1024x512xbf16>, vector<24x512xf32> -> vector<24x512xf32>
    %c0_10 = arith.constant 0 : index
    %c0_11 = arith.constant 0 : index
    %15 = vector.load %arg6[%c0_10, %c0_11] : memref<1x512xf32, #tpu.memory_space<vmem>>, vector<1x512xf32>
    %16 = vector.broadcast %15 : vector<1x512xf32> to vector<24x512xf32>
    %17 = arith.addf %14, %16 : vector<24x512xf32>
    %18 = vector.extract_strided_slice %17 {offsets = [0, 0], sizes = [16, 512], strides = [1, 1]} : vector<24x512xf32> to vector<16x512xf32>
    %19 = vector.extract_strided_slice %17 {offsets = [16, 0], sizes = [8, 512], strides = [1, 1]} : vector<24x512xf32> to vector<8x512xf32>
    %c0_12 = arith.constant 0 : index
    %c0_13 = arith.constant 0 : index
    %20 = vector.load %arg1[%c0_12, %c0_13] : memref<1x16xi32, #tpu.memory_space<vmem>>, vector<1x16xi32>
    %21 = tpu.iota {dimensions = array<i32: 0>} : vector<128x16xi32>
    %22 = vector.broadcast %20 : vector<1x16xi32> to vector<128x16xi32>
    %23 = arith.cmpi eq, %22, %21 : vector<128x16xi32>
    %24 = arith.extui %23 : vector<128x16xi1> to vector<128x16xi32>
    %25 = arith.sitofp %24 : vector<128x16xi32> to vector<128x16xf32>
    %cst_14 = arith.constant dense<0.000000e+00> : vector<128xf32>
    %26 = vector.multi_reduction <add>, %25, %cst_14 [1] : vector<128x16xf32> to vector<128xf32>
    %27 = vector.shape_cast %26 : vector<128xf32> to vector<128x1xf32>
    %cst_15 = arith.constant dense<0.000000e+00> : vector<128x512xf32>
    %28 = tpu.matmul %25, %18, %cst_15 {dimension_numbers = #tpu.dot_dimension_numbers<[1], [0], [0], [1], [0, 0, 1, 1], [], []>} : vector<128x16xf32>, vector<16x512xf32>, vector<128x512xf32> -> vector<128x512xf32>
    %cst_16 = arith.constant 1.000000e+00 : f32
    %29 = vector.broadcast %cst_16 : f32 to vector<128x1xf32>
    %30 = arith.maximumf %27, %29 : vector<128x1xf32>
    %31 = vector.broadcast %30 : vector<128x1xf32> to vector<128x512xf32>
    %32 = arith.divf %28, %31 : vector<128x512xf32>
    %33 = arith.mulf %19, %19 : vector<8x512xf32>
    %cst_17 = arith.constant dense<0.000000e+00> : vector<8xf32>
    %34 = vector.multi_reduction <add>, %33, %cst_17 [1] : vector<8x512xf32> to vector<8xf32>
    %35 = vector.shape_cast %34 : vector<8xf32> to vector<8x1xf32>
    %36 = arith.mulf %32, %32 : vector<128x512xf32>
    %cst_18 = arith.constant dense<0.000000e+00> : vector<128xf32>
    %37 = vector.multi_reduction <add>, %36, %cst_18 [1] : vector<128x512xf32> to vector<128xf32>
    %38 = vector.shape_cast %37 : vector<128xf32> to vector<128x1xf32>
    %cst_19 = arith.constant dense<0.000000e+00> : vector<8x128xf32>
    %39 = tpu.matmul %19, %32, %cst_19 {dimension_numbers = #tpu.dot_dimension_numbers<[1], [1], [0], [0], [0, 0, 1, 0], [], []>} : vector<8x512xf32>, vector<128x512xf32>, vector<8x128xf32> -> vector<8x128xf32>
    %cst_20 = arith.constant 2.000000e+00 : f32
    %40 = vector.broadcast %cst_20 : f32 to vector<8x128xf32>
    %41 = arith.mulf %40, %39 : vector<8x128xf32>
    %42 = vector.broadcast %35 : vector<8x1xf32> to vector<8x128xf32>
    %43 = arith.subf %41, %42 : vector<8x128xf32>
    %44 = tpu.transpose %38, [1, 0] : vector<128x1xf32> -> vector<1x128xf32>
    %45 = vector.broadcast %44 : vector<1x128xf32> to vector<8x128xf32>
    %46 = arith.subf %43, %45 : vector<8x128xf32>
    %c0_21 = arith.constant 0 : index
    %c0_22 = arith.constant 0 : index
    %47 = vector.load %arg7[%c0_21, %c0_22] : memref<8x128xf32, #tpu.memory_space<vmem>>, vector<8x128xf32>
    tpu.vector_store %arg7[%c0_21, %c0_22], %46 {strides = array<i32>} : memref<8x128xf32, #tpu.memory_space<vmem>>, vector<8x128xf32>,
    return
  }
}

</mosaic_0001>

<bundles_post_ra>
// kernel: tpu_custom_call.1
= control target key start
LH: loop header
LB: loop body
LE: loop exit
PB: predicated region body
PF: predicated region fallthrough
CT: control target
= control target key end

     0   :  { %13 = vsyncpa [#allocation4], 0  ;;  %s12455_s0 = inlined_call_operand.<no memory space> [shape: f32[1], index: 0, kind: input, shape index: {}]   ;;  %s12456_s1 = inlined_call_operand.hbm [shape: s32[1,16], index: 1, kind: input, shape index: {}]   ;;  %s12457_s2 = inlined_call_operand.hbm [shape: bf16[24,1664], index: 2, kind: input, shape index: {}]   ;;  %s12458_s3 = inlined_call_operand.hbm [shape: bf16[1664,1024], index: 3, kind: input, shape index: {}]   ;;  %s12459_s4 = inlined_call_operand.hbm [shape: f32[1,1024], index: 4, kind: input, shape index: {}]   ;;  %s12460_s5 = inlined_call_operand.hbm [shape: bf16[1024,512], index: 5, kind: input, shape index: {}]   ;;  %s12461_s6 = inlined_call_operand.hbm [shape: f32[1,512], index: 6, kind: input, shape index: {}]   ;;  %s12462_s7 = inlined_call_operand.hbm [shape: f32[8,128], index: 7, kind: output, shape index: {}]  }
   0x1   :  { %14 = vsyncpa [#allocation7], 0 }
   0x2   :  { %15 = vsyncpa [#allocation10], 0 }
   0x3   :  { %16 = vsyncpa [#allocation13], 0 }
   0x4   :  { %17 = vsyncpa [#allocation5], 0  ;;  %s11846_s24 = smov [#allocation6]   ;;  %s11682_s28 = scalar_lea.hbm %s12457_s2, 2496 }
   0x5   :  { %s35_s25 = sshll.u32 %s11846_s24, 4  ;;  %p11683_p0 = scmp.ne.s32.totalorder %s12457_s2, %s11682_s28  ;;  %s36_s25 = int_to_ptr.vmem [resolvable:$true] %s35_s25 }
   0x6   :  { %p11686_p1 = scmp.lt.u32.totalorder %s11682_s28, %s12457_s2 }
   0x8   :  { %p11688_p2 = pnand %p11686_p1, %p11683_p0 }
   0xa   :  { %11691 = shalt.err (!%p11688_p2)
}
   0xb   :  { %s11692_s10 = scalar_lea.vmem %s36_s25, 2496  ;;  %p11697_p4 = scmp.lt.s32.totalorder %s36_s25, %s36_s25 }
   0xc   :  { %p11693_p3 = scmp.ne.s32.totalorder %s36_s25, %s11692_s10  ;;  %p11698_p5 = scmp.lt.s32.totalorder %s11692_s10, %s11692_s10 }
   0xe   :  { %p11699_p6 = por %p11698_p5, %p11697_p4 }
  0x10   :  { %p11700_p7 = pnand %p11699_p6, %p11693_p3 }
  0x12   :  { %11703 = shalt.err (!%p11700_p7)
}
  0x13   :  { %s11847_s11 = smov 832   ;;  %s11848_s12 = smov 52  }
  0x14   :  { %41 = dma.hbm_to_vmem [thread:$0]  %s12457_s2, 2496, %s36_s25, [#allocation7], %s11847_s11, %s11847_s11, %s11848_s12  }
  0x15   :  { %s11849_s15 = smov [#allocation9]   ;;  %s11850_s17 = smov [#allocation3]  }
  0x16   :  { %s60_s16 = sshll.u32 %s11849_s15, 4  ;;  %s26_s18 = sshll.u32 %s11850_s17, 4  ;;  %s61_s16 = int_to_ptr.vmem [resolvable:$true] %s60_s16  ;;  %s27_s18 = int_to_ptr.vmem [resolvable:$true] %s26_s18 }
  0x17   :  { %s11704_s21 = scalar_lea.hbm %s12459_s4, 128 }
  0x18   :  { %p11705_p8 = scmp.ne.s32.totalorder %s12459_s4, %s11704_s21  ;;  %p11708_p9 = scmp.lt.u32.totalorder %s11704_s21, %s12459_s4 }
  0x1a   :  { %p11710_p10 = pnand %p11708_p9, %p11705_p8 }
  0x1c   :  { %11713 = shalt.err (!%p11710_p10)
}
  0x1d   :  { %s11714_s2 = scalar_lea.vmem %s61_s16, 128  ;;  %p11719_p12 = scmp.lt.s32.totalorder %s61_s16, %s61_s16 }
  0x1e   :  { %p11715_p11 = scmp.ne.s32.totalorder %s61_s16, %s11714_s2  ;;  %p11720_p13 = scmp.lt.s32.totalorder %s11714_s2, %s11714_s2 }
  0x20   :  { %p11721_p0 = por %p11720_p13, %p11719_p12 }
  0x22   :  { %p11722_p1 = pnand %p11721_p0, %p11715_p11 }
  0x24   :  { %11725 = shalt.err (!%p11722_p1)
}
  0x25   :  { %63 = dma.hbm_to_vmem [thread:$0]  %s12459_s4, 128, %s61_s16, [#allocation10]  }
  0x26   :  { %s11726_s30 = scalar_lea.hbm %s12456_s1, 16 }
  0x27   :  { %p11727_p2 = scmp.ne.s32.totalorder %s12456_s1, %s11726_s30  ;;  %p11730_p3 = scmp.lt.u32.totalorder %s11726_s30, %s12456_s1 }
  0x29   :  { %p11732_p4 = pnand %p11730_p3, %p11727_p2 }
  0x2b   :  { %11735 = shalt.err (!%p11732_p4)
}
  0x2c   :  { %s11736_s12 = scalar_lea.vmem %s27_s18, 16  ;;  %s11740_s13 = scalar_lea.vmem %s27_s18, 32 }
  0x2d   :  { %p11737_p5 = scmp.ne.s32.totalorder %s27_s18, %s11736_s12  ;;  %p11741_p6 = scmp.lt.s32.totalorder %s27_s18, %s27_s18 }
  0x2e   :  { %p11742_p7 = scmp.lt.s32.totalorder %s11740_s13, %s11736_s12 }
  0x30   :  { %p11743_p8 = por %p11742_p7, %p11741_p6 }
  0x32   :  { %p11744_p9 = pnand %p11743_p8, %p11737_p5 }
  0x34   :  { %11747 = shalt.err (!%p11744_p9)
}
  0x35   :  { %29 = dma.hbm_to_vmem [thread:$0]  %s12456_s1, 16, %s27_s18, [#allocation4]  }
  0x36   :  { %s11851_s15 = smov [#allocation8]   ;;  %s11748_s20 = scalar_lea.hbm %s12458_s3, 106496 }
  0x37   :  { %s47_s16 = sshll.u32 %s11851_s15, 4  ;;  %p11749_p10 = scmp.ne.s32.totalorder %s12458_s3, %s11748_s20  ;;  %s48_s16 = int_to_ptr.vmem [resolvable:$true] %s47_s16 }
  0x38   :  { %p11752_p11 = scmp.lt.u32.totalorder %s11748_s20, %s12458_s3 }
  0x3a   :  { %p11754_p12 = pnand %p11752_p11, %p11749_p10 }
  0x3c   :  { %11757 = shalt.err (!%p11754_p12)
}
  0x3d   :  { %s11758_s26 = scalar_lea.vmem %s48_s16, 106496  ;;  %p11763_p0 = scmp.lt.s32.totalorder %s48_s16, %s48_s16 }
  0x3e   :  { %p11759_p13 = scmp.ne.s32.totalorder %s48_s16, %s11758_s26  ;;  %p11764_p1 = scmp.lt.s32.totalorder %s11758_s26, %s11758_s26 }
  0x40   :  { %p11765_p2 = por %p11764_p1, %p11763_p0 }
  0x42   :  { %p11766_p3 = pnand %p11765_p2, %p11759_p13 }
  0x44   :  { %11769 = shalt.err (!%p11766_p3)
}
  0x45   :  { %s11852_s1 = smov 512   ;;  %s11853_s18 = smov 32  }
  0x46   :  { %53 = dma.hbm_to_vmem [thread:$0]  %s12458_s3, 106496, %s48_s16, [#allocation7], %s11852_s1, %s11852_s1, %s11853_s18  }
  0x47   :  { %s11854_s27 = smov [#allocation11]   ;;  %s11770_s8 = scalar_lea.hbm %s12460_s5, 32768 }
  0x48   :  { %s69_s28 = sshll.u32 %s11854_s27, 4  ;;  %p11771_p4 = scmp.ne.s32.totalorder %s12460_s5, %s11770_s8  ;;  %s70_s28 = int_to_ptr.vmem [resolvable:$true] %s69_s28 }
  0x49   :  { %p11774_p5 = scmp.lt.u32.totalorder %s11770_s8, %s12460_s5 }
  0x4b   :  { %p11776_p6 = pnand %p11774_p5, %p11771_p4 }
  0x4d   :  { %11779 = shalt.err (!%p11776_p6)
}
  0x4e   :  { %s11780_s13 = scalar_lea.vmem %s70_s28, 32768  ;;  %p11785_p8 = scmp.lt.s32.totalorder %s70_s28, %s70_s28 }
  0x4f   :  { %p11781_p7 = scmp.ne.s32.totalorder %s70_s28, %s11780_s13  ;;  %p11786_p9 = scmp.lt.s32.totalorder %s11780_s13, %s11780_s13 }
  0x51   :  { %p11787_p10 = por %p11786_p9, %p11785_p8 }
  0x53   :  { %p11788_p11 = pnand %p11787_p10, %p11781_p7 }
  0x55   :  { %11791 = shalt.err (!%p11788_p11)
}
  0x56   :  { %s11855_s3 = smov 256   ;;  %s11856_s4 = smov 16  }
  0x57   :  { %75 = dma.hbm_to_vmem [thread:$0]  %s12460_s5, 32768, %s70_s28, [#allocation10], %s11855_s3, %s11855_s3, %s11856_s4  }
  0x58   :  { %s11857_s16 = smov [#allocation12]   ;;  %s11792_s21 = scalar_lea.hbm %s12461_s6, 64 }
  0x59   :  { %s82_s17 = sshll.u32 %s11857_s16, 4  ;;  %p11793_p12 = scmp.ne.s32.totalorder %s12461_s6, %s11792_s21  ;;  %s83_s17 = int_to_ptr.vmem [resolvable:$true] %s82_s17 }
  0x5a   :  { %p11796_p13 = scmp.lt.u32.totalorder %s11792_s21, %s12461_s6 }
  0x5c   :  { %p11798_p0 = pnand %p11796_p13, %p11793_p12 }
  0x5e   :  { %11801 = shalt.err (!%p11798_p0)
}
  0x5f   :  { %s11802_s1 = scalar_lea.vmem %s83_s17, 64  ;;  %p11807_p2 = scmp.lt.s32.totalorder %s83_s17, %s83_s17 }
  0x60   :  { %p11803_p1 = scmp.ne.s32.totalorder %s83_s17, %s11802_s1  ;;  %p11808_p3 = scmp.lt.s32.totalorder %s11802_s1, %s11802_s1 }
  0x62   :  { %p11809_p4 = por %p11808_p3, %p11807_p2 }
  0x64   :  { %p11810_p5 = pnand %p11809_p4, %p11803_p1 }
  0x66   :  { %11813 = shalt.err (!%p11810_p5)
}
  0x67   :  { %85 = dma.hbm_to_vmem [thread:$0]  %s12461_s6, 64, %s83_s17, [#allocation13]  }
  0x68   :  { %11836 = dma.done.wait [#allocation4], 16  }
  0x69   :  { %11837 = vsyncadd [#allocation4], 4294967280 }
  0x6a   :  { %11838 = dma.done.wait [#allocation7], 108992  }
  0x6b   :  { %11839 = vsyncadd [#allocation7], 4294858304 }
  0x6c   :  { %11840 = dma.done.wait [#allocation10], 32896  }
  0x6d   :  { %11841 = vsyncadd [#allocation10], 4294934400 }
  0x6e   :  { %11842 = dma.done.wait [#allocation13], 64  }
  0x6f   :  { %11843 = vsyncadd [#allocation13], 4294967232  ;;  %v126_v0 = vld [vmem:[#allocation8] sm:$0xff]  ;;  %v127_v2 = vld [vmem:[#allocation8 + $0x8] sm:$0xff] }
  0x70   :  { %v130_v1 = vld [vmem:[#allocation8 + $0x20] sm:$0xff]  ;;  %v131_v4 = vld [vmem:[#allocation8 + $0x28] sm:$0xff] }
  0x71   :  { %v9719_v3 = vcombine.high %v126_v0, %v130_v1  ;;  %v9718_v5 = vcombine.low %v126_v0, %v130_v1  ;;  %v134_v6 = vld [vmem:[#allocation8 + $0x40] sm:$0xff]  ;;  %v9721_v8 = vcombine.high %v127_v2, %v131_v4  ;;  %v9720_v9 = vcombine.low %v127_v2, %v131_v4  ;;  %v135_v11 = vld [vmem:[#allocation8 + $0x48] sm:$0xff] }
  0x72   :  { %v138_v7 = vld [vmem:[#allocation8 + $0x60] sm:$0xff]  ;;  %v139_v12 = vld [vmem:[#allocation8 + $0x68] sm:$0xff] }
  0x73   :  { %v9727_v10 = vcombine.high %v134_v6, %v138_v7  ;;  %v142_v13 = vld [vmem:[#allocation8 + $0x80] sm:$0xff]  ;;  %5272 = vmatprep.subr.bf16.mxu0 %v9719_v3  ;;  %v9729_v14 = vcombine.high %v135_v11, %v139_v12  ;;  %v143_v16 = vld [vmem:[#allocation8 + $0x88] sm:$0xff]  ;;  %5629 = vmatprep.subr.bf16.mxu1 %v9721_v8  ;;  %v9726_v18 = vcombine.low %v134_v6, %v138_v7 }
  0x74   :  { %v146_v15 = vld [vmem:[#allocation8 + $0xa0] sm:$0xff]  ;;  %v147_v17 = vld [vmem:[#allocation8 + $0xa8] sm:$0xff]  ;;  %5273 = vmatpush1.bf16.msra.mxu0 %v9718_v5  ;;  %5630 = vmatpush1.bf16.msra.mxu1 %v9720_v9  ;;  %v9728_v19 = vcombine.low %v135_v11, %v139_v12 }
  0x75   :  { %5274 = vmatprep.subr.bf16.mxu0 %v9727_v10  ;;  %v9735_v20 = vcombine.high %v142_v13, %v146_v15  ;;  %5631 = vmatprep.subr.bf16.mxu1 %v9729_v14  ;;  %v9737_v21 = vcombine.high %v143_v16, %v147_v17  ;;  %v150_v22 = vld [vmem:[#allocation8 + $0xc0] sm:$0xff]  ;;  %v151_v24 = vld [vmem:[#allocation8 + $0xc8] sm:$0xff]  ;;  %v9734_v26 = vcombine.low %v142_v13, %v146_v15 }
  0x76   :  { %v154_v23 = vld [vmem:[#allocation8 + $0xe0] sm:$0xff]  ;;  %v155_v25 = vld [vmem:[#allocation8 + $0xe8] sm:$0xff]  ;;  %v9736_v27 = vcombine.low %v143_v16, %v147_v17 }
  0x77   :  { %v9743_v28 = vcombine.high %v150_v22, %v154_v23  ;;  %v9745_v29 = vcombine.high %v151_v24, %v155_v25  ;;  %v158_v30 = vld [vmem:[#allocation8 + $0x100] sm:$0xff]  ;;  %v159_v32 = vld [vmem:[#allocation8 + $0x108] sm:$0xff]  ;;  %v9742_v34 = vcombine.low %v150_v22, %v154_v23  ;;  %v9744_v35 = vcombine.low %v151_v24, %v155_v25 }
  0x78   :  { %5275 = vmatpush1.bf16.msra.mxu0 %v9726_v18  ;;  %5632 = vmatpush1.bf16.msra.mxu1 %v9728_v19  ;;  %v162_v31 = vld [vmem:[#allocation8 + $0x120] sm:$0xff]  ;;  %v163_v33 = vld [vmem:[#allocation8 + $0x128] sm:$0xff] }
  0x79   :  { %5276 = vmatprep.subr.bf16.mxu0 %v9735_v20  ;;  %5633 = vmatprep.subr.bf16.mxu1 %v9737_v21  ;;  %v9751_v36 = vcombine.high %v158_v30, %v162_v31  ;;  %v9753_v37 = vcombine.high %v159_v32, %v163_v33  ;;  %v166_v38 = vld [vmem:[#allocation8 + $0x140] sm:$0xff]  ;;  %v167_v40 = vld [vmem:[#allocation8 + $0x148] sm:$0xff]  ;;  %v9750_v42 = vcombine.low %v158_v30, %v162_v31 }
  0x7a   :  { %v170_v39 = vld [vmem:[#allocation8 + $0x160] sm:$0xff]  ;;  %v171_v41 = vld [vmem:[#allocation8 + $0x168] sm:$0xff]  ;;  %v9752_v43 = vcombine.low %v159_v32, %v163_v33 }
  0x7b   :  { %v9759_v44 = vcombine.high %v166_v38, %v170_v39  ;;  %v9761_v45 = vcombine.high %v167_v40, %v171_v41  ;;  %v174_v46 = vld [vmem:[#allocation8 + $0x180] sm:$0xff]  ;;  %v175_v48 = vld [vmem:[#allocation8 + $0x188] sm:$0xff]  ;;  %v9758_v50 = vcombine.low %v166_v38, %v170_v39  ;;  %v9760_v51 = vcombine.low %v167_v40, %v171_v41 }
  0x7c   :  { %5277 = vmatpush1.bf16.msra.mxu0 %v9734_v26  ;;  %5634 = vmatpush1.bf16.msra.mxu1 %v9736_v27  ;;  %v178_v47 = vld [vmem:[#allocation8 + $0x1a0] sm:$0xff]  ;;  %v179_v49 = vld [vmem:[#allocation8 + $0x1a8] sm:$0xff] }
  0x7d   :  { %5278 = vmatprep.subr.bf16.mxu0 %v9743_v28  ;;  %5635 = vmatprep.subr.bf16.mxu1 %v9745_v29  ;;  %v9767_v52 = vcombine.high %v174_v46, %v178_v47  ;;  %v9769_v53 = vcombine.high %v175_v48, %v179_v49  ;;  %v182_v54 = vld [vmem:[#allocation8 + $0x1c0] sm:$0xff]  ;;  %v11219_v56 = vld [vmem:[#allocation6 + $0x4] ss:$52 sps:$4 sm:$0xff]   ;;  %v9766_v59 = vcombine.low %v174_v46, %v178_v47 }
  0x7e   :  { %v186_v55 = vld [vmem:[#allocation8 + $0x1e0] sm:$0xff]  ;;  %v183_v57 = vld [vmem:[#allocation8 + $0x1c8] sm:$0xff]  ;;  %5304 = vmatprep.mubr.bf16.mxu0 %v11219_v56  ;;  %v9768_v60 = vcombine.low %v175_v48, %v179_v49  ;;  %5661 = vmatprep.mubr.bf16.mxu1 %v11219_v56 }
  0x7f   :  { %v187_v58 = vld [vmem:[#allocation8 + $0x1e8] sm:$0xff]  ;;  %v9775_v61 = vcombine.high %v182_v54, %v186_v55  ;;  %v190_v63 = vld [vmem:[#allocation8 + $0x200] sm:$0xff]  ;;  %v9774_v3 = vcombine.low %v182_v54, %v186_v55 }
  0x80   :  { %5279 = vmatpush1.bf16.msra.mxu0 %v9742_v34  ;;  %5636 = vmatpush1.bf16.msra.mxu1 %v9744_v35  ;;  %v9777_v62 = vcombine.high %v183_v57, %v187_v58  ;;  %v194_v0 = vld [vmem:[#allocation8 + $0x220] sm:$0xff]  ;;  %v191_v1 = vld [vmem:[#allocation8 + $0x208] sm:$0xff]  ;;  %v9776_v4 = vcombine.low %v183_v57, %v187_v58 }
  0x81   :  { %5280 = vmatprep.subr.bf16.mxu0 %v9751_v36  ;;  %5637 = vmatprep.subr.bf16.mxu1 %v9753_v37  ;;  %v195_v2 = vld [vmem:[#allocation8 + $0x228] sm:$0xff]  ;;  %v9783_v5 = vcombine.high %v190_v63, %v194_v0  ;;  %v198_v7 = vld [vmem:[#allocation8 + $0x240] sm:$0xff]  ;;  %v9782_v11 = vcombine.low %v190_v63, %v194_v0 }
  0x82   :  { %v9785_v6 = vcombine.high %v191_v1, %v195_v2  ;;  %v202_v8 = vld [vmem:[#allocation8 + $0x260] sm:$0xff]  ;;  %v199_v9 = vld [vmem:[#allocation8 + $0x248] sm:$0xff]  ;;  %v9784_v12 = vcombine.low %v191_v1, %v195_v2 }
  0x83   :  { %v203_v10 = vld [vmem:[#allocation8 + $0x268] sm:$0xff]  ;;  %v9791_v13 = vcombine.high %v198_v7, %v202_v8  ;;  %v206_v15 = vld [vmem:[#allocation8 + $0x280] sm:$0xff]  ;;  %v9790_v19 = vcombine.low %v198_v7, %v202_v8 }
  0x84   :  { %5281 = vmatpush1.bf16.msra.mxu0 %v9750_v42  ;;  %5638 = vmatpush1.bf16.msra.mxu1 %v9752_v43  ;;  %v9793_v14 = vcombine.high %v199_v9, %v203_v10  ;;  %v210_v16 = vld [vmem:[#allocation8 + $0x2a0] sm:$0xff]  ;;  %v207_v17 = vld [vmem:[#allocation8 + $0x288] sm:$0xff]  ;;  %v9792_v20 = vcombine.low %v199_v9, %v203_v10 }
  0x85   :  { %5282 = vmatprep.subr.bf16.mxu0 %v9759_v44  ;;  %5639 = vmatprep.subr.bf16.mxu1 %v9761_v45  ;;  %v211_v18 = vld [vmem:[#allocation8 + $0x2a8] sm:$0xff]  ;;  %v9799_v21 = vcombine.high %v206_v15, %v210_v16  ;;  %v214_v23 = vld [vmem:[#allocation8 + $0x2c0] sm:$0xff]  ;;  %v9798_v27 = vcombine.low %v206_v15, %v210_v16 }
  0x86   :  { %v9801_v22 = vcombine.high %v207_v17, %v211_v18  ;;  %v218_v24 = vld [vmem:[#allocation8 + $0x2e0] sm:$0xff]  ;;  %v215_v25 = vld [vmem:[#allocation8 + $0x2c8] sm:$0xff]  ;;  %v9800_v28 = vcombine.low %v207_v17, %v211_v18 }
  0x87   :  { %v219_v26 = vld [vmem:[#allocation8 + $0x2e8] sm:$0xff]  ;;  %v9807_v29 = vcombine.high %v214_v23, %v218_v24  ;;  %v222_v31 = vld [vmem:[#allocation8 + $0x300] sm:$0xff]  ;;  %v9806_v35 = vcombine.low %v214_v23, %v218_v24 }
  0x88   :  { %5283 = vmatpush1.bf16.msra.mxu0 %v9758_v50  ;;  %5640 = vmatpush1.bf16.msra.mxu1 %v9760_v51  ;;  %v9809_v30 = vcombine.high %v215_v25, %v219_v26  ;;  %v226_v32 = vld [vmem:[#allocation8 + $0x320] sm:$0xff]  ;;  %v223_v33 = vld [vmem:[#allocation8 + $0x308] sm:$0xff]  ;;  %v9808_v36 = vcombine.low %v215_v25, %v219_v26 }
  0x89   :  { %5284 = vmatprep.subr.bf16.mxu0 %v9767_v52  ;;  %5641 = vmatprep.subr.bf16.mxu1 %v9769_v53  ;;  %v227_v34 = vld [vmem:[#allocation8 + $0x328] sm:$0xff]  ;;  %v9815_v37 = vcombine.high %v222_v31, %v226_v32  ;;  %v230_v39 = vld [vmem:[#allocation8 + $0x340] sm:$0xff]  ;;  %v9814_v43 = vcombine.low %v222_v31, %v226_v32 }
  0x8a   :  { %v9817_v38 = vcombine.high %v223_v33, %v227_v34  ;;  %v234_v40 = vld [vmem:[#allocation8 + $0x360] sm:$0xff]  ;;  %v231_v41 = vld [vmem:[#allocation8 + $0x348] sm:$0xff]  ;;  %v9816_v44 = vcombine.low %v223_v33, %v227_v34 }
  0x8b   :  { %v235_v42 = vld [vmem:[#allocation8 + $0x368] sm:$0xff]  ;;  %v9823_v45 = vcombine.high %v230_v39, %v234_v40  ;;  %v238_v47 = vld [vmem:[#allocation8 + $0x380] sm:$0xff]  ;;  %v9822_v51 = vcombine.low %v230_v39, %v234_v40 }
  0x8c   :  { %5285 = vmatpush1.bf16.msra.mxu0 %v9766_v59  ;;  %5642 = vmatpush1.bf16.msra.mxu1 %v9768_v60  ;;  %v9825_v46 = vcombine.high %v231_v41, %v235_v42  ;;  %v242_v48 = vld [vmem:[#allocation8 + $0x3a0] sm:$0xff]  ;;  %v239_v49 = vld [vmem:[#allocation8 + $0x388] sm:$0xff]  ;;  %v9824_v52 = vcombine.low %v231_v41, %v235_v42 }
  0x8d   :  { %5286 = vmatprep.subr.bf16.mxu0 %v9775_v61  ;;  %5643 = vmatprep.subr.bf16.mxu1 %v9777_v62  ;;  %v243_v50 = vld [vmem:[#allocation8 + $0x3a8] sm:$0xff]  ;;  %v9831_v53 = vcombine.high %v238_v47, %v242_v48  ;;  %v246_v55 = vld [vmem:[#allocation8 + $0x3c0] sm:$0xff]  ;;  %v9830_v59 = vcombine.low %v238_v47, %v242_v48 }
  0x8e   :  { %v9833_v54 = vcombine.high %v239_v49, %v243_v50  ;;  %v250_v56 = vld [vmem:[#allocation8 + $0x3e0] sm:$0xff]  ;;  %v247_v57 = vld [vmem:[#allocation8 + $0x3c8] sm:$0xff]  ;;  %v9832_v60 = vcombine.low %v239_v49, %v243_v50 }
  0x8f   :  { %v251_v58 = vld [vmem:[#allocation8 + $0x3e8] sm:$0xff]  ;;  %v9839_v61 = vcombine.high %v246_v55, %v250_v56  ;;  %v254_v63 = vld [vmem:[#allocation8 + $0x400] sm:$0xff] }
  0x90   :  { %5287 = vmatpush1.bf16.msra.mxu0 %v9774_v3  ;;  %5644 = vmatpush1.bf16.msra.mxu1 %v9776_v4  ;;  %v9841_v62 = vcombine.high %v247_v57, %v251_v58  ;;  %v258_v0 = vld [vmem:[#allocation8 + $0x420] sm:$0xff]  ;;  %v255_v1 = vld [vmem:[#allocation8 + $0x408] sm:$0xff]  ;;  %v9838_v3 = vcombine.low %v246_v55, %v250_v56  ;;  %v9840_v4 = vcombine.low %v247_v57, %v251_v58 }
  0x91   :  { %5288 = vmatprep.subr.bf16.mxu0 %v9783_v5  ;;  %5645 = vmatprep.subr.bf16.mxu1 %v9785_v6  ;;  %v259_v2 = vld [vmem:[#allocation8 + $0x428] sm:$0xff]  ;;  %v9847_v5 = vcombine.high %v254_v63, %v258_v0  ;;  %v11221_v7 = vld [vmem:[#allocation6] ss:$52 sps:$4 sm:$0xff]  }
  0x92   :  { %v9849_v6 = vcombine.high %v255_v1, %v259_v2  ;;  %v262_v8 = vld [vmem:[#allocation8 + $0x440] sm:$0xff]  ;;  %v263_v10 = vld [vmem:[#allocation8 + $0x448] sm:$0xff] }
  0x93   :  { %v266_v9 = vld [vmem:[#allocation8 + $0x460] sm:$0xff]  ;;  %v299_v47 = vld [vmem:[#allocation8 + $0x568] sm:$0xff] }
  0x94   :  { %5289 = vmatpush1.bf16.msra.mxu0 %v9782_v11  ;;  %5646 = vmatpush1.bf16.msra.mxu1 %v9784_v12  ;;  %v267_v11 = vld [vmem:[#allocation8 + $0x468] sm:$0xff]  ;;  %v9855_v15 = vcombine.high %v262_v8, %v266_v9  ;;  %v270_v17 = vld [vmem:[#allocation8 + $0x480] sm:$0xff] }
  0x95   :  { %5290 = vmatprep.subr.bf16.mxu0 %v9791_v13  ;;  %5647 = vmatprep.subr.bf16.mxu1 %v9793_v14  ;;  %v119_v12 = vld [vmem:[#allocation6 + $0x68] sm:$0xff]  ;;  %v9846_v13 = vcombine.low %v254_v63, %v258_v0  ;;  %v9848_v14 = vcombine.low %v255_v1, %v259_v2  ;;  %v9857_v16 = vcombine.high %v263_v10, %v267_v11  ;;  %v274_v18 = vld [vmem:[#allocation8 + $0x4a0] sm:$0xff] }
  0x96   :  { %v9856_v23 = vcombine.low %v263_v10, %v267_v11  ;;  %v9863_v24 = vcombine.high %v270_v17, %v274_v18  ;;  %v278_v26 = vld [vmem:[#allocation8 + $0x4c0] sm:$0xff]  ;;  %v9862_v31 = vcombine.low %v270_v17, %v274_v18  ;;  %v307_v55 = vld [vmem:[#allocation8 + $0x5a8] sm:$0xff] }
  0x97   :  { %v286_v32 = vld [vmem:[#allocation8 + $0x500] sm:$0xff]  ;;  %v315_v63 = vld [vmem:[#allocation8 + $0x5e8] sm:$0xff] }
  0x98   :  { %5291 = vmatpush1.bf16.msra.mxu0 %v9790_v19  ;;  %5648 = vmatpush1.bf16.msra.mxu1 %v9792_v20  ;;  %v271_v19 = vld [vmem:[#allocation8 + $0x488] sm:$0xff]  ;;  %v11973_v20 = vcombine.high %v119_v12, %v119_v12  ;;  %v11226_v39 = vld [vmem:[#allocation6 + $0xc] ss:$52 sps:$4 sm:$0xff]  }
  0x99   :  { %5292 = vmatprep.subr.bf16.mxu0 %v9799_v21  ;;  %5649 = vmatprep.subr.bf16.mxu1 %v9801_v22  ;;  %v275_v21 = vld [vmem:[#allocation8 + $0x4a8] sm:$0xff]  ;;  %v9854_v22 = vcombine.low %v262_v8, %v266_v9  ;;  %v326_v11 = vld [vmem:[#allocation8 + $0x640] sm:$0xff] }
  0x9a   :  { %v9865_v25 = vcombine.high %v271_v19, %v275_v21  ;;  %v9864_v33 = vcombine.low %v271_v19, %v275_v21  ;;  %v334_v19 = vld [vmem:[#allocation8 + $0x680] sm:$0xff] }
  0x9b   :  { %v338_v21 = vld [vmem:[#allocation8 + $0x6a0] sm:$0xff] }
  0x9c   :  { %5293 = vmatpush1.bf16.msra.mxu0 %v9798_v27  ;;  %5650 = vmatpush1.bf16.msra.mxu1 %v9800_v28  ;;  %v282_v27 = vld [vmem:[#allocation8 + $0x4e0] sm:$0xff]  ;;  %v279_v28 = vld [vmem:[#allocation8 + $0x4c8] sm:$0xff] }
  0x9d   :  { %5294 = vmatprep.subr.bf16.mxu0 %v9807_v29  ;;  %5651 = vmatprep.subr.bf16.mxu1 %v9809_v30  ;;  %v283_v29 = vld [vmem:[#allocation8 + $0x4e8] sm:$0xff]  ;;  %v11977_v30 = vcombine.low %v119_v12, %v119_v12  ;;  %v9871_v34 = vcombine.high %v278_v26, %v282_v27  ;;  %v9870_v40 = vcombine.low %v278_v26, %v282_v27  ;;  %v330_v12 = vld [vmem:[#allocation8 + $0x660] sm:$0xff] }
  0x9e   :  { %v9872_v41 = vcombine.low %v279_v28, %v283_v29  ;;  %v9919_v18 = vcombine.high %v326_v11, %v330_v12  ;;  %v9927_v27 = vcombine.high %v334_v19, %v338_v21 }
  0xa0   :  { %5295 = vmatpush1.bf16.msra.mxu0 %v9806_v35  ;;  %5652 = vmatpush1.bf16.msra.mxu1 %v9808_v36  ;;  %v290_v35 = vld [vmem:[#allocation8 + $0x520] sm:$0xff]  ;;  %v287_v36 = vld [vmem:[#allocation8 + $0x508] sm:$0xff] }
  0xa1   :  { %5296 = vmatprep.subr.bf16.mxu0 %v9815_v37  ;;  %5653 = vmatprep.subr.bf16.mxu1 %v9817_v38  ;;  %v291_v37 = vld [vmem:[#allocation8 + $0x528] sm:$0xff]  ;;  %v9873_v38 = vcombine.high %v279_v28, %v283_v29  ;;  %v9879_v42 = vcombine.high %v286_v32, %v290_v35  ;;  %v9878_v48 = vcombine.low %v286_v32, %v290_v35  ;;  %v342_v28 = vld [vmem:[#allocation8 + $0x6c0] sm:$0xff] }
  0xa2   :  { %v9880_v49 = vcombine.low %v287_v36, %v291_v37  ;;  %v346_v29 = vld [vmem:[#allocation8 + $0x6e0] sm:$0xff] }
  0xa4   :  { %5297 = vmatpush1.bf16.msra.mxu0 %v9814_v43  ;;  %5654 = vmatpush1.bf16.msra.mxu1 %v9816_v44  ;;  %v294_v43 = vld [vmem:[#allocation8 + $0x540] sm:$0xff] }
  0xa5   :  { %5298 = vmatprep.subr.bf16.mxu0 %v9823_v45  ;;  %5655 = vmatprep.subr.bf16.mxu1 %v9825_v46  ;;  %v298_v44 = vld [vmem:[#allocation8 + $0x560] sm:$0xff]  ;;  %v295_v45 = vld [vmem:[#allocation8 + $0x548] sm:$0xff]  ;;  %v9881_v46 = vcombine.high %v287_v36, %v291_v37  ;;  %v9935_v36 = vcombine.high %v342_v28, %v346_v29 }
  0xa6   :  { %v9887_v50 = vcombine.high %v294_v43, %v298_v44  ;;  %v9886_v56 = vcombine.low %v294_v43, %v298_v44  ;;  %v9888_v57 = vcombine.low %v295_v45, %v299_v47  ;;  %v350_v37 = vld [vmem:[#allocation8 + $0x700] sm:$0xff] }
  0xa8   :  { %5299 = vmatpush1.bf16.msra.mxu0 %v9822_v51  ;;  %5656 = vmatpush1.bf16.msra.mxu1 %v9824_v52  ;;  %v302_v51 = vld [vmem:[#allocation8 + $0x580] sm:$0xff] }
  0xa9   :  { %5300 = vmatprep.subr.bf16.mxu0 %v9831_v53  ;;  %5657 = vmatprep.subr.bf16.mxu1 %v9833_v54  ;;  %v306_v52 = vld [vmem:[#allocation8 + $0x5a0] sm:$0xff]  ;;  %v303_v53 = vld [vmem:[#allocation8 + $0x588] sm:$0xff]  ;;  %v9889_v54 = vcombine.high %v295_v45, %v299_v47 }
  0xaa   :  { %v9895_v58 = vcombine.high %v302_v51, %v306_v52  ;;  %v9894_v0 = vcombine.low %v302_v51, %v306_v52  ;;  %v9896_v1 = vcombine.low %v303_v53, %v307_v55  ;;  %v358_v45 = vld [vmem:[#allocation8 + $0x740] sm:$0xff]  ;;  %v359_v47 = vld [vmem:[#allocation8 + $0x748] sm:$0xff] }
  0xac   :  { %5301 = vmatpush1.bf16.msra.mxu0 %v9830_v59  ;;  %5658 = vmatpush1.bf16.msra.mxu1 %v9832_v60  ;;  %v310_v59 = vld [vmem:[#allocation8 + $0x5c0] sm:$0xff] }
  0xad   :  { %5302 = vmatprep.subr.bf16.mxu0 %v9839_v61  ;;  %5659 = vmatprep.subr.bf16.mxu1 %v9841_v62  ;;  %v314_v60 = vld [vmem:[#allocation8 + $0x5e0] sm:$0xff]  ;;  %v311_v61 = vld [vmem:[#allocation8 + $0x5c8] sm:$0xff]  ;;  %v9897_v62 = vcombine.high %v303_v53, %v307_v55 }
  0xae   :  { %v9903_v2 = vcombine.high %v310_v59, %v314_v60  ;;  %v9902_v8 = vcombine.low %v310_v59, %v314_v60  ;;  %v9904_v9 = vcombine.low %v311_v61, %v315_v63  ;;  %v366_v53 = vld [vmem:[#allocation8 + $0x780] sm:$0xff]  ;;  %v367_v55 = vld [vmem:[#allocation8 + $0x788] sm:$0xff] }
  0xb0   :  { %5303 = vmatpush1.bf16.msra.mxu0 %v9838_v3  ;;  %5660 = vmatpush1.bf16.msra.mxu1 %v9840_v4  ;;  %v318_v3 = vld [vmem:[#allocation8 + $0x600] sm:$0xff] }
  0xb1   :  { %5323 = vmatprep.subr.bf16.mxu0 %v9847_v5  ;;  %5680 = vmatprep.subr.bf16.mxu1 %v9849_v6  ;;  %v322_v4 = vld [vmem:[#allocation8 + $0x620] sm:$0xff]  ;;  %v319_v5 = vld [vmem:[#allocation8 + $0x608] sm:$0xff]  ;;  %v9905_v6 = vcombine.high %v311_v61, %v315_v63 }
  0xb2   :  { %v9911_v10 = vcombine.high %v318_v3, %v322_v4  ;;  %v374_v61 = vld [vmem:[#allocation8 + $0x7c0] sm:$0xff]  ;;  %v375_v63 = vld [vmem:[#allocation8 + $0x7c8] sm:$0xff] }
  0xb3   :  { %5305 = vmatmul.mubr.bf16.vlgmr.msra.gmra.mrb[0].mxu0 %v11221_v7  ;;  %5662 = vmatmul.mubr.bf16.vlgmr.msra.gmra.mrb[0].mxu1 %v11221_v7  ;;  %v323_v7 = vld [vmem:[#allocation8 + $0x628] sm:$0xff] }
  0xb4   :  { %5324 = vmatpush1.bf16.msra.mxu0 %v9846_v13  ;;  %5681 = vmatpush1.bf16.msra.mxu1 %v9848_v14  ;;  %v327_v13 = vld [vmem:[#allocation8 + $0x648] sm:$0xff]  ;;  %v9913_v14 = vcombine.high %v319_v5, %v323_v7  ;;  %v9912_v17 = vcombine.low %v319_v5, %v323_v7  ;;  %v382_v5 = vld [vmem:[#allocation8 + $0x800] sm:$0xff] }
  0xb5   :  { %5325 = vmatprep.subr.bf16.mxu0 %v9855_v15  ;;  %5682 = vmatprep.subr.bf16.mxu1 %v9857_v16  ;;  %v331_v15 = vld [vmem:[#allocation8 + $0x668] sm:$0xff]  ;;  %v9910_v16 = vcombine.low %v318_v3, %v322_v4 }
  0xb6   :  { %5314 = vmatprep.mubr.bf16.mxu0 %v11973_v20  ;;  %5671 = vmatprep.mubr.bf16.mxu1 %v11973_v20  ;;  %v9920_v26 = vcombine.low %v327_v13, %v331_v15 }
  0xb8   :  { %5326 = vmatpush1.bf16.msra.mxu0 %v9854_v22  ;;  %5683 = vmatpush1.bf16.msra.mxu1 %v9856_v23  ;;  %v335_v22 = vld [vmem:[#allocation8 + $0x688] sm:$0xff]  ;;  %v9921_v23 = vcombine.high %v327_v13, %v331_v15  ;;  %v394_v15 = vld [vmem:[#allocation8 + $0x860] sm:$0xff] }
  0xb9   :  { %5327 = vmatprep.subr.bf16.mxu0 %v9863_v24  ;;  %5684 = vmatprep.subr.bf16.mxu1 %v9865_v25  ;;  %v339_v24 = vld [vmem:[#allocation8 + $0x6a8] sm:$0xff]  ;;  %v9918_v25 = vcombine.low %v326_v11, %v330_v12  ;;  %v390_v11 = vld [vmem:[#allocation8 + $0x840] sm:$0xff] }
  0xba   :  { %v9929_v32 = vcombine.high %v335_v22, %v339_v24  ;;  %v9928_v35 = vcombine.low %v335_v22, %v339_v24  ;;  %v11224_v13 = vld [vmem:[#allocation6 + $0x8] ss:$52 sps:$4 sm:$0xff]  }
  0xbb   :  { %5315 = vmatmul.mubr.bf16.gmra.mrb[4].mxu0 %v11977_v30  ;;  %5672 = vmatmul.mubr.bf16.gmra.mrb[4].mxu1 %v11977_v30  ;;  %v398_v24 = vld [vmem:[#allocation8 + $0x880] sm:$0xff] }
  0xbc   :  { %5328 = vmatpush1.bf16.msra.mxu0 %v9862_v31  ;;  %5685 = vmatpush1.bf16.msra.mxu1 %v9864_v33  ;;  %v343_v31 = vld [vmem:[#allocation8 + $0x6c8] sm:$0xff] }
  0xbd   :  { %5329 = vmatprep.subr.bf16.mxu0 %v9871_v34  ;;  %5686 = vmatprep.subr.bf16.mxu1 %v9873_v38  ;;  %v347_v33 = vld [vmem:[#allocation8 + $0x6e8] sm:$0xff]  ;;  %v9926_v34 = vcombine.low %v334_v19, %v338_v21  ;;  %v354_v38 = vld [vmem:[#allocation8 + $0x720] sm:$0xff]  ;;  %v120_v19 = vld [vmem:[#allocation6 + $0x70] sm:$0xff] }
  0xbe   :  { %5355 = vmatprep.mubr.bf16.mxu0 %v11226_v39  ;;  %5712 = vmatprep.mubr.bf16.mxu1 %v11226_v39  ;;  %v351_v39 = vld [vmem:[#allocation8 + $0x708] sm:$0xff]  ;;  %v9936_v43 = vcombine.low %v343_v31, %v347_v33  ;;  %v9943_v44 = vcombine.high %v350_v37, %v354_v38 }
  0xc0   :  { %5330 = vmatpush1.bf16.msra.mxu0 %v9870_v40  ;;  %5687 = vmatpush1.bf16.msra.mxu1 %v9872_v41  ;;  %v9937_v40 = vcombine.high %v343_v31, %v347_v33  ;;  %v355_v41 = vld [vmem:[#allocation8 + $0x728] sm:$0xff]  ;;  %v9982_v31 = vcombine.low %v390_v11, %v394_v15 }
  0xc1   :  { %5331 = vmatprep.subr.bf16.mxu0 %v9879_v42  ;;  %5688 = vmatprep.subr.bf16.mxu1 %v9881_v46  ;;  %v9934_v42 = vcombine.low %v342_v28, %v346_v29  ;;  %v362_v46 = vld [vmem:[#allocation8 + $0x760] sm:$0xff]  ;;  %v9944_v51 = vcombine.low %v351_v39, %v355_v41  ;;  %v403_v28 = vld [vmem:[#allocation8 + $0x8a8] sm:$0xff]  ;;  %v11981_v29 = vcombine.high %v120_v19, %v120_v19 }
  0xc2   :  { %v9951_v52 = vcombine.high %v358_v45, %v362_v46 }
  0xc4   :  { %5332 = vmatpush1.bf16.msra.mxu0 %v9878_v48  ;;  %5689 = vmatpush1.bf16.msra.mxu1 %v9880_v49  ;;  %v9945_v48 = vcombine.high %v351_v39, %v355_v41  ;;  %v363_v49 = vld [vmem:[#allocation8 + $0x768] sm:$0xff]  ;;  %v11985_v39 = vcombine.low %v120_v19, %v120_v19  ;;  %v414_v41 = vld [vmem:[#allocation8 + $0x900] sm:$0xff] }
  0xc5   :  { %5333 = vmatprep.subr.bf16.mxu0 %v9887_v50  ;;  %5690 = vmatprep.subr.bf16.mxu1 %v9889_v54  ;;  %v9942_v50 = vcombine.low %v350_v37, %v354_v38  ;;  %v370_v54 = vld [vmem:[#allocation8 + $0x7a0] sm:$0xff]  ;;  %v9952_v59 = vcombine.low %v359_v47, %v363_v49  ;;  %v411_v38 = vld [vmem:[#allocation8 + $0x8e8] sm:$0xff] }
  0xc6   :  { %v9959_v60 = vcombine.high %v366_v53, %v370_v54 }
  0xc8   :  { %5334 = vmatpush1.bf16.msra.mxu0 %v9886_v56  ;;  %5691 = vmatpush1.bf16.msra.mxu1 %v9888_v57  ;;  %v9953_v56 = vcombine.high %v359_v47, %v363_v49  ;;  %v371_v57 = vld [vmem:[#allocation8 + $0x7a8] sm:$0xff] }
  0xc9   :  { %5335 = vmatprep.subr.bf16.mxu0 %v9895_v58  ;;  %5692 = vmatprep.subr.bf16.mxu1 %v9897_v62  ;;  %v9950_v58 = vcombine.low %v358_v45, %v362_v46  ;;  %v378_v62 = vld [vmem:[#allocation8 + $0x7e0] sm:$0xff]  ;;  %v9960_v3 = vcombine.low %v367_v55, %v371_v57  ;;  %v415_v45 = vld [vmem:[#allocation8 + $0x908] sm:$0xff] }
  0xca   :  { %v9967_v4 = vcombine.high %v374_v61, %v378_v62  ;;  %v419_v46 = vld [vmem:[#allocation8 + $0x928] sm:$0xff] }
  0xcc   :  { %5336 = vmatpush1.bf16.msra.mxu0 %v9894_v0  ;;  %5693 = vmatpush1.bf16.msra.mxu1 %v9896_v1  ;;  %v9961_v0 = vcombine.high %v367_v55, %v371_v57  ;;  %v379_v1 = vld [vmem:[#allocation8 + $0x7e8] sm:$0xff]  ;;  %v10009_v55 = vcombine.high %v415_v45, %v419_v46 }
  0xcd   :  { %5337 = vmatprep.subr.bf16.mxu0 %v9903_v2  ;;  %5694 = vmatprep.subr.bf16.mxu1 %v9905_v6  ;;  %v9958_v2 = vcombine.low %v366_v53, %v370_v54  ;;  %v386_v6 = vld [vmem:[#allocation8 + $0x820] sm:$0xff]  ;;  %v9969_v7 = vcombine.high %v375_v63, %v379_v1  ;;  %v9968_v12 = vcombine.low %v375_v63, %v379_v1  ;;  %v423_v54 = vld [vmem:[#allocation8 + $0x948] sm:$0xff] }
  0xce   :  { %v9974_v21 = vcombine.low %v382_v5, %v386_v6  ;;  %v426_v53 = vld [vmem:[#allocation8 + $0x960] sm:$0xff] }
  0xd0   :  { %5338 = vmatpush1.bf16.msra.mxu0 %v9902_v8  ;;  %5695 = vmatpush1.bf16.msra.mxu1 %v9904_v9  ;;  %v383_v8 = vld [vmem:[#allocation8 + $0x808] sm:$0xff] }
  0xd1   :  { %5339 = vmatprep.subr.bf16.mxu0 %v9911_v10  ;;  %5696 = vmatprep.subr.bf16.mxu1 %v9913_v14  ;;  %v387_v9 = vld [vmem:[#allocation8 + $0x828] sm:$0xff]  ;;  %v9966_v10 = vcombine.low %v374_v61, %v378_v62  ;;  %v9975_v14 = vcombine.high %v382_v5, %v386_v6  ;;  %v434_v61 = vld [vmem:[#allocation8 + $0x9a0] sm:$0xff] }
  0xd2   :  { %v9976_v22 = vcombine.low %v383_v8, %v387_v9  ;;  %v431_v62 = vld [vmem:[#allocation8 + $0x988] sm:$0xff]  ;;  %v442_v5 = vld [vmem:[#allocation8 + $0x9e0] sm:$0xff] }
  0xd3   :  { %v439_v6 = vld [vmem:[#allocation8 + $0x9c8] sm:$0xff] }
  0xd4   :  { %5340 = vmatpush1.bf16.msra.mxu0 %v9910_v16  ;;  %5697 = vmatpush1.bf16.msra.mxu1 %v9912_v17  ;;  %v391_v16 = vld [vmem:[#allocation8 + $0x848] sm:$0xff] }
  0xd5   :  { %5341 = vmatprep.subr.bf16.mxu0 %v9919_v18  ;;  %5698 = vmatprep.subr.bf16.mxu1 %v9921_v23  ;;  %v395_v17 = vld [vmem:[#allocation8 + $0x868] sm:$0xff]  ;;  %v9977_v18 = vcombine.high %v383_v8, %v387_v9  ;;  %v9983_v23 = vcombine.high %v390_v11, %v394_v15 }
  0xd6   :  { %v443_v8 = vld [vmem:[#allocation8 + $0x9e8] sm:$0xff] }
  0xd7   :  { %v10033_v15 = vcombine.high %v439_v6, %v443_v8 }
  0xd8   :  { %5342 = vmatpush1.bf16.msra.mxu0 %v9918_v25  ;;  %5699 = vmatpush1.bf16.msra.mxu1 %v9920_v26  ;;  %v9985_v25 = vcombine.high %v391_v16, %v395_v17  ;;  %v402_v26 = vld [vmem:[#allocation8 + $0x8a0] sm:$0xff] }
  0xd9   :  { %5343 = vmatprep.subr.bf16.mxu0 %v9927_v27  ;;  %5700 = vmatprep.subr.bf16.mxu1 %v9929_v32  ;;  %v399_v27 = vld [vmem:[#allocation8 + $0x888] sm:$0xff]  ;;  %v9984_v32 = vcombine.low %v391_v16, %v395_v17  ;;  %v9991_v33 = vcombine.high %v398_v24, %v402_v26 }
  0xda   :  { %v9993_v37 = vcombine.high %v399_v27, %v403_v28  ;;  %v451_v16 = vld [vmem:[#allocation8 + $0xa28] sm:$0xff] }
  0xdc   :  { %5344 = vmatpush1.bf16.msra.mxu0 %v9926_v34  ;;  %5701 = vmatpush1.bf16.msra.mxu1 %v9928_v35  ;;  %v406_v34 = vld [vmem:[#allocation8 + $0x8c0] sm:$0xff] }
  0xdd   :  { %5345 = vmatprep.subr.bf16.mxu0 %v9935_v36  ;;  %5702 = vmatprep.subr.bf16.mxu1 %v9937_v40  ;;  %v410_v35 = vld [vmem:[#allocation8 + $0x8e0] sm:$0xff]  ;;  %v407_v36 = vld [vmem:[#allocation8 + $0x8c8] sm:$0xff]  ;;  %v9990_v40 = vcombine.low %v398_v24, %v402_v26 }
  0xde   :  { %v10001_v47 = vcombine.high %v407_v36, %v411_v38  ;;  %v9998_v49 = vcombine.low %v406_v34, %v410_v35 }
  0xe0   :  { %5346 = vmatpush1.bf16.msra.mxu0 %v9934_v42  ;;  %5703 = vmatpush1.bf16.msra.mxu1 %v9936_v43  ;;  %v9992_v42 = vcombine.low %v399_v27, %v403_v28  ;;  %v9999_v43 = vcombine.high %v406_v34, %v410_v35  ;;  %v467_v35 = vld [vmem:[#allocation8 + $0xaa8] sm:$0xff] }
  0xe1   :  { %5347 = vmatprep.subr.bf16.mxu0 %v9943_v44  ;;  %5704 = vmatprep.subr.bf16.mxu1 %v9945_v48  ;;  %v418_v44 = vld [vmem:[#allocation8 + $0x920] sm:$0xff]  ;;  %v11231_v48 = vld [vmem:[#allocation6 + $0x14] ss:$52 sps:$4 sm:$0xff]  }
  0xe2   :  { %v10006_v57 = vcombine.low %v414_v41, %v418_v44 }
  0xe4   :  { %5348 = vmatpush1.bf16.msra.mxu0 %v9942_v50  ;;  %5705 = vmatpush1.bf16.msra.mxu1 %v9944_v51  ;;  %v10000_v50 = vcombine.low %v407_v36, %v411_v38  ;;  %v10007_v51 = vcombine.high %v414_v41, %v418_v44  ;;  %v474_v41 = vld [vmem:[#allocation8 + $0xae0] sm:$0xff]  ;;  %v475_v44 = vld [vmem:[#allocation8 + $0xae8] sm:$0xff] }
  0xe5   :  { %5349 = vmatprep.subr.bf16.mxu0 %v9951_v52  ;;  %5706 = vmatprep.subr.bf16.mxu1 %v9953_v56  ;;  %v422_v52 = vld [vmem:[#allocation8 + $0x940] sm:$0xff]  ;;  %v427_v56 = vld [vmem:[#allocation8 + $0x968] sm:$0xff] }
  0xe6   :  { %v10017_v63 = vcombine.high %v423_v54, %v427_v56  ;;  %v10014_v1 = vcombine.low %v422_v52, %v426_v53 }
  0xe8   :  { %5350 = vmatpush1.bf16.msra.mxu0 %v9950_v58  ;;  %5707 = vmatpush1.bf16.msra.mxu1 %v9952_v59  ;;  %v10008_v58 = vcombine.low %v415_v45, %v419_v46  ;;  %v10015_v59 = vcombine.high %v422_v52, %v426_v53  ;;  %v483_v52 = vld [vmem:[#allocation8 + $0xb28] sm:$0xff] }
  0xe9   :  { %5351 = vmatprep.subr.bf16.mxu0 %v9959_v60  ;;  %5708 = vmatprep.subr.bf16.mxu1 %v9961_v0  ;;  %v430_v60 = vld [vmem:[#allocation8 + $0x980] sm:$0xff]  ;;  %v435_v0 = vld [vmem:[#allocation8 + $0x9a8] sm:$0xff] }
  0xea   :  { %v10022_v9 = vcombine.low %v430_v60, %v434_v61 }
  0xec   :  { %5352 = vmatpush1.bf16.msra.mxu0 %v9958_v2  ;;  %5709 = vmatpush1.bf16.msra.mxu1 %v9960_v3  ;;  %v10016_v2 = vcombine.low %v423_v54, %v427_v56  ;;  %v10023_v3 = vcombine.high %v430_v60, %v434_v61  ;;  %v486_v56 = vld [vmem:[#allocation8 + $0xb40] sm:$0xff]  ;;  %v491_v60 = vld [vmem:[#allocation8 + $0xb68] sm:$0xff] }
  0xed   :  { %5353 = vmatprep.subr.bf16.mxu0 %v9967_v4  ;;  %5710 = vmatprep.subr.bf16.mxu1 %v9969_v7  ;;  %v438_v4 = vld [vmem:[#allocation8 + $0x9c0] sm:$0xff]  ;;  %v10025_v7 = vcombine.high %v431_v62, %v435_v0 }
  0xee   :  { %v10031_v11 = vcombine.high %v438_v4, %v442_v5  ;;  %v10030_v17 = vcombine.low %v438_v4, %v442_v5  ;;  %v499_v4 = vld [vmem:[#allocation8 + $0xba8] sm:$0xff] }
  0xf0   :  { %5354 = vmatpush1.bf16.msra.mxu0 %v9966_v10  ;;  %5711 = vmatpush1.bf16.msra.mxu1 %v9968_v12  ;;  %v10024_v10 = vcombine.low %v431_v62, %v435_v0  ;;  %v446_v12 = vld [vmem:[#allocation8 + $0xa00] sm:$0xff] }
  0xf1   :  { %5374 = vmatprep.subr.bf16.mxu0 %v9975_v14  ;;  %5731 = vmatprep.subr.bf16.mxu1 %v9977_v18  ;;  %v447_v14 = vld [vmem:[#allocation8 + $0xa08] sm:$0xff]  ;;  %v10032_v18 = vcombine.low %v439_v6, %v443_v8  ;;  %v494_v0 = vld [vmem:[#allocation8 + $0xb80] sm:$0xff] }
  0xf2   :  { %v10041_v24 = vcombine.high %v447_v14, %v451_v16  ;;  %v10040_v27 = vcombine.low %v447_v14, %v451_v16  ;;  %v502_v8 = vld [vmem:[#allocation8 + $0xbc0] sm:$0xff] }
  0xf3   :  { %5356 = vmatmul.mubr.bf16.vlgmr.msra.gmra.mrb[0].mxu0 %v11224_v13  ;;  %5713 = vmatmul.mubr.bf16.vlgmr.msra.gmra.mrb[0].mxu1 %v11224_v13  ;;  %v450_v13 = vld [vmem:[#allocation8 + $0xa20] sm:$0xff] }
  0xf4   :  { %5375 = vmatpush1.bf16.msra.mxu0 %v9974_v21  ;;  %5732 = vmatpush1.bf16.msra.mxu1 %v9976_v22  ;;  %v10039_v19 = vcombine.high %v446_v12, %v450_v13  ;;  %v454_v21 = vld [vmem:[#allocation8 + $0xa40] sm:$0xff]  ;;  %v10038_v26 = vcombine.low %v446_v12, %v450_v13  ;;  %v507_v12 = vld [vmem:[#allocation8 + $0xbe8] sm:$0xff] }
  0xf5   :  { %5376 = vmatprep.subr.bf16.mxu0 %v9983_v23  ;;  %5733 = vmatprep.subr.bf16.mxu1 %v9985_v25  ;;  %v458_v22 = vld [vmem:[#allocation8 + $0xa60] sm:$0xff]  ;;  %v455_v23 = vld [vmem:[#allocation8 + $0xa48] sm:$0xff] }
  0xf6   :  { %5365 = vmatprep.mubr.bf16.mxu0 %v11981_v29  ;;  %5722 = vmatprep.mubr.bf16.mxu1 %v11981_v29  ;;  %v459_v25 = vld [vmem:[#allocation8 + $0xa68] sm:$0xff]  ;;  %v10047_v28 = vcombine.high %v454_v21, %v458_v22  ;;  %v10046_v36 = vcombine.low %v454_v21, %v458_v22  ;;  %v510_v16 = vld [vmem:[#allocation8 + $0xc00] sm:$0xff] }
  0xf7   :  { %v10049_v34 = vcombine.high %v455_v23, %v459_v25  ;;  %v515_v21 = vld [vmem:[#allocation8 + $0xc28] sm:$0xff] }
  0xf8   :  { %5377 = vmatpush1.bf16.msra.mxu0 %v9982_v31  ;;  %5734 = vmatpush1.bf16.msra.mxu1 %v9984_v32  ;;  %v462_v31 = vld [vmem:[#allocation8 + $0xa80] sm:$0xff] }
  0xf9   :  { %5378 = vmatprep.subr.bf16.mxu0 %v9991_v33  ;;  %5735 = vmatprep.subr.bf16.mxu1 %v9993_v37  ;;  %v466_v32 = vld [vmem:[#allocation8 + $0xaa0] sm:$0xff]  ;;  %v463_v33 = vld [vmem:[#allocation8 + $0xa88] sm:$0xff]  ;;  %v10048_v37 = vcombine.low %v455_v23, %v459_v25 }
  0xfa   :  { %v10055_v38 = vcombine.high %v462_v31, %v466_v32  ;;  %v10054_v45 = vcombine.low %v462_v31, %v466_v32  ;;  %v10056_v46 = vcombine.low %v463_v33, %v467_v35  ;;  %v518_v23 = vld [vmem:[#allocation8 + $0xc40] sm:$0xff]  ;;  %v11229_v25 = vld [vmem:[#allocation6 + $0x10] ss:$52 sps:$4 sm:$0xff]  }
  0xfb   :  { %5366 = vmatmul.mubr.bf16.gmra.mrb[4].mxu0 %v11985_v39  ;;  %5723 = vmatmul.mubr.bf16.gmra.mrb[4].mxu1 %v11985_v39  ;;  %v523_v31 = vld [vmem:[#allocation8 + $0xc68] sm:$0xff] }
  0xfc   :  { %5379 = vmatpush1.bf16.msra.mxu0 %v9990_v40  ;;  %5736 = vmatpush1.bf16.msra.mxu1 %v9992_v42  ;;  %v470_v40 = vld [vmem:[#allocation8 + $0xac0] sm:$0xff]  ;;  %v471_v42 = vld [vmem:[#allocation8 + $0xac8] sm:$0xff] }
  0xfd   :  { %5380 = vmatprep.subr.bf16.mxu0 %v9999_v43  ;;  %5737 = vmatprep.subr.bf16.mxu1 %v10001_v47  ;;  %v10057_v43 = vcombine.high %v463_v33, %v467_v35  ;;  %v10063_v47 = vcombine.high %v470_v40, %v474_v41  ;;  %v10062_v53 = vcombine.low %v470_v40, %v474_v41  ;;  %v121_v33 = vld [vmem:[#allocation6 + $0x78] sm:$0xff]  ;;  %v527_v41 = vld [vmem:[#allocation8 + $0xc88] sm:$0xff] }
  0xfe   :  { %5406 = vmatprep.mubr.bf16.mxu0 %v11231_v48  ;;  %5763 = vmatprep.mubr.bf16.mxu1 %v11231_v48  ;;  %v478_v48 = vld [vmem:[#allocation8 + $0xb00] sm:$0xff]  ;;  %v10064_v54 = vcombine.low %v471_v42, %v475_v44 }
  0xff   :  { %v530_v40 = vld [vmem:[#allocation8 + $0xca0] sm:$0xff] }
 0x100   :  { %5381 = vmatpush1.bf16.msra.mxu0 %v9998_v49  ;;  %5738 = vmatpush1.bf16.msra.mxu1 %v10000_v50  ;;  %v482_v49 = vld [vmem:[#allocation8 + $0xb20] sm:$0xff]  ;;  %v479_v50 = vld [vmem:[#allocation8 + $0xb08] sm:$0xff] }
 0x101   :  { %5382 = vmatprep.subr.bf16.mxu0 %v10007_v51  ;;  %5739 = vmatprep.subr.bf16.mxu1 %v10009_v55  ;;  %v10065_v51 = vcombine.high %v471_v42, %v475_v44  ;;  %v10071_v55 = vcombine.high %v478_v48, %v482_v49  ;;  %v10070_v61 = vcombine.low %v478_v48, %v482_v49  ;;  %v531_v42 = vld [vmem:[#allocation8 + $0xca8] sm:$0xff]  ;;  %v538_v48 = vld [vmem:[#allocation8 + $0xce0] sm:$0xff] }
 0x102   :  { %v10072_v62 = vcombine.low %v479_v50, %v483_v52  ;;  %v535_v49 = vld [vmem:[#allocation8 + $0xcc8] sm:$0xff] }
 0x104   :  { %5383 = vmatpush1.bf16.msra.mxu0 %v10006_v57  ;;  %5740 = vmatpush1.bf16.msra.mxu1 %v10008_v58  ;;  %v490_v57 = vld [vmem:[#allocation8 + $0xb60] sm:$0xff]  ;;  %v487_v58 = vld [vmem:[#allocation8 + $0xb48] sm:$0xff] }
 0x105   :  { %5384 = vmatprep.subr.bf16.mxu0 %v10015_v59  ;;  %5741 = vmatprep.subr.bf16.mxu1 %v10017_v63  ;;  %v10073_v59 = vcombine.high %v479_v50, %v483_v52  ;;  %v10079_v63 = vcombine.high %v486_v56, %v490_v57  ;;  %v10078_v5 = vcombine.low %v486_v56, %v490_v57  ;;  %v546_v57 = vld [vmem:[#allocation8 + $0xd20] sm:$0xff] }
 0x106   :  { %v10080_v6 = vcombine.low %v487_v58, %v491_v60  ;;  %v10121_v50 = vcombine.high %v527_v41, %v531_v42  ;;  %v11993_v52 = vcombine.low %v121_v33, %v121_v33 }
 0x108   :  { %5385 = vmatpush1.bf16.msra.mxu0 %v10014_v1  ;;  %5742 = vmatpush1.bf16.msra.mxu1 %v10016_v2  ;;  %v498_v1 = vld [vmem:[#allocation8 + $0xba0] sm:$0xff]  ;;  %v495_v2 = vld [vmem:[#allocation8 + $0xb88] sm:$0xff] }
 0x109   :  { %5386 = vmatprep.subr.bf16.mxu0 %v10023_v3  ;;  %5743 = vmatprep.subr.bf16.mxu1 %v10025_v7  ;;  %v10081_v3 = vcombine.high %v487_v58, %v491_v60  ;;  %v10087_v7 = vcombine.high %v494_v0, %v498_v1  ;;  %v10086_v13 = vcombine.low %v494_v0, %v498_v1  ;;  %v543_v58 = vld [vmem:[#allocation8 + $0xd08] sm:$0xff]  ;;  %v550_v1 = vld [vmem:[#allocation8 + $0xd40] sm:$0xff] }
 0x10a   :  { %v10088_v14 = vcombine.low %v495_v2, %v499_v4 }
 0x10c   :  { %5387 = vmatpush1.bf16.msra.mxu0 %v10022_v9  ;;  %5744 = vmatpush1.bf16.msra.mxu1 %v10024_v10  ;;  %v506_v9 = vld [vmem:[#allocation8 + $0xbe0] sm:$0xff]  ;;  %v503_v10 = vld [vmem:[#allocation8 + $0xbc8] sm:$0xff] }
 0x10d   :  { %5388 = vmatprep.subr.bf16.mxu0 %v10031_v11  ;;  %5745 = vmatprep.subr.bf16.mxu1 %v10033_v15  ;;  %v10089_v11 = vcombine.high %v495_v2, %v499_v4  ;;  %v10095_v15 = vcombine.high %v502_v8, %v506_v9  ;;  %v10094_v22 = vcombine.low %v502_v8, %v506_v9  ;;  %v551_v4 = vld [vmem:[#allocation8 + $0xd48] sm:$0xff] }
 0x110   :  { %5389 = vmatpush1.bf16.msra.mxu0 %v10030_v17  ;;  %5746 = vmatpush1.bf16.msra.mxu1 %v10032_v18  ;;  %v514_v17 = vld [vmem:[#allocation8 + $0xc20] sm:$0xff]  ;;  %v10097_v18 = vcombine.high %v503_v10, %v507_v12 }
 0x111   :  { %5390 = vmatprep.subr.bf16.mxu0 %v10039_v19  ;;  %5747 = vmatprep.subr.bf16.mxu1 %v10041_v24  ;;  %v511_v19 = vld [vmem:[#allocation8 + $0xc08] sm:$0xff]  ;;  %v10096_v24 = vcombine.low %v503_v10, %v507_v12  ;;  %v558_v10 = vld [vmem:[#allocation8 + $0xd80] sm:$0xff] }
 0x112   :  { %v10105_v32 = vcombine.high %v511_v19, %v515_v21  ;;  %v10104_v35 = vcombine.low %v511_v19, %v515_v21  ;;  %v559_v12 = vld [vmem:[#allocation8 + $0xd88] sm:$0xff]  ;;  %v570_v19 = vld [vmem:[#allocation8 + $0xde0] sm:$0xff] }
 0x113   :  { %v567_v21 = vld [vmem:[#allocation8 + $0xdc8] sm:$0xff] }
 0x114   :  { %5391 = vmatpush1.bf16.msra.mxu0 %v10038_v26  ;;  %5748 = vmatpush1.bf16.msra.mxu1 %v10040_v27  ;;  %v10103_v26 = vcombine.high %v510_v16, %v514_v17  ;;  %v522_v27 = vld [vmem:[#allocation8 + $0xc60] sm:$0xff] }
 0x115   :  { %5392 = vmatprep.subr.bf16.mxu0 %v10047_v28  ;;  %5749 = vmatprep.subr.bf16.mxu1 %v10049_v34  ;;  %v519_v28 = vld [vmem:[#allocation8 + $0xc48] sm:$0xff]  ;;  %v10102_v34 = vcombine.low %v510_v16, %v514_v17  ;;  %v10110_v44 = vcombine.low %v518_v23, %v522_v27 }
 0x118   :  { %5393 = vmatpush1.bf16.msra.mxu0 %v10046_v36  ;;  %5750 = vmatpush1.bf16.msra.mxu1 %v10048_v37  ;;  %v10111_v36 = vcombine.high %v518_v23, %v522_v27  ;;  %v526_v37 = vld [vmem:[#allocation8 + $0xc80] sm:$0xff] }
 0x119   :  { %5394 = vmatprep.subr.bf16.mxu0 %v10055_v38  ;;  %5751 = vmatprep.subr.bf16.mxu1 %v10057_v43  ;;  %v10113_v38 = vcombine.high %v519_v28, %v523_v31  ;;  %v11989_v43 = vcombine.high %v121_v33, %v121_v33  ;;  %v574_v27 = vld [vmem:[#allocation8 + $0xe00] sm:$0xff] }
 0x11c   :  { %5395 = vmatpush1.bf16.msra.mxu0 %v10054_v45  ;;  %5752 = vmatpush1.bf16.msra.mxu1 %v10056_v46  ;;  %v10112_v45 = vcombine.low %v519_v28, %v523_v31  ;;  %v10119_v46 = vcombine.high %v526_v37, %v530_v40  ;;  %v578_v28 = vld [vmem:[#allocation8 + $0xe20] sm:$0xff]  ;;  %v575_v31 = vld [vmem:[#allocation8 + $0xe08] sm:$0xff] }
 0x11d   :  { %5396 = vmatprep.subr.bf16.mxu0 %v10063_v47  ;;  %5753 = vmatprep.subr.bf16.mxu1 %v10065_v51  ;;  %v534_v47 = vld [vmem:[#allocation8 + $0xcc0] sm:$0xff]  ;;  %v539_v51 = vld [vmem:[#allocation8 + $0xce8] sm:$0xff] }
 0x11e   :  { %v10127_v56 = vcombine.high %v534_v47, %v538_v48  ;;  %v10129_v60 = vcombine.high %v535_v49, %v539_v51 }
 0x120   :  { %5397 = vmatpush1.bf16.msra.mxu0 %v10062_v53  ;;  %5754 = vmatpush1.bf16.msra.mxu1 %v10064_v54  ;;  %v10118_v53 = vcombine.low %v526_v37, %v530_v40  ;;  %v542_v54 = vld [vmem:[#allocation8 + $0xd00] sm:$0xff]  ;;  %v583_v40 = vld [vmem:[#allocation8 + $0xe48] sm:$0xff] }
 0x121   :  { %5398 = vmatprep.subr.bf16.mxu0 %v10071_v55  ;;  %5755 = vmatprep.subr.bf16.mxu1 %v10073_v59  ;;  %v10120_v55 = vcombine.low %v527_v41, %v531_v42  ;;  %v547_v59 = vld [vmem:[#allocation8 + $0xd28] sm:$0xff]  ;;  %v10135_v0 = vcombine.high %v542_v54, %v546_v57  ;;  %v582_v37 = vld [vmem:[#allocation8 + $0xe40] sm:$0xff]  ;;  %v10166_v42 = vcombine.low %v574_v27, %v578_v28 }
 0x122   :  { %v10137_v2 = vcombine.high %v543_v58, %v547_v59  ;;  %v587_v41 = vld [vmem:[#allocation8 + $0xe68] sm:$0xff] }
 0x124   :  { %5399 = vmatpush1.bf16.msra.mxu0 %v10070_v61  ;;  %5756 = vmatpush1.bf16.msra.mxu1 %v10072_v62  ;;  %v11236_v61 = vld [vmem:[#allocation6 + $0x1c] ss:$52 sps:$4 sm:$0xff]   ;;  %v10126_v62 = vcombine.low %v534_v47, %v538_v48 }
 0x125   :  { %5400 = vmatprep.subr.bf16.mxu0 %v10079_v63  ;;  %5757 = vmatprep.subr.bf16.mxu1 %v10081_v3  ;;  %v10128_v63 = vcombine.low %v535_v49, %v539_v51  ;;  %v554_v3 = vld [vmem:[#allocation8 + $0xd60] sm:$0xff]  ;;  %v591_v49 = vld [vmem:[#allocation8 + $0xe88] sm:$0xff] }
 0x126   :  { %v10143_v8 = vcombine.high %v550_v1, %v554_v3  ;;  %v590_v47 = vld [vmem:[#allocation8 + $0xe80] sm:$0xff] }
 0x127   :  { %v594_v48 = vld [vmem:[#allocation8 + $0xea0] sm:$0xff] }
 0x128   :  { %5401 = vmatpush1.bf16.msra.mxu0 %v10078_v5  ;;  %5758 = vmatpush1.bf16.msra.mxu1 %v10080_v6  ;;  %v555_v5 = vld [vmem:[#allocation8 + $0xd68] sm:$0xff]  ;;  %v10134_v6 = vcombine.low %v542_v54, %v546_v57  ;;  %v10183_v54 = vcombine.high %v590_v47, %v594_v48  ;;  %v602_v57 = vld [vmem:[#allocation8 + $0xee0] sm:$0xff] }
 0x129   :  { %5402 = vmatprep.subr.bf16.mxu0 %v10087_v7  ;;  %5759 = vmatprep.subr.bf16.mxu1 %v10089_v11  ;;  %v10136_v7 = vcombine.low %v543_v58, %v547_v59  ;;  %v10145_v9 = vcombine.high %v551_v4, %v555_v5  ;;  %v562_v11 = vld [vmem:[#allocation8 + $0xda0] sm:$0xff]  ;;  %v599_v58 = vld [vmem:[#allocation8 + $0xec8] sm:$0xff] }
 0x12a   :  { %v10151_v16 = vcombine.high %v558_v10, %v562_v11  ;;  %v10150_v23 = vcombine.low %v558_v10, %v562_v11  ;;  %v603_v59 = vld [vmem:[#allocation8 + $0xee8] sm:$0xff] }
 0x12b   :  { %v615_v10 = vld [vmem:[#allocation8 + $0xf48] sm:$0xff] }
 0x12c   :  { %5403 = vmatpush1.bf16.msra.mxu0 %v10086_v13  ;;  %5760 = vmatpush1.bf16.msra.mxu1 %v10088_v14  ;;  %v563_v13 = vld [vmem:[#allocation8 + $0xda8] sm:$0xff]  ;;  %v10142_v14 = vcombine.low %v550_v1, %v554_v3  ;;  %v610_v1 = vld [vmem:[#allocation8 + $0xf20] sm:$0xff] }
 0x12d   :  { %5404 = vmatprep.subr.bf16.mxu0 %v10095_v15  ;;  %5761 = vmatprep.subr.bf16.mxu1 %v10097_v18  ;;  %v10144_v15 = vcombine.low %v551_v4, %v555_v5  ;;  %v10153_v17 = vcombine.high %v559_v12, %v563_v13  ;;  %v566_v18 = vld [vmem:[#allocation8 + $0xdc0] sm:$0xff]  ;;  %v611_v3 = vld [vmem:[#allocation8 + $0xf28] sm:$0xff]  ;;  %v10192_v5 = vcombine.low %v599_v58, %v603_v59 }
 0x12e   :  { %v10158_v33 = vcombine.low %v566_v18, %v570_v19  ;;  %v619_v11 = vld [vmem:[#allocation8 + $0xf68] sm:$0xff] }
 0x130   :  { %5405 = vmatpush1.bf16.msra.mxu0 %v10094_v22  ;;  %5762 = vmatpush1.bf16.msra.mxu1 %v10096_v24  ;;  %v571_v22 = vld [vmem:[#allocation8 + $0xde8] sm:$0xff]  ;;  %v10152_v24 = vcombine.low %v559_v12, %v563_v13 }
 0x131   :  { %5425 = vmatprep.subr.bf16.mxu0 %v10103_v26  ;;  %5782 = vmatprep.subr.bf16.mxu1 %v10105_v32  ;;  %v10161_v26 = vcombine.high %v567_v21, %v571_v22  ;;  %v579_v32 = vld [vmem:[#allocation8 + $0xe28] sm:$0xff] }
 0x133   :  { %5407 = vmatmul.mubr.bf16.vlgmr.msra.gmra.mrb[0].mxu0 %v11229_v25  ;;  %5764 = vmatmul.mubr.bf16.vlgmr.msra.gmra.mrb[0].mxu1 %v11229_v25  ;;  %v10159_v25 = vcombine.high %v566_v18, %v570_v19  ;;  %v623_v18 = vld [vmem:[#allocation8 + $0xf88] sm:$0xff] }
 0x134   :  { %5426 = vmatpush1.bf16.msra.mxu0 %v10102_v34  ;;  %5783 = vmatpush1.bf16.msra.mxu1 %v10104_v35  ;;  %v10160_v34 = vcombine.low %v567_v21, %v571_v22  ;;  %v10167_v35 = vcombine.high %v574_v27, %v578_v28  ;;  %v627_v19 = vld [vmem:[#allocation8 + $0xfa8] sm:$0xff]  ;;  %v10208_v22 = vcombine.low %v615_v10, %v619_v11 }
 0x135   :  { %5427 = vmatprep.subr.bf16.mxu0 %v10111_v36  ;;  %5784 = vmatprep.subr.bf16.mxu1 %v10113_v38  ;;  %v10169_v36 = vcombine.high %v575_v31, %v579_v32  ;;  %v586_v38 = vld [vmem:[#allocation8 + $0xe60] sm:$0xff]  ;;  %v631_v27 = vld [vmem:[#allocation8 + $0xfc8] sm:$0xff] }
 0x136   :  { %5416 = vmatprep.mubr.bf16.mxu0 %v11989_v43  ;;  %5773 = vmatprep.mubr.bf16.mxu1 %v11989_v43  ;;  %v10174_v51 = vcombine.low %v582_v37, %v586_v38  ;;  %v635_v28 = vld [vmem:[#allocation8 + $0xfe8] sm:$0xff] }
 0x138   :  { %5428 = vmatpush1.bf16.msra.mxu0 %v10110_v44  ;;  %5785 = vmatpush1.bf16.msra.mxu1 %v10112_v45  ;;  %v10168_v44 = vcombine.low %v575_v31, %v579_v32  ;;  %v10175_v45 = vcombine.high %v582_v37, %v586_v38  ;;  %v10216_v32 = vcombine.low %v623_v18, %v627_v19  ;;  %v639_v37 = vld [vmem:[#allocation8 + $0x1008] sm:$0xff] }
 0x139   :  { %5429 = vmatprep.subr.bf16.mxu0 %v10119_v46  ;;  %5786 = vmatprep.subr.bf16.mxu1 %v10121_v50  ;;  %v10177_v46 = vcombine.high %v583_v40, %v587_v41  ;;  %v595_v50 = vld [vmem:[#allocation8 + $0xea8] sm:$0xff] }
 0x13a   :  { %v643_v38 = vld [vmem:[#allocation8 + $0x1028] sm:$0xff] }
 0x13b   :  { %5417 = vmatmul.mubr.bf16.gmra.mrb[4].mxu0 %v11993_v52  ;;  %5774 = vmatmul.mubr.bf16.gmra.mrb[4].mxu1 %v11993_v52 }
 0x13c   :  { %5430 = vmatpush1.bf16.msra.mxu0 %v10118_v53  ;;  %5787 = vmatpush1.bf16.msra.mxu1 %v10120_v55  ;;  %v10176_v53 = vcombine.low %v583_v40, %v587_v41  ;;  %v10185_v55 = vcombine.high %v591_v49, %v595_v50  ;;  %v10224_v41 = vcombine.low %v631_v27, %v635_v28 }
 0x13d   :  { %5431 = vmatprep.subr.bf16.mxu0 %v10127_v56  ;;  %5788 = vmatprep.subr.bf16.mxu1 %v10129_v60  ;;  %v598_v56 = vld [vmem:[#allocation8 + $0xec0] sm:$0xff]  ;;  %v10182_v60 = vcombine.low %v590_v47, %v594_v48  ;;  %v647_v48 = vld [vmem:[#allocation8 + $0x1048] sm:$0xff] }
 0x13e   :  { %5457 = vmatprep.mubr.bf16.mxu0 %v11236_v61  ;;  %5814 = vmatprep.mubr.bf16.mxu1 %v11236_v61  ;;  %v10184_v61 = vcombine.low %v591_v49, %v595_v50  ;;  %v10190_v4 = vcombine.low %v598_v56, %v602_v57  ;;  %v650_v47 = vld [vmem:[#allocation8 + $0x1060] sm:$0xff]  ;;  %v651_v49 = vld [vmem:[#allocation8 + $0x1068] sm:$0xff] }
 0x13f   :  { %v122_v50 = vld [vmem:[#allocation6 + $0x80] sm:$0xff] }
 0x140   :  { %5432 = vmatpush1.bf16.msra.mxu0 %v10126_v62  ;;  %5789 = vmatpush1.bf16.msra.mxu1 %v10128_v63  ;;  %v10191_v62 = vcombine.high %v598_v56, %v602_v57  ;;  %v10193_v63 = vcombine.high %v599_v58, %v603_v59  ;;  %v654_v56 = vld [vmem:[#allocation8 + $0x1080] sm:$0xff]  ;;  %v11997_v58 = vcombine.high %v122_v50, %v122_v50  ;;  %v655_v59 = vld [vmem:[#allocation8 + $0x1088] sm:$0xff] }
 0x141   :  { %5433 = vmatprep.subr.bf16.mxu0 %v10135_v0  ;;  %5790 = vmatprep.subr.bf16.mxu1 %v10137_v2  ;;  %v606_v0 = vld [vmem:[#allocation8 + $0xf00] sm:$0xff]  ;;  %v607_v2 = vld [vmem:[#allocation8 + $0xf08] sm:$0xff] }
 0x142   :  { %v10198_v12 = vcombine.low %v606_v0, %v610_v1  ;;  %v10200_v13 = vcombine.low %v607_v2, %v611_v3  ;;  %v658_v57 = vld [vmem:[#allocation8 + $0x10a0] sm:$0xff] }
 0x144   :  { %5434 = vmatpush1.bf16.msra.mxu0 %v10134_v6  ;;  %5791 = vmatpush1.bf16.msra.mxu1 %v10136_v7  ;;  %v10199_v6 = vcombine.high %v606_v0, %v610_v1  ;;  %v10201_v7 = vcombine.high %v607_v2, %v611_v3  ;;  %v662_v1 = vld [vmem:[#allocation8 + $0x10c0] sm:$0xff]  ;;  %v663_v3 = vld [vmem:[#allocation8 + $0x10c8] sm:$0xff] }
 0x145   :  { %5435 = vmatprep.subr.bf16.mxu0 %v10143_v8  ;;  %5792 = vmatprep.subr.bf16.mxu1 %v10145_v9  ;;  %v614_v8 = vld [vmem:[#allocation8 + $0xf40] sm:$0xff] }
 0x146   :  { %v618_v9 = vld [vmem:[#allocation8 + $0xf60] sm:$0xff] }
 0x147   :  { %v10206_v21 = vcombine.low %v614_v8, %v618_v9  ;;  %v666_v2 = vld [vmem:[#allocation8 + $0x10e0] sm:$0xff] }
 0x148   :  { %5436 = vmatpush1.bf16.msra.mxu0 %v10142_v14  ;;  %5793 = vmatpush1.bf16.msra.mxu1 %v10144_v15  ;;  %v10207_v14 = vcombine.high %v614_v8, %v618_v9  ;;  %v10209_v15 = vcombine.high %v615_v10, %v619_v11  ;;  %v10255_v8 = vcombine.high %v662_v1, %v666_v2  ;;  %v670_v10 = vld [vmem:[#allocation8 + $0x1100] sm:$0xff] }
 0x149   :  { %5437 = vmatprep.subr.bf16.mxu0 %v10151_v16  ;;  %5794 = vmatprep.subr.bf16.mxu1 %v10153_v17  ;;  %v622_v16 = vld [vmem:[#allocation8 + $0xf80] sm:$0xff] }
 0x14a   :  { %v626_v17 = vld [vmem:[#allocation8 + $0xfa0] sm:$0xff] }
 0x14b   :  { %v10214_v31 = vcombine.low %v622_v16, %v626_v17  ;;  %v674_v11 = vld [vmem:[#allocation8 + $0x1120] sm:$0xff] }
 0x14c   :  { %5438 = vmatpush1.bf16.msra.mxu0 %v10150_v23  ;;  %5795 = vmatpush1.bf16.msra.mxu1 %v10152_v24  ;;  %v10215_v23 = vcombine.high %v622_v16, %v626_v17  ;;  %v10217_v24 = vcombine.high %v623_v18, %v627_v19  ;;  %v10263_v17 = vcombine.high %v670_v10, %v674_v11  ;;  %v678_v19 = vld [vmem:[#allocation8 + $0x1140] sm:$0xff] }
 0x14d   :  { %5439 = vmatprep.subr.bf16.mxu0 %v10159_v25  ;;  %5796 = vmatprep.subr.bf16.mxu1 %v10161_v26  ;;  %v630_v25 = vld [vmem:[#allocation8 + $0xfc0] sm:$0xff] }
 0x14e   :  { %v634_v26 = vld [vmem:[#allocation8 + $0xfe0] sm:$0xff] }
 0x14f   :  { %v10222_v40 = vcombine.low %v630_v25, %v634_v26 }
 0x150   :  { %5440 = vmatpush1.bf16.msra.mxu0 %v10158_v33  ;;  %5797 = vmatpush1.bf16.msra.mxu1 %v10160_v34  ;;  %v10223_v33 = vcombine.high %v630_v25, %v634_v26  ;;  %v10225_v34 = vcombine.high %v631_v27, %v635_v28  ;;  %v686_v28 = vld [vmem:[#allocation8 + $0x1180] sm:$0xff] }
 0x151   :  { %5441 = vmatprep.subr.bf16.mxu0 %v10167_v35  ;;  %5798 = vmatprep.subr.bf16.mxu1 %v10169_v36  ;;  %v638_v35 = vld [vmem:[#allocation8 + $0x1000] sm:$0xff] }
 0x152   :  { %v642_v36 = vld [vmem:[#allocation8 + $0x1020] sm:$0xff] }
 0x154   :  { %5442 = vmatpush1.bf16.msra.mxu0 %v10166_v42  ;;  %5799 = vmatpush1.bf16.msra.mxu1 %v10168_v44  ;;  %v10231_v42 = vcombine.high %v638_v35, %v642_v36  ;;  %v11234_v44 = vld [vmem:[#allocation6 + $0x18] ss:$52 sps:$4 sm:$0xff]  }
 0x155   :  { %5443 = vmatprep.subr.bf16.mxu0 %v10175_v45  ;;  %5800 = vmatprep.subr.bf16.mxu1 %v10177_v46  ;;  %v10233_v45 = vcombine.high %v639_v37, %v643_v38  ;;  %v646_v46 = vld [vmem:[#allocation8 + $0x1040] sm:$0xff] }
 0x158   :  { %5444 = vmatpush1.bf16.msra.mxu0 %v10174_v51  ;;  %5801 = vmatpush1.bf16.msra.mxu1 %v10176_v53  ;;  %v10230_v51 = vcombine.low %v638_v35, %v642_v36  ;;  %v10232_v53 = vcombine.low %v639_v37, %v643_v38  ;;  %v694_v38 = vld [vmem:[#allocation8 + $0x11c0] sm:$0xff] }
 0x159   :  { %5445 = vmatprep.subr.bf16.mxu0 %v10183_v54  ;;  %5802 = vmatprep.subr.bf16.mxu1 %v10185_v55  ;;  %v10239_v54 = vcombine.high %v646_v46, %v650_v47  ;;  %v10241_v55 = vcombine.high %v647_v48, %v651_v49 }
 0x15c   :  { %5446 = vmatpush1.bf16.msra.mxu0 %v10182_v60  ;;  %5803 = vmatpush1.bf16.msra.mxu1 %v10184_v61  ;;  %v659_v60 = vld [vmem:[#allocation8 + $0x10a8] sm:$0xff]  ;;  %v10238_v61 = vcombine.low %v646_v46, %v650_v47 }
 0x15d   :  { %5447 = vmatprep.subr.bf16.mxu0 %v10191_v62  ;;  %5804 = vmatprep.subr.bf16.mxu1 %v10193_v63  ;;  %v10240_v62 = vcombine.low %v647_v48, %v651_v49  ;;  %v10247_v63 = vcombine.high %v654_v56, %v658_v57  ;;  %v10249_v0 = vcombine.high %v655_v59, %v659_v60  ;;  %v702_v48 = vld [vmem:[#allocation8 + $0x1200] sm:$0xff] }
 0x15e   :  { %v706_v49 = vld [vmem:[#allocation8 + $0x1220] sm:$0xff] }
 0x160   :  { %5448 = vmatpush1.bf16.msra.mxu0 %v10190_v4  ;;  %5805 = vmatpush1.bf16.msra.mxu1 %v10192_v5  ;;  %v667_v4 = vld [vmem:[#allocation8 + $0x10e8] sm:$0xff]  ;;  %v12001_v5 = vcombine.low %v122_v50, %v122_v50 }
 0x161   :  { %5449 = vmatprep.subr.bf16.mxu0 %v10199_v6  ;;  %5806 = vmatprep.subr.bf16.mxu1 %v10201_v7  ;;  %v10246_v6 = vcombine.low %v654_v56, %v658_v57  ;;  %v10248_v7 = vcombine.low %v655_v59, %v659_v60  ;;  %v10257_v9 = vcombine.high %v663_v3, %v667_v4  ;;  %v703_v50 = vld [vmem:[#allocation8 + $0x1208] sm:$0xff]  ;;  %v710_v57 = vld [vmem:[#allocation8 + $0x1240] sm:$0xff] }
 0x162   :  { %v10256_v16 = vcombine.low %v663_v3, %v667_v4  ;;  %v714_v59 = vld [vmem:[#allocation8 + $0x1260] sm:$0xff]  ;;  %v711_v60 = vld [vmem:[#allocation8 + $0x1248] sm:$0xff] }
 0x163   :  { %v722_v3 = vld [vmem:[#allocation8 + $0x12a0] sm:$0xff]  ;;  %v719_v4 = vld [vmem:[#allocation8 + $0x1288] sm:$0xff] }
 0x164   :  { %5450 = vmatpush1.bf16.msra.mxu0 %v10198_v12  ;;  %5807 = vmatpush1.bf16.msra.mxu1 %v10200_v13  ;;  %v11241_v12 = vld [vmem:[#allocation6 + $0x24] ss:$52 sps:$4 sm:$0xff]  }
 0x165   :  { %5451 = vmatprep.subr.bf16.mxu0 %v10207_v14  ;;  %5808 = vmatprep.subr.bf16.mxu1 %v10209_v15  ;;  %v671_v13 = vld [vmem:[#allocation8 + $0x1108] sm:$0xff]  ;;  %v10254_v15 = vcombine.low %v662_v1, %v666_v2  ;;  %v718_v2 = vld [vmem:[#allocation8 + $0x1280] sm:$0xff] }
 0x166   :  { %v675_v14 = vld [vmem:[#allocation8 + $0x1128] sm:$0xff] }
 0x167   :  { %v10265_v18 = vcombine.high %v671_v13, %v675_v14  ;;  %v10264_v25 = vcombine.low %v671_v13, %v675_v14  ;;  %v727_v13 = vld [vmem:[#allocation8 + $0x12c8] sm:$0xff] }
 0x168   :  { %5452 = vmatpush1.bf16.msra.mxu0 %v10206_v21  ;;  %5809 = vmatpush1.bf16.msra.mxu1 %v10208_v22  ;;  %v682_v21 = vld [vmem:[#allocation8 + $0x1160] sm:$0xff]  ;;  %v679_v22 = vld [vmem:[#allocation8 + $0x1148] sm:$0xff] }
 0x169   :  { %5453 = vmatprep.subr.bf16.mxu0 %v10215_v23  ;;  %5810 = vmatprep.subr.bf16.mxu1 %v10217_v24  ;;  %v683_v23 = vld [vmem:[#allocation8 + $0x1168] sm:$0xff]  ;;  %v10262_v24 = vcombine.low %v670_v10, %v674_v11  ;;  %v10271_v26 = vcombine.high %v678_v19, %v682_v21  ;;  %v726_v11 = vld [vmem:[#allocation8 + $0x12c0] sm:$0xff] }
 0x16a   :  { %v10273_v27 = vcombine.high %v679_v22, %v683_v23  ;;  %v10272_v35 = vcombine.low %v679_v22, %v683_v23  ;;  %v731_v14 = vld [vmem:[#allocation8 + $0x12e8] sm:$0xff] }
 0x16b   :  { %v735_v22 = vld [vmem:[#allocation8 + $0x1308] sm:$0xff] }
 0x16c   :  { %5454 = vmatpush1.bf16.msra.mxu0 %v10214_v31  ;;  %5811 = vmatpush1.bf16.msra.mxu1 %v10216_v32  ;;  %v690_v31 = vld [vmem:[#allocation8 + $0x11a0] sm:$0xff]  ;;  %v687_v32 = vld [vmem:[#allocation8 + $0x1188] sm:$0xff] }
 0x16d   :  { %5455 = vmatprep.subr.bf16.mxu0 %v10223_v33  ;;  %5812 = vmatprep.subr.bf16.mxu1 %v10225_v34  ;;  %v691_v33 = vld [vmem:[#allocation8 + $0x11a8] sm:$0xff]  ;;  %v10270_v34 = vcombine.low %v678_v19, %v682_v21  ;;  %v10279_v36 = vcombine.high %v686_v28, %v690_v31  ;;  %v734_v19 = vld [vmem:[#allocation8 + $0x1300] sm:$0xff] }
 0x16e   :  { %v10281_v37 = vcombine.high %v687_v32, %v691_v33  ;;  %v738_v21 = vld [vmem:[#allocation8 + $0x1320] sm:$0xff]  ;;  %v739_v23 = vld [vmem:[#allocation8 + $0x1328] sm:$0xff] }
 0x170   :  { %5456 = vmatpush1.bf16.msra.mxu0 %v10222_v40  ;;  %5813 = vmatpush1.bf16.msra.mxu1 %v10224_v41  ;;  %v698_v40 = vld [vmem:[#allocation8 + $0x11e0] sm:$0xff]  ;;  %v695_v41 = vld [vmem:[#allocation8 + $0x11c8] sm:$0xff] }
 0x171   :  { %5476 = vmatprep.subr.bf16.mxu0 %v10231_v42  ;;  %5833 = vmatprep.subr.bf16.mxu1 %v10233_v45  ;;  %v699_v42 = vld [vmem:[#allocation8 + $0x11e8] sm:$0xff]  ;;  %v10280_v45 = vcombine.low %v687_v32, %v691_v33  ;;  %v10287_v46 = vcombine.high %v694_v38, %v698_v40 }
 0x172   :  { %v10289_v47 = vcombine.high %v695_v41, %v699_v42  ;;  %v743_v32 = vld [vmem:[#allocation8 + $0x1348] sm:$0xff] }
 0x173   :  { %5458 = vmatmul.mubr.bf16.vlgmr.msra.gmra.mrb[0].mxu0 %v11234_v44  ;;  %5815 = vmatmul.mubr.bf16.vlgmr.msra.gmra.mrb[0].mxu1 %v11234_v44  ;;  %v10278_v44 = vcombine.low %v686_v28, %v690_v31  ;;  %v742_v28 = vld [vmem:[#allocation8 + $0x1340] sm:$0xff]  ;;  %v747_v33 = vld [vmem:[#allocation8 + $0x1368] sm:$0xff] }
 0x174   :  { %5477 = vmatpush1.bf16.msra.mxu0 %v10230_v51  ;;  %5834 = vmatpush1.bf16.msra.mxu1 %v10232_v53  ;;  %v707_v51 = vld [vmem:[#allocation8 + $0x1228] sm:$0xff]  ;;  %v10286_v53 = vcombine.low %v694_v38, %v698_v40  ;;  %v746_v31 = vld [vmem:[#allocation8 + $0x1360] sm:$0xff] }
 0x175   :  { %5478 = vmatprep.subr.bf16.mxu0 %v10239_v54  ;;  %5835 = vmatprep.subr.bf16.mxu1 %v10241_v55  ;;  %v10288_v54 = vcombine.low %v695_v41, %v699_v42  ;;  %v10295_v55 = vcombine.high %v702_v48, %v706_v49  ;;  %v10297_v56 = vcombine.high %v703_v50, %v707_v51  ;;  %v750_v38 = vld [vmem:[#allocation8 + $0x1380] sm:$0xff]  ;;  %v751_v41 = vld [vmem:[#allocation8 + $0x1388] sm:$0xff] }
 0x176   :  { %5467 = vmatprep.mubr.bf16.mxu0 %v11997_v58  ;;  %5824 = vmatprep.mubr.bf16.mxu1 %v11997_v58  ;;  %v754_v40 = vld [vmem:[#allocation8 + $0x13a0] sm:$0xff]  ;;  %v755_v42 = vld [vmem:[#allocation8 + $0x13a8] sm:$0xff] }
 0x178   :  { %5479 = vmatpush1.bf16.msra.mxu0 %v10238_v61  ;;  %5836 = vmatpush1.bf16.msra.mxu1 %v10240_v62  ;;  %v715_v61 = vld [vmem:[#allocation8 + $0x1268] sm:$0xff]  ;;  %v10294_v62 = vcombine.low %v702_v48, %v706_v49  ;;  %v758_v48 = vld [vmem:[#allocation8 + $0x13c0] sm:$0xff] }
 0x179   :  { %5480 = vmatprep.subr.bf16.mxu0 %v10247_v63  ;;  %5837 = vmatprep.subr.bf16.mxu1 %v10249_v0  ;;  %v10296_v63 = vcombine.low %v703_v50, %v707_v51  ;;  %v10303_v0 = vcombine.high %v710_v57, %v714_v59  ;;  %v10305_v1 = vcombine.high %v711_v60, %v715_v61  ;;  %v762_v49 = vld [vmem:[#allocation8 + $0x13e0] sm:$0xff]  ;;  %v759_v50 = vld [vmem:[#allocation8 + $0x13c8] sm:$0xff] }
 0x17a   :  { %v763_v51 = vld [vmem:[#allocation8 + $0x13e8] sm:$0xff] }
 0x17b   :  { %5468 = vmatmul.mubr.bf16.gmra.mrb[4].mxu0 %v12001_v5  ;;  %5825 = vmatmul.mubr.bf16.gmra.mrb[4].mxu1 %v12001_v5 }
 0x17c   :  { %5481 = vmatpush1.bf16.msra.mxu0 %v10246_v6  ;;  %5838 = vmatpush1.bf16.msra.mxu1 %v10248_v7  ;;  %v723_v6 = vld [vmem:[#allocation8 + $0x12a8] sm:$0xff]  ;;  %v10302_v7 = vcombine.low %v710_v57, %v714_v59  ;;  %v766_v57 = vld [vmem:[#allocation8 + $0x1400] sm:$0xff] }
 0x17d   :  { %5482 = vmatprep.subr.bf16.mxu0 %v10255_v8  ;;  %5839 = vmatprep.subr.bf16.mxu1 %v10257_v9  ;;  %v10304_v8 = vcombine.low %v711_v60, %v715_v61  ;;  %v10311_v9 = vcombine.high %v718_v2, %v722_v3  ;;  %v10313_v10 = vcombine.high %v719_v4, %v723_v6  ;;  %v770_v59 = vld [vmem:[#allocation8 + $0x1420] sm:$0xff]  ;;  %v767_v60 = vld [vmem:[#allocation8 + $0x1408] sm:$0xff] }
 0x17e   :  { %5508 = vmatprep.mubr.bf16.mxu0 %v11241_v12  ;;  %5865 = vmatprep.mubr.bf16.mxu1 %v11241_v12  ;;  %v730_v12 = vld [vmem:[#allocation8 + $0x12e0] sm:$0xff]  ;;  %v771_v61 = vld [vmem:[#allocation8 + $0x1428] sm:$0xff] }
 0x180   :  { %5483 = vmatpush1.bf16.msra.mxu0 %v10254_v15  ;;  %5840 = vmatpush1.bf16.msra.mxu1 %v10256_v16  ;;  %v10310_v15 = vcombine.low %v718_v2, %v722_v3  ;;  %v10312_v16 = vcombine.low %v719_v4, %v723_v6  ;;  %v10361_v2 = vcombine.high %v767_v60, %v771_v61  ;;  %v774_v3 = vld [vmem:[#allocation8 + $0x1440] sm:$0xff]  ;;  %v775_v6 = vld [vmem:[#allocation8 + $0x1448] sm:$0xff] }
 0x181   :  { %5484 = vmatprep.subr.bf16.mxu0 %v10263_v17  ;;  %5841 = vmatprep.subr.bf16.mxu1 %v10265_v18  ;;  %v10319_v17 = vcombine.high %v726_v11, %v730_v12  ;;  %v10321_v18 = vcombine.high %v727_v13, %v731_v14  ;;  %v778_v4 = vld [vmem:[#allocation8 + $0x1460] sm:$0xff] }
 0x184   :  { %5485 = vmatpush1.bf16.msra.mxu0 %v10262_v24  ;;  %5842 = vmatpush1.bf16.msra.mxu1 %v10264_v25  ;;  %v10318_v24 = vcombine.low %v726_v11, %v730_v12  ;;  %v10320_v25 = vcombine.low %v727_v13, %v731_v14  ;;  %v10367_v11 = vcombine.high %v774_v3, %v778_v4  ;;  %v782_v13 = vld [vmem:[#allocation8 + $0x1480] sm:$0xff] }
 0x185   :  { %5486 = vmatprep.subr.bf16.mxu0 %v10271_v26  ;;  %5843 = vmatprep.subr.bf16.mxu1 %v10273_v27  ;;  %v10327_v26 = vcombine.high %v734_v19, %v738_v21  ;;  %v10329_v27 = vcombine.high %v735_v22, %v739_v23  ;;  %v786_v14 = vld [vmem:[#allocation8 + $0x14a0] sm:$0xff] }
 0x188   :  { %5487 = vmatpush1.bf16.msra.mxu0 %v10270_v34  ;;  %5844 = vmatpush1.bf16.msra.mxu1 %v10272_v35  ;;  %v10326_v34 = vcombine.low %v734_v19, %v738_v21  ;;  %v10328_v35 = vcombine.low %v735_v22, %v739_v23  ;;  %v10375_v21 = vcombine.high %v782_v13, %v786_v14  ;;  %v790_v23 = vld [vmem:[#allocation8 + $0x14c0] sm:$0xff] }
 0x189   :  { %5488 = vmatprep.subr.bf16.mxu0 %v10279_v36  ;;  %5845 = vmatprep.subr.bf16.mxu1 %v10281_v37  ;;  %v10335_v36 = vcombine.high %v742_v28, %v746_v31  ;;  %v10337_v37 = vcombine.high %v743_v32, %v747_v33 }
 0x18c   :  { %5489 = vmatpush1.bf16.msra.mxu0 %v10278_v44  ;;  %5846 = vmatpush1.bf16.msra.mxu1 %v10280_v45  ;;  %v10334_v44 = vcombine.low %v742_v28, %v746_v31  ;;  %v10336_v45 = vcombine.low %v743_v32, %v747_v33  ;;  %v10374_v28 = vcombine.low %v782_v13, %v786_v14 }
 0x18d   :  { %5490 = vmatprep.subr.bf16.mxu0 %v10287_v46  ;;  %5847 = vmatprep.subr.bf16.mxu1 %v10289_v47  ;;  %v10343_v46 = vcombine.high %v750_v38, %v754_v40  ;;  %v10345_v47 = vcombine.high %v751_v41, %v755_v42 }
 0x190   :  { %5491 = vmatpush1.bf16.msra.mxu0 %v10286_v53  ;;  %5848 = vmatpush1.bf16.msra.mxu1 %v10288_v54  ;;  %v10342_v53 = vcombine.low %v750_v38, %v754_v40  ;;  %v10344_v54 = vcombine.low %v751_v41, %v755_v42  ;;  %v803_v38 = vld [vmem:[#allocation8 + $0x1528] sm:$0xff] }
 0x191   :  { %5492 = vmatprep.subr.bf16.mxu0 %v10295_v55  ;;  %5849 = vmatprep.subr.bf16.mxu1 %v10297_v56  ;;  %v10351_v55 = vcombine.high %v758_v48, %v762_v49  ;;  %v10353_v56 = vcombine.high %v759_v50, %v763_v51 }
 0x194   :  { %5493 = vmatpush1.bf16.msra.mxu0 %v10294_v62  ;;  %5850 = vmatpush1.bf16.msra.mxu1 %v10296_v63  ;;  %v10350_v62 = vcombine.low %v758_v48, %v762_v49  ;;  %v10352_v63 = vcombine.low %v759_v50, %v763_v51  ;;  %v811_v48 = vld [vmem:[#allocation8 + $0x1568] sm:$0xff] }
 0x195   :  { %5494 = vmatprep.subr.bf16.mxu0 %v10303_v0  ;;  %5851 = vmatprep.subr.bf16.mxu1 %v10305_v1  ;;  %v10359_v0 = vcombine.high %v766_v57, %v770_v59  ;;  %v11239_v1 = vld [vmem:[#allocation6 + $0x20] ss:$52 sps:$4 sm:$0xff]  }
 0x198   :  { %5495 = vmatpush1.bf16.msra.mxu0 %v10302_v7  ;;  %5852 = vmatpush1.bf16.msra.mxu1 %v10304_v8  ;;  %v779_v7 = vld [vmem:[#allocation8 + $0x1468] sm:$0xff] }
 0x199   :  { %5496 = vmatprep.subr.bf16.mxu0 %v10311_v9  ;;  %5853 = vmatprep.subr.bf16.mxu1 %v10313_v10  ;;  %v123_v8 = vld [vmem:[#allocation6 + $0x88] sm:$0xff]  ;;  %v10358_v9 = vcombine.low %v766_v57, %v770_v59  ;;  %v10360_v10 = vcombine.low %v767_v60, %v771_v61  ;;  %v10369_v12 = vcombine.high %v775_v6, %v779_v7 }
 0x19a   :  { %v10368_v19 = vcombine.low %v775_v6, %v779_v7  ;;  %v819_v57 = vld [vmem:[#allocation8 + $0x15a8] sm:$0xff] }
 0x19c   :  { %5497 = vmatpush1.bf16.msra.mxu0 %v10310_v15  ;;  %5854 = vmatpush1.bf16.msra.mxu1 %v10312_v16  ;;  %v12005_v15 = vcombine.high %v123_v8, %v123_v8  ;;  %v783_v16 = vld [vmem:[#allocation8 + $0x1488] sm:$0xff] }
 0x19d   :  { %5498 = vmatprep.subr.bf16.mxu0 %v10319_v17  ;;  %5855 = vmatprep.subr.bf16.mxu1 %v10321_v18  ;;  %v787_v17 = vld [vmem:[#allocation8 + $0x14a8] sm:$0xff]  ;;  %v10366_v18 = vcombine.low %v774_v3, %v778_v4 }
 0x19e   :  { %v10377_v22 = vcombine.high %v783_v16, %v787_v17  ;;  %v10376_v31 = vcombine.low %v783_v16, %v787_v17  ;;  %v838_v17 = vld [vmem:[#allocation8 + $0x1640] sm:$0xff] }
 0x1a0   :  { %5499 = vmatpush1.bf16.msra.mxu0 %v10318_v24  ;;  %5856 = vmatpush1.bf16.msra.mxu1 %v10320_v25  ;;  %v794_v24 = vld [vmem:[#allocation8 + $0x14e0] sm:$0xff]  ;;  %v791_v25 = vld [vmem:[#allocation8 + $0x14c8] sm:$0xff] }
 0x1a1   :  { %5500 = vmatprep.subr.bf16.mxu0 %v10327_v26  ;;  %5857 = vmatprep.subr.bf16.mxu1 %v10329_v27  ;;  %v795_v26 = vld [vmem:[#allocation8 + $0x14e8] sm:$0xff]  ;;  %v12009_v27 = vcombine.low %v123_v8, %v123_v8  ;;  %v10383_v32 = vcombine.high %v790_v23, %v794_v24  ;;  %v10382_v40 = vcombine.low %v790_v23, %v794_v24  ;;  %v830_v8 = vld [vmem:[#allocation8 + $0x1600] sm:$0xff] }
 0x1a2   :  { %v10385_v33 = vcombine.high %v791_v25, %v795_v26  ;;  %v10384_v41 = vcombine.low %v791_v25, %v795_v26  ;;  %v846_v26 = vld [vmem:[#allocation8 + $0x1680] sm:$0xff] }
 0x1a4   :  { %5501 = vmatpush1.bf16.msra.mxu0 %v10326_v34  ;;  %5858 = vmatpush1.bf16.msra.mxu1 %v10328_v35  ;;  %v798_v34 = vld [vmem:[#allocation8 + $0x1500] sm:$0xff] }
 0x1a5   :  { %5502 = vmatprep.subr.bf16.mxu0 %v10335_v36  ;;  %5859 = vmatprep.subr.bf16.mxu1 %v10337_v37  ;;  %v802_v35 = vld [vmem:[#allocation8 + $0x1520] sm:$0xff]  ;;  %v799_v37 = vld [vmem:[#allocation8 + $0x1508] sm:$0xff] }
 0x1a6   :  { %v11246_v36 = vld [vmem:[#allocation6 + $0x2c] ss:$52 sps:$4 sm:$0xff]   ;;  %v10391_v42 = vcombine.high %v798_v34, %v802_v35  ;;  %v10390_v49 = vcombine.low %v798_v34, %v802_v35  ;;  %v10392_v50 = vcombine.low %v799_v37, %v803_v38 }
 0x1a8   :  { %5503 = vmatpush1.bf16.msra.mxu0 %v10334_v44  ;;  %5860 = vmatpush1.bf16.msra.mxu1 %v10336_v45  ;;  %v10393_v44 = vcombine.high %v799_v37, %v803_v38  ;;  %v806_v45 = vld [vmem:[#allocation8 + $0x1540] sm:$0xff] }
 0x1a9   :  { %5504 = vmatprep.subr.bf16.mxu0 %v10343_v46  ;;  %5861 = vmatprep.subr.bf16.mxu1 %v10345_v47  ;;  %v810_v46 = vld [vmem:[#allocation8 + $0x1560] sm:$0xff]  ;;  %v807_v47 = vld [vmem:[#allocation8 + $0x1548] sm:$0xff] }
 0x1aa   :  { %v10399_v51 = vcombine.high %v806_v45, %v810_v46  ;;  %v10398_v59 = vcombine.low %v806_v45, %v810_v46  ;;  %v10400_v60 = vcombine.low %v807_v47, %v811_v48  ;;  %v854_v37 = vld [vmem:[#allocation8 + $0x16c0] sm:$0xff] }
 0x1ab   :  { %v858_v38 = vld [vmem:[#allocation8 + $0x16e0] sm:$0xff] }
 0x1ac   :  { %5505 = vmatpush1.bf16.msra.mxu0 %v10342_v53  ;;  %5862 = vmatpush1.bf16.msra.mxu1 %v10344_v54  ;;  %v10401_v53 = vcombine.high %v807_v47, %v811_v48  ;;  %v814_v54 = vld [vmem:[#allocation8 + $0x1580] sm:$0xff]  ;;  %v10447_v45 = vcombine.high %v854_v37, %v858_v38 }
 0x1ad   :  { %5506 = vmatprep.subr.bf16.mxu0 %v10351_v55  ;;  %5863 = vmatprep.subr.bf16.mxu1 %v10353_v56  ;;  %v818_v55 = vld [vmem:[#allocation8 + $0x15a0] sm:$0xff]  ;;  %v815_v56 = vld [vmem:[#allocation8 + $0x1588] sm:$0xff] }
 0x1ae   :  { %v10407_v61 = vcombine.high %v814_v54, %v818_v55  ;;  %v10406_v3 = vcombine.low %v814_v54, %v818_v55  ;;  %v10408_v4 = vcombine.low %v815_v56, %v819_v57  ;;  %v862_v47 = vld [vmem:[#allocation8 + $0x1700] sm:$0xff] }
 0x1af   :  { %v866_v48 = vld [vmem:[#allocation8 + $0x1720] sm:$0xff] }
 0x1b0   :  { %5507 = vmatpush1.bf16.msra.mxu0 %v10350_v62  ;;  %5864 = vmatpush1.bf16.msra.mxu1 %v10352_v63  ;;  %v10409_v62 = vcombine.high %v815_v56, %v819_v57  ;;  %v822_v63 = vld [vmem:[#allocation8 + $0x15c0] sm:$0xff]  ;;  %v10455_v54 = vcombine.high %v862_v47, %v866_v48 }
 0x1b1   :  { %5527 = vmatprep.subr.bf16.mxu0 %v10359_v0  ;;  %5884 = vmatprep.subr.bf16.mxu1 %v10361_v2  ;;  %v826_v0 = vld [vmem:[#allocation8 + $0x15e0] sm:$0xff]  ;;  %v827_v2 = vld [vmem:[#allocation8 + $0x15e8] sm:$0xff] }
 0x1b2   :  { %v10415_v6 = vcombine.high %v822_v63, %v826_v0  ;;  %v870_v56 = vld [vmem:[#allocation8 + $0x1740] sm:$0xff] }
 0x1b3   :  { %5509 = vmatmul.mubr.bf16.vlgmr.msra.gmra.mrb[0].mxu0 %v11239_v1  ;;  %5866 = vmatmul.mubr.bf16.vlgmr.msra.gmra.mrb[0].mxu1 %v11239_v1  ;;  %v823_v1 = vld [vmem:[#allocation8 + $0x15c8] sm:$0xff]  ;;  %v874_v57 = vld [vmem:[#allocation8 + $0x1760] sm:$0xff] }
 0x1b4   :  { %5528 = vmatpush1.bf16.msra.mxu0 %v10358_v9  ;;  %5885 = vmatpush1.bf16.msra.mxu1 %v10360_v10  ;;  %v10417_v7 = vcombine.high %v823_v1, %v827_v2  ;;  %v834_v9 = vld [vmem:[#allocation8 + $0x1620] sm:$0xff]  ;;  %v831_v10 = vld [vmem:[#allocation8 + $0x1608] sm:$0xff]  ;;  %v10416_v13 = vcombine.low %v823_v1, %v827_v2 }
 0x1b5   :  { %5529 = vmatprep.subr.bf16.mxu0 %v10367_v11  ;;  %5886 = vmatprep.subr.bf16.mxu1 %v10369_v12  ;;  %v835_v11 = vld [vmem:[#allocation8 + $0x1628] sm:$0xff]  ;;  %v10414_v12 = vcombine.low %v822_v63, %v826_v0  ;;  %v10423_v14 = vcombine.high %v830_v8, %v834_v9  ;;  %v10463_v63 = vcombine.high %v870_v56, %v874_v57  ;;  %v878_v1 = vld [vmem:[#allocation8 + $0x1780] sm:$0xff] }
 0x1b6   :  { %5518 = vmatprep.mubr.bf16.mxu0 %v12005_v15  ;;  %5875 = vmatprep.mubr.bf16.mxu1 %v12005_v15  ;;  %v10425_v16 = vcombine.high %v831_v10, %v835_v11  ;;  %v10424_v23 = vcombine.low %v831_v10, %v835_v11  ;;  %v882_v2 = vld [vmem:[#allocation8 + $0x17a0] sm:$0xff] }
 0x1b7   :  { %v886_v10 = vld [vmem:[#allocation8 + $0x17c0] sm:$0xff] }
 0x1b8   :  { %5530 = vmatpush1.bf16.msra.mxu0 %v10366_v18  ;;  %5887 = vmatpush1.bf16.msra.mxu1 %v10368_v19  ;;  %v842_v18 = vld [vmem:[#allocation8 + $0x1660] sm:$0xff]  ;;  %v839_v19 = vld [vmem:[#allocation8 + $0x1648] sm:$0xff] }
 0x1b9   :  { %5531 = vmatprep.subr.bf16.mxu0 %v10375_v21  ;;  %5888 = vmatprep.subr.bf16.mxu1 %v10377_v22  ;;  %v843_v21 = vld [vmem:[#allocation8 + $0x1668] sm:$0xff]  ;;  %v10422_v22 = vcombine.low %v830_v8, %v834_v9  ;;  %v10431_v24 = vcombine.high %v838_v17, %v842_v18  ;;  %v10471_v8 = vcombine.high %v878_v1, %v882_v2  ;;  %v890_v11 = vld [vmem:[#allocation8 + $0x17e0] sm:$0xff] }
 0x1ba   :  { %v10433_v25 = vcombine.high %v839_v19, %v843_v21  ;;  %v10432_v34 = vcombine.low %v839_v19, %v843_v21  ;;  %v894_v19 = vld [vmem:[#allocation8 + $0x1800] sm:$0xff] }
 0x1bb   :  { %5519 = vmatmul.mubr.bf16.gmra.mrb[4].mxu0 %v12009_v27  ;;  %5876 = vmatmul.mubr.bf16.gmra.mrb[4].mxu1 %v12009_v27  ;;  %v898_v21 = vld [vmem:[#allocation8 + $0x1820] sm:$0xff] }
 0x1bc   :  { %5532 = vmatpush1.bf16.msra.mxu0 %v10374_v28  ;;  %5889 = vmatpush1.bf16.msra.mxu1 %v10376_v31  ;;  %v850_v28 = vld [vmem:[#allocation8 + $0x16a0] sm:$0xff]  ;;  %v847_v31 = vld [vmem:[#allocation8 + $0x1688] sm:$0xff] }
 0x1bd   :  { %5533 = vmatprep.subr.bf16.mxu0 %v10383_v32  ;;  %5890 = vmatprep.subr.bf16.mxu1 %v10385_v33  ;;  %v851_v32 = vld [vmem:[#allocation8 + $0x16a8] sm:$0xff]  ;;  %v10430_v33 = vcombine.low %v838_v17, %v842_v18  ;;  %v10439_v35 = vcombine.high %v846_v26, %v850_v28  ;;  %v10479_v17 = vcombine.high %v886_v10, %v890_v11 }
 0x1be   :  { %5559 = vmatprep.mubr.bf16.mxu0 %v11246_v36  ;;  %5916 = vmatprep.mubr.bf16.mxu1 %v11246_v36  ;;  %v10441_v36 = vcombine.high %v847_v31, %v851_v32 }
 0x1c0   :  { %5534 = vmatpush1.bf16.msra.mxu0 %v10382_v40  ;;  %5891 = vmatpush1.bf16.msra.mxu1 %v10384_v41  ;;  %v855_v40 = vld [vmem:[#allocation8 + $0x16c8] sm:$0xff] }
 0x1c1   :  { %5535 = vmatprep.subr.bf16.mxu0 %v10391_v42  ;;  %5892 = vmatprep.subr.bf16.mxu1 %v10393_v44  ;;  %v859_v41 = vld [vmem:[#allocation8 + $0x16e8] sm:$0xff]  ;;  %v10438_v42 = vcombine.low %v846_v26, %v850_v28  ;;  %v10440_v44 = vcombine.low %v847_v31, %v851_v32  ;;  %v10487_v26 = vcombine.high %v894_v19, %v898_v21  ;;  %v902_v32 = vld [vmem:[#allocation8 + $0x1840] sm:$0xff] }
 0x1c2   :  { %v10449_v46 = vcombine.high %v855_v40, %v859_v41  ;;  %v11244_v28 = vld [vmem:[#allocation6 + $0x28] ss:$52 sps:$4 sm:$0xff]  }
 0x1c4   :  { %5536 = vmatpush1.bf16.msra.mxu0 %v10390_v49  ;;  %5893 = vmatpush1.bf16.msra.mxu1 %v10392_v50  ;;  %v863_v49 = vld [vmem:[#allocation8 + $0x1708] sm:$0xff] }
 0x1c5   :  { %5537 = vmatprep.subr.bf16.mxu0 %v10399_v51  ;;  %5894 = vmatprep.subr.bf16.mxu1 %v10401_v53  ;;  %v867_v50 = vld [vmem:[#allocation8 + $0x1728] sm:$0xff]  ;;  %v10446_v51 = vcombine.low %v854_v37, %v858_v38  ;;  %v10448_v53 = vcombine.low %v855_v40, %v859_v41  ;;  %v10486_v37 = vcombine.low %v894_v19, %v898_v21  ;;  %v946_v19 = vld [vmem:[#allocation8 + $0x19a0] sm:$0xff] }
 0x1c6   :  { %v10457_v55 = vcombine.high %v863_v49, %v867_v50  ;;  %v943_v21 = vld [vmem:[#allocation8 + $0x1988] sm:$0xff] }
 0x1c8   :  { %5538 = vmatpush1.bf16.msra.mxu0 %v10398_v59  ;;  %5895 = vmatpush1.bf16.msra.mxu1 %v10400_v60  ;;  %v871_v59 = vld [vmem:[#allocation8 + $0x1748] sm:$0xff] }
 0x1c9   :  { %5539 = vmatprep.subr.bf16.mxu0 %v10407_v61  ;;  %5896 = vmatprep.subr.bf16.mxu1 %v10409_v62  ;;  %v875_v60 = vld [vmem:[#allocation8 + $0x1768] sm:$0xff]  ;;  %v10454_v61 = vcombine.low %v862_v47, %v866_v48  ;;  %v10456_v62 = vcombine.low %v863_v49, %v867_v50 }
 0x1ca   :  { %v10465_v0 = vcombine.high %v871_v59, %v875_v60  ;;  %v915_v47 = vld [vmem:[#allocation8 + $0x18a8] sm:$0xff] }
 0x1cc   :  { %5540 = vmatpush1.bf16.msra.mxu0 %v10406_v3  ;;  %5897 = vmatpush1.bf16.msra.mxu1 %v10408_v4  ;;  %v879_v3 = vld [vmem:[#allocation8 + $0x1788] sm:$0xff] }
 0x1cd   :  { %5541 = vmatprep.subr.bf16.mxu0 %v10415_v6  ;;  %5898 = vmatprep.subr.bf16.mxu1 %v10417_v7  ;;  %v883_v4 = vld [vmem:[#allocation8 + $0x17a8] sm:$0xff]  ;;  %v10462_v6 = vcombine.low %v870_v56, %v874_v57  ;;  %v10464_v7 = vcombine.low %v871_v59, %v875_v60 }
 0x1ce   :  { %v10473_v9 = vcombine.high %v879_v3, %v883_v4  ;;  %v923_v56 = vld [vmem:[#allocation8 + $0x18e8] sm:$0xff] }
 0x1d0   :  { %5542 = vmatpush1.bf16.msra.mxu0 %v10414_v12  ;;  %5899 = vmatpush1.bf16.msra.mxu1 %v10416_v13  ;;  %v887_v12 = vld [vmem:[#allocation8 + $0x17c8] sm:$0xff] }
 0x1d1   :  { %5543 = vmatprep.subr.bf16.mxu0 %v10423_v14  ;;  %5900 = vmatprep.subr.bf16.mxu1 %v10425_v16  ;;  %v891_v13 = vld [vmem:[#allocation8 + $0x17e8] sm:$0xff]  ;;  %v10470_v14 = vcombine.low %v878_v1, %v882_v2  ;;  %v10472_v16 = vcombine.low %v879_v3, %v883_v4 }
 0x1d2   :  { %v10481_v18 = vcombine.high %v887_v12, %v891_v13  ;;  %v927_v1 = vld [vmem:[#allocation8 + $0x1908] sm:$0xff] }
 0x1d3   :  { %v931_v2 = vld [vmem:[#allocation8 + $0x1928] sm:$0xff] }
 0x1d4   :  { %5544 = vmatpush1.bf16.msra.mxu0 %v10422_v22  ;;  %5901 = vmatpush1.bf16.msra.mxu1 %v10424_v23  ;;  %v895_v22 = vld [vmem:[#allocation8 + $0x1808] sm:$0xff] }
 0x1d5   :  { %5545 = vmatprep.subr.bf16.mxu0 %v10431_v24  ;;  %5902 = vmatprep.subr.bf16.mxu1 %v10433_v25  ;;  %v899_v23 = vld [vmem:[#allocation8 + $0x1828] sm:$0xff]  ;;  %v10478_v24 = vcombine.low %v886_v10, %v890_v11  ;;  %v10480_v25 = vcombine.low %v887_v12, %v891_v13  ;;  %v11858_v10 = vmov 0  }
 0x1d6   :  { %v10489_v31 = vcombine.high %v895_v22, %v899_v23  ;;  %v10488_v38 = vcombine.low %v895_v22, %v899_v23  ;;  %v935_v11 = vld [vmem:[#allocation8 + $0x1948] sm:$0xff] }
 0x1d7   :  { %v939_v12 = vld [vmem:[#allocation8 + $0x1968] sm:$0xff] }
 0x1d8   :  { %5546 = vmatpush1.bf16.msra.mxu0 %v10430_v33  ;;  %5903 = vmatpush1.bf16.msra.mxu1 %v10432_v34  ;;  %v906_v33 = vld [vmem:[#allocation8 + $0x1860] sm:$0xff]  ;;  %v903_v34 = vld [vmem:[#allocation8 + $0x1848] sm:$0xff] }
 0x1d9   :  { %5547 = vmatprep.subr.bf16.mxu0 %v10439_v35  ;;  %5904 = vmatprep.subr.bf16.mxu1 %v10441_v36  ;;  %v907_v35 = vld [vmem:[#allocation8 + $0x1868] sm:$0xff]  ;;  %v124_v36 = vld [vmem:[#allocation6 + $0x90] sm:$0xff]  ;;  %v10495_v40 = vcombine.high %v902_v32, %v906_v33  ;;  %v10494_v48 = vcombine.low %v902_v32, %v906_v33 }
 0x1da   :  { %v10497_v41 = vcombine.high %v903_v34, %v907_v35  ;;  %v10496_v49 = vcombine.low %v903_v34, %v907_v35  ;;  %v12017_v57 = vcombine.low %v124_v36, %v124_v36  ;;  %v947_v22 = vld [vmem:[#allocation8 + $0x19a8] sm:$0xff] }
 0x1db   :  { %v951_v32 = vld [vmem:[#allocation8 + $0x19c8] sm:$0xff]  ;;  %v10536_v35 = vcombine.low %v943_v21, %v947_v22 }
 0x1dc   :  { %5548 = vmatpush1.bf16.msra.mxu0 %v10438_v42  ;;  %5905 = vmatpush1.bf16.msra.mxu1 %v10440_v44  ;;  %v910_v42 = vld [vmem:[#allocation8 + $0x1880] sm:$0xff]  ;;  %v955_v33 = vld [vmem:[#allocation8 + $0x19e8] sm:$0xff] }
 0x1dd   :  { %5549 = vmatprep.subr.bf16.mxu0 %v10447_v45  ;;  %5906 = vmatprep.subr.bf16.mxu1 %v10449_v46  ;;  %v914_v44 = vld [vmem:[#allocation8 + $0x18a0] sm:$0xff]  ;;  %v12013_v45 = vcombine.high %v124_v36, %v124_v36  ;;  %v911_v46 = vld [vmem:[#allocation8 + $0x1888] sm:$0xff] }
 0x1de   :  { %v10503_v50 = vcombine.high %v910_v42, %v914_v44  ;;  %v10502_v59 = vcombine.low %v910_v42, %v914_v44  ;;  %v10504_v60 = vcombine.low %v911_v46, %v915_v47  ;;  %v133_v42 = vld [vmem:[#allocation8 + $0x38] sm:$0xff] }
 0x1e0   :  { %5550 = vmatpush1.bf16.msra.mxu0 %v10446_v51  ;;  %5907 = vmatpush1.bf16.msra.mxu1 %v10448_v53  ;;  %v10505_v51 = vcombine.high %v911_v46, %v915_v47  ;;  %v918_v53 = vld [vmem:[#allocation8 + $0x18c0] sm:$0xff]  ;;  %v10544_v46 = vcombine.low %v951_v32, %v955_v33 }
 0x1e1   :  { %5551 = vmatprep.subr.bf16.mxu0 %v10455_v54  ;;  %5908 = vmatprep.subr.bf16.mxu1 %v10457_v55  ;;  %v922_v54 = vld [vmem:[#allocation8 + $0x18e0] sm:$0xff]  ;;  %v919_v55 = vld [vmem:[#allocation8 + $0x18c8] sm:$0xff] }
 0x1e2   :  { %v10510_v3 = vcombine.low %v918_v53, %v922_v54  ;;  %v10512_v4 = vcombine.low %v919_v55, %v923_v56 }
 0x1e4   :  { %5552 = vmatpush1.bf16.msra.mxu0 %v10454_v61  ;;  %5909 = vmatpush1.bf16.msra.mxu1 %v10456_v62  ;;  %v10511_v61 = vcombine.high %v918_v53, %v922_v54  ;;  %v10513_v62 = vcombine.high %v919_v55, %v923_v56  ;;  %v137_v53 = vld [vmem:[#allocation8 + $0x58] sm:$0xff] }
 0x1e5   :  { %5553 = vmatprep.subr.bf16.mxu0 %v10463_v63  ;;  %5910 = vmatprep.subr.bf16.mxu1 %v10465_v0  ;;  %v926_v63 = vld [vmem:[#allocation8 + $0x1900] sm:$0xff]  ;;  %v141_v54 = vld [vmem:[#allocation8 + $0x78] sm:$0xff] }
 0x1e6   :  { %v930_v0 = vld [vmem:[#allocation8 + $0x1920] sm:$0xff] }
 0x1e7   :  { %v10518_v13 = vcombine.low %v926_v63, %v930_v0 }
 0x1e8   :  { %5554 = vmatpush1.bf16.msra.mxu0 %v10462_v6  ;;  %5911 = vmatpush1.bf16.msra.mxu1 %v10464_v7  ;;  %v10519_v6 = vcombine.high %v926_v63, %v930_v0  ;;  %v10521_v7 = vcombine.high %v927_v1, %v931_v2  ;;  %v145_v63 = vld [vmem:[#allocation8 + $0x98] sm:$0xff] }
 0x1e9   :  { %5555 = vmatprep.subr.bf16.mxu0 %v10471_v8  ;;  %5912 = vmatprep.subr.bf16.mxu1 %v10473_v9  ;;  %v934_v8 = vld [vmem:[#allocation8 + $0x1940] sm:$0xff]  ;;  %v149_v0 = vld [vmem:[#allocation8 + $0xb8] sm:$0xff] }
 0x1ea   :  { %v938_v9 = vld [vmem:[#allocation8 + $0x1960] sm:$0xff] }
 0x1eb   :  { %v10526_v23 = vcombine.low %v934_v8, %v938_v9 }
 0x1ec   :  { %5556 = vmatpush1.bf16.msra.mxu0 %v10470_v14  ;;  %5913 = vmatpush1.bf16.msra.mxu1 %v10472_v16  ;;  %v10520_v14 = vcombine.low %v927_v1, %v931_v2  ;;  %v10527_v16 = vcombine.high %v934_v8, %v938_v9  ;;  %v9732_v2 = vcombine.low %v137_v53, %v141_v54  ;;  %v11250_v8 = vld [vmem:[#allocation6 + $0x98] ss:$0 sps:$4 sm:$0xff]  }
 0x1ed   :  { %5557 = vmatprep.subr.bf16.mxu0 %v10479_v17  ;;  %5914 = vmatprep.subr.bf16.mxu1 %v10481_v18  ;;  %v10529_v17 = vcombine.high %v935_v11, %v939_v12  ;;  %v942_v18 = vld [vmem:[#allocation8 + $0x1980] sm:$0xff]  ;;  %v153_v9 = vld [vmem:[#allocation8 + $0xd8] sm:$0xff] }
 0x1ee   :  { %v10534_v34 = vcombine.low %v942_v18, %v946_v19 }
 0x1f0   :  { %5558 = vmatpush1.bf16.msra.mxu0 %v10478_v24  ;;  %5915 = vmatpush1.bf16.msra.mxu1 %v10480_v25  ;;  %v10528_v24 = vcombine.low %v935_v11, %v939_v12  ;;  %v10535_v25 = vcombine.high %v942_v18, %v946_v19  ;;  %v157_v11 = vld [vmem:[#allocation8 + $0xf8] sm:$0xff]  ;;  %v164_v18 = vld [vmem:[#allocation8 + $0x130] sm:$0xff] }
 0x1f1   :  { %5578 = vmatprep.subr.bf16.mxu0 %v10487_v26  ;;  %5935 = vmatprep.subr.bf16.mxu1 %v10489_v31  ;;  %v10537_v26 = vcombine.high %v943_v21, %v947_v22  ;;  %v954_v31 = vld [vmem:[#allocation8 + $0x19e0] sm:$0xff]  ;;  %v161_v19 = vld [vmem:[#allocation8 + $0x118] sm:$0xff] }
 0x1f2   :  { %v165_v21 = vld [vmem:[#allocation8 + $0x138] sm:$0xff] }
 0x1f3   :  { %5560 = vmatmul.mubr.bf16.vlgmr.msra.gmra.mrb[0].mxu0 %v11244_v28  ;;  %5917 = vmatmul.mubr.bf16.vlgmr.msra.gmra.mrb[0].mxu1 %v11244_v28  ;;  %v950_v28 = vld [vmem:[#allocation8 + $0x19c0] sm:$0xff] }
 0x1f4   :  { %5579 = vmatpush1.bf16.msra.mxu0 %v10486_v37  ;;  %5936 = vmatpush1.bf16.msra.mxu1 %v10488_v38  ;;  %v10543_v36 = vcombine.high %v950_v28, %v954_v31  ;;  %v10545_v37 = vcombine.high %v951_v32, %v955_v33  ;;  %v128_v38 = vld [vmem:[#allocation8 + $0x10] sm:$0xff]  ;;  %v10542_v44 = vcombine.low %v950_v28, %v954_v31  ;;  %v11667_v31 = vld [vmem:[#allocation6 + $0x4] ss:$52 sps:$4 sm:$0xff]  }
 0x1f5   :  { %5580 = vmatprep.subr.bf16.mxu0 %v10495_v40  ;;  %5937 = vmatprep.subr.bf16.mxu1 %v10497_v41  ;;  %v132_v40 = vld [vmem:[#allocation8 + $0x30] sm:$0xff]  ;;  %v129_v41 = vld [vmem:[#allocation8 + $0x18] sm:$0xff] }
 0x1f6   :  { %5569 = vmatprep.mubr.bf16.mxu0 %v12013_v45  ;;  %5926 = vmatprep.mubr.bf16.mxu1 %v12013_v45  ;;  %v9723_v47 = vcombine.high %v128_v38, %v132_v40  ;;  %v9722_v55 = vcombine.low %v128_v38, %v132_v40  ;;  %v9724_v56 = vcombine.low %v129_v41, %v133_v42  ;;  %v172_v28 = vld [vmem:[#allocation8 + $0x170] sm:$0xff]  ;;  %v169_v32 = vld [vmem:[#allocation8 + $0x158] sm:$0xff] }
 0x1f7   :  { %v173_v33 = vld [vmem:[#allocation8 + $0x178] sm:$0xff]  ;;  %v176_v38 = vld [vmem:[#allocation8 + $0x190] sm:$0xff] }
 0x1f8   :  { %5581 = vmatpush1.bf16.msra.mxu0 %v10494_v48  ;;  %5938 = vmatpush1.bf16.msra.mxu1 %v10496_v49  ;;  %v9725_v48 = vcombine.high %v129_v41, %v133_v42  ;;  %v136_v49 = vld [vmem:[#allocation8 + $0x50] sm:$0xff]  ;;  %v177_v41 = vld [vmem:[#allocation8 + $0x198] sm:$0xff] }
 0x1f9   :  { %5582 = vmatprep.subr.bf16.mxu0 %v10503_v50  ;;  %5939 = vmatprep.subr.bf16.mxu1 %v10505_v51  ;;  %v140_v50 = vld [vmem:[#allocation8 + $0x70] sm:$0xff]  ;;  %v181_v42 = vld [vmem:[#allocation8 + $0x1b8] sm:$0xff] }
 0x1fa   :  { %v11249_v51 = vld [vmem:[#allocation6 + $0x30] ss:$52 sps:$4 sm:$0xff]   ;;  %v9730_v1 = vcombine.low %v136_v49, %v140_v50 }
 0x1fb   :  { %5570 = vmatmul.mubr.bf16.gmra.mrb[4].mxu0 %v12017_v57  ;;  %5927 = vmatmul.mubr.bf16.gmra.mrb[4].mxu1 %v12017_v57  ;;  %v180_v40 = vld [vmem:[#allocation8 + $0x1b0] sm:$0xff] }
 0x1fc   :  { %5583 = vmatpush1.bf16.msra.mxu0 %v10502_v59  ;;  %5940 = vmatpush1.bf16.msra.mxu1 %v10504_v60  ;;  %v9731_v59 = vcombine.high %v136_v49, %v140_v50  ;;  %v9733_v60 = vcombine.high %v137_v53, %v141_v54  ;;  %v184_v49 = vld [vmem:[#allocation8 + $0x1d0] sm:$0xff]  ;;  %v189_v53 = vld [vmem:[#allocation8 + $0x1f8] sm:$0xff]  ;;  %v9770_v54 = vcombine.low %v176_v38, %v180_v40 }
 0x1fd   :  { %5584 = vmatprep.subr.bf16.mxu0 %v10511_v61  ;;  %5941 = vmatprep.subr.bf16.mxu1 %v10513_v62  ;;  %v144_v61 = vld [vmem:[#allocation8 + $0x90] sm:$0xff] }
 0x1fe   :  { %5610 = vmatprep.mubr.bf16.mxu0 %v11858_v10  ;;  %5967 = vmatprep.mubr.bf16.mxu1 %v11858_v10  ;;  %v148_v62 = vld [vmem:[#allocation8 + $0xb0] sm:$0xff] }
 0x1ff   :  { %v9738_v12 = vcombine.low %v144_v61, %v148_v62  ;;  %v188_v50 = vld [vmem:[#allocation8 + $0x1f0] sm:$0xff] }
 0x200   :  { %5585 = vmatpush1.bf16.msra.mxu0 %v10510_v3  ;;  %5942 = vmatpush1.bf16.msra.mxu1 %v10512_v4  ;;  %v9739_v3 = vcombine.high %v144_v61, %v148_v62  ;;  %v9741_v4 = vcombine.high %v145_v63, %v149_v0  ;;  %v196_v61 = vld [vmem:[#allocation8 + $0x230] sm:$0xff]  ;;  %v193_v62 = vld [vmem:[#allocation8 + $0x218] sm:$0xff] }
 0x201   :  { %5586 = vmatprep.subr.bf16.mxu0 %v10519_v6  ;;  %5943 = vmatprep.subr.bf16.mxu1 %v10521_v7  ;;  %v152_v6 = vld [vmem:[#allocation8 + $0xd0] sm:$0xff] }
 0x202   :  { %v156_v7 = vld [vmem:[#allocation8 + $0xf0] sm:$0xff] }
 0x203   :  { %v9746_v22 = vcombine.low %v152_v6, %v156_v7 }
 0x204   :  { %5587 = vmatpush1.bf16.msra.mxu0 %v10518_v13  ;;  %5944 = vmatpush1.bf16.msra.mxu1 %v10520_v14  ;;  %v9740_v13 = vcombine.low %v145_v63, %v149_v0  ;;  %v9747_v14 = vcombine.high %v152_v6, %v156_v7  ;;  %v197_v63 = vld [vmem:[#allocation8 + $0x238] sm:$0xff]  ;;  %v9778_v0 = vcombine.low %v184_v49, %v188_v50  ;;  %v204_v6 = vld [vmem:[#allocation8 + $0x270] sm:$0xff] }
 0x205   :  { %5588 = vmatprep.subr.bf16.mxu0 %v10527_v16  ;;  %5945 = vmatprep.subr.bf16.mxu1 %v10529_v17  ;;  %v9749_v16 = vcombine.high %v153_v9, %v157_v11  ;;  %v160_v17 = vld [vmem:[#allocation8 + $0x110] sm:$0xff]  ;;  %v201_v7 = vld [vmem:[#allocation8 + $0x258] sm:$0xff] }
 0x208   :  { %5589 = vmatpush1.bf16.msra.mxu0 %v10526_v23  ;;  %5946 = vmatpush1.bf16.msra.mxu1 %v10528_v24  ;;  %v9748_v23 = vcombine.low %v153_v9, %v157_v11  ;;  %v9755_v24 = vcombine.high %v160_v17, %v164_v18  ;;  %v9788_v11 = vcombine.low %v193_v62, %v197_v63 }
 0x209   :  { %5590 = vmatprep.subr.bf16.mxu0 %v10535_v25  ;;  %5947 = vmatprep.subr.bf16.mxu1 %v10537_v26  ;;  %v9757_v25 = vcombine.high %v161_v19, %v165_v21  ;;  %v168_v26 = vld [vmem:[#allocation8 + $0x150] sm:$0xff] }
 0x20c   :  { %5591 = vmatpush1.bf16.msra.mxu0 %v10534_v34  ;;  %5948 = vmatpush1.bf16.msra.mxu1 %v10536_v35  ;;  %v9754_v34 = vcombine.low %v160_v17, %v164_v18  ;;  %v9756_v35 = vcombine.low %v161_v19, %v165_v21  ;;  %v209_v17 = vld [vmem:[#allocation8 + $0x298] sm:$0xff] }
 0x20d   :  { %5592 = vmatprep.subr.bf16.mxu0 %v10543_v36  ;;  %5949 = vmatprep.subr.bf16.mxu1 %v10545_v37  ;;  %v9763_v36 = vcombine.high %v168_v26, %v172_v28  ;;  %v9765_v37 = vcombine.high %v169_v32, %v173_v33  ;;  %v213_v18 = vld [vmem:[#allocation8 + $0x2b8] sm:$0xff] }
 0x210   :  { %5593 = vmatpush1.bf16.msra.mxu0 %v10542_v44  ;;  %5950 = vmatpush1.bf16.msra.mxu1 %v10544_v46  ;;  %v9762_v44 = vcombine.low %v168_v26, %v172_v28  ;;  %v9764_v46 = vcombine.low %v169_v32, %v173_v33  ;;  %v217_v26 = vld [vmem:[#allocation8 + $0x2d8] sm:$0xff]  ;;  %v9804_v32 = vcombine.low %v209_v17, %v213_v18 }
 0x211   :  { %5986 = vmatprep.subr.bf16.mxu0 %v9723_v47  ;;  %6343 = vmatprep.subr.bf16.mxu1 %v9725_v48  ;;  %v9771_v47 = vcombine.high %v176_v38, %v180_v40  ;;  %v9773_v48 = vcombine.high %v177_v41, %v181_v42  ;;  %v221_v28 = vld [vmem:[#allocation8 + $0x2f8] sm:$0xff] }
 0x212   :  { %v229_v38 = vld [vmem:[#allocation8 + $0x338] sm:$0xff] }
 0x213   :  { %5611 = vmatmul.mubr.bf16.vlgmr.msra.gmra.mrb[0].mxu0 %v11249_v51  ;;  %5968 = vmatmul.mubr.bf16.vlgmr.msra.gmra.mrb[0].mxu1 %v11249_v51  ;;  %v185_v51 = vld [vmem:[#allocation8 + $0x1d8] sm:$0xff] }
 0x214   :  { %5987 = vmatpush1.bf16.msra.mxu0 %v9722_v55  ;;  %6344 = vmatpush1.bf16.msra.mxu1 %v9724_v56  ;;  %v9772_v55 = vcombine.low %v177_v41, %v181_v42  ;;  %v9779_v56 = vcombine.high %v184_v49, %v188_v50  ;;  %v9812_v41 = vcombine.low %v217_v26, %v221_v28  ;;  %v237_v49 = vld [vmem:[#allocation8 + $0x378] sm:$0xff] }
 0x215   :  { %5988 = vmatprep.subr.bf16.mxu0 %v9731_v59  ;;  %6345 = vmatprep.subr.bf16.mxu1 %v9733_v60  ;;  %v9781_v59 = vcombine.high %v185_v51, %v189_v53  ;;  %v192_v60 = vld [vmem:[#allocation8 + $0x210] sm:$0xff] }
 0x216   :  { %5620 = vmatprep.mubr.bf16.mxu0 %v11858_v10  ;;  %5977 = vmatprep.mubr.bf16.mxu1 %v11858_v10  ;;  %v9786_v9 = vcombine.low %v192_v60, %v196_v61 }
 0x218   :  { %5989 = vmatpush1.bf16.msra.mxu0 %v9730_v1  ;;  %6346 = vmatpush1.bf16.msra.mxu1 %v9732_v2  ;;  %v9780_v1 = vcombine.low %v185_v51, %v189_v53  ;;  %v9787_v2 = vcombine.high %v192_v60, %v196_v61  ;;  %v245_v60 = vld [vmem:[#allocation8 + $0x3b8] sm:$0xff] }
 0x219   :  { %5990 = vmatprep.subr.bf16.mxu0 %v9739_v3  ;;  %6347 = vmatprep.subr.bf16.mxu1 %v9741_v4  ;;  %v9789_v3 = vcombine.high %v193_v62, %v197_v63  ;;  %v200_v4 = vld [vmem:[#allocation8 + $0x250] sm:$0xff] }
 0x21a   :  { %v9794_v19 = vcombine.low %v200_v4, %v204_v6 }
 0x21b   :  { %5621 = vmatmul.mubr.bf16.gmra.mrb[4].mxu0 %v11250_v8  ;;  %5978 = vmatmul.mubr.bf16.gmra.mrb[4].mxu1 %v11250_v8  ;;  %v205_v8 = vld [vmem:[#allocation8 + $0x278] sm:$0xff] }
 0x21c   :  { %5991 = vmatpush1.bf16.msra.mxu0 %v9738_v12  ;;  %6348 = vmatpush1.bf16.msra.mxu1 %v9740_v13  ;;  %v9795_v12 = vcombine.high %v200_v4, %v204_v6  ;;  %v9797_v13 = vcombine.high %v201_v7, %v205_v8  ;;  %v9796_v21 = vcombine.low %v201_v7, %v205_v8  ;;  %v253_v4 = vld [vmem:[#allocation8 + $0x3f8] sm:$0xff] }
 0x21d   :  { %5992 = vmatprep.subr.bf16.mxu0 %v9747_v14  ;;  %6349 = vmatprep.subr.bf16.mxu1 %v9749_v16  ;;  %v208_v14 = vld [vmem:[#allocation8 + $0x290] sm:$0xff] }
 0x21e   :  { %6018 = vmatprep.mubr.bf16.mxu0 %v11667_v31  ;;  %6375 = vmatprep.mubr.bf16.mxu1 %v11667_v31  ;;  %v212_v16 = vld [vmem:[#allocation8 + $0x2b0] sm:$0xff] }
 0x21f   :  { %v9802_v31 = vcombine.low %v208_v14, %v212_v16 }
 0x220   :  { %5993 = vmatpush1.bf16.msra.mxu0 %v9746_v22  ;;  %6350 = vmatpush1.bf16.msra.mxu1 %v9748_v23  ;;  %v9803_v22 = vcombine.high %v208_v14, %v212_v16  ;;  %v9805_v23 = vcombine.high %v209_v17, %v213_v18  ;;  %v261_v14 = vld [vmem:[#allocation8 + $0x438] sm:$0xff] }
 0x221   :  { %5994 = vmatprep.subr.bf16.mxu0 %v9755_v24  ;;  %6351 = vmatprep.subr.bf16.mxu1 %v9757_v25  ;;  %v216_v24 = vld [vmem:[#allocation8 + $0x2d0] sm:$0xff] }
 0x222   :  { %v220_v25 = vld [vmem:[#allocation8 + $0x2f0] sm:$0xff] }
 0x223   :  { %v9811_v33 = vcombine.high %v216_v24, %v220_v25  ;;  %v9810_v40 = vcombine.low %v216_v24, %v220_v25  ;;  %v269_v24 = vld [vmem:[#allocation8 + $0x478] sm:$0xff] }
 0x224   :  { %5995 = vmatpush1.bf16.msra.mxu0 %v9754_v34  ;;  %6352 = vmatpush1.bf16.msra.mxu1 %v9756_v35  ;;  %v9813_v34 = vcombine.high %v217_v26, %v221_v28  ;;  %v224_v35 = vld [vmem:[#allocation8 + $0x310] sm:$0xff] }
 0x225   :  { %5996 = vmatprep.subr.bf16.mxu0 %v9763_v36  ;;  %6353 = vmatprep.subr.bf16.mxu1 %v9765_v37  ;;  %v228_v36 = vld [vmem:[#allocation8 + $0x330] sm:$0xff]  ;;  %v225_v37 = vld [vmem:[#allocation8 + $0x318] sm:$0xff] }
 0x226   :  { %v9819_v42 = vcombine.high %v224_v35, %v228_v36  ;;  %v9818_v50 = vcombine.low %v224_v35, %v228_v36  ;;  %v9820_v51 = vcombine.low %v225_v37, %v229_v38  ;;  %v273_v35 = vld [vmem:[#allocation8 + $0x498] sm:$0xff] }
 0x227   :  { %v277_v36 = vld [vmem:[#allocation8 + $0x4b8] sm:$0xff] }
 0x228   :  { %5997 = vmatpush1.bf16.msra.mxu0 %v9762_v44  ;;  %6354 = vmatpush1.bf16.msra.mxu1 %v9764_v46  ;;  %v9821_v44 = vcombine.high %v225_v37, %v229_v38  ;;  %v232_v46 = vld [vmem:[#allocation8 + $0x350] sm:$0xff] }
 0x229   :  { %5998 = vmatprep.subr.bf16.mxu0 %v9771_v47  ;;  %6355 = vmatprep.subr.bf16.mxu1 %v9773_v48  ;;  %v236_v47 = vld [vmem:[#allocation8 + $0x370] sm:$0xff]  ;;  %v233_v48 = vld [vmem:[#allocation8 + $0x358] sm:$0xff] }
 0x22a   :  { %v9827_v53 = vcombine.high %v232_v46, %v236_v47  ;;  %v9826_v61 = vcombine.low %v232_v46, %v236_v47  ;;  %v9828_v62 = vcombine.low %v233_v48, %v237_v49  ;;  %v281_v46 = vld [vmem:[#allocation8 + $0x4d8] sm:$0xff] }
 0x22b   :  { %v285_v47 = vld [vmem:[#allocation8 + $0x4f8] sm:$0xff] }
 0x22c   :  { %5999 = vmatpush1.bf16.msra.mxu0 %v9770_v54  ;;  %6356 = vmatpush1.bf16.msra.mxu1 %v9772_v55  ;;  %v9829_v54 = vcombine.high %v233_v48, %v237_v49  ;;  %v240_v55 = vld [vmem:[#allocation8 + $0x390] sm:$0xff]  ;;  %v9868_v49 = vcombine.low %v273_v35, %v277_v36 }
 0x22d   :  { %6000 = vmatprep.subr.bf16.mxu0 %v9779_v56  ;;  %6357 = vmatprep.subr.bf16.mxu1 %v9781_v59  ;;  %v244_v56 = vld [vmem:[#allocation8 + $0x3b0] sm:$0xff]  ;;  %v241_v59 = vld [vmem:[#allocation8 + $0x398] sm:$0xff] }
 0x22e   :  { %v9835_v63 = vcombine.high %v240_v55, %v244_v56  ;;  %v9834_v6 = vcombine.low %v240_v55, %v244_v56  ;;  %v9836_v7 = vcombine.low %v241_v59, %v245_v60  ;;  %v289_v55 = vld [vmem:[#allocation8 + $0x518] sm:$0xff] }
 0x22f   :  { %v293_v56 = vld [vmem:[#allocation8 + $0x538] sm:$0xff] }
 0x230   :  { %6001 = vmatpush1.bf16.msra.mxu0 %v9778_v0  ;;  %6358 = vmatpush1.bf16.msra.mxu1 %v9780_v1  ;;  %v9837_v0 = vcombine.high %v241_v59, %v245_v60  ;;  %v248_v1 = vld [vmem:[#allocation8 + $0x3d0] sm:$0xff] }
 0x231   :  { %6002 = vmatprep.subr.bf16.mxu0 %v9787_v2  ;;  %6359 = vmatprep.subr.bf16.mxu1 %v9789_v3  ;;  %v252_v2 = vld [vmem:[#allocation8 + $0x3f0] sm:$0xff]  ;;  %v249_v3 = vld [vmem:[#allocation8 + $0x3d8] sm:$0xff] }
 0x232   :  { %v9843_v8 = vcombine.high %v248_v1, %v252_v2  ;;  %v9842_v16 = vcombine.low %v248_v1, %v252_v2  ;;  %v9844_v17 = vcombine.low %v249_v3, %v253_v4  ;;  %v297_v1 = vld [vmem:[#allocation8 + $0x558] sm:$0xff] }
 0x233   :  { %v301_v2 = vld [vmem:[#allocation8 + $0x578] sm:$0xff] }
 0x234   :  { %6003 = vmatpush1.bf16.msra.mxu0 %v9786_v9  ;;  %6360 = vmatpush1.bf16.msra.mxu1 %v9788_v11  ;;  %v9845_v9 = vcombine.high %v249_v3, %v253_v4  ;;  %v256_v11 = vld [vmem:[#allocation8 + $0x410] sm:$0xff]  ;;  %v9884_v4 = vcombine.low %v289_v55, %v293_v56 }
 0x235   :  { %6004 = vmatprep.subr.bf16.mxu0 %v9795_v12  ;;  %6361 = vmatprep.subr.bf16.mxu1 %v9797_v13  ;;  %v260_v12 = vld [vmem:[#allocation8 + $0x430] sm:$0xff]  ;;  %v257_v13 = vld [vmem:[#allocation8 + $0x418] sm:$0xff] }
 0x236   :  { %v9851_v18 = vcombine.high %v256_v11, %v260_v12  ;;  %v9850_v25 = vcombine.low %v256_v11, %v260_v12  ;;  %v9852_v26 = vcombine.low %v257_v13, %v261_v14  ;;  %v309_v11 = vld [vmem:[#allocation8 + $0x5b8] sm:$0xff] }
 0x238   :  { %6005 = vmatpush1.bf16.msra.mxu0 %v9794_v19  ;;  %6362 = vmatpush1.bf16.msra.mxu1 %v9796_v21  ;;  %v9853_v19 = vcombine.high %v257_v13, %v261_v14  ;;  %v264_v21 = vld [vmem:[#allocation8 + $0x450] sm:$0xff]  ;;  %v9892_v13 = vcombine.low %v297_v1, %v301_v2 }
 0x239   :  { %6006 = vmatprep.subr.bf16.mxu0 %v9803_v22  ;;  %6363 = vmatprep.subr.bf16.mxu1 %v9805_v23  ;;  %v268_v22 = vld [vmem:[#allocation8 + $0x470] sm:$0xff]  ;;  %v265_v23 = vld [vmem:[#allocation8 + $0x458] sm:$0xff] }
 0x23a   :  { %v9859_v28 = vcombine.high %v264_v21, %v268_v22  ;;  %v9858_v37 = vcombine.low %v264_v21, %v268_v22  ;;  %v9860_v38 = vcombine.low %v265_v23, %v269_v24  ;;  %v317_v21 = vld [vmem:[#allocation8 + $0x5f8] sm:$0xff] }
 0x23c   :  { %6007 = vmatpush1.bf16.msra.mxu0 %v9802_v31  ;;  %6364 = vmatpush1.bf16.msra.mxu1 %v9804_v32  ;;  %v9861_v31 = vcombine.high %v265_v23, %v269_v24  ;;  %v272_v32 = vld [vmem:[#allocation8 + $0x490] sm:$0xff] }
 0x23d   :  { %6008 = vmatprep.subr.bf16.mxu0 %v9811_v33  ;;  %6365 = vmatprep.subr.bf16.mxu1 %v9813_v34  ;;  %v276_v33 = vld [vmem:[#allocation8 + $0x4b0] sm:$0xff]  ;;  %v11668_v34 = vld [vmem:[#allocation6] ss:$52 sps:$4 sm:$0xff]  }
 0x23e   :  { %v9866_v48 = vcombine.low %v272_v32, %v276_v33 }
 0x240   :  { %6009 = vmatpush1.bf16.msra.mxu0 %v9810_v40  ;;  %6366 = vmatpush1.bf16.msra.mxu1 %v9812_v41  ;;  %v9867_v40 = vcombine.high %v272_v32, %v276_v33  ;;  %v9869_v41 = vcombine.high %v273_v35, %v277_v36  ;;  %v325_v32 = vld [vmem:[#allocation8 + $0x638] sm:$0xff] }
 0x241   :  { %6010 = vmatprep.subr.bf16.mxu0 %v9819_v42  ;;  %6367 = vmatprep.subr.bf16.mxu1 %v9821_v44  ;;  %v280_v42 = vld [vmem:[#allocation8 + $0x4d0] sm:$0xff] }
 0x242   :  { %v284_v44 = vld [vmem:[#allocation8 + $0x4f0] sm:$0xff] }
 0x243   :  { %v9874_v59 = vcombine.low %v280_v42, %v284_v44 }
 0x244   :  { %6011 = vmatpush1.bf16.msra.mxu0 %v9818_v50  ;;  %6368 = vmatpush1.bf16.msra.mxu1 %v9820_v51  ;;  %v9875_v50 = vcombine.high %v280_v42, %v284_v44  ;;  %v9877_v51 = vcombine.high %v281_v46, %v285_v47 }
 0x245   :  { %6012 = vmatprep.subr.bf16.mxu0 %v9827_v53  ;;  %6369 = vmatprep.subr.bf16.mxu1 %v9829_v54  ;;  %v288_v53 = vld [vmem:[#allocation8 + $0x510] sm:$0xff] }
 0x246   :  { %v292_v54 = vld [vmem:[#allocation8 + $0x530] sm:$0xff] }
 0x247   :  { %v9883_v60 = vcombine.high %v288_v53, %v292_v54  ;;  %v9882_v3 = vcombine.low %v288_v53, %v292_v54 }
 0x248   :  { %6013 = vmatpush1.bf16.msra.mxu0 %v9826_v61  ;;  %6370 = vmatpush1.bf16.msra.mxu1 %v9828_v62  ;;  %v9885_v61 = vcombine.high %v289_v55, %v293_v56  ;;  %v296_v62 = vld [vmem:[#allocation8 + $0x550] sm:$0xff] }
 0x249   :  { %6014 = vmatprep.subr.bf16.mxu0 %v9835_v63  ;;  %6371 = vmatprep.subr.bf16.mxu1 %v9837_v0  ;;  %v300_v63 = vld [vmem:[#allocation8 + $0x570] sm:$0xff] }
 0x24a   :  { %v11669_v0 = vld [vmem:[#allocation6 + $0xc] ss:$52 sps:$4 sm:$0xff]   ;;  %v9890_v12 = vcombine.low %v296_v62, %v300_v63 }
 0x24c   :  { %6015 = vmatpush1.bf16.msra.mxu0 %v9834_v6  ;;  %6372 = vmatpush1.bf16.msra.mxu1 %v9836_v7  ;;  %v9891_v6 = vcombine.high %v296_v62, %v300_v63  ;;  %v304_v7 = vld [vmem:[#allocation8 + $0x590] sm:$0xff] }
 0x24d   :  { %6016 = vmatprep.subr.bf16.mxu0 %v9843_v8  ;;  %6373 = vmatprep.subr.bf16.mxu1 %v9845_v9  ;;  %v308_v8 = vld [vmem:[#allocation8 + $0x5b0] sm:$0xff]  ;;  %v305_v9 = vld [vmem:[#allocation8 + $0x598] sm:$0xff] }
 0x24e   :  { %v9899_v14 = vcombine.high %v304_v7, %v308_v8  ;;  %v9898_v22 = vcombine.low %v304_v7, %v308_v8  ;;  %v9900_v23 = vcombine.low %v305_v9, %v309_v11 }
 0x250   :  { %6017 = vmatpush1.bf16.msra.mxu0 %v9842_v16  ;;  %6374 = vmatpush1.bf16.msra.mxu1 %v9844_v17  ;;  %v9901_v16 = vcombine.high %v305_v9, %v309_v11  ;;  %v312_v17 = vld [vmem:[#allocation8 + $0x5d0] sm:$0xff] }
 0x251   :  { %6037 = vmatprep.subr.bf16.mxu0 %v9851_v18  ;;  %6394 = vmatprep.subr.bf16.mxu1 %v9853_v19  ;;  %v316_v18 = vld [vmem:[#allocation8 + $0x5f0] sm:$0xff]  ;;  %v313_v19 = vld [vmem:[#allocation8 + $0x5d8] sm:$0xff] }
 0x252   :  { %v9907_v24 = vcombine.high %v312_v17, %v316_v18  ;;  %v9906_v33 = vcombine.low %v312_v17, %v316_v18  ;;  %v360_v11 = vld [vmem:[#allocation8 + $0x750] sm:$0xff] }
 0x253   :  { %6019 = vmatmul.mubr.bf16.vlgmr.msra.gmra.mrb[8].mxu0 %v11668_v34  ;;  %6376 = vmatmul.mubr.bf16.vlgmr.msra.gmra.mrb[8].mxu1 %v11668_v34  ;;  %v9908_v34 = vcombine.low %v313_v19, %v317_v21 }
 0x254   :  { %6038 = vmatpush1.bf16.msra.mxu0 %v9850_v25  ;;  %6395 = vmatpush1.bf16.msra.mxu1 %v9852_v26  ;;  %v9909_v25 = vcombine.high %v313_v19, %v317_v21  ;;  %v320_v26 = vld [vmem:[#allocation8 + $0x610] sm:$0xff] }
 0x255   :  { %6039 = vmatprep.subr.bf16.mxu0 %v9859_v28  ;;  %6396 = vmatprep.subr.bf16.mxu1 %v9861_v31  ;;  %v324_v28 = vld [vmem:[#allocation8 + $0x630] sm:$0xff]  ;;  %v321_v31 = vld [vmem:[#allocation8 + $0x618] sm:$0xff] }
 0x256   :  { %6028 = vmatprep.mubr.bf16.mxu0 %v11973_v20  ;;  %6385 = vmatprep.mubr.bf16.mxu1 %v11973_v20  ;;  %v9876_v20 = vcombine.low %v281_v46, %v285_v47  ;;  %v9915_v35 = vcombine.high %v320_v26, %v324_v28  ;;  %v9917_v36 = vcombine.high %v321_v31, %v325_v32  ;;  %v368_v21 = vld [vmem:[#allocation8 + $0x790] sm:$0xff] }
 0x257   :  { %v9914_v42 = vcombine.low %v320_v26, %v324_v28  ;;  %v9916_v44 = vcombine.low %v321_v31, %v325_v32  ;;  %v376_v32 = vld [vmem:[#allocation8 + $0x7d0] sm:$0xff] }
 0x258   :  { %6040 = vmatpush1.bf16.msra.mxu0 %v9858_v37  ;;  %6397 = vmatpush1.bf16.msra.mxu1 %v9860_v38  ;;  %v328_v37 = vld [vmem:[#allocation8 + $0x650] sm:$0xff] }
 0x259   :  { %6041 = vmatprep.subr.bf16.mxu0 %v9867_v40  ;;  %6398 = vmatprep.subr.bf16.mxu1 %v9869_v41  ;;  %v332_v38 = vld [vmem:[#allocation8 + $0x670] sm:$0xff]  ;;  %v329_v40 = vld [vmem:[#allocation8 + $0x658] sm:$0xff] }
 0x25a   :  { %v333_v41 = vld [vmem:[#allocation8 + $0x678] sm:$0xff]  ;;  %v9923_v46 = vcombine.high %v328_v37, %v332_v38  ;;  %v9922_v53 = vcombine.low %v328_v37, %v332_v38 }
 0x25b   :  { %6029 = vmatmul.mubr.bf16.gmra.mrb[12].mxu0 %v11977_v30  ;;  %6386 = vmatmul.mubr.bf16.gmra.mrb[12].mxu1 %v11977_v30  ;;  %v9893_v30 = vcombine.high %v297_v1, %v301_v2  ;;  %v9925_v47 = vcombine.high %v329_v40, %v333_v41  ;;  %v9924_v54 = vcombine.low %v329_v40, %v333_v41  ;;  %v352_v2 = vld [vmem:[#allocation8 + $0x710] sm:$0xff] }
 0x25c   :  { %6042 = vmatpush1.bf16.msra.mxu0 %v9866_v48  ;;  %6399 = vmatpush1.bf16.msra.mxu1 %v9868_v49  ;;  %v336_v48 = vld [vmem:[#allocation8 + $0x690] sm:$0xff] }
 0x25d   :  { %6043 = vmatprep.subr.bf16.mxu0 %v9875_v50  ;;  %6400 = vmatprep.subr.bf16.mxu1 %v9877_v51  ;;  %v340_v49 = vld [vmem:[#allocation8 + $0x6b0] sm:$0xff]  ;;  %v337_v50 = vld [vmem:[#allocation8 + $0x698] sm:$0xff] }
 0x25e   :  { %6069 = vmatprep.mubr.bf16.mxu0 %v11669_v0  ;;  %6426 = vmatprep.mubr.bf16.mxu1 %v11669_v0  ;;  %v341_v51 = vld [vmem:[#allocation8 + $0x6b8] sm:$0xff]  ;;  %v9931_v55 = vcombine.high %v336_v48, %v340_v49  ;;  %v9930_v62 = vcombine.low %v336_v48, %v340_v49  ;;  %v384_v41 = vld [vmem:[#allocation8 + $0x810] sm:$0xff] }
 0x25f   :  { %v9933_v56 = vcombine.high %v337_v50, %v341_v51  ;;  %v9932_v63 = vcombine.low %v337_v50, %v341_v51  ;;  %v392_v51 = vld [vmem:[#allocation8 + $0x850] sm:$0xff] }
 0x260   :  { %6044 = vmatpush1.bf16.msra.mxu0 %v9874_v59  ;;  %6401 = vmatpush1.bf16.msra.mxu1 %v9876_v20  ;;  %v344_v59 = vld [vmem:[#allocation8 + $0x6d0] sm:$0xff] }
 0x261   :  { %6045 = vmatprep.subr.bf16.mxu0 %v9883_v60  ;;  %6402 = vmatprep.subr.bf16.mxu1 %v9885_v61  ;;  %v348_v20 = vld [vmem:[#allocation8 + $0x6f0] sm:$0xff]  ;;  %v345_v60 = vld [vmem:[#allocation8 + $0x6d8] sm:$0xff] }
 0x262   :  { %v349_v61 = vld [vmem:[#allocation8 + $0x6f8] sm:$0xff]  ;;  %v9939_v0 = vcombine.high %v344_v59, %v348_v20 }
 0x263   :  { %v9941_v1 = vcombine.high %v345_v60, %v349_v61  ;;  %v9940_v7 = vcombine.low %v345_v60, %v349_v61  ;;  %v400_v61 = vld [vmem:[#allocation8 + $0x890] sm:$0xff] }
 0x264   :  { %6046 = vmatpush1.bf16.msra.mxu0 %v9882_v3  ;;  %6403 = vmatpush1.bf16.msra.mxu1 %v9884_v4  ;;  %v356_v3 = vld [vmem:[#allocation8 + $0x730] sm:$0xff]  ;;  %v353_v4 = vld [vmem:[#allocation8 + $0x718] sm:$0xff] }
 0x265   :  { %6047 = vmatprep.subr.bf16.mxu0 %v9891_v6  ;;  %6404 = vmatprep.subr.bf16.mxu1 %v9893_v30  ;;  %v357_v6 = vld [vmem:[#allocation8 + $0x738] sm:$0xff]  ;;  %v9938_v30 = vcombine.low %v344_v59, %v348_v20  ;;  %v9947_v8 = vcombine.high %v352_v2, %v356_v3 }
 0x266   :  { %v9949_v9 = vcombine.high %v353_v4, %v357_v6  ;;  %v9948_v17 = vcombine.low %v353_v4, %v357_v6 }
 0x268   :  { %6048 = vmatpush1.bf16.msra.mxu0 %v9890_v12  ;;  %6405 = vmatpush1.bf16.msra.mxu1 %v9892_v13  ;;  %v364_v12 = vld [vmem:[#allocation8 + $0x770] sm:$0xff]  ;;  %v361_v13 = vld [vmem:[#allocation8 + $0x758] sm:$0xff] }
 0x269   :  { %6049 = vmatprep.subr.bf16.mxu0 %v9899_v14  ;;  %6406 = vmatprep.subr.bf16.mxu1 %v9901_v16  ;;  %v365_v14 = vld [vmem:[#allocation8 + $0x778] sm:$0xff]  ;;  %v9946_v16 = vcombine.low %v352_v2, %v356_v3  ;;  %v9955_v18 = vcombine.high %v360_v11, %v364_v12 }
 0x26a   :  { %v9957_v19 = vcombine.high %v361_v13, %v365_v14  ;;  %v9956_v26 = vcombine.low %v361_v13, %v365_v14 }
 0x26c   :  { %6050 = vmatpush1.bf16.msra.mxu0 %v9898_v22  ;;  %6407 = vmatpush1.bf16.msra.mxu1 %v9900_v23  ;;  %v372_v22 = vld [vmem:[#allocation8 + $0x7b0] sm:$0xff]  ;;  %v369_v23 = vld [vmem:[#allocation8 + $0x798] sm:$0xff] }
 0x26d   :  { %6051 = vmatprep.subr.bf16.mxu0 %v9907_v24  ;;  %6408 = vmatprep.subr.bf16.mxu1 %v9909_v25  ;;  %v373_v24 = vld [vmem:[#allocation8 + $0x7b8] sm:$0xff]  ;;  %v9954_v25 = vcombine.low %v360_v11, %v364_v12  ;;  %v9963_v28 = vcombine.high %v368_v21, %v372_v22 }
 0x26e   :  { %v9965_v31 = vcombine.high %v369_v23, %v373_v24  ;;  %v9964_v37 = vcombine.low %v369_v23, %v373_v24  ;;  %v424_v24 = vld [vmem:[#allocation8 + $0x950] sm:$0xff] }
 0x270   :  { %6052 = vmatpush1.bf16.msra.mxu0 %v9906_v33  ;;  %6409 = vmatpush1.bf16.msra.mxu1 %v9908_v34  ;;  %v380_v33 = vld [vmem:[#allocation8 + $0x7f0] sm:$0xff]  ;;  %v377_v34 = vld [vmem:[#allocation8 + $0x7d8] sm:$0xff] }
 0x271   :  { %6053 = vmatprep.subr.bf16.mxu0 %v9915_v35  ;;  %6410 = vmatprep.subr.bf16.mxu1 %v9917_v36  ;;  %v381_v35 = vld [vmem:[#allocation8 + $0x7f8] sm:$0xff]  ;;  %v9962_v36 = vcombine.low %v368_v21, %v372_v22  ;;  %v9971_v38 = vcombine.high %v376_v32, %v380_v33 }
 0x272   :  { %v9973_v40 = vcombine.high %v377_v34, %v381_v35  ;;  %v9972_v48 = vcombine.low %v377_v34, %v381_v35  ;;  %v432_v35 = vld [vmem:[#allocation8 + $0x990] sm:$0xff] }
 0x274   :  { %6054 = vmatpush1.bf16.msra.mxu0 %v9914_v42  ;;  %6411 = vmatpush1.bf16.msra.mxu1 %v9916_v44  ;;  %v388_v42 = vld [vmem:[#allocation8 + $0x830] sm:$0xff]  ;;  %v385_v44 = vld [vmem:[#allocation8 + $0x818] sm:$0xff] }
 0x275   :  { %6055 = vmatprep.subr.bf16.mxu0 %v9923_v46  ;;  %6412 = vmatprep.subr.bf16.mxu1 %v9925_v47  ;;  %v389_v46 = vld [vmem:[#allocation8 + $0x838] sm:$0xff]  ;;  %v9970_v47 = vcombine.low %v376_v32, %v380_v33  ;;  %v9979_v49 = vcombine.high %v384_v41, %v388_v42 }
 0x276   :  { %v9981_v50 = vcombine.high %v385_v44, %v389_v46  ;;  %v9980_v59 = vcombine.low %v385_v44, %v389_v46  ;;  %v440_v46 = vld [vmem:[#allocation8 + $0x9d0] sm:$0xff] }
 0x278   :  { %6056 = vmatpush1.bf16.msra.mxu0 %v9922_v53  ;;  %6413 = vmatpush1.bf16.msra.mxu1 %v9924_v54  ;;  %v396_v53 = vld [vmem:[#allocation8 + $0x870] sm:$0xff]  ;;  %v393_v54 = vld [vmem:[#allocation8 + $0x858] sm:$0xff] }
 0x279   :  { %6057 = vmatprep.subr.bf16.mxu0 %v9931_v55  ;;  %6414 = vmatprep.subr.bf16.mxu1 %v9933_v56  ;;  %v397_v55 = vld [vmem:[#allocation8 + $0x878] sm:$0xff]  ;;  %v9978_v56 = vcombine.low %v384_v41, %v388_v42  ;;  %v9987_v20 = vcombine.high %v392_v51, %v396_v53  ;;  %v9986_v2 = vcombine.low %v392_v51, %v396_v53 }
 0x27a   :  { %v9989_v60 = vcombine.high %v393_v54, %v397_v55  ;;  %v9988_v3 = vcombine.low %v393_v54, %v397_v55  ;;  %v448_v55 = vld [vmem:[#allocation8 + $0xa10] sm:$0xff] }
 0x27c   :  { %6058 = vmatpush1.bf16.msra.mxu0 %v9930_v62  ;;  %6415 = vmatpush1.bf16.msra.mxu1 %v9932_v63  ;;  %v404_v62 = vld [vmem:[#allocation8 + $0x8b0] sm:$0xff]  ;;  %v11670_v63 = vld [vmem:[#allocation6 + $0x8] ss:$52 sps:$4 sm:$0xff]  }
 0x27d   :  { %6059 = vmatprep.subr.bf16.mxu0 %v9939_v0  ;;  %6416 = vmatprep.subr.bf16.mxu1 %v9941_v1  ;;  %v401_v0 = vld [vmem:[#allocation8 + $0x898] sm:$0xff]  ;;  %v9995_v4 = vcombine.high %v400_v61, %v404_v62  ;;  %v9994_v11 = vcombine.low %v400_v61, %v404_v62 }
 0x27e   :  { %v405_v1 = vld [vmem:[#allocation8 + $0x8b8] sm:$0xff] }
 0x27f   :  { %v9997_v6 = vcombine.high %v401_v0, %v405_v1  ;;  %v9996_v12 = vcombine.low %v401_v0, %v405_v1  ;;  %v456_v0 = vld [vmem:[#allocation8 + $0xa50] sm:$0xff] }
 0x280   :  { %6060 = vmatpush1.bf16.msra.mxu0 %v9938_v30  ;;  %6417 = vmatpush1.bf16.msra.mxu1 %v9940_v7  ;;  %v408_v30 = vld [vmem:[#allocation8 + $0x8d0] sm:$0xff] }
 0x281   :  { %6061 = vmatprep.subr.bf16.mxu0 %v9947_v8  ;;  %6418 = vmatprep.subr.bf16.mxu1 %v9949_v9  ;;  %v412_v7 = vld [vmem:[#allocation8 + $0x8f0] sm:$0xff]  ;;  %v409_v8 = vld [vmem:[#allocation8 + $0x8d8] sm:$0xff] }
 0x282   :  { %v413_v9 = vld [vmem:[#allocation8 + $0x8f8] sm:$0xff]  ;;  %v10003_v13 = vcombine.high %v408_v30, %v412_v7  ;;  %v10002_v21 = vcombine.low %v408_v30, %v412_v7  ;;  %v460_v1 = vld [vmem:[#allocation8 + $0xa70] sm:$0xff] }
 0x283   :  { %v10005_v14 = vcombine.high %v409_v8, %v413_v9  ;;  %v10051_v30 = vcombine.high %v456_v0, %v460_v1 }
 0x284   :  { %6062 = vmatpush1.bf16.msra.mxu0 %v9946_v16  ;;  %6419 = vmatpush1.bf16.msra.mxu1 %v9948_v17  ;;  %v416_v16 = vld [vmem:[#allocation8 + $0x910] sm:$0xff] }
 0x285   :  { %6063 = vmatprep.subr.bf16.mxu0 %v9955_v18  ;;  %6420 = vmatprep.subr.bf16.mxu1 %v9957_v19  ;;  %v420_v17 = vld [vmem:[#allocation8 + $0x930] sm:$0xff]  ;;  %v417_v18 = vld [vmem:[#allocation8 + $0x918] sm:$0xff] }
 0x286   :  { %v421_v19 = vld [vmem:[#allocation8 + $0x938] sm:$0xff]  ;;  %v10011_v22 = vcombine.high %v416_v16, %v420_v17  ;;  %v10010_v32 = vcombine.low %v416_v16, %v420_v17 }
 0x287   :  { %v10013_v23 = vcombine.high %v417_v18, %v421_v19  ;;  %v10012_v33 = vcombine.low %v417_v18, %v421_v19  ;;  %v472_v18 = vld [vmem:[#allocation8 + $0xad0] sm:$0xff] }
 0x288   :  { %6064 = vmatpush1.bf16.msra.mxu0 %v9954_v25  ;;  %6421 = vmatpush1.bf16.msra.mxu1 %v9956_v26  ;;  %v428_v25 = vld [vmem:[#allocation8 + $0x970] sm:$0xff]  ;;  %v11671_v26 = vld [vmem:[#allocation6 + $0x14] ss:$52 sps:$4 sm:$0xff]  }
 0x289   :  { %6065 = vmatprep.subr.bf16.mxu0 %v9963_v28  ;;  %6422 = vmatprep.subr.bf16.mxu1 %v9965_v31  ;;  %v425_v28 = vld [vmem:[#allocation8 + $0x958] sm:$0xff]  ;;  %v10019_v34 = vcombine.high %v424_v24, %v428_v25  ;;  %v476_v19 = vld [vmem:[#allocation8 + $0xaf0] sm:$0xff] }
 0x28a   :  { %v429_v31 = vld [vmem:[#allocation8 + $0x978] sm:$0xff] }
 0x28b   :  { %v10020_v41 = vcombine.low %v425_v28, %v429_v31 }
 0x28c   :  { %6066 = vmatpush1.bf16.msra.mxu0 %v9962_v36  ;;  %6423 = vmatpush1.bf16.msra.mxu1 %v9964_v37  ;;  %v436_v36 = vld [vmem:[#allocation8 + $0x9b0] sm:$0xff]  ;;  %v433_v37 = vld [vmem:[#allocation8 + $0x998] sm:$0xff] }
 0x28d   :  { %6067 = vmatprep.subr.bf16.mxu0 %v9971_v38  ;;  %6424 = vmatprep.subr.bf16.mxu1 %v9973_v40  ;;  %v437_v38 = vld [vmem:[#allocation8 + $0x9b8] sm:$0xff]  ;;  %v10018_v40 = vcombine.low %v424_v24, %v428_v25  ;;  %v10027_v42 = vcombine.high %v432_v35, %v436_v36  ;;  %v10067_v24 = vcombine.high %v472_v18, %v476_v19 }
 0x28e   :  { %v10029_v44 = vcombine.high %v433_v37, %v437_v38  ;;  %v10028_v51 = vcombine.low %v433_v37, %v437_v38  ;;  %v492_v37 = vld [vmem:[#allocation8 + $0xb70] sm:$0xff]  ;;  %v489_v38 = vld [vmem:[#allocation8 + $0xb58] sm:$0xff] }
 0x290   :  { %6068 = vmatpush1.bf16.msra.mxu0 %v9970_v47  ;;  %6425 = vmatpush1.bf16.msra.mxu1 %v9972_v48  ;;  %v444_v47 = vld [vmem:[#allocation8 + $0x9f0] sm:$0xff]  ;;  %v441_v48 = vld [vmem:[#allocation8 + $0x9d8] sm:$0xff] }
 0x291   :  { %6088 = vmatprep.subr.bf16.mxu0 %v9979_v49  ;;  %6445 = vmatprep.subr.bf16.mxu1 %v9981_v50  ;;  %v445_v49 = vld [vmem:[#allocation8 + $0x9f8] sm:$0xff]  ;;  %v10026_v50 = vcombine.low %v432_v35, %v436_v36  ;;  %v10035_v53 = vcombine.high %v440_v46, %v444_v47  ;;  %v488_v36 = vld [vmem:[#allocation8 + $0xb50] sm:$0xff] }
 0x292   :  { %v10037_v54 = vcombine.high %v441_v48, %v445_v49  ;;  %v10036_v61 = vcombine.low %v441_v48, %v445_v49  ;;  %v500_v48 = vld [vmem:[#allocation8 + $0xbb0] sm:$0xff]  ;;  %v497_v49 = vld [vmem:[#allocation8 + $0xb98] sm:$0xff] }
 0x293   :  { %6070 = vmatmul.mubr.bf16.vlgmr.msra.gmra.mrb[8].mxu0 %v11670_v63  ;;  %6427 = vmatmul.mubr.bf16.vlgmr.msra.gmra.mrb[8].mxu1 %v11670_v63 }
 0x294   :  { %6089 = vmatpush1.bf16.msra.mxu0 %v9978_v56  ;;  %6446 = vmatpush1.bf16.msra.mxu1 %v9980_v59  ;;  %v452_v56 = vld [vmem:[#allocation8 + $0xa30] sm:$0xff]  ;;  %v449_v59 = vld [vmem:[#allocation8 + $0xa18] sm:$0xff] }
 0x295   :  { %6090 = vmatprep.subr.bf16.mxu0 %v9987_v20  ;;  %6447 = vmatprep.subr.bf16.mxu1 %v9989_v60  ;;  %v453_v20 = vld [vmem:[#allocation8 + $0xa38] sm:$0xff]  ;;  %v10034_v60 = vcombine.low %v440_v46, %v444_v47  ;;  %v10043_v62 = vcombine.high %v448_v55, %v452_v56  ;;  %v496_v47 = vld [vmem:[#allocation8 + $0xb90] sm:$0xff] }
 0x296   :  { %6079 = vmatprep.mubr.bf16.mxu0 %v11981_v29  ;;  %6436 = vmatprep.mubr.bf16.mxu1 %v11981_v29  ;;  %v10004_v29 = vcombine.low %v409_v8, %v413_v9  ;;  %v10045_v63 = vcombine.high %v449_v59, %v453_v20  ;;  %v464_v8 = vld [vmem:[#allocation8 + $0xa90] sm:$0xff] }
 0x297   :  { %v468_v9 = vld [vmem:[#allocation8 + $0xab0] sm:$0xff] }
 0x298   :  { %6091 = vmatpush1.bf16.msra.mxu0 %v9986_v2  ;;  %6448 = vmatpush1.bf16.msra.mxu1 %v9988_v3  ;;  %v457_v2 = vld [vmem:[#allocation8 + $0xa58] sm:$0xff]  ;;  %v10059_v16 = vcombine.high %v464_v8, %v468_v9 }
 0x299   :  { %6092 = vmatprep.subr.bf16.mxu0 %v9995_v4  ;;  %6449 = vmatprep.subr.bf16.mxu1 %v9997_v6  ;;  %v461_v3 = vld [vmem:[#allocation8 + $0xa78] sm:$0xff]  ;;  %v10042_v4 = vcombine.low %v448_v55, %v452_v56  ;;  %v10044_v6 = vcombine.low %v449_v59, %v453_v20  ;;  %v504_v56 = vld [vmem:[#allocation8 + $0xbd0] sm:$0xff] }
 0x29a   :  { %v10053_v7 = vcombine.high %v457_v2, %v461_v3  ;;  %v508_v59 = vld [vmem:[#allocation8 + $0xbf0] sm:$0xff]  ;;  %v505_v20 = vld [vmem:[#allocation8 + $0xbd8] sm:$0xff] }
 0x29b   :  { %6080 = vmatmul.mubr.bf16.gmra.mrb[12].mxu0 %v11985_v39  ;;  %6437 = vmatmul.mubr.bf16.gmra.mrb[12].mxu1 %v11985_v39  ;;  %v10021_v39 = vcombine.high %v425_v28, %v429_v31  ;;  %v484_v28 = vld [vmem:[#allocation8 + $0xb30] sm:$0xff]  ;;  %v481_v31 = vld [vmem:[#allocation8 + $0xb18] sm:$0xff] }
 0x29c   :  { %6093 = vmatpush1.bf16.msra.mxu0 %v9994_v11  ;;  %6450 = vmatpush1.bf16.msra.mxu1 %v9996_v12  ;;  %v465_v11 = vld [vmem:[#allocation8 + $0xa98] sm:$0xff] }
 0x29d   :  { %6094 = vmatprep.subr.bf16.mxu0 %v10003_v13  ;;  %6451 = vmatprep.subr.bf16.mxu1 %v10005_v14  ;;  %v469_v12 = vld [vmem:[#allocation8 + $0xab8] sm:$0xff]  ;;  %v10050_v13 = vcombine.low %v456_v0, %v460_v1  ;;  %v10052_v14 = vcombine.low %v457_v2, %v461_v3  ;;  %v512_v1 = vld [vmem:[#allocation8 + $0xc10] sm:$0xff] }
 0x29e   :  { %6120 = vmatprep.mubr.bf16.mxu0 %v11671_v26  ;;  %6477 = vmatprep.mubr.bf16.mxu1 %v11671_v26  ;;  %v10061_v17 = vcombine.high %v465_v11, %v469_v12  ;;  %v480_v26 = vld [vmem:[#allocation8 + $0xb10] sm:$0xff]  ;;  %v513_v3 = vld [vmem:[#allocation8 + $0xc18] sm:$0xff] }
 0x29f   :  { %v516_v2 = vld [vmem:[#allocation8 + $0xc30] sm:$0xff] }
 0x2a0   :  { %6095 = vmatpush1.bf16.msra.mxu0 %v10002_v21  ;;  %6452 = vmatpush1.bf16.msra.mxu1 %v10004_v29  ;;  %v473_v21 = vld [vmem:[#allocation8 + $0xad8] sm:$0xff] }
 0x2a1   :  { %6096 = vmatprep.subr.bf16.mxu0 %v10011_v22  ;;  %6453 = vmatprep.subr.bf16.mxu1 %v10013_v23  ;;  %v477_v29 = vld [vmem:[#allocation8 + $0xaf8] sm:$0xff]  ;;  %v10058_v22 = vcombine.low %v464_v8, %v468_v9  ;;  %v10060_v23 = vcombine.low %v465_v11, %v469_v12  ;;  %v520_v9 = vld [vmem:[#allocation8 + $0xc50] sm:$0xff] }
 0x2a2   :  { %v10069_v25 = vcombine.high %v473_v21, %v477_v29  ;;  %v524_v11 = vld [vmem:[#allocation8 + $0xc70] sm:$0xff]  ;;  %v521_v12 = vld [vmem:[#allocation8 + $0xc58] sm:$0xff] }
 0x2a4   :  { %6097 = vmatpush1.bf16.msra.mxu0 %v10010_v32  ;;  %6454 = vmatpush1.bf16.msra.mxu1 %v10012_v33  ;;  %v485_v32 = vld [vmem:[#allocation8 + $0xb38] sm:$0xff]  ;;  %v10066_v33 = vcombine.low %v472_v18, %v476_v19  ;;  %v528_v19 = vld [vmem:[#allocation8 + $0xc90] sm:$0xff] }
 0x2a5   :  { %6098 = vmatprep.subr.bf16.mxu0 %v10019_v34  ;;  %6455 = vmatprep.subr.bf16.mxu1 %v10021_v39  ;;  %v10068_v34 = vcombine.low %v473_v21, %v477_v29  ;;  %v10075_v39 = vcombine.high %v480_v26, %v484_v28  ;;  %v10077_v35 = vcombine.high %v481_v31, %v485_v32  ;;  %v532_v21 = vld [vmem:[#allocation8 + $0xcb0] sm:$0xff] }
 0x2a6   :  { %v11672_v29 = vld [vmem:[#allocation6 + $0x10] ss:$52 sps:$4 sm:$0xff]  }
 0x2a8   :  { %6099 = vmatpush1.bf16.msra.mxu0 %v10018_v40  ;;  %6456 = vmatpush1.bf16.msra.mxu1 %v10020_v41  ;;  %v493_v40 = vld [vmem:[#allocation8 + $0xb78] sm:$0xff]  ;;  %v10074_v41 = vcombine.low %v480_v26, %v484_v28  ;;  %v10123_v26 = vcombine.high %v528_v19, %v532_v21 }
 0x2a9   :  { %6100 = vmatprep.subr.bf16.mxu0 %v10027_v42  ;;  %6457 = vmatprep.subr.bf16.mxu1 %v10029_v44  ;;  %v10076_v42 = vcombine.low %v481_v31, %v485_v32  ;;  %v10083_v44 = vcombine.high %v488_v36, %v492_v37  ;;  %v10085_v46 = vcombine.high %v489_v38, %v493_v40  ;;  %v536_v31 = vld [vmem:[#allocation8 + $0xcd0] sm:$0xff] }
 0x2aa   :  { %v540_v32 = vld [vmem:[#allocation8 + $0xcf0] sm:$0xff] }
 0x2ac   :  { %6101 = vmatpush1.bf16.msra.mxu0 %v10026_v50  ;;  %6458 = vmatpush1.bf16.msra.mxu1 %v10028_v51  ;;  %v501_v50 = vld [vmem:[#allocation8 + $0xbb8] sm:$0xff]  ;;  %v10082_v51 = vcombine.low %v488_v36, %v492_v37  ;;  %v10131_v37 = vcombine.high %v536_v31, %v540_v32 }
 0x2ad   :  { %6102 = vmatprep.subr.bf16.mxu0 %v10035_v53  ;;  %6459 = vmatprep.subr.bf16.mxu1 %v10037_v54  ;;  %v10084_v53 = vcombine.low %v489_v38, %v493_v40  ;;  %v10091_v54 = vcombine.high %v496_v47, %v500_v48  ;;  %v10093_v55 = vcombine.high %v497_v49, %v501_v50  ;;  %v544_v40 = vld [vmem:[#allocation8 + $0xd10] sm:$0xff] }
 0x2b0   :  { %6103 = vmatpush1.bf16.msra.mxu0 %v10034_v60  ;;  %6460 = vmatpush1.bf16.msra.mxu1 %v10036_v61  ;;  %v509_v60 = vld [vmem:[#allocation8 + $0xbf8] sm:$0xff]  ;;  %v10090_v61 = vcombine.low %v496_v47, %v500_v48  ;;  %v10130_v47 = vcombine.low %v536_v31, %v540_v32 }
 0x2b1   :  { %6104 = vmatprep.subr.bf16.mxu0 %v10043_v62  ;;  %6461 = vmatprep.subr.bf16.mxu1 %v10045_v63  ;;  %v10092_v62 = vcombine.low %v497_v49, %v501_v50  ;;  %v10099_v63 = vcombine.high %v504_v56, %v508_v59  ;;  %v10101_v0 = vcombine.high %v505_v20, %v509_v60  ;;  %v552_v50 = vld [vmem:[#allocation8 + $0xd50] sm:$0xff] }
 0x2b4   :  { %6105 = vmatpush1.bf16.msra.mxu0 %v10042_v4  ;;  %6462 = vmatpush1.bf16.msra.mxu1 %v10044_v6  ;;  %v517_v4 = vld [vmem:[#allocation8 + $0xc38] sm:$0xff]  ;;  %v10098_v6 = vcombine.low %v504_v56, %v508_v59 }
 0x2b5   :  { %6106 = vmatprep.subr.bf16.mxu0 %v10051_v30  ;;  %6463 = vmatprep.subr.bf16.mxu1 %v10053_v7  ;;  %v10100_v30 = vcombine.low %v505_v20, %v509_v60  ;;  %v10107_v7 = vcombine.high %v512_v1, %v516_v2  ;;  %v10109_v8 = vcombine.high %v513_v3, %v517_v4  ;;  %v557_v56 = vld [vmem:[#allocation8 + $0xd78] sm:$0xff]  ;;  %v958_v20 = vld [vmem:[#allocation9] sm:$0xff] }
 0x2b8   :  { %6107 = vmatpush1.bf16.msra.mxu0 %v10050_v13  ;;  %6464 = vmatpush1.bf16.msra.mxu1 %v10052_v14  ;;  %v525_v13 = vld [vmem:[#allocation8 + $0xc78] sm:$0xff]  ;;  %v10106_v14 = vcombine.low %v512_v1, %v516_v2 }
 0x2b9   :  { %6108 = vmatprep.subr.bf16.mxu0 %v10059_v16  ;;  %6465 = vmatprep.subr.bf16.mxu1 %v10061_v17  ;;  %v10108_v16 = vcombine.low %v513_v3, %v517_v4  ;;  %v10115_v17 = vcombine.high %v520_v9, %v524_v11  ;;  %v10117_v18 = vcombine.high %v521_v12, %v525_v13  ;;  %v561_v2 = vld [vmem:[#allocation8 + $0xd98] sm:$0xff] }
 0x2ba   :  { %v565_v3 = vld [vmem:[#allocation8 + $0xdb8] sm:$0xff] }
 0x2bb   :  { %v10156_v32 = vcombine.low %v561_v2, %v565_v3 }
 0x2bc   :  { %6109 = vmatpush1.bf16.msra.mxu0 %v10058_v22  ;;  %6466 = vmatpush1.bf16.msra.mxu1 %v10060_v23  ;;  %v529_v22 = vld [vmem:[#allocation8 + $0xc98] sm:$0xff] }
 0x2bd   :  { %6110 = vmatprep.subr.bf16.mxu0 %v10067_v24  ;;  %6467 = vmatprep.subr.bf16.mxu1 %v10069_v25  ;;  %v533_v23 = vld [vmem:[#allocation8 + $0xcb8] sm:$0xff]  ;;  %v10114_v24 = vcombine.low %v520_v9, %v524_v11  ;;  %v10116_v25 = vcombine.low %v521_v12, %v525_v13  ;;  %v10157_v9 = vcombine.high %v561_v2, %v565_v3  ;;  %v12050_v11 = vld [vmem:[#allocation8 + $0xdd0] sm:$0xff] }
 0x2be   :  { %v10125_v28 = vcombine.high %v529_v22, %v533_v23  ;;  %v10124_v36 = vcombine.low %v529_v22, %v533_v23  ;;  %v12052_v12 = vld [vmem:[#allocation8 + $0xdf0] sm:$0xff] }
 0x2c0   :  { %6111 = vmatpush1.bf16.msra.mxu0 %v10066_v33  ;;  %6468 = vmatpush1.bf16.msra.mxu1 %v10068_v34  ;;  %v537_v33 = vld [vmem:[#allocation8 + $0xcd8] sm:$0xff] }
 0x2c1   :  { %6112 = vmatprep.subr.bf16.mxu0 %v10075_v39  ;;  %6469 = vmatprep.subr.bf16.mxu1 %v10077_v35  ;;  %v541_v34 = vld [vmem:[#allocation8 + $0xcf8] sm:$0xff]  ;;  %v960_v39 = vlaneseq  ;;  %v10122_v35 = vcombine.low %v528_v19, %v532_v21 }
 0x2c2   :  { %v10133_v38 = vcombine.high %v537_v33, %v541_v34  ;;  %v12062_v21 = vld [vmem:[#allocation8 + $0xdd8] sm:$0xff] }
 0x2c4   :  { %6113 = vmatpush1.bf16.msra.mxu0 %v10074_v41  ;;  %6470 = vmatpush1.bf16.msra.mxu1 %v10076_v42  ;;  %v548_v41 = vld [vmem:[#allocation8 + $0xd30] sm:$0xff]  ;;  %v545_v42 = vld [vmem:[#allocation8 + $0xd18] sm:$0xff] }
 0x2c5   :  { %6114 = vmatprep.subr.bf16.mxu0 %v10083_v44  ;;  %6471 = vmatprep.subr.bf16.mxu1 %v10085_v46  ;;  %v549_v44 = vld [vmem:[#allocation8 + $0xd38] sm:$0xff]  ;;  %v12035_v46 = vshrl.u32 %v960_v39, 7  ;;  %v10139_v48 = vcombine.high %v544_v40, %v548_v41  ;;  %v10138_v59 = vcombine.low %v544_v40, %v548_v41 }
 0x2c6   :  { %v10141_v49 = vcombine.high %v545_v42, %v549_v44  ;;  %v10140_v60 = vcombine.low %v545_v42, %v549_v44  ;;  %v581_v40 = vld [vmem:[#allocation8 + $0xe38] sm:$0xff] }
 0x2c7   :  { %v974_v19 = vsub.s32 3, %v12035_v46 }
 0x2c8   :  { %6115 = vmatpush1.bf16.msra.mxu0 %v10082_v51  ;;  %6472 = vmatpush1.bf16.msra.mxu1 %v10084_v53  ;;  %v556_v51 = vld [vmem:[#allocation8 + $0xd70] sm:$0xff] }
 0x2c9   :  { %6116 = vmatprep.subr.bf16.mxu0 %v10091_v54  ;;  %6473 = vmatprep.subr.bf16.mxu1 %v10093_v55  ;;  %v11673_v53 = vld [vmem:[#allocation6 + $0x1c] ss:$52 sps:$4 sm:$0xff]   ;;  %v12040_v54 = vsub.s32 0, %v12035_v46  ;;  %v553_v55 = vld [vmem:[#allocation8 + $0xd58] sm:$0xff]  ;;  %v12083_v42 = vrot.slane %v958_v20, %v974_v19 }
 0x2cb   :  { %v12044_v1 = vrot.slane %v958_v20, %v12040_v54 }
 0x2cc   :  { %6117 = vmatpush1.bf16.msra.mxu0 %v10090_v61  ;;  %6474 = vmatpush1.bf16.msra.mxu1 %v10092_v62  ;;  %v10147_v61 = vcombine.high %v552_v50, %v556_v51  ;;  %v10149_v62 = vcombine.high %v553_v55, %v557_v56 }
 0x2cd   :  { %6118 = vmatprep.subr.bf16.mxu0 %v10099_v63  ;;  %6475 = vmatprep.subr.bf16.mxu1 %v10101_v0  ;;  %v560_v63 = vld [vmem:[#allocation8 + $0xd90] sm:$0xff] }
 0x2ce   :  { %v564_v0 = vld [vmem:[#allocation8 + $0xdb0] sm:$0xff] }
 0x2d0   :  { %6119 = vmatpush1.bf16.msra.mxu0 %v10098_v6  ;;  %6476 = vmatpush1.bf16.msra.mxu1 %v10100_v30  ;;  %v10146_v6 = vcombine.low %v552_v50, %v556_v51  ;;  %v10148_v30 = vcombine.low %v553_v55, %v557_v56  ;;  %v588_v55 = vld [vmem:[#allocation8 + $0xe70] sm:$0xff] }
 0x2d1   :  { %6139 = vmatprep.subr.bf16.mxu0 %v10107_v7  ;;  %6496 = vmatprep.subr.bf16.mxu1 %v10109_v8  ;;  %v10155_v7 = vcombine.high %v560_v63, %v564_v0 }
 0x2d3   :  { %6121 = vmatmul.mubr.bf16.vlgmr.msra.gmra.mrb[8].mxu0 %v11672_v29  ;;  %6478 = vmatmul.mubr.bf16.vlgmr.msra.gmra.mrb[8].mxu1 %v11672_v29  ;;  %v12064_v29 = vld [vmem:[#allocation8 + $0xdf8] sm:$0xff] }
 0x2d4   :  { %6140 = vmatpush1.bf16.msra.mxu0 %v10106_v14  ;;  %6497 = vmatpush1.bf16.msra.mxu1 %v10108_v16  ;;  %v12058_v14 = vstv %s12455_s0  ;;  %s11860_s0 = smov [#allocation14]  }
 0x2d5   :  { %6141 = vmatprep.subr.bf16.mxu0 %v10115_v17  ;;  %6498 = vmatprep.subr.bf16.mxu1 %v10117_v18  ;;  %v966_v17 = vsub.s32 1, %v12035_v46  ;;  %s9680_s25 = sshll.u32 %s11860_s0, 4  ;;  %s9681_s25 = int_to_ptr.vmem [resolvable:$true] %s9680_s25 }
 0x2d6   :  { %6130 = vmatprep.mubr.bf16.mxu0 %v11989_v43  ;;  %6487 = vmatprep.mubr.bf16.mxu1 %v11989_v43  ;;  %v10132_v43 = vcombine.low %v537_v33, %v541_v34  ;;  %v10163_v33 = vcombine.high %v12050_v11, %v12052_v12  ;;  %v12070_v34 = vld [vmem:[#allocation8 + $0xe10] sm:$0xff]  ;;  %s11814_s27 = scalar_lea.vmem %s9681_s25, 128  ;;  %p11819_p7 = scmp.lt.s32.totalorder %s9681_s25, %s9681_s25 }
 0x2d7   :  { %v12079_v41 = vrot.slane %v958_v20, %v966_v17  ;;  %p11815_p6 = scmp.ne.s32.totalorder %s9681_s25, %s11814_s27  ;;  %p11820_p8 = scmp.lt.s32.totalorder %s11814_s27, %s11814_s27 }
 0x2d8   :  { %6142 = vmatpush1.bf16.msra.mxu0 %v10114_v24  ;;  %6499 = vmatpush1.bf16.msra.mxu1 %v10116_v25  ;;  %v10154_v25 = vcombine.low %v560_v63, %v564_v0 }
 0x2d9   :  { %6143 = vmatprep.subr.bf16.mxu0 %v10123_v26  ;;  %6500 = vmatprep.subr.bf16.mxu1 %v10125_v28  ;;  %p11821_p9 = por %p11820_p8, %p11819_p7 }
 0x2db   :  { %6131 = vmatmul.mubr.bf16.gmra.mrb[12].mxu0 %v11993_v52  ;;  %6488 = vmatmul.mubr.bf16.gmra.mrb[12].mxu1 %v11993_v52  ;;  %v970_v52 = vsub.s32 2, %v12035_v46  ;;  %p11822_p10 = pnand %p11821_p9, %p11815_p6 }
 0x2dc   :  { %6144 = vmatpush1.bf16.msra.mxu0 %v10122_v35  ;;  %6501 = vmatpush1.bf16.msra.mxu1 %v10124_v36  ;;  %v10165_v36 = vcombine.high %v12062_v21, %v12064_v29 }
 0x2dd   :  { %6145 = vmatprep.subr.bf16.mxu0 %v10131_v37  ;;  %6502 = vmatprep.subr.bf16.mxu1 %v10133_v38  ;;  %v12048_v4 = vrot.slane %v958_v20, %v970_v52  ;;  %v580_v37 = vld [vmem:[#allocation8 + $0xe30] sm:$0xff]  ;;  %v12075_v38 = vld [vmem:[#allocation8 + $0xe18] sm:$0xff] }
 0x2de   :  { %6171 = vmatprep.mubr.bf16.mxu0 %v11673_v53  ;;  %6528 = vmatprep.mubr.bf16.mxu1 %v11673_v53  ;;  %v10171_v50 = vcombine.high %v12070_v34, %v580_v37  ;;  %v10173_v51 = vcombine.high %v12075_v38, %v581_v40  ;;  %v584_v53 = vld [vmem:[#allocation8 + $0xe50] sm:$0xff]  ;;  %v10170_v3 = vcombine.low %v12070_v34, %v580_v37  ;;  %v597_v34 = vld [vmem:[#allocation8 + $0xeb8] sm:$0xff] }
 0x2e0   :  { %6146 = vmatpush1.bf16.msra.mxu0 %v10130_v47  ;;  %6503 = vmatpush1.bf16.msra.mxu1 %v10132_v43 }
 0x2e1   :  { %6147 = vmatprep.subr.bf16.mxu0 %v10139_v48  ;;  %6504 = vmatprep.subr.bf16.mxu1 %v10141_v49  ;;  %v10162_v48 = vcombine.low %v12050_v11, %v12052_v12  ;;  %v10164_v49 = vcombine.low %v12062_v21, %v12064_v29  ;;  %v10172_v12 = vcombine.low %v12075_v38, %v581_v40  ;;  %v600_v40 = vld [vmem:[#allocation8 + $0xed0] sm:$0xff] }
 0x2e4   :  { %6148 = vmatpush1.bf16.msra.mxu0 %v10138_v59  ;;  %6505 = vmatpush1.bf16.msra.mxu1 %v10140_v60 }
 0x2e5   :  { %6149 = vmatprep.subr.bf16.mxu0 %v10147_v61  ;;  %6506 = vmatprep.subr.bf16.mxu1 %v10149_v62 }
 0x2e6   :  { %v5612_v8 = vpop.f32.mrb[0].mxu0  ;;  %v5969_v16 = vpop.f32.mrb[0].mxu1 }
 0x2e7   :  { %v10927_v13 = vadd.f32 %v5612_v8, %v12044_v1  ;;  %v5614_v18 = vpop.f32.mrb[1].mxu0  ;;  %v10933_v22 = vadd.f32 %v5969_v16, %v12048_v4  ;;  %v5971_v23 = vpop.f32.mrb[1].mxu1 }
 0x2e8   :  { %v5616_v24 = vpop.f32.mrb[2].mxu0  ;;  %6150 = vmatpush1.bf16.msra.mxu0 %v10146_v6  ;;  %v5973_v28 = vpop.f32.mrb[2].mxu1  ;;  %6507 = vmatpush1.bf16.msra.mxu1 %v10148_v30  ;;  %v10928_v61 = vadd.f32 %v5614_v18, %v12079_v41  ;;  %v585_v6 = vld [vmem:[#allocation8 + $0xe58] sm:$0xff]  ;;  %v10934_v16 = vadd.f32 %v5971_v23, %v12083_v42  ;;  %v10178_v23 = vcombine.low %v584_v53, %v588_v55 }
 0x2e9   :  { %v10929_v26 = vadd.f32 %v5616_v24, %v12044_v1  ;;  %v5618_v31 = vpop.f32.mrb[3].mxu0  ;;  %6151 = vmatprep.subr.bf16.mxu0 %v10155_v7  ;;  %v6726_v39 = vmul.f32 %v10927_v13, %v12058_v14  ;;  %v5975_v35 = vpop.f32.mrb[3].mxu1  ;;  %6508 = vmatprep.subr.bf16.mxu1 %v10157_v9  ;;  %vm6701_vm0 = vcmp.ge.f32.partialorder %v10927_v13, 0.0  ;;  %v6728_v44 = vmul.f32 %v10933_v22, %v12058_v14  ;;  %v589_v30 = vld [vmem:[#allocation8 + $0xe78] sm:$0xff] }
 0x2ea   :  { %v10935_v43 = vadd.f32 %v5973_v28, %v12048_v4  ;;  %vm6703_vm2 = vcmp.ge.f32.partialorder %v10933_v22, 0.0  ;;  %v10930_v63 = vadd.f32 %v5618_v31, %v12079_v41  ;;  %v10936_v21 = vadd.f32 %v5975_v35, %v12083_v42  ;;  %v596_v28 = vld [vmem:[#allocation8 + $0xeb0] sm:$0xff] }
 0x2eb   :  { %vm6709_vm1 = vcmp.ge.f32.partialorder %v10929_v26, 0.0  ;;  %v6734_v47 = vmul.f32 %v10929_v26, %v12058_v14  ;;  %v6750_v56 = vsel %vm6701_vm0, %v10927_v13, %v6726_v39  ;;  %v6752_v7 = vsel %vm6703_vm2, %v10933_v22, %v6728_v44  ;;  %v604_v44 = vld [vmem:[#allocation8 + $0xef0] sm:$0xff] }
 0x2ec   :  { %6152 = vmatpush1.bf16.msra.mxu0 %v10154_v25  ;;  %6509 = vmatpush1.bf16.msra.mxu1 %v10156_v32  ;;  %vm6711_vm3 = vcmp.ge.f32.partialorder %v10935_v43, 0.0  ;;  %v6736_v20 = vmul.f32 %v10935_v43, %v12058_v14  ;;  %v10179_v13 = vcombine.high %v584_v53, %v588_v55  ;;  %v10181_v22 = vcombine.high %v585_v6, %v589_v30 }
 0x2ed   :  { %6153 = vmatprep.subr.bf16.mxu0 %v10163_v33  ;;  %v6758_v59 = vsel %vm6709_vm1, %v10929_v26, %v6734_v47  ;;  %6510 = vmatprep.subr.bf16.mxu1 %v10165_v36  ;;  %v592_v26 = vld [vmem:[#allocation8 + $0xe90] sm:$0xff]  ;;  %v6727_v31 = vmul.f32 %v10928_v61, %v12058_v14  ;;  %v6735_v32 = vmul.f32 %v10930_v63, %v12058_v14  ;;  %v593_v33 = vld [vmem:[#allocation8 + $0xe98] sm:$0xff]  ;;  %vm6702_vm4 = vcmp.ge.f32.partialorder %v10928_v61, 0.0 }
 0x2ee   :  { %v12096_v60 = vpop.f32.mrb[4].mxu0  ;;  %v12099_v62 = vpack.c.bf16 %v6758_v59, %v6750_v56  ;;  %v12102_v0 = vpop.f32.mrb[4].mxu1  ;;  %v6760_v8 = vsel %vm6711_vm3, %v10935_v43, %v6736_v20  ;;  %vm6710_vm5 = vcmp.ge.f32.partialorder %v10930_v63, 0.0  ;;  %v10180_v39 = vcombine.low %v585_v6, %v589_v30  ;;  %v601_v47 = vld [vmem:[#allocation8 + $0xed8] sm:$0xff]  ;;  %v612_v6 = vld [vmem:[#allocation8 + $0xf30] sm:$0xff] }
 0x2ef   :  { %v12104_v2 = vpop.f32.mrb[5].mxu0  ;;  %v12108_v9 = vpop.f32.mrb[5].mxu1  ;;  %v12112_v18 = vpack.c.bf16 %v6760_v8, %v6752_v7  ;;  %v6729_v35 = vmul.f32 %v10934_v16, %v12058_v14  ;;  %v6737_v36 = vmul.f32 %v10936_v21, %v12058_v14  ;;  %v10187_v37 = vcombine.high %v592_v26, %v596_v28  ;;  %v605_v43 = vld [vmem:[#allocation8 + $0xef8] sm:$0xff] }
 0x2f0   :  { %v5626_v11 = vpop.f32.mrb[6].mxu0  ;;  %6154 = vmatpush1.bf16.msra.mxu0 %v10162_v48  ;;  %v5983_v29 = vpop.f32.mrb[6].mxu1  ;;  %6511 = vmatpush1.bf16.msra.mxu1 %v10164_v49  ;;  %vm6704_vm6 = vcmp.ge.f32.partialorder %v10934_v16, 0.0  ;;  %vm6712_vm7 = vcmp.ge.f32.partialorder %v10936_v21, 0.0  ;;  %v10189_v38 = vcombine.high %v593_v33, %v597_v34  ;;  %v6751_v48 = vsel %vm6702_vm4, %v10928_v61, %v6727_v31  ;;  %v609_v61 = vld [vmem:[#allocation8 + $0xf18] sm:$0xff]  ;;  %v628_v31 = vld [vmem:[#allocation8 + $0xfb0] sm:$0xff] }
 0x2f1   :  { %v5627_v24 = vpop.f32.mrb[7].mxu0  ;;  %6155 = vmatprep.subr.bf16.mxu0 %v10171_v50  ;;  %v5984_v25 = vpop.f32.mrb[7].mxu1  ;;  %6512 = vmatprep.subr.bf16.mxu1 %v10173_v51  ;;  %v6759_v49 = vsel %vm6710_vm5, %v10930_v63, %v6735_v32  ;;  %v10186_v50 = vcombine.low %v592_v26, %v596_v28  ;;  %v10188_v51 = vcombine.low %v593_v33, %v597_v34  ;;  %v613_v63 = vld [vmem:[#allocation8 + $0xf38] sm:$0xff]  ;;  %v624_v28 = vld [vmem:[#allocation8 + $0xf90] sm:$0xff] }
 0x2f2   :  { %v12121_v53 = vpack.c.bf16 %v6759_v49, %v6751_v48  ;;  %v10195_v55 = vcombine.high %v600_v40, %v604_v44  ;;  %v6753_v56 = vsel %vm6704_vm6, %v10934_v16, %v6729_v35  ;;  %v6761_v59 = vsel %vm6712_vm7, %v10936_v21, %v6737_v36  ;;  %v620_v16 = vld [vmem:[#allocation8 + $0xf70] sm:$0xff]  ;;  %v617_v29 = vld [vmem:[#allocation8 + $0xf58] sm:$0xff] }
 0x2f3   :  { %v10197_v20 = vcombine.high %v601_v47, %v605_v43  ;;  %v12125_v30 = vpack.c.bf16 %v6761_v59, %v6753_v56  ;;  %v10194_v7 = vcombine.low %v600_v40, %v604_v44  ;;  %v10196_v8 = vcombine.low %v601_v47, %v605_v43  ;;  %v621_v21 = vld [vmem:[#allocation8 + $0xf78] sm:$0xff]  ;;  %v632_v36 = vld [vmem:[#allocation8 + $0xfd0] sm:$0xff] }
 0x2f4   :  { %6156 = vmatpush1.bf16.msra.mxu0 %v10170_v3  ;;  %6513 = vmatpush1.bf16.msra.mxu1 %v10172_v12  ;;  %v608_v3 = vld [vmem:[#allocation8 + $0xf10] sm:$0xff]  ;;  %v10205_v12 = vcombine.high %v609_v61, %v613_v63  ;;  %v10204_v25 = vcombine.low %v609_v61, %v613_v63  ;;  %v10213_v26 = vcombine.high %v617_v29, %v621_v21  ;;  %v625_v32 = vld [vmem:[#allocation8 + $0xf98] sm:$0xff] }
 0x2f5   :  { %6157 = vmatprep.subr.bf16.mxu0 %v10179_v13  ;;  %6514 = vmatprep.subr.bf16.mxu1 %v10181_v22  ;;  %v10203_v11 = vcombine.high %v608_v3, %v612_v6  ;;  %v616_v13 = vld [vmem:[#allocation8 + $0xf50] sm:$0xff]  ;;  %v10202_v24 = vcombine.low %v608_v3, %v612_v6  ;;  %v629_v33 = vld [vmem:[#allocation8 + $0xfb8] sm:$0xff]  ;;  %v10218_v44 = vcombine.low %v624_v28, %v628_v31 }
 0x2f6   :  { %v10211_v22 = vcombine.high %v616_v13, %v620_v16  ;;  %v10210_v34 = vcombine.low %v616_v13, %v620_v16  ;;  %v10221_v35 = vcombine.high %v625_v32, %v629_v33  ;;  %v637_v40 = vld [vmem:[#allocation8 + $0xff8] sm:$0xff]  ;;  %v10220_v47 = vcombine.low %v625_v32, %v629_v33  ;;  %v640_v49 = vld [vmem:[#allocation8 + $0x1010] sm:$0xff] }
 0x2f7   :  { %v648_v6 = vld [vmem:[#allocation8 + $0x1050] sm:$0xff]  ;;  %v649_v63 = vld [vmem:[#allocation8 + $0x1058] sm:$0xff] }
 0x2f8   :  { %6158 = vmatpush1.bf16.msra.mxu0 %v10178_v23  ;;  %6515 = vmatpush1.bf16.msra.mxu1 %v10180_v39  ;;  %v10212_v23 = vcombine.low %v617_v29, %v621_v21  ;;  %v10219_v39 = vcombine.high %v624_v28, %v628_v31  ;;  %v652_v61 = vld [vmem:[#allocation8 + $0x1070] sm:$0xff] }
 0x2f9   :  { %6159 = vmatprep.subr.bf16.mxu0 %v10187_v37  ;;  %6516 = vmatprep.subr.bf16.mxu1 %v10189_v38  ;;  %v636_v37 = vld [vmem:[#allocation8 + $0xff0] sm:$0xff]  ;;  %v633_v38 = vld [vmem:[#allocation8 + $0xfd8] sm:$0xff] }
 0x2fa   :  { %v10227_v43 = vcombine.high %v632_v36, %v636_v37  ;;  %v10229_v48 = vcombine.high %v633_v38, %v637_v40  ;;  %v10226_v56 = vcombine.low %v632_v36, %v636_v37  ;;  %v10228_v59 = vcombine.low %v633_v38, %v637_v40  ;;  %v656_v16 = vld [vmem:[#allocation8 + $0x1090] sm:$0xff] }
 0x2fb   :  { %v660_v29 = vld [vmem:[#allocation8 + $0x10b0] sm:$0xff] }
 0x2fc   :  { %6160 = vmatpush1.bf16.msra.mxu0 %v10186_v50  ;;  %6517 = vmatpush1.bf16.msra.mxu1 %v10188_v51  ;;  %v644_v50 = vld [vmem:[#allocation8 + $0x1030] sm:$0xff]  ;;  %v641_v51 = vld [vmem:[#allocation8 + $0x1018] sm:$0xff]  ;;  %v10251_v28 = vcombine.high %v656_v16, %v660_v29 }
 0x2fd   :  { %6161 = vmatprep.subr.bf16.mxu0 %v10195_v55  ;;  %6518 = vmatprep.subr.bf16.mxu1 %v10197_v20  ;;  %v645_v55 = vld [vmem:[#allocation8 + $0x1038] sm:$0xff]  ;;  %v10235_v20 = vcombine.high %v640_v49, %v644_v50  ;;  %v664_v32 = vld [vmem:[#allocation8 + $0x10d0] sm:$0xff] }
 0x2fe   :  { %v10237_v3 = vcombine.high %v641_v51, %v645_v55  ;;  %v11674_v21 = vld [vmem:[#allocation6 + $0x18] ss:$52 sps:$4 sm:$0xff]  }
 0x2ff   :  { %v668_v33 = vld [vmem:[#allocation8 + $0x10f0] sm:$0xff] }
 0x300   :  { %6162 = vmatpush1.bf16.msra.mxu0 %v10194_v7  ;;  %6519 = vmatpush1.bf16.msra.mxu1 %v10196_v8  ;;  %v653_v7 = vld [vmem:[#allocation8 + $0x1078] sm:$0xff]  ;;  %v10234_v8 = vcombine.low %v640_v49, %v644_v50  ;;  %v10259_v36 = vcombine.high %v664_v32, %v668_v33  ;;  %v672_v38 = vld [vmem:[#allocation8 + $0x1110] sm:$0xff] }
 0x301   :  { %6163 = vmatprep.subr.bf16.mxu0 %v10203_v11  ;;  %6520 = vmatprep.subr.bf16.mxu1 %v10205_v12  ;;  %v10236_v11 = vcombine.low %v641_v51, %v645_v55  ;;  %v10243_v12 = vcombine.high %v648_v6, %v652_v61  ;;  %v10245_v13 = vcombine.high %v649_v63, %v653_v7  ;;  %v676_v40 = vld [vmem:[#allocation8 + $0x1130] sm:$0xff]  ;;  %v11675_v55 = vld [vmem:[#allocation6 + $0x24] ss:$52 sps:$4 sm:$0xff]  }
 0x302   :  { %v680_v50 = vld [vmem:[#allocation8 + $0x1150] sm:$0xff] }
 0x303   :  { %v684_v51 = vld [vmem:[#allocation8 + $0x1170] sm:$0xff] }
 0x304   :  { %6164 = vmatpush1.bf16.msra.mxu0 %v10202_v24  ;;  %6521 = vmatpush1.bf16.msra.mxu1 %v10204_v25  ;;  %v657_v24 = vld [vmem:[#allocation8 + $0x1098] sm:$0xff] }
 0x305   :  { %6165 = vmatprep.subr.bf16.mxu0 %v10211_v22  ;;  %6522 = vmatprep.subr.bf16.mxu1 %v10213_v26  ;;  %v661_v25 = vld [vmem:[#allocation8 + $0x10b8] sm:$0xff]  ;;  %v10242_v22 = vcombine.low %v648_v6, %v652_v61  ;;  %v10244_v26 = vcombine.low %v649_v63, %v653_v7  ;;  %v10275_v6 = vcombine.high %v680_v50, %v684_v51  ;;  %v688_v61 = vld [vmem:[#allocation8 + $0x1190] sm:$0xff] }
 0x306   :  { %v10253_v31 = vcombine.high %v657_v24, %v661_v25  ;;  %v692_v63 = vld [vmem:[#allocation8 + $0x11b0] sm:$0xff]  ;;  %v689_v7 = vld [vmem:[#allocation8 + $0x1198] sm:$0xff] }
 0x308   :  { %6166 = vmatpush1.bf16.msra.mxu0 %v10210_v34  ;;  %6523 = vmatpush1.bf16.msra.mxu1 %v10212_v23  ;;  %v665_v34 = vld [vmem:[#allocation8 + $0x10d8] sm:$0xff] }
 0x309   :  { %6167 = vmatprep.subr.bf16.mxu0 %v10219_v39  ;;  %6524 = vmatprep.subr.bf16.mxu1 %v10221_v35  ;;  %v669_v23 = vld [vmem:[#allocation8 + $0x10f8] sm:$0xff]  ;;  %v10250_v39 = vcombine.low %v656_v16, %v660_v29  ;;  %v10252_v35 = vcombine.low %v657_v24, %v661_v25  ;;  %v696_v29 = vld [vmem:[#allocation8 + $0x11d0] sm:$0xff] }
 0x30a   :  { %v10261_v37 = vcombine.high %v665_v34, %v669_v23  ;;  %v697_v24 = vld [vmem:[#allocation8 + $0x11d8] sm:$0xff] }
 0x30b   :  { %v701_v25 = vld [vmem:[#allocation8 + $0x11f8] sm:$0xff] }
 0x30c   :  { %6168 = vmatpush1.bf16.msra.mxu0 %v10218_v44  ;;  %6525 = vmatpush1.bf16.msra.mxu1 %v10220_v47  ;;  %v673_v44 = vld [vmem:[#allocation8 + $0x1118] sm:$0xff] }
 0x30d   :  { %6169 = vmatprep.subr.bf16.mxu0 %v10227_v43  ;;  %6526 = vmatprep.subr.bf16.mxu1 %v10229_v48  ;;  %v677_v47 = vld [vmem:[#allocation8 + $0x1138] sm:$0xff]  ;;  %v10258_v43 = vcombine.low %v664_v32, %v668_v33  ;;  %v10267_v48 = vcombine.high %v672_v38, %v676_v40  ;;  %v704_v32 = vld [vmem:[#allocation8 + $0x1210] sm:$0xff] }
 0x30e   :  { %v10269_v49 = vcombine.high %v673_v44, %v677_v47  ;;  %v708_v33 = vld [vmem:[#allocation8 + $0x1230] sm:$0xff] }
 0x310   :  { %6170 = vmatpush1.bf16.msra.mxu0 %v10226_v56  ;;  %6527 = vmatpush1.bf16.msra.mxu1 %v10228_v59  ;;  %v681_v56 = vld [vmem:[#allocation8 + $0x1158] sm:$0xff] }
 0x311   :  { %6190 = vmatprep.subr.bf16.mxu0 %v10235_v20  ;;  %6547 = vmatprep.subr.bf16.mxu1 %v10237_v3  ;;  %v685_v59 = vld [vmem:[#allocation8 + $0x1178] sm:$0xff]  ;;  %v10266_v20 = vcombine.low %v672_v38, %v676_v40  ;;  %v10268_v3 = vcombine.low %v673_v44, %v677_v47  ;;  %v712_v38 = vld [vmem:[#allocation8 + $0x1250] sm:$0xff] }
 0x312   :  { %v716_v40 = vld [vmem:[#allocation8 + $0x1270] sm:$0xff]  ;;  %v713_v44 = vld [vmem:[#allocation8 + $0x1258] sm:$0xff] }
 0x313   :  { %6172 = vmatmul.mubr.bf16.vlgmr.msra.gmra.mrb[8].mxu0 %v11674_v21  ;;  %6529 = vmatmul.mubr.bf16.vlgmr.msra.gmra.mrb[8].mxu1 %v11674_v21  ;;  %v700_v21 = vld [vmem:[#allocation8 + $0x11f0] sm:$0xff]  ;;  %v717_v47 = vld [vmem:[#allocation8 + $0x1278] sm:$0xff] }
 0x314   :  { %6191 = vmatpush1.bf16.msra.mxu0 %v10234_v8  ;;  %6548 = vmatpush1.bf16.msra.mxu1 %v10236_v11  ;;  %v693_v8 = vld [vmem:[#allocation8 + $0x11b8] sm:$0xff]  ;;  %v10274_v11 = vcombine.low %v680_v50, %v684_v51  ;;  %v720_v50 = vld [vmem:[#allocation8 + $0x1290] sm:$0xff] }
 0x315   :  { %6192 = vmatprep.subr.bf16.mxu0 %v10243_v12  ;;  %6549 = vmatprep.subr.bf16.mxu1 %v10245_v13  ;;  %v10276_v12 = vcombine.low %v681_v56, %v685_v59  ;;  %v10283_v13 = vcombine.high %v688_v61, %v692_v63  ;;  %v10285_v16 = vcombine.high %v689_v7, %v693_v8  ;;  %v724_v51 = vld [vmem:[#allocation8 + $0x12b0] sm:$0xff] }
 0x316   :  { %6181 = vmatprep.mubr.bf16.mxu0 %v11997_v58  ;;  %6538 = vmatprep.mubr.bf16.mxu1 %v11997_v58  ;;  %v10260_v58 = vcombine.low %v665_v34, %v669_v23  ;;  %v705_v34 = vld [vmem:[#allocation8 + $0x1218] sm:$0xff] }
 0x317   :  { %v709_v23 = vld [vmem:[#allocation8 + $0x1238] sm:$0xff] }
 0x318   :  { %6193 = vmatpush1.bf16.msra.mxu0 %v10242_v22  ;;  %6550 = vmatpush1.bf16.msra.mxu1 %v10244_v26  ;;  %v10282_v22 = vcombine.low %v688_v61, %v692_v63  ;;  %v10284_v26 = vcombine.low %v689_v7, %v693_v8  ;;  %v732_v61 = vld [vmem:[#allocation8 + $0x12f0] sm:$0xff]  ;;  %v729_v63 = vld [vmem:[#allocation8 + $0x12d8] sm:$0xff]  ;;  %v10314_v8 = vcombine.low %v720_v50, %v724_v51 }
 0x319   :  { %6194 = vmatprep.subr.bf16.mxu0 %v10251_v28  ;;  %6551 = vmatprep.subr.bf16.mxu1 %v10253_v31  ;;  %v10291_v28 = vcombine.high %v696_v29, %v700_v21  ;;  %v10293_v31 = vcombine.high %v697_v24, %v701_v25  ;;  %v733_v7 = vld [vmem:[#allocation8 + $0x12f8] sm:$0xff] }
 0x31b   :  { %6182 = vmatmul.mubr.bf16.gmra.mrb[12].mxu0 %v12001_v5  ;;  %6539 = vmatmul.mubr.bf16.gmra.mrb[12].mxu1 %v12001_v5  ;;  %v10277_v5 = vcombine.high %v681_v56, %v685_v59  ;;  %v725_v56 = vld [vmem:[#allocation8 + $0x12b8] sm:$0xff]  ;;  %v10306_v59 = vcombine.low %v712_v38, %v716_v40 }
 0x31c   :  { %6195 = vmatpush1.bf16.msra.mxu0 %v10250_v39  ;;  %6552 = vmatpush1.bf16.msra.mxu1 %v10252_v35  ;;  %v10290_v39 = vcombine.low %v696_v29, %v700_v21  ;;  %v10292_v35 = vcombine.low %v697_v24, %v701_v25  ;;  %v740_v29 = vld [vmem:[#allocation8 + $0x1330] sm:$0xff]  ;;  %v737_v21 = vld [vmem:[#allocation8 + $0x1318] sm:$0xff] }
 0x31d   :  { %6196 = vmatprep.subr.bf16.mxu0 %v10259_v36  ;;  %6553 = vmatprep.subr.bf16.mxu1 %v10261_v37  ;;  %v10299_v36 = vcombine.high %v704_v32, %v708_v33  ;;  %v10301_v37 = vcombine.high %v705_v34, %v709_v23  ;;  %v741_v24 = vld [vmem:[#allocation8 + $0x1338] sm:$0xff] }
 0x31e   :  { %6222 = vmatprep.mubr.bf16.mxu0 %v11675_v55  ;;  %6579 = vmatprep.mubr.bf16.mxu1 %v11675_v55  ;;  %v721_v55 = vld [vmem:[#allocation8 + $0x1298] sm:$0xff] }
 0x320   :  { %6197 = vmatpush1.bf16.msra.mxu0 %v10258_v43  ;;  %6554 = vmatpush1.bf16.msra.mxu1 %v10260_v58  ;;  %v10298_v43 = vcombine.low %v704_v32, %v708_v33  ;;  %v10300_v58 = vcombine.low %v705_v34, %v709_v23  ;;  %v748_v32 = vld [vmem:[#allocation8 + $0x1370] sm:$0xff]  ;;  %v745_v33 = vld [vmem:[#allocation8 + $0x1358] sm:$0xff] }
 0x321   :  { %6198 = vmatprep.subr.bf16.mxu0 %v10267_v48  ;;  %6555 = vmatprep.subr.bf16.mxu1 %v10269_v49  ;;  %v10307_v48 = vcombine.high %v712_v38, %v716_v40  ;;  %v10309_v49 = vcombine.high %v713_v44, %v717_v47  ;;  %v749_v34 = vld [vmem:[#allocation8 + $0x1378] sm:$0xff]  ;;  %v756_v38 = vld [vmem:[#allocation8 + $0x13b0] sm:$0xff] }
 0x322   :  { %v753_v40 = vld [vmem:[#allocation8 + $0x1398] sm:$0xff] }
 0x324   :  { %6199 = vmatpush1.bf16.msra.mxu0 %v10266_v20  ;;  %6556 = vmatpush1.bf16.msra.mxu1 %v10268_v3  ;;  %v10308_v20 = vcombine.low %v713_v44, %v717_v47  ;;  %v10315_v3 = vcombine.high %v720_v50, %v724_v51  ;;  %v757_v44 = vld [vmem:[#allocation8 + $0x13b8] sm:$0xff]  ;;  %v764_v50 = vld [vmem:[#allocation8 + $0x13f0] sm:$0xff] }
 0x325   :  { %6200 = vmatprep.subr.bf16.mxu0 %v10275_v6  ;;  %6557 = vmatprep.subr.bf16.mxu1 %v10277_v5  ;;  %v10317_v6 = vcombine.high %v721_v55, %v725_v56  ;;  %v728_v5 = vld [vmem:[#allocation8 + $0x12d0] sm:$0xff]  ;;  %v761_v51 = vld [vmem:[#allocation8 + $0x13d8] sm:$0xff] }
 0x326   :  { %v10322_v25 = vcombine.low %v728_v5, %v732_v61 }
 0x328   :  { %6201 = vmatpush1.bf16.msra.mxu0 %v10274_v11  ;;  %6558 = vmatpush1.bf16.msra.mxu1 %v10276_v12  ;;  %v10316_v11 = vcombine.low %v721_v55, %v725_v56  ;;  %v10323_v12 = vcombine.high %v728_v5, %v732_v61  ;;  %v765_v55 = vld [vmem:[#allocation8 + $0x13f8] sm:$0xff]  ;;  %v772_v5 = vld [vmem:[#allocation8 + $0x1430] sm:$0xff] }
 0x329   :  { %6202 = vmatprep.subr.bf16.mxu0 %v10283_v13  ;;  %6559 = vmatprep.subr.bf16.mxu1 %v10285_v16  ;;  %v10325_v13 = vcombine.high %v729_v63, %v733_v7  ;;  %v736_v16 = vld [vmem:[#allocation8 + $0x1310] sm:$0xff]  ;;  %v769_v61 = vld [vmem:[#allocation8 + $0x1418] sm:$0xff] }
 0x32a   :  { %v10330_v23 = vcombine.low %v736_v16, %v740_v29 }
 0x32c   :  { %6203 = vmatpush1.bf16.msra.mxu0 %v10282_v22  ;;  %6560 = vmatpush1.bf16.msra.mxu1 %v10284_v26  ;;  %v10324_v22 = vcombine.low %v729_v63, %v733_v7  ;;  %v10331_v26 = vcombine.high %v736_v16, %v740_v29  ;;  %v773_v63 = vld [vmem:[#allocation8 + $0x1438] sm:$0xff]  ;;  %v780_v16 = vld [vmem:[#allocation8 + $0x1470] sm:$0xff] }
 0x32d   :  { %6204 = vmatprep.subr.bf16.mxu0 %v10291_v28  ;;  %6561 = vmatprep.subr.bf16.mxu1 %v10293_v31  ;;  %v10333_v28 = vcombine.high %v737_v21, %v741_v24  ;;  %v744_v31 = vld [vmem:[#allocation8 + $0x1350] sm:$0xff]  ;;  %v777_v29 = vld [vmem:[#allocation8 + $0x1458] sm:$0xff] }
 0x32e   :  { %v10338_v47 = vcombine.low %v744_v31, %v748_v32 }
 0x330   :  { %6205 = vmatpush1.bf16.msra.mxu0 %v10290_v39  ;;  %6562 = vmatpush1.bf16.msra.mxu1 %v10292_v35  ;;  %v10332_v39 = vcombine.low %v737_v21, %v741_v24  ;;  %v10339_v35 = vcombine.high %v744_v31, %v748_v32  ;;  %v781_v21 = vld [vmem:[#allocation8 + $0x1478] sm:$0xff]  ;;  %v788_v31 = vld [vmem:[#allocation8 + $0x14b0] sm:$0xff] }
 0x331   :  { %6206 = vmatprep.subr.bf16.mxu0 %v10299_v36  ;;  %6563 = vmatprep.subr.bf16.mxu1 %v10301_v37  ;;  %v10341_v36 = vcombine.high %v745_v33, %v749_v34  ;;  %v752_v37 = vld [vmem:[#allocation8 + $0x1390] sm:$0xff]  ;;  %v11676_v32 = vld [vmem:[#allocation6 + $0x20] ss:$52 sps:$4 sm:$0xff]  }
 0x332   :  { %v10346_v56 = vcombine.low %v752_v37, %v756_v38 }
 0x334   :  { %6207 = vmatpush1.bf16.msra.mxu0 %v10298_v43  ;;  %6564 = vmatpush1.bf16.msra.mxu1 %v10300_v58  ;;  %v10340_v43 = vcombine.low %v745_v33, %v749_v34  ;;  %v10347_v58 = vcombine.high %v752_v37, %v756_v38  ;;  %v785_v33 = vld [vmem:[#allocation8 + $0x1498] sm:$0xff]  ;;  %v792_v37 = vld [vmem:[#allocation8 + $0x14d0] sm:$0xff] }
 0x335   :  { %6208 = vmatprep.subr.bf16.mxu0 %v10307_v48  ;;  %6565 = vmatprep.subr.bf16.mxu1 %v10309_v49  ;;  %v10349_v48 = vcombine.high %v753_v40, %v757_v44  ;;  %v760_v49 = vld [vmem:[#allocation8 + $0x13d0] sm:$0xff]  ;;  %v789_v34 = vld [vmem:[#allocation8 + $0x14b8] sm:$0xff] }
 0x336   :  { %v10354_v7 = vcombine.low %v760_v49, %v764_v50  ;;  %v796_v38 = vld [vmem:[#allocation8 + $0x14f0] sm:$0xff] }
 0x338   :  { %6209 = vmatpush1.bf16.msra.mxu0 %v10306_v59  ;;  %6566 = vmatpush1.bf16.msra.mxu1 %v10308_v20  ;;  %v10348_v59 = vcombine.low %v753_v40, %v757_v44  ;;  %v10355_v20 = vcombine.high %v760_v49, %v764_v50  ;;  %v793_v40 = vld [vmem:[#allocation8 + $0x14d8] sm:$0xff]  ;;  %v800_v49 = vld [vmem:[#allocation8 + $0x1510] sm:$0xff] }
 0x339   :  { %6210 = vmatprep.subr.bf16.mxu0 %v10315_v3  ;;  %6567 = vmatprep.subr.bf16.mxu1 %v10317_v6  ;;  %v10357_v3 = vcombine.high %v761_v51, %v765_v55  ;;  %v768_v6 = vld [vmem:[#allocation8 + $0x1410] sm:$0xff]  ;;  %v797_v44 = vld [vmem:[#allocation8 + $0x14f8] sm:$0xff] }
 0x33a   :  { %v10362_v24 = vcombine.low %v768_v6, %v772_v5  ;;  %v804_v50 = vld [vmem:[#allocation8 + $0x1530] sm:$0xff] }
 0x33c   :  { %6211 = vmatpush1.bf16.msra.mxu0 %v10314_v8  ;;  %6568 = vmatpush1.bf16.msra.mxu1 %v10316_v11  ;;  %v10356_v8 = vcombine.low %v761_v51, %v765_v55  ;;  %v10363_v11 = vcombine.high %v768_v6, %v772_v5  ;;  %v801_v51 = vld [vmem:[#allocation8 + $0x1518] sm:$0xff]  ;;  %v812_v6 = vld [vmem:[#allocation8 + $0x1570] sm:$0xff] }
 0x33d   :  { %6212 = vmatprep.subr.bf16.mxu0 %v10323_v12  ;;  %6569 = vmatprep.subr.bf16.mxu1 %v10325_v13  ;;  %v10365_v12 = vcombine.high %v769_v61, %v773_v63  ;;  %v776_v13 = vld [vmem:[#allocation8 + $0x1450] sm:$0xff]  ;;  %v805_v55 = vld [vmem:[#allocation8 + $0x1538] sm:$0xff] }
 0x33e   :  { %v11677_v5 = vld [vmem:[#allocation6 + $0x2c] ss:$52 sps:$4 sm:$0xff]  }
 0x340   :  { %6213 = vmatpush1.bf16.msra.mxu0 %v10322_v25  ;;  %6570 = vmatpush1.bf16.msra.mxu1 %v10324_v22  ;;  %v10364_v25 = vcombine.low %v769_v61, %v773_v63  ;;  %v10371_v22 = vcombine.high %v776_v13, %v780_v16  ;;  %v809_v61 = vld [vmem:[#allocation8 + $0x1558] sm:$0xff] }
 0x341   :  { %6214 = vmatprep.subr.bf16.mxu0 %v10331_v26  ;;  %6571 = vmatprep.subr.bf16.mxu1 %v10333_v28  ;;  %v10373_v26 = vcombine.high %v777_v29, %v781_v21  ;;  %v784_v28 = vld [vmem:[#allocation8 + $0x1490] sm:$0xff]  ;;  %v813_v63 = vld [vmem:[#allocation8 + $0x1578] sm:$0xff] }
 0x344   :  { %6215 = vmatpush1.bf16.msra.mxu0 %v10330_v23  ;;  %6572 = vmatpush1.bf16.msra.mxu1 %v10332_v39  ;;  %v10370_v23 = vcombine.low %v776_v13, %v780_v16  ;;  %v10372_v39 = vcombine.low %v777_v29, %v781_v21  ;;  %v820_v13 = vld [vmem:[#allocation8 + $0x15b0] sm:$0xff]  ;;  %v817_v16 = vld [vmem:[#allocation8 + $0x1598] sm:$0xff] }
 0x345   :  { %6216 = vmatprep.subr.bf16.mxu0 %v10339_v35  ;;  %6573 = vmatprep.subr.bf16.mxu1 %v10341_v36  ;;  %v10379_v35 = vcombine.high %v784_v28, %v788_v31  ;;  %v10381_v36 = vcombine.high %v785_v33, %v789_v34  ;;  %v821_v29 = vld [vmem:[#allocation8 + $0x15b8] sm:$0xff] }
 0x348   :  { %6217 = vmatpush1.bf16.msra.mxu0 %v10338_v47  ;;  %6574 = vmatpush1.bf16.msra.mxu1 %v10340_v43  ;;  %v10378_v47 = vcombine.low %v784_v28, %v788_v31  ;;  %v10380_v43 = vcombine.low %v785_v33, %v789_v34  ;;  %v828_v28 = vld [vmem:[#allocation8 + $0x15f0] sm:$0xff]  ;;  %v825_v31 = vld [vmem:[#allocation8 + $0x15d8] sm:$0xff]  ;;  %v10412_v34 = vcombine.low %v817_v16, %v821_v29 }
 0x349   :  { %6218 = vmatprep.subr.bf16.mxu0 %v10347_v58  ;;  %6575 = vmatprep.subr.bf16.mxu1 %v10349_v48  ;;  %v10387_v58 = vcombine.high %v792_v37, %v796_v38  ;;  %v10389_v48 = vcombine.high %v793_v40, %v797_v44 }
 0x34c   :  { %6219 = vmatpush1.bf16.msra.mxu0 %v10346_v56  ;;  %6576 = vmatpush1.bf16.msra.mxu1 %v10348_v59  ;;  %v10386_v56 = vcombine.low %v792_v37, %v796_v38  ;;  %v10395_v59 = vcombine.high %v800_v49, %v804_v50  ;;  %v833_v37 = vld [vmem:[#allocation8 + $0x1618] sm:$0xff] }
 0x34d   :  { %6220 = vmatprep.subr.bf16.mxu0 %v10355_v20  ;;  %6577 = vmatprep.subr.bf16.mxu1 %v10357_v3  ;;  %v10397_v20 = vcombine.high %v801_v51, %v805_v55  ;;  %v808_v3 = vld [vmem:[#allocation8 + $0x1550] sm:$0xff]  ;;  %v837_v38 = vld [vmem:[#allocation8 + $0x1638] sm:$0xff] }
 0x34e   :  { %v10402_v21 = vcombine.low %v808_v3, %v812_v6 }
 0x350   :  { %6221 = vmatpush1.bf16.msra.mxu0 %v10354_v7  ;;  %6578 = vmatpush1.bf16.msra.mxu1 %v10356_v8  ;;  %v10394_v7 = vcombine.low %v800_v49, %v804_v50  ;;  %v10396_v8 = vcombine.low %v801_v51, %v805_v55  ;;  %v841_v49 = vld [vmem:[#allocation8 + $0x1658] sm:$0xff]  ;;  %v10428_v55 = vcombine.low %v833_v37, %v837_v38 }
 0x351   :  { %6241 = vmatprep.subr.bf16.mxu0 %v10363_v11  ;;  %6598 = vmatprep.subr.bf16.mxu1 %v10365_v12  ;;  %v10403_v11 = vcombine.high %v808_v3, %v812_v6  ;;  %v816_v12 = vld [vmem:[#allocation8 + $0x1590] sm:$0xff]  ;;  %v845_v50 = vld [vmem:[#allocation8 + $0x1678] sm:$0xff] }
 0x352   :  { %v10410_v33 = vcombine.low %v816_v12, %v820_v13  ;;  %v849_v3 = vld [vmem:[#allocation8 + $0x1698] sm:$0xff] }
 0x353   :  { %6223 = vmatmul.mubr.bf16.vlgmr.msra.gmra.mrb[8].mxu0 %v11676_v32  ;;  %6580 = vmatmul.mubr.bf16.vlgmr.msra.gmra.mrb[8].mxu1 %v11676_v32  ;;  %v829_v32 = vld [vmem:[#allocation8 + $0x15f8] sm:$0xff] }
 0x354   :  { %6242 = vmatpush1.bf16.msra.mxu0 %v10362_v24  ;;  %6599 = vmatpush1.bf16.msra.mxu1 %v10364_v25  ;;  %v10404_v24 = vcombine.low %v809_v61, %v813_v63  ;;  %v10411_v25 = vcombine.high %v816_v12, %v820_v13  ;;  %v853_v6 = vld [vmem:[#allocation8 + $0x16b8] sm:$0xff] }
 0x355   :  { %6243 = vmatprep.subr.bf16.mxu0 %v10371_v22  ;;  %6600 = vmatprep.subr.bf16.mxu1 %v10373_v26  ;;  %v10413_v22 = vcombine.high %v817_v16, %v821_v29  ;;  %v824_v26 = vld [vmem:[#allocation8 + $0x15d0] sm:$0xff]  ;;  %v861_v12 = vld [vmem:[#allocation8 + $0x16f8] sm:$0xff]  ;;  %v10444_v16 = vcombine.low %v849_v3, %v853_v6 }
 0x356   :  { %6232 = vmatprep.mubr.bf16.mxu0 %v12005_v15  ;;  %6589 = vmatprep.mubr.bf16.mxu1 %v12005_v15  ;;  %v10388_v15 = vcombine.low %v793_v40, %v797_v44  ;;  %v10418_v40 = vcombine.low %v824_v26, %v828_v28  ;;  %v10420_v44 = vcombine.low %v825_v31, %v829_v32 }
 0x358   :  { %6244 = vmatpush1.bf16.msra.mxu0 %v10370_v23  ;;  %6601 = vmatpush1.bf16.msra.mxu1 %v10372_v39  ;;  %v10419_v23 = vcombine.high %v824_v26, %v828_v28  ;;  %v10421_v39 = vcombine.high %v825_v31, %v829_v32  ;;  %v869_v26 = vld [vmem:[#allocation8 + $0x1738] sm:$0xff] }
 0x359   :  { %6245 = vmatprep.subr.bf16.mxu0 %v10379_v35  ;;  %6602 = vmatprep.subr.bf16.mxu1 %v10381_v36  ;;  %v832_v35 = vld [vmem:[#allocation8 + $0x1610] sm:$0xff] }
 0x35a   :  { %v836_v36 = vld [vmem:[#allocation8 + $0x1630] sm:$0xff] }
 0x35b   :  { %6233 = vmatmul.mubr.bf16.gmra.mrb[12].mxu0 %v12009_v27  ;;  %6590 = vmatmul.mubr.bf16.gmra.mrb[12].mxu1 %v12009_v27  ;;  %v10405_v27 = vcombine.high %v809_v61, %v813_v63  ;;  %v10426_v51 = vcombine.low %v832_v35, %v836_v36  ;;  %v10436_v61 = vcombine.low %v841_v49, %v845_v50 }
 0x35c   :  { %6246 = vmatpush1.bf16.msra.mxu0 %v10378_v47  ;;  %6603 = vmatpush1.bf16.msra.mxu1 %v10380_v43  ;;  %v10427_v47 = vcombine.high %v832_v35, %v836_v36  ;;  %v10429_v43 = vcombine.high %v833_v37, %v837_v38  ;;  %v877_v35 = vld [vmem:[#allocation8 + $0x1778] sm:$0xff] }
 0x35d   :  { %6247 = vmatprep.subr.bf16.mxu0 %v10387_v58  ;;  %6604 = vmatprep.subr.bf16.mxu1 %v10389_v48  ;;  %v840_v58 = vld [vmem:[#allocation8 + $0x1650] sm:$0xff] }
 0x35e   :  { %6273 = vmatprep.mubr.bf16.mxu0 %v11677_v5  ;;  %6630 = vmatprep.mubr.bf16.mxu1 %v11677_v5  ;;  %v844_v48 = vld [vmem:[#allocation8 + $0x1670] sm:$0xff] }
 0x35f   :  { %v10434_v5 = vcombine.low %v840_v58, %v844_v48 }
 0x360   :  { %6248 = vmatpush1.bf16.msra.mxu0 %v10386_v56  ;;  %6605 = vmatpush1.bf16.msra.mxu1 %v10388_v15  ;;  %v10435_v56 = vcombine.high %v840_v58, %v844_v48  ;;  %v10437_v15 = vcombine.high %v841_v49, %v845_v50  ;;  %v885_v58 = vld [vmem:[#allocation8 + $0x17b8] sm:$0xff] }
 0x361   :  { %6249 = vmatprep.subr.bf16.mxu0 %v10395_v59  ;;  %6606 = vmatprep.subr.bf16.mxu1 %v10397_v20  ;;  %v848_v59 = vld [vmem:[#allocation8 + $0x1690] sm:$0xff] }
 0x362   :  { %v852_v20 = vld [vmem:[#allocation8 + $0x16b0] sm:$0xff] }
 0x363   :  { %v10443_v63 = vcombine.high %v848_v59, %v852_v20  ;;  %v10442_v13 = vcombine.low %v848_v59, %v852_v20  ;;  %v893_v59 = vld [vmem:[#allocation8 + $0x17f8] sm:$0xff] }
 0x364   :  { %6250 = vmatpush1.bf16.msra.mxu0 %v10394_v7  ;;  %6607 = vmatpush1.bf16.msra.mxu1 %v10396_v8  ;;  %v10445_v7 = vcombine.high %v849_v3, %v853_v6  ;;  %v856_v8 = vld [vmem:[#allocation8 + $0x16d0] sm:$0xff] }
 0x365   :  { %6251 = vmatprep.subr.bf16.mxu0 %v10403_v11  ;;  %6608 = vmatprep.subr.bf16.mxu1 %v10405_v27  ;;  %v860_v11 = vld [vmem:[#allocation8 + $0x16f0] sm:$0xff]  ;;  %v857_v27 = vld [vmem:[#allocation8 + $0x16d8] sm:$0xff] }
 0x366   :  { %v10451_v29 = vcombine.high %v856_v8, %v860_v11  ;;  %v10450_v28 = vcombine.low %v856_v8, %v860_v11  ;;  %v10452_v31 = vcombine.low %v857_v27, %v861_v12  ;;  %v901_v8 = vld [vmem:[#allocation8 + $0x1838] sm:$0xff] }
 0x368   :  { %6252 = vmatpush1.bf16.msra.mxu0 %v10402_v21  ;;  %6609 = vmatpush1.bf16.msra.mxu1 %v10404_v24  ;;  %v10453_v21 = vcombine.high %v857_v27, %v861_v12  ;;  %v864_v24 = vld [vmem:[#allocation8 + $0x1710] sm:$0xff] }
 0x369   :  { %6253 = vmatprep.subr.bf16.mxu0 %v10411_v25  ;;  %6610 = vmatprep.subr.bf16.mxu1 %v10413_v22  ;;  %v868_v25 = vld [vmem:[#allocation8 + $0x1730] sm:$0xff]  ;;  %v865_v22 = vld [vmem:[#allocation8 + $0x1718] sm:$0xff] }
 0x36a   :  { %v10459_v32 = vcombine.high %v864_v24, %v868_v25  ;;  %v10458_v36 = vcombine.low %v864_v24, %v868_v25  ;;  %v10460_v37 = vcombine.low %v865_v22, %v869_v26  ;;  %v909_v24 = vld [vmem:[#allocation8 + $0x1878] sm:$0xff] }
 0x36c   :  { %6254 = vmatpush1.bf16.msra.mxu0 %v10410_v33  ;;  %6611 = vmatpush1.bf16.msra.mxu1 %v10412_v34  ;;  %v10461_v33 = vcombine.high %v865_v22, %v869_v26  ;;  %v872_v34 = vld [vmem:[#allocation8 + $0x1750] sm:$0xff] }
 0x36d   :  { %6255 = vmatprep.subr.bf16.mxu0 %v10419_v23  ;;  %6612 = vmatprep.subr.bf16.mxu1 %v10421_v39  ;;  %v876_v23 = vld [vmem:[#allocation8 + $0x1770] sm:$0xff]  ;;  %v873_v39 = vld [vmem:[#allocation8 + $0x1758] sm:$0xff] }
 0x36e   :  { %v10467_v38 = vcombine.high %v872_v34, %v876_v23  ;;  %v10466_v48 = vcombine.low %v872_v34, %v876_v23  ;;  %v10468_v49 = vcombine.low %v873_v39, %v877_v35  ;;  %v913_v34 = vld [vmem:[#allocation8 + $0x1898] sm:$0xff] }
 0x36f   :  { %v917_v23 = vld [vmem:[#allocation8 + $0x18b8] sm:$0xff] }
 0x370   :  { %6256 = vmatpush1.bf16.msra.mxu0 %v10418_v40  ;;  %6613 = vmatpush1.bf16.msra.mxu1 %v10420_v44  ;;  %v10469_v40 = vcombine.high %v873_v39, %v877_v35  ;;  %v880_v44 = vld [vmem:[#allocation8 + $0x1790] sm:$0xff] }
 0x371   :  { %6257 = vmatprep.subr.bf16.mxu0 %v10427_v47  ;;  %6614 = vmatprep.subr.bf16.mxu1 %v10429_v43  ;;  %v884_v47 = vld [vmem:[#allocation8 + $0x17b0] sm:$0xff]  ;;  %v881_v43 = vld [vmem:[#allocation8 + $0x1798] sm:$0xff] }
 0x372   :  { %v10475_v50 = vcombine.high %v880_v44, %v884_v47  ;;  %v10474_v20 = vcombine.low %v880_v44, %v884_v47  ;;  %v10476_v3 = vcombine.low %v881_v43, %v885_v58  ;;  %v921_v44 = vld [vmem:[#allocation8 + $0x18d8] sm:$0xff] }
 0x373   :  { %v925_v47 = vld [vmem:[#allocation8 + $0x18f8] sm:$0xff] }
 0x374   :  { %6258 = vmatpush1.bf16.msra.mxu0 %v10426_v51  ;;  %6615 = vmatpush1.bf16.msra.mxu1 %v10428_v55  ;;  %v10477_v51 = vcombine.high %v881_v43, %v885_v58  ;;  %v888_v55 = vld [vmem:[#allocation8 + $0x17d0] sm:$0xff]  ;;  %v10508_v58 = vcombine.low %v913_v34, %v917_v23 }
 0x375   :  { %6259 = vmatprep.subr.bf16.mxu0 %v10435_v56  ;;  %6616 = vmatprep.subr.bf16.mxu1 %v10437_v15  ;;  %v892_v56 = vld [vmem:[#allocation8 + $0x17f0] sm:$0xff]  ;;  %v889_v15 = vld [vmem:[#allocation8 + $0x17d8] sm:$0xff] }
 0x376   :  { %v10483_v6 = vcombine.high %v888_v55, %v892_v56  ;;  %v10482_v11 = vcombine.low %v888_v55, %v892_v56  ;;  %v10484_v27 = vcombine.low %v889_v15, %v893_v59  ;;  %v929_v55 = vld [vmem:[#allocation8 + $0x1918] sm:$0xff] }
 0x377   :  { %v933_v56 = vld [vmem:[#allocation8 + $0x1938] sm:$0xff] }
 0x378   :  { %6260 = vmatpush1.bf16.msra.mxu0 %v10434_v5  ;;  %6617 = vmatpush1.bf16.msra.mxu1 %v10436_v61  ;;  %v10485_v5 = vcombine.high %v889_v15, %v893_v59  ;;  %v896_v61 = vld [vmem:[#allocation8 + $0x1810] sm:$0xff] }
 0x379   :  { %6261 = vmatprep.subr.bf16.mxu0 %v10443_v63  ;;  %6618 = vmatprep.subr.bf16.mxu1 %v10445_v7  ;;  %v900_v63 = vld [vmem:[#allocation8 + $0x1830] sm:$0xff]  ;;  %v897_v7 = vld [vmem:[#allocation8 + $0x1818] sm:$0xff] }
 0x37a   :  { %v10491_v12 = vcombine.high %v896_v61, %v900_v63  ;;  %v10490_v25 = vcombine.low %v896_v61, %v900_v63  ;;  %v10492_v22 = vcombine.low %v897_v7, %v901_v8  ;;  %v941_v61 = vld [vmem:[#allocation8 + $0x1978] sm:$0xff] }
 0x37c   :  { %6262 = vmatpush1.bf16.msra.mxu0 %v10442_v13  ;;  %6619 = vmatpush1.bf16.msra.mxu1 %v10444_v16  ;;  %v10493_v13 = vcombine.high %v897_v7, %v901_v8  ;;  %v904_v16 = vld [vmem:[#allocation8 + $0x1850] sm:$0xff]  ;;  %v10524_v7 = vcombine.low %v929_v55, %v933_v56 }
 0x37d   :  { %6263 = vmatprep.subr.bf16.mxu0 %v10451_v29  ;;  %6620 = vmatprep.subr.bf16.mxu1 %v10453_v21  ;;  %v908_v29 = vld [vmem:[#allocation8 + $0x1870] sm:$0xff]  ;;  %v905_v21 = vld [vmem:[#allocation8 + $0x1858] sm:$0xff] }
 0x37e   :  { %v10499_v26 = vcombine.high %v904_v16, %v908_v29  ;;  %v10498_v39 = vcombine.low %v904_v16, %v908_v29  ;;  %v10500_v35 = vcombine.low %v905_v21, %v909_v24 }
 0x380   :  { %6264 = vmatpush1.bf16.msra.mxu0 %v10450_v28  ;;  %6621 = vmatpush1.bf16.msra.mxu1 %v10452_v31  ;;  %v10501_v28 = vcombine.high %v905_v21, %v909_v24  ;;  %v912_v31 = vld [vmem:[#allocation8 + $0x1890] sm:$0xff] }
 0x381   :  { %6265 = vmatprep.subr.bf16.mxu0 %v10459_v32  ;;  %6622 = vmatprep.subr.bf16.mxu1 %v10461_v33  ;;  %v916_v32 = vld [vmem:[#allocation8 + $0x18b0] sm:$0xff]  ;;  %v11678_v33 = vld [vmem:[#allocation6 + $0x28] ss:$52 sps:$4 sm:$0xff]  }
 0x382   :  { %v10506_v43 = vcombine.low %v912_v31, %v916_v32 }
 0x384   :  { %6266 = vmatpush1.bf16.msra.mxu0 %v10458_v36  ;;  %6623 = vmatpush1.bf16.msra.mxu1 %v10460_v37  ;;  %v10507_v36 = vcombine.high %v912_v31, %v916_v32  ;;  %v10509_v37 = vcombine.high %v913_v34, %v917_v23 }
 0x385   :  { %6267 = vmatprep.subr.bf16.mxu0 %v10467_v38  ;;  %6624 = vmatprep.subr.bf16.mxu1 %v10469_v40  ;;  %v920_v38 = vld [vmem:[#allocation8 + $0x18d0] sm:$0xff] }
 0x386   :  { %v924_v40 = vld [vmem:[#allocation8 + $0x18f0] sm:$0xff] }
 0x387   :  { %v10514_v15 = vcombine.low %v920_v38, %v924_v40 }
 0x388   :  { %6268 = vmatpush1.bf16.msra.mxu0 %v10466_v48  ;;  %6625 = vmatpush1.bf16.msra.mxu1 %v10468_v49  ;;  %v10515_v48 = vcombine.high %v920_v38, %v924_v40  ;;  %v10517_v49 = vcombine.high %v921_v44, %v925_v47  ;;  %v11254_v38 = vld [vmem:[#allocation11 + $0x8] ss:$16 sps:$4 sm:$0xff]   ;;  %v11259_v40 = vld [vmem:[#allocation11 + $0x24] ss:$16 sps:$4 sm:$0xff]  }
 0x389   :  { %6269 = vmatprep.subr.bf16.mxu0 %v10475_v50  ;;  %6626 = vmatprep.subr.bf16.mxu1 %v10477_v51  ;;  %v928_v50 = vld [vmem:[#allocation8 + $0x1910] sm:$0xff] }
 0x38a   :  { %v932_v51 = vld [vmem:[#allocation8 + $0x1930] sm:$0xff] }
 0x38b   :  { %v10523_v59 = vcombine.high %v928_v50, %v932_v51  ;;  %v10522_v63 = vcombine.low %v928_v50, %v932_v51  ;;  %v11263_v50 = vld [vmem:[#allocation11 + $0x40] ss:$16 sps:$4 sm:$0xff]   ;;  %v11266_v51 = vld [vmem:[#allocation11 + $0x48] ss:$16 sps:$4 sm:$0xff]  }
 0x38c   :  { %6270 = vmatpush1.bf16.msra.mxu0 %v10474_v20  ;;  %6627 = vmatpush1.bf16.msra.mxu1 %v10476_v3  ;;  %v10525_v20 = vcombine.high %v929_v55, %v933_v56  ;;  %v936_v3 = vld [vmem:[#allocation8 + $0x1950] sm:$0xff]  ;;  %v11271_v55 = vld [vmem:[#allocation11 + $0x64] ss:$16 sps:$4 sm:$0xff]  }
 0x38d   :  { %6271 = vmatprep.subr.bf16.mxu0 %v10483_v6  ;;  %6628 = vmatprep.subr.bf16.mxu1 %v10485_v5  ;;  %v940_v6 = vld [vmem:[#allocation8 + $0x1970] sm:$0xff]  ;;  %v937_v5 = vld [vmem:[#allocation8 + $0x1958] sm:$0xff] }
 0x38e   :  { %v10533_v8 = vcombine.high %v937_v5, %v941_v61  ;;  %v10530_v16 = vcombine.low %v936_v3, %v940_v6  ;;  %v10532_v29 = vcombine.low %v937_v5, %v941_v61  ;;  %v11680_v56 = vld [vmem:[#allocation6 + $0x98] ss:$0 sps:$4 sm:$0xff]   ;;  %v11286_v61 = vld [vmem:[#allocation11 + $0xac] ss:$16 sps:$4 sm:$0xff]  }
 0x38f   :  { %v11283_v5 = vld [vmem:[#allocation11 + $0xa4] ss:$16 sps:$4 sm:$0xff]  }
 0x390   :  { %6272 = vmatpush1.bf16.msra.mxu0 %v10482_v11  ;;  %6629 = vmatpush1.bf16.msra.mxu1 %v10484_v27  ;;  %v944_v11 = vld [vmem:[#allocation8 + $0x1990] sm:$0xff] }
 0x391   :  { %6292 = vmatprep.subr.bf16.mxu0 %v10491_v12  ;;  %6649 = vmatprep.subr.bf16.mxu1 %v10493_v13  ;;  %v948_v27 = vld [vmem:[#allocation8 + $0x19b0] sm:$0xff]  ;;  %v945_v12 = vld [vmem:[#allocation8 + $0x1998] sm:$0xff] }
 0x392   :  { %v949_v13 = vld [vmem:[#allocation8 + $0x19b8] sm:$0xff]  ;;  %v10539_v21 = vcombine.high %v944_v11, %v948_v27  ;;  %v10538_v31 = vcombine.low %v944_v11, %v948_v27  ;;  %v11290_v11 = vld [vmem:[#allocation11 + $0xc8] ss:$16 sps:$4 sm:$0xff]  }
 0x393   :  { %6274 = vmatmul.mubr.bf16.vlgmr.msra.gmra.mrb[8].mxu0 %v11678_v33  ;;  %6631 = vmatmul.mubr.bf16.vlgmr.msra.gmra.mrb[8].mxu1 %v11678_v33  ;;  %v10541_v24 = vcombine.high %v945_v12, %v949_v13  ;;  %v10540_v32 = vcombine.low %v945_v12, %v949_v13  ;;  %v11295_v27 = vld [vmem:[#allocation11 + $0xe4] ss:$16 sps:$4 sm:$0xff]   ;;  %v11298_v12 = vld [vmem:[#allocation11 + $0xec] ss:$16 sps:$4 sm:$0xff]   ;;  %v11293_v13 = vld [vmem:[#allocation11 + $0xe0] ss:$16 sps:$4 sm:$0xff]  }
 0x394   :  { %6293 = vmatpush1.bf16.msra.mxu0 %v10490_v25  ;;  %6650 = vmatpush1.bf16.msra.mxu1 %v10492_v22  ;;  %v952_v25 = vld [vmem:[#allocation8 + $0x19d0] sm:$0xff] }
 0x395   :  { %6294 = vmatprep.subr.bf16.mxu0 %v10499_v26  ;;  %6651 = vmatprep.subr.bf16.mxu1 %v10501_v28  ;;  %v956_v22 = vld [vmem:[#allocation8 + $0x19f0] sm:$0xff]  ;;  %v953_v26 = vld [vmem:[#allocation8 + $0x19d8] sm:$0xff] }
 0x396   :  { %6283 = vmatprep.mubr.bf16.mxu0 %v12013_v45  ;;  %6640 = vmatprep.mubr.bf16.mxu1 %v12013_v45  ;;  %v10516_v45 = vcombine.low %v921_v44, %v925_v47  ;;  %v957_v28 = vld [vmem:[#allocation8 + $0x19f8] sm:$0xff]  ;;  %v10547_v33 = vcombine.high %v952_v25, %v956_v22  ;;  %v10546_v23 = vcombine.low %v952_v25, %v956_v22  ;;  %v11262_v44 = vld [vmem:[#allocation11 + $0x2c] ss:$16 sps:$4 sm:$0xff]   ;;  %v11302_v25 = vld [vmem:[#allocation11 + $0x108] ss:$16 sps:$4 sm:$0xff]  }
 0x397   :  { %v10549_v34 = vcombine.high %v953_v26, %v957_v28  ;;  %v11679_v47 = vld [vmem:[#allocation6 + $0x30] ss:$52 sps:$4 sm:$0xff]   ;;  %v11307_v22 = vld [vmem:[#allocation11 + $0x124] ss:$16 sps:$4 sm:$0xff]  }
 0x398   :  { %6295 = vmatpush1.bf16.msra.mxu0 %v10498_v39  ;;  %6652 = vmatpush1.bf16.msra.mxu1 %v10500_v35  ;;  %v10548_v39 = vcombine.low %v953_v26, %v957_v28  ;;  %v11253_v35 = vld [vmem:[#allocation11 + $0x4] ss:$16 sps:$4 sm:$0xff]   ;;  %v11310_v26 = vld [vmem:[#allocation11 + $0x12c] ss:$16 sps:$4 sm:$0xff]   ;;  %v11305_v28 = vld [vmem:[#allocation11 + $0x120] ss:$16 sps:$4 sm:$0xff]  }
 0x399   :  { %6296 = vmatprep.subr.bf16.mxu0 %v10507_v36  ;;  %6653 = vmatprep.subr.bf16.mxu1 %v10509_v37  ;;  %v11256_v36 = vld [vmem:[#allocation11 + $0xc] ss:$16 sps:$4 sm:$0xff]   ;;  %v11251_v37 = vld [vmem:[#allocation11] ss:$16 sps:$4 sm:$0xff]  }
 0x39b   :  { %6284 = vmatmul.mubr.bf16.gmra.mrb[12].mxu0 %v12017_v57  ;;  %6641 = vmatmul.mubr.bf16.gmra.mrb[12].mxu1 %v12017_v57  ;;  %v10531_v57 = vcombine.high %v936_v3, %v940_v6  ;;  %v11275_v3 = vld [vmem:[#allocation11 + $0x80] ss:$16 sps:$4 sm:$0xff]   ;;  %v11278_v6 = vld [vmem:[#allocation11 + $0x88] ss:$16 sps:$4 sm:$0xff]  }
 0x39c   :  { %6297 = vmatpush1.bf16.msra.mxu0 %v10506_v43  ;;  %6654 = vmatpush1.bf16.msra.mxu1 %v10508_v58  ;;  %v11257_v43 = vld [vmem:[#allocation11 + $0x20] ss:$16 sps:$4 sm:$0xff]   ;;  %v11260_v58 = vld [vmem:[#allocation11 + $0x28] ss:$16 sps:$4 sm:$0xff]  }
 0x39d   :  { %6298 = vmatprep.subr.bf16.mxu0 %v10515_v48  ;;  %6655 = vmatprep.subr.bf16.mxu1 %v10517_v49  ;;  %v11265_v48 = vld [vmem:[#allocation11 + $0x44] ss:$16 sps:$4 sm:$0xff]   ;;  %v11268_v49 = vld [vmem:[#allocation11 + $0x4c] ss:$16 sps:$4 sm:$0xff]  }
 0x39e   :  { %6324 = vmatprep.mubr.bf16.mxu0 %v11858_v10  ;;  %6681 = vmatprep.mubr.bf16.mxu1 %v11858_v10 }
 0x3a0   :  { %6299 = vmatpush1.bf16.msra.mxu0 %v10514_v15  ;;  %6656 = vmatpush1.bf16.msra.mxu1 %v10516_v45  ;;  %v11274_v15 = vld [vmem:[#allocation11 + $0x6c] ss:$16 sps:$4 sm:$0xff]   ;;  %v11269_v45 = vld [vmem:[#allocation11 + $0x60] ss:$16 sps:$4 sm:$0xff]  }
 0x3a1   :  { %6300 = vmatprep.subr.bf16.mxu0 %v10523_v59  ;;  %6657 = vmatprep.subr.bf16.mxu1 %v10525_v20  ;;  %v11272_v59 = vld [vmem:[#allocation11 + $0x68] ss:$16 sps:$4 sm:$0xff]   ;;  %v11277_v20 = vld [vmem:[#allocation11 + $0x84] ss:$16 sps:$4 sm:$0xff]  }
 0x3a4   :  { %6301 = vmatpush1.bf16.msra.mxu0 %v10522_v63  ;;  %6658 = vmatpush1.bf16.msra.mxu1 %v10524_v7  ;;  %v11281_v63 = vld [vmem:[#allocation11 + $0xa0] ss:$16 sps:$4 sm:$0xff]   ;;  %v11284_v7 = vld [vmem:[#allocation11 + $0xa8] ss:$16 sps:$4 sm:$0xff]  }
 0x3a5   :  { %6302 = vmatprep.subr.bf16.mxu0 %v10531_v57  ;;  %6659 = vmatprep.subr.bf16.mxu1 %v10533_v8  ;;  %v11289_v57 = vld [vmem:[#allocation11 + $0xc4] ss:$16 sps:$4 sm:$0xff]   ;;  %v11292_v8 = vld [vmem:[#allocation11 + $0xcc] ss:$16 sps:$4 sm:$0xff]  }
 0x3a8   :  { %6303 = vmatpush1.bf16.msra.mxu0 %v10530_v16  ;;  %6660 = vmatpush1.bf16.msra.mxu1 %v10532_v29  ;;  %v11296_v16 = vld [vmem:[#allocation11 + $0xe8] ss:$16 sps:$4 sm:$0xff]   ;;  %v11301_v29 = vld [vmem:[#allocation11 + $0x104] ss:$16 sps:$4 sm:$0xff]  }
 0x3a9   :  { %6304 = vmatprep.subr.bf16.mxu0 %v10539_v21  ;;  %6661 = vmatprep.subr.bf16.mxu1 %v10541_v24  ;;  %v11304_v21 = vld [vmem:[#allocation11 + $0x10c] ss:$16 sps:$4 sm:$0xff]   ;;  %v11299_v24 = vld [vmem:[#allocation11 + $0x100] ss:$16 sps:$4 sm:$0xff]  }
 0x3ac   :  { %6305 = vmatpush1.bf16.msra.mxu0 %v10538_v31  ;;  %6662 = vmatpush1.bf16.msra.mxu1 %v10540_v32  ;;  %v11308_v31 = vld [vmem:[#allocation11 + $0x128] ss:$16 sps:$4 sm:$0xff]   ;;  %v11313_v32 = vld [vmem:[#allocation11 + $0x144] ss:$16 sps:$4 sm:$0xff]  }
 0x3ad   :  { %6306 = vmatprep.subr.bf16.mxu0 %v10547_v33  ;;  %6663 = vmatprep.subr.bf16.mxu1 %v10549_v34  ;;  %v11316_v33 = vld [vmem:[#allocation11 + $0x14c] ss:$16 sps:$4 sm:$0xff]   ;;  %v11311_v34 = vld [vmem:[#allocation11 + $0x140] ss:$16 sps:$4 sm:$0xff]  }
 0x3b0   :  { %6307 = vmatpush1.bf16.msra.mxu0 %v10546_v23  ;;  %6664 = vmatpush1.bf16.msra.mxu1 %v10548_v39  ;;  %v11314_v23 = vld [vmem:[#allocation11 + $0x148] ss:$16 sps:$4 sm:$0xff]   ;;  %v11319_v39 = vld [vmem:[#allocation11 + $0x164] ss:$16 sps:$4 sm:$0xff]  }
 0x3b1   :  { %8348 = vmatprep.subr.bf16.mxu0 %v11253_v35  ;;  %8552 = vmatprep.subr.bf16.mxu1 %v11256_v36  ;;  %v11322_v35 = vld [vmem:[#allocation11 + $0x16c] ss:$16 sps:$4 sm:$0xff]   ;;  %v11317_v36 = vld [vmem:[#allocation11 + $0x160] ss:$16 sps:$4 sm:$0xff]  }
 0x3b3   :  { %6325 = vmatmul.mubr.bf16.vlgmr.msra.gmra.mrb[8].mxu0 %v11679_v47  ;;  %6682 = vmatmul.mubr.bf16.vlgmr.msra.gmra.mrb[8].mxu1 %v11679_v47  ;;  %v11326_v47 = vld [vmem:[#allocation11 + $0x188] ss:$16 sps:$4 sm:$0xff]  }
 0x3b4   :  { %8349 = vmatpush1.bf16.msra.mxu0 %v11251_v37  ;;  %8553 = vmatpush1.bf16.msra.mxu1 %v11254_v38  ;;  %v11320_v37 = vld [vmem:[#allocation11 + $0x168] ss:$16 sps:$4 sm:$0xff]   ;;  %v11325_v38 = vld [vmem:[#allocation11 + $0x184] ss:$16 sps:$4 sm:$0xff]  }
 0x3b5   :  { %8350 = vmatprep.subr.bf16.mxu0 %v11259_v40  ;;  %8554 = vmatprep.subr.bf16.mxu1 %v11262_v44  ;;  %v11328_v40 = vld [vmem:[#allocation11 + $0x18c] ss:$16 sps:$4 sm:$0xff]   ;;  %v11323_v44 = vld [vmem:[#allocation11 + $0x180] ss:$16 sps:$4 sm:$0xff]  }
 0x3b6   :  { %6334 = vmatprep.mubr.bf16.mxu0 %v11858_v10  ;;  %6691 = vmatprep.mubr.bf16.mxu1 %v11858_v10  ;;  %v11280_v10 = vld [vmem:[#allocation11 + $0x8c] ss:$16 sps:$4 sm:$0xff]  }
 0x3b8   :  { %8351 = vmatpush1.bf16.msra.mxu0 %v11257_v43  ;;  %8555 = vmatpush1.bf16.msra.mxu1 %v11260_v58  ;;  %v11331_v43 = vld [vmem:[#allocation11 + $0x1a4] ss:$16 sps:$4 sm:$0xff]   ;;  %v11334_v58 = vld [vmem:[#allocation11 + $0x1ac] ss:$16 sps:$4 sm:$0xff]  }
 0x3b9   :  { %8352 = vmatprep.subr.bf16.mxu0 %v11265_v48  ;;  %8556 = vmatprep.subr.bf16.mxu1 %v11268_v49  ;;  %v11329_v48 = vld [vmem:[#allocation11 + $0x1a0] ss:$16 sps:$4 sm:$0xff]   ;;  %v11332_v49 = vld [vmem:[#allocation11 + $0x1a8] ss:$16 sps:$4 sm:$0xff]  }
 0x3bb   :  { %6335 = vmatmul.mubr.bf16.gmra.mrb[12].mxu0 %v11680_v56  ;;  %6692 = vmatmul.mubr.bf16.gmra.mrb[12].mxu1 %v11680_v56  ;;  %v11335_v56 = vld [vmem:[#allocation11 + $0x1c0] ss:$16 sps:$4 sm:$0xff]  }
 0x3bc   :  { %8353 = vmatpush1.bf16.msra.mxu0 %v11263_v50  ;;  %8380 = vmatprep.mubr.bf16.mxu0 %v12121_v53  ;;  %v11337_v50 = vld [vmem:[#allocation11 + $0x1c4] ss:$16 sps:$4 sm:$0xff]  }
 0x3bd   :  { %8557 = vmatpush1.bf16.msra.mxu1 %v11266_v51  ;;  %8584 = vmatprep.mubr.bf16.mxu1 %v12121_v53  ;;  %v11287_v53 = vld [vmem:[#allocation11 + $0xc0] ss:$16 sps:$4 sm:$0xff]   ;;  %v11340_v51 = vld [vmem:[#allocation11 + $0x1cc] ss:$16 sps:$4 sm:$0xff]  }
 0x3be   :  { %8354 = vmatprep.subr.bf16.mxu0 %v11271_v55  ;;  %8558 = vmatprep.subr.bf16.mxu1 %v11274_v15  ;;  %v10932_v55 = vadd.f32 %v12104_v2, %v12079_v41  ;;  %v11338_v15 = vld [vmem:[#allocation11 + $0x1c8] ss:$16 sps:$4 sm:$0xff]   ;;  %v10931_v41 = vadd.f32 %v12096_v60, %v12044_v1  ;;  %v11352_v2 = vld [vmem:[#allocation11 + $0x20c] ss:$16 sps:$4 sm:$0xff]   ;;  %v11353_v1 = vld [vmem:[#allocation11 + $0x220] ss:$16 sps:$4 sm:$0xff]  }
 0x3bf   :  { %v11356_v60 = vld [vmem:[#allocation11 + $0x228] ss:$16 sps:$4 sm:$0xff]  }
 0x3c0   :  { %8355 = vmatpush1.bf16.msra.mxu0 %v11269_v45  ;;  %v11343_v45 = vld [vmem:[#allocation11 + $0x1e4] ss:$16 sps:$4 sm:$0xff]   ;;  %vm6718_vm8 = vcmp.ge.f32.partialorder %v10932_v55, 0.0  ;;  %vm6717_vm9 = vcmp.ge.f32.partialorder %v10931_v41, 0.0 }
 0x3c1   :  { %8559 = vmatpush1.bf16.msra.mxu1 %v11272_v59  ;;  %8356 = vmatprep.subr.bf16.mxu0 %v11277_v20  ;;  %v11346_v59 = vld [vmem:[#allocation11 + $0x1ec] ss:$16 sps:$4 sm:$0xff]   ;;  %v6743_v20 = vmul.f32 %v10932_v55, %v12058_v14 }
 0x3c2   :  { %8560 = vmatprep.subr.bf16.mxu1 %v11280_v10  ;;  %v11341_v10 = vld [vmem:[#allocation11 + $0x1e0] ss:$16 sps:$4 sm:$0xff]  }
 0x3c4   :  { %8357 = vmatpush1.bf16.msra.mxu0 %v11275_v3  ;;  %v11344_v3 = vld [vmem:[#allocation11 + $0x1e8] ss:$16 sps:$4 sm:$0xff]  }
 0x3c5   :  { %8561 = vmatpush1.bf16.msra.mxu1 %v11278_v6  ;;  %8358 = vmatprep.subr.bf16.mxu0 %v11283_v5  ;;  %v11349_v6 = vld [vmem:[#allocation11 + $0x204] ss:$16 sps:$4 sm:$0xff]   ;;  %v6767_v5 = vsel %vm6718_vm8, %v10932_v55, %v6743_v20  ;;  %v11404_v55 = vld [vmem:[#allocation11 + $0x328] ss:$16 sps:$4 sm:$0xff]  }
 0x3c6   :  { %8562 = vmatprep.subr.bf16.mxu1 %v11286_v61  ;;  %v11347_v61 = vld [vmem:[#allocation11 + $0x200] ss:$16 sps:$4 sm:$0xff]   ;;  %v11415_v20 = vld [vmem:[#allocation11 + $0x364] ss:$16 sps:$4 sm:$0xff]  }
 0x3c8   :  { %8359 = vmatpush1.bf16.msra.mxu0 %v11281_v63  ;;  %v6742_v63 = vmul.f32 %v10931_v41, %v12058_v14 }
 0x3c9   :  { %8563 = vmatpush1.bf16.msra.mxu1 %v11284_v7  ;;  %8360 = vmatprep.subr.bf16.mxu0 %v11289_v57  ;;  %v11350_v7 = vld [vmem:[#allocation11 + $0x208] ss:$16 sps:$4 sm:$0xff]   ;;  %v6783_v57 = vpack.c.bf16 %v6767_v5, %v6767_v5  ;;  %v11419_v5 = vld [vmem:[#allocation11 + $0x380] ss:$16 sps:$4 sm:$0xff]  }
 0x3ca   :  { %8564 = vmatprep.subr.bf16.mxu1 %v11292_v8  ;;  %v11355_v8 = vld [vmem:[#allocation11 + $0x224] ss:$16 sps:$4 sm:$0xff]  }
 0x3cc   :  { %8361 = vmatpush1.bf16.msra.mxu0 %v11287_v53  ;;  %v11358_v53 = vld [vmem:[#allocation11 + $0x22c] ss:$16 sps:$4 sm:$0xff]  }
 0x3cd   :  { %8565 = vmatpush1.bf16.msra.mxu1 %v11290_v11  ;;  %8362 = vmatprep.subr.bf16.mxu0 %v11295_v27  ;;  %v6766_v11 = vsel %vm6717_vm9, %v10931_v41, %v6742_v63  ;;  %v11361_v27 = vld [vmem:[#allocation11 + $0x244] ss:$16 sps:$4 sm:$0xff]   ;;  %vm8826_vm9 = vcmask 130048  }
 0x3ce   :  { %8566 = vmatprep.subr.bf16.mxu1 %v11298_v12  ;;  %v11364_v12 = vld [vmem:[#allocation11 + $0x24c] ss:$16 sps:$4 sm:$0xff]   ;;  %v11421_v41 = vld [vmem:[#allocation11 + $0x384] ss:$16 sps:$4 sm:$0xff]  }
 0x3cf   :  { %v11427_v63 = vld [vmem:[#allocation11 + $0x3a4] ss:$16 sps:$4 sm:$0xff]  }
 0x3d0   :  { %8363 = vmatpush1.bf16.msra.mxu0 %v11293_v13  ;;  %v6782_v13 = vpack.c.bf16 %v6766_v11, %v6766_v11  ;;  %v11431_v11 = vld [vmem:[#allocation11 + $0x3c0] ss:$16 sps:$4 sm:$0xff]  }
 0x3d1   :  { %8567 = vmatpush1.bf16.msra.mxu1 %v11296_v16  ;;  %8364 = vmatprep.subr.bf16.mxu0 %v11301_v29  ;;  %v11359_v16 = vld [vmem:[#allocation11 + $0x240] ss:$16 sps:$4 sm:$0xff]   ;;  %v11362_v29 = vld [vmem:[#allocation11 + $0x248] ss:$16 sps:$4 sm:$0xff]  }
 0x3d2   :  { %8568 = vmatprep.subr.bf16.mxu1 %v11304_v21  ;;  %v11367_v21 = vld [vmem:[#allocation11 + $0x264] ss:$16 sps:$4 sm:$0xff]  }
 0x3d4   :  { %8365 = vmatpush1.bf16.msra.mxu0 %v11299_v24  ;;  %v11365_v24 = vld [vmem:[#allocation11 + $0x260] ss:$16 sps:$4 sm:$0xff]  }
 0x3d5   :  { %8569 = vmatpush1.bf16.msra.mxu1 %v11302_v25  ;;  %8366 = vmatprep.subr.bf16.mxu0 %v11307_v22  ;;  %v11368_v25 = vld [vmem:[#allocation11 + $0x268] ss:$16 sps:$4 sm:$0xff]   ;;  %v11373_v22 = vld [vmem:[#allocation11 + $0x284] ss:$16 sps:$4 sm:$0xff]  }
 0x3d6   :  { %8570 = vmatprep.subr.bf16.mxu1 %v11310_v26  ;;  %v11376_v26 = vld [vmem:[#allocation11 + $0x28c] ss:$16 sps:$4 sm:$0xff]  }
 0x3d8   :  { %8367 = vmatpush1.bf16.msra.mxu0 %v11305_v28  ;;  %v11371_v28 = vld [vmem:[#allocation11 + $0x280] ss:$16 sps:$4 sm:$0xff]  }
 0x3d9   :  { %8571 = vmatpush1.bf16.msra.mxu1 %v11308_v31  ;;  %8368 = vmatprep.subr.bf16.mxu0 %v11313_v32  ;;  %v11374_v31 = vld [vmem:[#allocation11 + $0x288] ss:$16 sps:$4 sm:$0xff]   ;;  %v11379_v32 = vld [vmem:[#allocation11 + $0x2a4] ss:$16 sps:$4 sm:$0xff]  }
 0x3da   :  { %8572 = vmatprep.subr.bf16.mxu1 %v11316_v33  ;;  %v11382_v33 = vld [vmem:[#allocation11 + $0x2ac] ss:$16 sps:$4 sm:$0xff]  }
 0x3dc   :  { %8369 = vmatpush1.bf16.msra.mxu0 %v11311_v34  ;;  %v11377_v34 = vld [vmem:[#allocation11 + $0x2a0] ss:$16 sps:$4 sm:$0xff]  }
 0x3dd   :  { %8573 = vmatpush1.bf16.msra.mxu1 %v11314_v23  ;;  %8370 = vmatprep.subr.bf16.mxu0 %v11319_v39  ;;  %v11385_v23 = vld [vmem:[#allocation11 + $0x2c4] ss:$16 sps:$4 sm:$0xff]   ;;  %v11388_v39 = vld [vmem:[#allocation11 + $0x2cc] ss:$16 sps:$4 sm:$0xff]  }
 0x3de   :  { %8574 = vmatprep.subr.bf16.mxu1 %v11322_v35  ;;  %v11383_v35 = vld [vmem:[#allocation11 + $0x2c0] ss:$16 sps:$4 sm:$0xff]  }
 0x3e0   :  { %8371 = vmatpush1.bf16.msra.mxu0 %v11317_v36  ;;  %v11386_v36 = vld [vmem:[#allocation11 + $0x2c8] ss:$16 sps:$4 sm:$0xff]  }
 0x3e1   :  { %8575 = vmatpush1.bf16.msra.mxu1 %v11320_v37  ;;  %8372 = vmatprep.subr.bf16.mxu0 %v11325_v38  ;;  %v11391_v37 = vld [vmem:[#allocation11 + $0x2e4] ss:$16 sps:$4 sm:$0xff]   ;;  %v11394_v38 = vld [vmem:[#allocation11 + $0x2ec] ss:$16 sps:$4 sm:$0xff]  }
 0x3e2   :  { %8576 = vmatprep.subr.bf16.mxu1 %v11328_v40  ;;  %v11389_v40 = vld [vmem:[#allocation11 + $0x2e0] ss:$16 sps:$4 sm:$0xff]  }
 0x3e4   :  { %8373 = vmatpush1.bf16.msra.mxu0 %v11323_v44  ;;  %v11392_v44 = vld [vmem:[#allocation11 + $0x2e8] ss:$16 sps:$4 sm:$0xff]  }
 0x3e5   :  { %8577 = vmatpush1.bf16.msra.mxu1 %v11326_v47  ;;  %8374 = vmatprep.subr.bf16.mxu0 %v11331_v43  ;;  %v11397_v47 = vld [vmem:[#allocation11 + $0x304] ss:$16 sps:$4 sm:$0xff]   ;;  %v11400_v43 = vld [vmem:[#allocation11 + $0x30c] ss:$16 sps:$4 sm:$0xff]  }
 0x3e6   :  { %8578 = vmatprep.subr.bf16.mxu1 %v11334_v58  ;;  %v11395_v58 = vld [vmem:[#allocation11 + $0x300] ss:$16 sps:$4 sm:$0xff]  }
 0x3e8   :  { %8375 = vmatpush1.bf16.msra.mxu0 %v11329_v48  ;;  %v11398_v48 = vld [vmem:[#allocation11 + $0x308] ss:$16 sps:$4 sm:$0xff]  }
 0x3e9   :  { %8579 = vmatpush1.bf16.msra.mxu1 %v11332_v49  ;;  %8376 = vmatprep.subr.bf16.mxu0 %v11337_v50  ;;  %v11403_v49 = vld [vmem:[#allocation11 + $0x324] ss:$16 sps:$4 sm:$0xff]   ;;  %v11406_v50 = vld [vmem:[#allocation11 + $0x32c] ss:$16 sps:$4 sm:$0xff]  }
 0x3ea   :  { %8580 = vmatprep.subr.bf16.mxu1 %v11340_v51  ;;  %v11401_v51 = vld [vmem:[#allocation11 + $0x320] ss:$16 sps:$4 sm:$0xff]  }
 0x3ec   :  { %8377 = vmatpush1.bf16.msra.mxu0 %v11335_v56  ;;  %v11409_v56 = vld [vmem:[#allocation11 + $0x344] ss:$16 sps:$4 sm:$0xff]  }
 0x3ed   :  { %8581 = vmatpush1.bf16.msra.mxu1 %v11338_v15  ;;  %8378 = vmatprep.subr.bf16.mxu0 %v11343_v45  ;;  %v11412_v15 = vld [vmem:[#allocation11 + $0x34c] ss:$16 sps:$4 sm:$0xff]   ;;  %v11407_v45 = vld [vmem:[#allocation11 + $0x340] ss:$16 sps:$4 sm:$0xff]  }
 0x3ee   :  { %8582 = vmatprep.subr.bf16.mxu1 %v11346_v59  ;;  %v11410_v59 = vld [vmem:[#allocation11 + $0x348] ss:$16 sps:$4 sm:$0xff]  }
 0x3f0   :  { %8379 = vmatpush1.bf16.msra.mxu0 %v11341_v10  ;;  %v11418_v10 = vld [vmem:[#allocation11 + $0x36c] ss:$16 sps:$4 sm:$0xff]  }
 0x3f1   :  { %8583 = vmatpush1.bf16.msra.mxu1 %v11344_v3  ;;  %8399 = vmatprep.subr.bf16.mxu0 %v11349_v6  ;;  %v11413_v3 = vld [vmem:[#allocation11 + $0x360] ss:$16 sps:$4 sm:$0xff]   ;;  %v11416_v6 = vld [vmem:[#allocation11 + $0x368] ss:$16 sps:$4 sm:$0xff]  }
 0x3f2   :  { %8603 = vmatprep.subr.bf16.mxu1 %v11352_v2  ;;  %v11424_v2 = vld [vmem:[#allocation11 + $0x38c] ss:$16 sps:$4 sm:$0xff]  }
 0x3f3   :  { %8381 = vmatmul.mubr.bf16.vlgmr.msra.gmra.mrb[16].mxu0 %v12099_v62 }
 0x3f4   :  { %8585 = vmatmul.mubr.bf16.vlgmr.msra.gmra.mrb[16].mxu1 %v12099_v62  ;;  %8390 = vmatprep.mubr.bf16.mxu0 %v6783_v57  ;;  %v11370_v62 = vld [vmem:[#allocation11 + $0x26c] ss:$16 sps:$4 sm:$0xff]  }
 0x3f5   :  { %8400 = vmatpush1.bf16.msra.mxu0 %v11347_v61  ;;  %8594 = vmatprep.mubr.bf16.mxu1 %v6783_v57  ;;  %v11422_v61 = vld [vmem:[#allocation11 + $0x388] ss:$16 sps:$4 sm:$0xff]   ;;  %v11425_v57 = vld [vmem:[#allocation11 + $0x3a0] ss:$16 sps:$4 sm:$0xff]  }
 0x3f6   :  { %8604 = vmatpush1.bf16.msra.mxu1 %v11350_v7  ;;  %8401 = vmatprep.subr.bf16.mxu0 %v11355_v8  ;;  %v11430_v7 = vld [vmem:[#allocation11 + $0x3ac] ss:$16 sps:$4 sm:$0xff]   ;;  %v11428_v8 = vld [vmem:[#allocation11 + $0x3a8] ss:$16 sps:$4 sm:$0xff]  }
 0x3f7   :  { %8605 = vmatprep.subr.bf16.mxu1 %v11358_v53  ;;  %v11433_v53 = vld [vmem:[#allocation11 + $0x3c4] ss:$16 sps:$4 sm:$0xff]  }
 0x3f9   :  { %8402 = vmatpush1.bf16.msra.mxu0 %v11353_v1  ;;  %v11436_v1 = vld [vmem:[#allocation11 + $0x3cc] ss:$16 sps:$4 sm:$0xff]  }
 0x3fa   :  { %8606 = vmatpush1.bf16.msra.mxu1 %v11356_v60  ;;  %8403 = vmatprep.subr.bf16.mxu0 %v11361_v27  ;;  %v10938_v60 = vadd.f32 %v12108_v9, %v12083_v42  ;;  %v11434_v27 = vld [vmem:[#allocation11 + $0x3c8] ss:$16 sps:$4 sm:$0xff]   ;;  %v10937_v42 = vadd.f32 %v12102_v0, %v12048_v4  ;;  %v11448_v9 = vld [vmem:[#allocation11 + $0x40c] ss:$16 sps:$4 sm:$0xff]   ;;  %v11449_v4 = vld [vmem:[#allocation11 + $0x420] ss:$16 sps:$4 sm:$0xff]  }
 0x3fb   :  { %8391 = vmatmul.mubr.bf16.gmra.mrb[20].mxu0 %v6782_v13  ;;  %8607 = vmatprep.subr.bf16.mxu1 %v11364_v12  ;;  %v11439_v12 = vld [vmem:[#allocation11 + $0x3e4] ss:$16 sps:$4 sm:$0xff]  }
 0x3fc   :  { %8595 = vmatmul.mubr.bf16.gmra.mrb[20].mxu1 %v6782_v13  ;;  %8431 = vmatprep.mubr.bf16.mxu0 %v12125_v30  ;;  %v11442_v13 = vld [vmem:[#allocation11 + $0x3ec] ss:$16 sps:$4 sm:$0xff]   ;;  %vm6720_vm10 = vcmp.ge.f32.partialorder %v10938_v60, 0.0  ;;  %vm6719_vm11 = vcmp.ge.f32.partialorder %v10937_v42, 0.0 }
 0x3fd   :  { %8404 = vmatpush1.bf16.msra.mxu0 %v11359_v16  ;;  %8635 = vmatprep.mubr.bf16.mxu1 %v12125_v30  ;;  %v11380_v30 = vld [vmem:[#allocation11 + $0x2a8] ss:$16 sps:$4 sm:$0xff]   ;;  %v6745_v16 = vmul.f32 %v10938_v60, %v12058_v14 }
 0x3fe   :  { %8608 = vmatpush1.bf16.msra.mxu1 %v11362_v29  ;;  %8405 = vmatprep.subr.bf16.mxu0 %v11367_v21  ;;  %v11437_v29 = vld [vmem:[#allocation11 + $0x3e0] ss:$16 sps:$4 sm:$0xff]   ;;  %v11440_v21 = vld [vmem:[#allocation11 + $0x3e8] ss:$16 sps:$4 sm:$0xff]  }
 0x3ff   :  { %8609 = vmatprep.subr.bf16.mxu1 %v11370_v62  ;;  %v11445_v62 = vld [vmem:[#allocation11 + $0x404] ss:$16 sps:$4 sm:$0xff]  }
 0x401   :  { %8406 = vmatpush1.bf16.msra.mxu0 %v11365_v24  ;;  %v6769_v24 = vsel %vm6720_vm10, %v10938_v60, %v6745_v16  ;;  %v11511_v60 = vld [vmem:[#allocation11 + $0x564] ss:$16 sps:$4 sm:$0xff]   ;;  %v11520_v16 = vld [vmem:[#allocation11 + $0x58c] ss:$16 sps:$4 sm:$0xff]  }
 0x402   :  { %8610 = vmatpush1.bf16.msra.mxu1 %v11368_v25  ;;  %8407 = vmatprep.subr.bf16.mxu0 %v11373_v22  ;;  %v11443_v25 = vld [vmem:[#allocation11 + $0x400] ss:$16 sps:$4 sm:$0xff]   ;;  %v6744_v22 = vmul.f32 %v10937_v42, %v12058_v14 }
 0x403   :  { %8611 = vmatprep.subr.bf16.mxu1 %v11376_v26  ;;  %v6785_v26 = vpack.c.bf16 %v6769_v24, %v6769_v24  ;;  %v11524_v24 = vld [vmem:[#allocation11 + $0x5a8] ss:$16 sps:$4 sm:$0xff]  }
 0x404   :  { %v6768_v0 = vsel %vm6719_vm11, %v10937_v42, %v6744_v22  ;;  %v11526_v42 = vld [vmem:[#allocation11 + $0x5ac] ss:$16 sps:$4 sm:$0xff]  }
 0x405   :  { %8408 = vmatpush1.bf16.msra.mxu0 %v11371_v28  ;;  %v11446_v28 = vld [vmem:[#allocation11 + $0x408] ss:$16 sps:$4 sm:$0xff]   ;;  %v11532_v22 = vld [vmem:[#allocation11 + $0x5cc] ss:$16 sps:$4 sm:$0xff]  }
 0x406   :  { %8612 = vmatpush1.bf16.msra.mxu1 %v11374_v31  ;;  %8409 = vmatprep.subr.bf16.mxu0 %v11379_v32  ;;  %v11451_v31 = vld [vmem:[#allocation11 + $0x424] ss:$16 sps:$4 sm:$0xff]   ;;  %v11454_v32 = vld [vmem:[#allocation11 + $0x42c] ss:$16 sps:$4 sm:$0xff]  }
 0x407   :  { %8613 = vmatprep.subr.bf16.mxu1 %v11382_v33  ;;  %v11452_v33 = vld [vmem:[#allocation11 + $0x428] ss:$16 sps:$4 sm:$0xff]  }
 0x409   :  { %8410 = vmatpush1.bf16.msra.mxu0 %v11377_v34  ;;  %v11457_v34 = vld [vmem:[#allocation11 + $0x444] ss:$16 sps:$4 sm:$0xff]  }
 0x40a   :  { %8614 = vmatpush1.bf16.msra.mxu1 %v11380_v30  ;;  %8411 = vmatprep.subr.bf16.mxu0 %v11385_v23  ;;  %v11460_v30 = vld [vmem:[#allocation11 + $0x44c] ss:$16 sps:$4 sm:$0xff]   ;;  %v6784_v23 = vpack.c.bf16 %v6768_v0, %v6768_v0  ;;  %v11536_v0 = vld [vmem:[#allocation11 + $0x5e8] ss:$16 sps:$4 sm:$0xff]  }
 0x40b   :  { %8615 = vmatprep.subr.bf16.mxu1 %v11388_v39  ;;  %v11455_v39 = vld [vmem:[#allocation11 + $0x440] ss:$16 sps:$4 sm:$0xff]  }
 0x40d   :  { %8412 = vmatpush1.bf16.msra.mxu0 %v11383_v35  ;;  %v11458_v35 = vld [vmem:[#allocation11 + $0x448] ss:$16 sps:$4 sm:$0xff]  }
 0x40e   :  { %8616 = vmatpush1.bf16.msra.mxu1 %v11386_v36  ;;  %8413 = vmatprep.subr.bf16.mxu0 %v11391_v37  ;;  %v11463_v36 = vld [vmem:[#allocation11 + $0x464] ss:$16 sps:$4 sm:$0xff]   ;;  %v11461_v37 = vld [vmem:[#allocation11 + $0x460] ss:$16 sps:$4 sm:$0xff]  }
 0x40f   :  { %8617 = vmatprep.subr.bf16.mxu1 %v11394_v38  ;;  %v11464_v38 = vld [vmem:[#allocation11 + $0x468] ss:$16 sps:$4 sm:$0xff]  }
 0x411   :  { %8414 = vmatpush1.bf16.msra.mxu0 %v11389_v40  ;;  %v11469_v40 = vld [vmem:[#allocation11 + $0x484] ss:$16 sps:$4 sm:$0xff]  }
 0x412   :  { %8618 = vmatpush1.bf16.msra.mxu1 %v11392_v44  ;;  %8415 = vmatprep.subr.bf16.mxu0 %v11397_v47  ;;  %v11472_v44 = vld [vmem:[#allocation11 + $0x48c] ss:$16 sps:$4 sm:$0xff]   ;;  %v11467_v47 = vld [vmem:[#allocation11 + $0x480] ss:$16 sps:$4 sm:$0xff]  }
 0x413   :  { %8619 = vmatprep.subr.bf16.mxu1 %v11400_v43  ;;  %v11470_v43 = vld [vmem:[#allocation11 + $0x488] ss:$16 sps:$4 sm:$0xff]  }
 0x415   :  { %8416 = vmatpush1.bf16.msra.mxu0 %v11395_v58  ;;  %v11475_v58 = vld [vmem:[#allocation11 + $0x4a4] ss:$16 sps:$4 sm:$0xff]  }
 0x416   :  { %8620 = vmatpush1.bf16.msra.mxu1 %v11398_v48  ;;  %8417 = vmatprep.subr.bf16.mxu0 %v11403_v49  ;;  %v11478_v48 = vld [vmem:[#allocation11 + $0x4ac] ss:$16 sps:$4 sm:$0xff]   ;;  %v11473_v49 = vld [vmem:[#allocation11 + $0x4a0] ss:$16 sps:$4 sm:$0xff]  }
 0x417   :  { %8621 = vmatprep.subr.bf16.mxu1 %v11406_v50  ;;  %v11476_v50 = vld [vmem:[#allocation11 + $0x4a8] ss:$16 sps:$4 sm:$0xff]  }
 0x419   :  { %8418 = vmatpush1.bf16.msra.mxu0 %v11401_v51  ;;  %v11481_v51 = vld [vmem:[#allocation11 + $0x4c4] ss:$16 sps:$4 sm:$0xff]  }
 0x41a   :  { %8622 = vmatpush1.bf16.msra.mxu1 %v11404_v55  ;;  %8419 = vmatprep.subr.bf16.mxu0 %v11409_v56  ;;  %v11484_v55 = vld [vmem:[#allocation11 + $0x4cc] ss:$16 sps:$4 sm:$0xff]   ;;  %v11479_v56 = vld [vmem:[#allocation11 + $0x4c0] ss:$16 sps:$4 sm:$0xff]  }
 0x41b   :  { %8623 = vmatprep.subr.bf16.mxu1 %v11412_v15  ;;  %v11482_v15 = vld [vmem:[#allocation11 + $0x4c8] ss:$16 sps:$4 sm:$0xff]  }
 0x41d   :  { %8420 = vmatpush1.bf16.msra.mxu0 %v11407_v45  ;;  %v11487_v45 = vld [vmem:[#allocation11 + $0x4e4] ss:$16 sps:$4 sm:$0xff]  }
 0x41e   :  { %8624 = vmatpush1.bf16.msra.mxu1 %v11410_v59  ;;  %8421 = vmatprep.subr.bf16.mxu0 %v11415_v20  ;;  %v11490_v59 = vld [vmem:[#allocation11 + $0x4ec] ss:$16 sps:$4 sm:$0xff]   ;;  %v11485_v20 = vld [vmem:[#allocation11 + $0x4e0] ss:$16 sps:$4 sm:$0xff]  }
 0x41f   :  { %8625 = vmatprep.subr.bf16.mxu1 %v11418_v10  ;;  %v11488_v10 = vld [vmem:[#allocation11 + $0x4e8] ss:$16 sps:$4 sm:$0xff]  }
 0x421   :  { %8422 = vmatpush1.bf16.msra.mxu0 %v11413_v3  ;;  %v11493_v3 = vld [vmem:[#allocation11 + $0x504] ss:$16 sps:$4 sm:$0xff]  }
 0x422   :  { %8626 = vmatpush1.bf16.msra.mxu1 %v11416_v6  ;;  %8423 = vmatprep.subr.bf16.mxu0 %v11421_v41  ;;  %v11496_v6 = vld [vmem:[#allocation11 + $0x50c] ss:$16 sps:$4 sm:$0xff]   ;;  %v11491_v41 = vld [vmem:[#allocation11 + $0x500] ss:$16 sps:$4 sm:$0xff]  }
 0x423   :  { %8627 = vmatprep.subr.bf16.mxu1 %v11424_v2  ;;  %v11494_v2 = vld [vmem:[#allocation11 + $0x508] ss:$16 sps:$4 sm:$0xff]  }
 0x425   :  { %8424 = vmatpush1.bf16.msra.mxu0 %v11419_v5  ;;  %v11499_v5 = vld [vmem:[#allocation11 + $0x524] ss:$16 sps:$4 sm:$0xff]  }
 0x426   :  { %8628 = vmatpush1.bf16.msra.mxu1 %v11422_v61  ;;  %8425 = vmatprep.subr.bf16.mxu0 %v11427_v63  ;;  %v11502_v61 = vld [vmem:[#allocation11 + $0x52c] ss:$16 sps:$4 sm:$0xff]   ;;  %v11497_v63 = vld [vmem:[#allocation11 + $0x520] ss:$16 sps:$4 sm:$0xff]  }
 0x427   :  { %8629 = vmatprep.subr.bf16.mxu1 %v11430_v7  ;;  %v11500_v7 = vld [vmem:[#allocation11 + $0x528] ss:$16 sps:$4 sm:$0xff]  }
 0x429   :  { %8426 = vmatpush1.bf16.msra.mxu0 %v11425_v57  ;;  %v11505_v57 = vld [vmem:[#allocation11 + $0x544] ss:$16 sps:$4 sm:$0xff]  }
 0x42a   :  { %8630 = vmatpush1.bf16.msra.mxu1 %v11428_v8  ;;  %8427 = vmatprep.subr.bf16.mxu0 %v11433_v53  ;;  %v11508_v8 = vld [vmem:[#allocation11 + $0x54c] ss:$16 sps:$4 sm:$0xff]   ;;  %v11503_v53 = vld [vmem:[#allocation11 + $0x540] ss:$16 sps:$4 sm:$0xff]  }
 0x42b   :  { %8631 = vmatprep.subr.bf16.mxu1 %v11436_v1  ;;  %v11506_v1 = vld [vmem:[#allocation11 + $0x548] ss:$16 sps:$4 sm:$0xff]  }
 0x42d   :  { %8428 = vmatpush1.bf16.msra.mxu0 %v11431_v11  ;;  %v11514_v11 = vld [vmem:[#allocation11 + $0x56c] ss:$16 sps:$4 sm:$0xff]  }
 0x42e   :  { %8632 = vmatpush1.bf16.msra.mxu1 %v11434_v27  ;;  %8429 = vmatprep.subr.bf16.mxu0 %v11439_v12  ;;  %v11509_v27 = vld [vmem:[#allocation11 + $0x560] ss:$16 sps:$4 sm:$0xff]   ;;  %v11512_v12 = vld [vmem:[#allocation11 + $0x568] ss:$16 sps:$4 sm:$0xff]  }
 0x42f   :  { %8633 = vmatprep.subr.bf16.mxu1 %v11442_v13  ;;  %v11517_v13 = vld [vmem:[#allocation11 + $0x584] ss:$16 sps:$4 sm:$0xff]  }
 0x431   :  { %8430 = vmatpush1.bf16.msra.mxu0 %v11437_v29  ;;  %v11515_v29 = vld [vmem:[#allocation11 + $0x580] ss:$16 sps:$4 sm:$0xff]  }
 0x432   :  { %8634 = vmatpush1.bf16.msra.mxu1 %v11440_v21  ;;  %8450 = vmatprep.subr.bf16.mxu0 %v11445_v62  ;;  %v11518_v21 = vld [vmem:[#allocation11 + $0x588] ss:$16 sps:$4 sm:$0xff]   ;;  %v11523_v62 = vld [vmem:[#allocation11 + $0x5a4] ss:$16 sps:$4 sm:$0xff]  }
 0x433   :  { %8654 = vmatprep.subr.bf16.mxu1 %v11448_v9  ;;  %v11521_v9 = vld [vmem:[#allocation11 + $0x5a0] ss:$16 sps:$4 sm:$0xff]  }
 0x434   :  { %8432 = vmatmul.mubr.bf16.vlgmr.msra.gmra.mrb[16].mxu0 %v12112_v18 }
 0x435   :  { %8636 = vmatmul.mubr.bf16.vlgmr.msra.gmra.mrb[16].mxu1 %v12112_v18  ;;  %8441 = vmatprep.mubr.bf16.mxu0 %v6785_v26  ;;  %v11466_v18 = vld [vmem:[#allocation11 + $0x46c] ss:$16 sps:$4 sm:$0xff]  }
 0x436   :  { %8645 = vmatprep.mubr.bf16.mxu1 %v6785_v26  ;;  %8451 = vmatpush1.bf16.msra.mxu0 %v11443_v25  ;;  %v11529_v25 = vld [vmem:[#allocation11 + $0x5c4] ss:$16 sps:$4 sm:$0xff]   ;;  %v11527_v26 = vld [vmem:[#allocation11 + $0x5c0] ss:$16 sps:$4 sm:$0xff]  }
 0x437   :  { %8655 = vmatpush1.bf16.msra.mxu1 %v11446_v28  ;;  %8452 = vmatprep.subr.bf16.mxu0 %v11451_v31  ;;  %v11530_v28 = vld [vmem:[#allocation11 + $0x5c8] ss:$16 sps:$4 sm:$0xff]   ;;  %v11535_v31 = vld [vmem:[#allocation11 + $0x5e4] ss:$16 sps:$4 sm:$0xff]  }
 0x438   :  { %8656 = vmatprep.subr.bf16.mxu1 %v11454_v32  ;;  %v11538_v32 = vld [vmem:[#allocation11 + $0x5ec] ss:$16 sps:$4 sm:$0xff]  }
 0x43a   :  { %8453 = vmatpush1.bf16.msra.mxu0 %v11449_v4  ;;  %v11533_v4 = vld [vmem:[#allocation11 + $0x5e0] ss:$16 sps:$4 sm:$0xff]  }
 0x43b   :  { %8657 = vmatpush1.bf16.msra.mxu1 %v11452_v33  ;;  %8454 = vmatprep.subr.bf16.mxu0 %v11457_v34  ;;  %v11541_v33 = vld [vmem:[#allocation11 + $0x604] ss:$16 sps:$4 sm:$0xff]   ;;  %v11544_v34 = vld [vmem:[#allocation11 + $0x60c] ss:$16 sps:$4 sm:$0xff]  }
 0x43c   :  { %8442 = vmatmul.mubr.bf16.gmra.mrb[20].mxu0 %v6784_v23  ;;  %8658 = vmatprep.subr.bf16.mxu1 %v11460_v30  ;;  %v978_v30 = vsub.s32 4, %v12035_v46 }
 0x43d   :  { %8646 = vmatmul.mubr.bf16.gmra.mrb[20].mxu1 %v6784_v23  ;;  %v986_v23 = vsub.s32 6, %v12035_v46 }
 0x43e   :  { %8455 = vmatpush1.bf16.msra.mxu0 %v11455_v39  ;;  %v982_v39 = vsub.s32 5, %v12035_v46 }
 0x43f   :  { %8659 = vmatpush1.bf16.msra.mxu1 %v11458_v35  ;;  %8456 = vmatprep.subr.bf16.mxu0 %v11463_v36  ;;  %v990_v35 = vsub.s32 7, %v12035_v46  ;;  %v11681_v36 = vld [vmem:[#allocation9] sm:$0xff] }
 0x440   :  { %8660 = vmatprep.subr.bf16.mxu1 %v11466_v18  ;;  %v979_v18 = vrot.slane %v11681_v36, %v978_v30  ;;  %v11547_v30 = vld [vmem:[#allocation11 + $0x624] ss:$16 sps:$4 sm:$0xff]  }
 0x442   :  { %8457 = vmatpush1.bf16.msra.mxu0 %v11461_v37  ;;  %v12167_v37 = vrot.slane %v11681_v36, %v986_v23  ;;  %v11550_v23 = vld [vmem:[#allocation11 + $0x62c] ss:$16 sps:$4 sm:$0xff]  }
 0x443   :  { %8661 = vmatpush1.bf16.msra.mxu1 %v11464_v38  ;;  %8458 = vmatprep.subr.bf16.mxu0 %v11469_v40  ;;  %v983_v38 = vrot.slane %v11681_v36, %v982_v39  ;;  %v12169_v40 = vrot.slane %v11681_v36, %v990_v35 }
 0x444   :  { %8662 = vmatprep.subr.bf16.mxu1 %v11472_v44 }
 0x446   :  { %8459 = vmatpush1.bf16.msra.mxu0 %v11467_v47 }
 0x447   :  { %8663 = vmatpush1.bf16.msra.mxu1 %v11470_v43  ;;  %8460 = vmatprep.subr.bf16.mxu0 %v11475_v58 }
 0x448   :  { %8664 = vmatprep.subr.bf16.mxu1 %v11478_v48 }
 0x44a   :  { %8461 = vmatpush1.bf16.msra.mxu0 %v11473_v49 }
 0x44b   :  { %8665 = vmatpush1.bf16.msra.mxu1 %v11476_v50  ;;  %8462 = vmatprep.subr.bf16.mxu0 %v11481_v51 }
 0x44c   :  { %8666 = vmatprep.subr.bf16.mxu1 %v11484_v55 }
 0x44e   :  { %8463 = vmatpush1.bf16.msra.mxu0 %v11479_v56 }
 0x44f   :  { %8667 = vmatpush1.bf16.msra.mxu1 %v11482_v15  ;;  %8464 = vmatprep.subr.bf16.mxu0 %v11487_v45 }
 0x450   :  { %8668 = vmatprep.subr.bf16.mxu1 %v11490_v59 }
 0x452   :  { %8465 = vmatpush1.bf16.msra.mxu0 %v11485_v20 }
 0x453   :  { %8669 = vmatpush1.bf16.msra.mxu1 %v11488_v10  ;;  %8466 = vmatprep.subr.bf16.mxu0 %v11493_v3 }
 0x454   :  { %8670 = vmatprep.subr.bf16.mxu1 %v11496_v6 }
 0x456   :  { %8467 = vmatpush1.bf16.msra.mxu0 %v11491_v41 }
 0x457   :  { %8671 = vmatpush1.bf16.msra.mxu1 %v11494_v2  ;;  %8468 = vmatprep.subr.bf16.mxu0 %v11499_v5 }
 0x458   :  { %8672 = vmatprep.subr.bf16.mxu1 %v11502_v61 }
 0x45a   :  { %8469 = vmatpush1.bf16.msra.mxu0 %v11497_v63 }
 0x45b   :  { %8673 = vmatpush1.bf16.msra.mxu1 %v11500_v7  ;;  %8470 = vmatprep.subr.bf16.mxu0 %v11505_v57 }
 0x45c   :  { %8674 = vmatprep.subr.bf16.mxu1 %v11508_v8 }
 0x45e   :  { %8471 = vmatpush1.bf16.msra.mxu0 %v11503_v53 }
 0x45f   :  { %8675 = vmatpush1.bf16.msra.mxu1 %v11506_v1  ;;  %8472 = vmatprep.subr.bf16.mxu0 %v11511_v60 }
 0x460   :  { %8676 = vmatprep.subr.bf16.mxu1 %v11514_v11 }
 0x462   :  { %8473 = vmatpush1.bf16.msra.mxu0 %v11509_v27 }
 0x463   :  { %8677 = vmatpush1.bf16.msra.mxu1 %v11512_v12  ;;  %8474 = vmatprep.subr.bf16.mxu0 %v11517_v13 }
 0x464   :  { %8678 = vmatprep.subr.bf16.mxu1 %v11520_v16 }
 0x466   :  { %8475 = vmatpush1.bf16.msra.mxu0 %v11515_v29 }
 0x467   :  { %8679 = vmatpush1.bf16.msra.mxu1 %v11518_v21  ;;  %8476 = vmatprep.subr.bf16.mxu0 %v11523_v62 }
 0x468   :  { %8680 = vmatprep.subr.bf16.mxu1 %v11526_v42 }
 0x46a   :  { %8477 = vmatpush1.bf16.msra.mxu0 %v11521_v9 }
 0x46b   :  { %8681 = vmatpush1.bf16.msra.mxu1 %v11524_v24  ;;  %8478 = vmatprep.subr.bf16.mxu0 %v11529_v25 }
 0x46c   :  { %8682 = vmatprep.subr.bf16.mxu1 %v11532_v22 }
 0x46e   :  { %8479 = vmatpush1.bf16.msra.mxu0 %v11527_v26 }
 0x46f   :  { %8683 = vmatpush1.bf16.msra.mxu1 %v11530_v28  ;;  %8480 = vmatprep.subr.bf16.mxu0 %v11535_v31 }
 0x470   :  { %8684 = vmatprep.subr.bf16.mxu1 %v11538_v32 }
 0x472   :  { %8481 = vmatpush1.bf16.msra.mxu0 %v11533_v4 }
 0x473   :  { %8685 = vmatpush1.bf16.msra.mxu1 %v11536_v0  ;;  %8501 = vmatprep.subr.bf16.mxu0 %v11541_v33  ;;  %v11539_v0 = vld [vmem:[#allocation11 + $0x600] ss:$16 sps:$4 sm:$0xff]   ;;  %v11542_v33 = vld [vmem:[#allocation11 + $0x608] ss:$16 sps:$4 sm:$0xff]  }
 0x474   :  { %8705 = vmatprep.subr.bf16.mxu1 %v11544_v34 }
 0x486   :  { %v6326_v44 = vpop.f32.mrb[8].mxu0  ;;  %v6683_v43 = vpop.f32.mrb[8].mxu1 }
 0x487   :  { %v10939_v47 = vadd.f32 %v6326_v44, %v979_v18  ;;  %v6328_v58 = vpop.f32.mrb[9].mxu0  ;;  %v10945_v48 = vadd.f32 %v6683_v43, %v12167_v37  ;;  %v6685_v50 = vpop.f32.mrb[9].mxu1  ;;  %v11553_v44 = vld [vmem:[#allocation11 + $0x644] ss:$16 sps:$4 sm:$0xff]  }
 0x488   :  { %v10940_v49 = vadd.f32 %v6328_v58, %v983_v38  ;;  %v6330_v51 = vpop.f32.mrb[10].mxu0  ;;  %v10946_v56 = vadd.f32 %v6685_v50, %v12169_v40  ;;  %v6687_v45 = vpop.f32.mrb[10].mxu1  ;;  %v11551_v58 = vld [vmem:[#allocation11 + $0x640] ss:$16 sps:$4 sm:$0xff]   ;;  %v11559_v50 = vld [vmem:[#allocation11 + $0x664] ss:$16 sps:$4 sm:$0xff]  }
 0x489   :  { %v6730_v55 = vmul.f32 %v10939_v47, %v12058_v14  ;;  %v10941_v15 = vadd.f32 %v6330_v51, %v979_v18  ;;  %v6332_v59 = vpop.f32.mrb[11].mxu0  ;;  %vm6705_vm12 = vcmp.ge.f32.partialorder %v10939_v47, 0.0  ;;  %v6689_v20 = vpop.f32.mrb[11].mxu1  ;;  %vm6707_vm13 = vcmp.ge.f32.partialorder %v10945_v48, 0.0  ;;  %v11562_v51 = vld [vmem:[#allocation11 + $0x66c] ss:$16 sps:$4 sm:$0xff]  }
 0x48a   :  { %v6732_v10 = vmul.f32 %v10945_v48, %v12058_v14  ;;  %vm6706_vm15 = vcmp.ge.f32.partialorder %v10940_v49, 0.0  ;;  %v10947_v6 = vadd.f32 %v6687_v45, %v12167_v37  ;;  %v10942_v41 = vadd.f32 %v6332_v59, %v983_v38  ;;  %v11568_v45 = vld [vmem:[#allocation11 + $0x68c] ss:$16 sps:$4 sm:$0xff]   ;;  %v11563_v59 = vld [vmem:[#allocation11 + $0x680] ss:$16 sps:$4 sm:$0xff]  }
 0x48b   :  { %vm6713_vm14 = vcmp.ge.f32.partialorder %v10941_v15, 0.0  ;;  %v6738_v3 = vmul.f32 %v10941_v15, %v12058_v14  ;;  %v6754_v2 = vsel %vm6705_vm12, %v10939_v47, %v6730_v55  ;;  %v6731_v5 = vmul.f32 %v10940_v49, %v12058_v14  ;;  %v11556_v47 = vld [vmem:[#allocation11 + $0x64c] ss:$16 sps:$4 sm:$0xff]   ;;  %v11557_v55 = vld [vmem:[#allocation11 + $0x660] ss:$16 sps:$4 sm:$0xff]  }
 0x48c   :  { %v6733_v61 = vmul.f32 %v10946_v56, %v12058_v14  ;;  %v10948_v63 = vadd.f32 %v6689_v20, %v12169_v40  ;;  %vm6715_vm0 = vcmp.ge.f32.partialorder %v10947_v6, 0.0  ;;  %v6740_v57 = vmul.f32 %v10947_v6, %v12058_v14  ;;  %v11566_v20 = vld [vmem:[#allocation11 + $0x688] ss:$16 sps:$4 sm:$0xff]  }
 0x48d   :  { %v6762_v7 = vsel %vm6713_vm14, %v10941_v15, %v6738_v3  ;;  %vm6714_vm1 = vcmp.ge.f32.partialorder %v10942_v41, 0.0  ;;  %v6739_v1 = vmul.f32 %v10942_v41, %v12058_v14  ;;  %v6756_v12 = vsel %vm6707_vm13, %v10945_v48, %v6732_v10  ;;  %v11554_v48 = vld [vmem:[#allocation11 + $0x648] ss:$16 sps:$4 sm:$0xff]   ;;  %v11565_v15 = vld [vmem:[#allocation11 + $0x684] ss:$16 sps:$4 sm:$0xff]  }
 0x48e   :  { %v6336_v8 = vpop.f32.mrb[12].mxu0  ;;  %v6778_v53 = vpack.c.bf16 %v6762_v7, %v6754_v2  ;;  %vm6716_vm2 = vcmp.ge.f32.partialorder %v10948_v63, 0.0  ;;  %v6741_v60 = vmul.f32 %v10948_v63, %v12058_v14  ;;  %v12183_v11 = vpop.f32.mrb[12].mxu1  ;;  %vm6708_vm3 = vcmp.ge.f32.partialorder %v10946_v56, 0.0  ;;  %v11571_v10 = vld [vmem:[#allocation11 + $0x6a4] ss:$16 sps:$4 sm:$0xff]  }
 0x48f   :  { %v6338_v27 = vpop.f32.mrb[13].mxu0  ;;  %v6764_v13 = vsel %vm6715_vm0, %v10947_v6, %v6740_v57  ;;  %v12186_v29 = vpop.f32.mrb[13].mxu1  ;;  %v6763_v24 = vsel %vm6714_vm1, %v10942_v41, %v6739_v1  ;;  %v10943_v22 = vadd.f32 %v6336_v8, %v979_v18  ;;  %v6755_v31 = vsel %vm6706_vm15, %v10940_v49, %v6731_v5  ;;  %v11545_v18 = vld [vmem:[#allocation11 + $0x620] ss:$16 sps:$4 sm:$0xff]   ;;  %v11574_v3 = vld [vmem:[#allocation11 + $0x6ac] ss:$16 sps:$4 sm:$0xff]  }
 0x490   :  { %v10944_v16 = vadd.f32 %v6338_v27, %v983_v38  ;;  %v6340_v21 = vpop.f32.mrb[14].mxu0  ;;  %v12188_v62 = vpack.c.bf16 %v6764_v13, %v6756_v12  ;;  %v6697_v42 = vpop.f32.mrb[14].mxu1  ;;  %v6765_v25 = vsel %vm6716_vm2, %v10948_v63, %v6741_v60  ;;  %v6757_v32 = vsel %vm6708_vm3, %v10946_v56, %v6733_v61  ;;  %v11548_v38 = vld [vmem:[#allocation11 + $0x628] ss:$16 sps:$4 sm:$0xff]   ;;  %v11569_v6 = vld [vmem:[#allocation11 + $0x6a0] ss:$16 sps:$4 sm:$0xff]  }
 0x491   :  { %v6341_v9 = vpop.f32.mrb[15].mxu0  ;;  %v6698_v26 = vpop.f32.mrb[15].mxu1  ;;  %v6779_v4 = vpack.c.bf16 %v6763_v24, %v6755_v31  ;;  %v6781_v34 = vpack.c.bf16 %v6765_v25, %v6757_v32  ;;  %v6746_v35 = vmul.f32 %v10943_v22, %v12058_v14  ;;  %vm6721_vm5 = vcmp.ge.f32.partialorder %v10943_v22, 0.0  ;;  %v11560_v56 = vld [vmem:[#allocation11 + $0x668] ss:$16 sps:$4 sm:$0xff]  }
 0x492   :  { %vm6722_vm4 = vcmp.ge.f32.partialorder %v10944_v16, 0.0  ;;  %v6747_v28 = vmul.f32 %v10944_v16, %v12058_v14  ;;  %v11572_v41 = vld [vmem:[#allocation11 + $0x6a8] ss:$16 sps:$4 sm:$0xff]   ;;  %v11577_v2 = vld [vmem:[#allocation11 + $0x6c4] ss:$16 sps:$4 sm:$0xff]  }
 0x493   :  { %8482 = vmatprep.mubr.bf16.mxu0 %v6779_v4  ;;  %8686 = vmatprep.mubr.bf16.mxu1 %v6779_v4  ;;  %v6770_v43 = vsel %vm6721_vm5, %v10943_v22, %v6746_v35  ;;  %v11580_v5 = vld [vmem:[#allocation11 + $0x6cc] ss:$16 sps:$4 sm:$0xff]   ;;  %v11575_v61 = vld [vmem:[#allocation11 + $0x6c0] ss:$16 sps:$4 sm:$0xff]   ;;  %v11578_v63 = vld [vmem:[#allocation11 + $0x6c8] ss:$16 sps:$4 sm:$0xff]  }
 0x494   :  { %v6771_v39 = vsel %vm6722_vm4, %v10944_v16, %v6747_v28  ;;  %8483 = vmatmul.mubr.bf16.vlgmr.msra.gmra.mrb[16].mxu0 %v6778_v53  ;;  %8687 = vmatmul.mubr.bf16.vlgmr.msra.gmra.mrb[16].mxu1 %v6778_v53  ;;  %v6786_v49 = vpack.c.bf16 %v6770_v43, %v6770_v43  ;;  %v11583_v7 = vld [vmem:[#allocation11 + $0x6e4] ss:$16 sps:$4 sm:$0xff]   ;;  %v11586_v57 = vld [vmem:[#allocation11 + $0x6ec] ss:$16 sps:$4 sm:$0xff]   ;;  %v11581_v8 = vld [vmem:[#allocation11 + $0x6e0] ss:$16 sps:$4 sm:$0xff]  }
 0x495   :  { %v6787_v36 = vpack.c.bf16 %v6771_v39, %v6771_v39  ;;  %8502 = vmatpush1.bf16.msra.mxu0 %v11539_v0  ;;  %8706 = vmatpush1.bf16.msra.mxu1 %v11542_v33  ;;  %v11584_v53 = vld [vmem:[#allocation11 + $0x6e8] ss:$16 sps:$4 sm:$0xff]   ;;  %v11589_v1 = vld [vmem:[#allocation11 + $0x704] ss:$16 sps:$4 sm:$0xff]   ;;  %v11592_v60 = vld [vmem:[#allocation11 + $0x70c] ss:$16 sps:$4 sm:$0xff]  }
 0x496   :  { %8503 = vmatprep.subr.bf16.mxu0 %v11547_v30  ;;  %8707 = vmatprep.subr.bf16.mxu1 %v11550_v23  ;;  %v11587_v27 = vld [vmem:[#allocation11 + $0x700] ss:$16 sps:$4 sm:$0xff]   ;;  %v11590_v12 = vld [vmem:[#allocation11 + $0x708] ss:$16 sps:$4 sm:$0xff]   ;;  %v11595_v13 = vld [vmem:[#allocation11 + $0x724] ss:$16 sps:$4 sm:$0xff]  }
 0x497   :  { %8492 = vmatprep.mubr.bf16.mxu0 %v6787_v36  ;;  %8696 = vmatprep.mubr.bf16.mxu1 %v6787_v36  ;;  %v11598_v16 = vld [vmem:[#allocation11 + $0x72c] ss:$16 sps:$4 sm:$0xff]   ;;  %v11593_v21 = vld [vmem:[#allocation11 + $0x720] ss:$16 sps:$4 sm:$0xff]   ;;  %v11596_v42 = vld [vmem:[#allocation11 + $0x728] ss:$16 sps:$4 sm:$0xff]  }
 0x498   :  { %v11601_v9 = vld [vmem:[#allocation11 + $0x744] ss:$16 sps:$4 sm:$0xff]   ;;  %v11604_v24 = vld [vmem:[#allocation11 + $0x74c] ss:$16 sps:$4 sm:$0xff]   ;;  %v11599_v25 = vld [vmem:[#allocation11 + $0x740] ss:$16 sps:$4 sm:$0xff]  }
 0x499   :  { %8504 = vmatpush1.bf16.msra.mxu0 %v11545_v18  ;;  %8708 = vmatpush1.bf16.msra.mxu1 %v11548_v38  ;;  %v11602_v22 = vld [vmem:[#allocation11 + $0x748] ss:$16 sps:$4 sm:$0xff]   ;;  %v11607_v26 = vld [vmem:[#allocation11 + $0x764] ss:$16 sps:$4 sm:$0xff]   ;;  %v11610_v28 = vld [vmem:[#allocation11 + $0x76c] ss:$16 sps:$4 sm:$0xff]   ;;  %v10950_v38 = vadd.f32 %v12186_v29, %v12169_v40  ;;  %v10949_v40 = vadd.f32 %v12183_v11, %v12167_v37 }
 0x49a   :  { %8505 = vmatprep.subr.bf16.mxu0 %v11553_v44  ;;  %8709 = vmatprep.subr.bf16.mxu1 %v11556_v47  ;;  %v11605_v31 = vld [vmem:[#allocation11 + $0x760] ss:$16 sps:$4 sm:$0xff]   ;;  %v11608_v32 = vld [vmem:[#allocation11 + $0x768] ss:$16 sps:$4 sm:$0xff]   ;;  %v11613_v4 = vld [vmem:[#allocation11 + $0x784] ss:$16 sps:$4 sm:$0xff]  }
 0x49b   :  { %v11616_v0 = vld [vmem:[#allocation11 + $0x78c] ss:$16 sps:$4 sm:$0xff]   ;;  %v11611_v33 = vld [vmem:[#allocation11 + $0x780] ss:$16 sps:$4 sm:$0xff]   ;;  %v11619_v30 = vld [vmem:[#allocation11 + $0x7a4] ss:$16 sps:$4 sm:$0xff]  }
 0x49c   :  { %8493 = vmatmul.mubr.bf16.gmra.mrb[20].mxu0 %v6786_v49  ;;  %8697 = vmatmul.mubr.bf16.gmra.mrb[20].mxu1 %v6786_v49  ;;  %v11622_v23 = vld [vmem:[#allocation11 + $0x7ac] ss:$16 sps:$4 sm:$0xff]   ;;  %v11617_v39 = vld [vmem:[#allocation11 + $0x7a0] ss:$16 sps:$4 sm:$0xff]   ;;  %v11620_v35 = vld [vmem:[#allocation11 + $0x7a8] ss:$16 sps:$4 sm:$0xff]  }
 0x49d   :  { %8506 = vmatpush1.bf16.msra.mxu0 %v11551_v58  ;;  %8710 = vmatpush1.bf16.msra.mxu1 %v11554_v48  ;;  %v11625_v36 = vld [vmem:[#allocation11 + $0x7c4] ss:$16 sps:$4 sm:$0xff]   ;;  %v11628_v18 = vld [vmem:[#allocation11 + $0x7cc] ss:$16 sps:$4 sm:$0xff]   ;;  %v11623_v44 = vld [vmem:[#allocation11 + $0x7c0] ss:$16 sps:$4 sm:$0xff]   ;;  %v6749_v48 = vmul.f32 %v10950_v38, %v12058_v14 }
 0x49e   :  { %8533 = vmatprep.mubr.bf16.mxu0 %v6781_v34  ;;  %8737 = vmatprep.mubr.bf16.mxu1 %v6781_v34  ;;  %v11614_v34 = vld [vmem:[#allocation11 + $0x788] ss:$16 sps:$4 sm:$0xff]   ;;  %v11631_v43 = vld [vmem:[#allocation11 + $0x7e4] ss:$16 sps:$4 sm:$0xff]   ;;  %v11634_v58 = vld [vmem:[#allocation11 + $0x7ec] ss:$16 sps:$4 sm:$0xff]  }
 0x49f   :  { %8507 = vmatprep.subr.bf16.mxu0 %v11559_v50  ;;  %8711 = vmatprep.subr.bf16.mxu1 %v11562_v51  ;;  %v11626_v47 = vld [vmem:[#allocation11 + $0x7c8] ss:$16 sps:$4 sm:$0xff]   ;;  %vm6724_vm6 = vcmp.ge.f32.partialorder %v10950_v38, 0.0  ;;  %v11629_v49 = vld [vmem:[#allocation11 + $0x7e0] ss:$16 sps:$4 sm:$0xff]   ;;  %v6748_v51 = vmul.f32 %v10949_v40, %v12058_v14  ;;  %vm6723_vm7 = vcmp.ge.f32.partialorder %v10949_v40, 0.0 }
 0x4a0   :  { %v11632_v50 = vld [vmem:[#allocation11 + $0x7e8] ss:$16 sps:$4 sm:$0xff]   ;;  %v6773_v29 = vsel %vm6724_vm6, %v10950_v38, %v6749_v48  ;;  %v8759_v14 = vadd.s32 8, %v12035_v46  ;;  %v8760_v11 = vadd.s32 16, %v12035_v46 }
 0x4a1   :  { %8508 = vmatpush1.bf16.msra.mxu0 %v11557_v55  ;;  %8712 = vmatpush1.bf16.msra.mxu1 %v11560_v56  ;;  %v6789_v55 = vpack.c.bf16 %v6773_v29, %v6773_v29  ;;  %v6772_v56 = vsel %vm6723_vm7, %v10949_v40, %v6748_v51  ;;  %v12204_v37 = vld [vmem:[#allocation3] ss:$0 sm:$0xff] }
 0x4a2   :  { %8509 = vmatprep.subr.bf16.mxu0 %v11565_v15  ;;  %8713 = vmatprep.subr.bf16.mxu1 %v11568_v45  ;;  %v6788_v15 = vpack.c.bf16 %v6772_v56, %v6772_v56  ;;  %v11859_v45 = vmov 0.0   ;;  %vm8778_vm8 = vcmp.eq.s32.totalorder %v12204_v37, %v12035_v46  ;;  %vm8779_vm10 = vcmp.eq.s32.totalorder %v12204_v37, %v8759_v14 }
 0x4a3   :  { %vm8780_vm11 = vcmp.eq.s32.totalorder %v12204_v37, %v8760_v11 }
 0x4a5   :  { %8510 = vmatpush1.bf16.msra.mxu0 %v11563_v59  ;;  %8714 = vmatpush1.bf16.msra.mxu1 %v11566_v20  ;;  %v8761_v59 = vadd.s32 24, %v12035_v46  ;;  %v8762_v20 = vadd.s32 32, %v12035_v46 }
 0x4a6   :  { %8511 = vmatprep.subr.bf16.mxu0 %v11571_v10  ;;  %8715 = vmatprep.subr.bf16.mxu1 %v11574_v3  ;;  %v8763_v3 = vadd.s32 40, %v12035_v46 }
 0x4a7   :  { %vm8781_vm12 = vcmp.eq.s32.totalorder %v12204_v37, %v8761_v59  ;;  %vm8782_vm13 = vcmp.eq.s32.totalorder %v12204_v37, %v8762_v20 }
 0x4a8   :  { %vm8783_vm14 = vcmp.eq.s32.totalorder %v12204_v37, %v8763_v3 }
 0x4a9   :  { %8512 = vmatpush1.bf16.msra.mxu0 %v11569_v6  ;;  %8716 = vmatpush1.bf16.msra.mxu1 %v11572_v41  ;;  %v8764_v6 = vadd.s32 48, %v12035_v46  ;;  %v12224_v41 = vsel %vm8779_vm10, 1.0, %v11859_v45 }
 0x4aa   :  { %8513 = vmatprep.subr.bf16.mxu0 %v11577_v2  ;;  %8717 = vmatprep.subr.bf16.mxu1 %v11580_v5  ;;  %v12227_v2 = vsel %vm8780_vm11, 1.0, %v11859_v45  ;;  %v8830_v5 = vsel %vm8826_vm9, %v12224_v41, 0.0 }
 0x4ab   :  { %vm8784_vm15 = vcmp.eq.s32.totalorder %v12204_v37, %v8764_v6 }
 0x4ad   :  { %8514 = vmatpush1.bf16.msra.mxu0 %v11575_v61  ;;  %8718 = vmatpush1.bf16.msra.mxu1 %v11578_v63  ;;  %v8833_v61 = vsel %vm8826_vm9, %v12227_v2, 0.0  ;;  %v12234_v63 = vsel %vm8781_vm12, 1.0, %v11859_v45 }
 0x4ae   :  { %8515 = vmatprep.subr.bf16.mxu0 %v11583_v7  ;;  %8719 = vmatprep.subr.bf16.mxu1 %v11586_v57  ;;  %v12237_v7 = vsel %vm8782_vm13, 1.0, %v11859_v45  ;;  %v8765_v57 = vadd.s32 56, %v12035_v46 }
 0x4af   :  { %8834 = vadd.xlane.f32.xlu1 %v8833_v61 }
 0x4b0   :  { %vm8785_vm0 = vcmp.eq.s32.totalorder %v12204_v37, %v8765_v57 }
 0x4b1   :  { %8516 = vmatpush1.bf16.msra.mxu0 %v11581_v8  ;;  %8720 = vmatpush1.bf16.msra.mxu1 %v11584_v53  ;;  %v8766_v8 = vadd.s32 64, %v12035_v46  ;;  %v8836_v53 = vsel %vm8826_vm9, %v12234_v63, 0.0 }
 0x4b2   :  { %8517 = vmatprep.subr.bf16.mxu0 %v11589_v1  ;;  %8721 = vmatprep.subr.bf16.mxu1 %v11592_v60  ;;  %v8839_v1 = vsel %vm8826_vm9, %v12237_v7, 0.0  ;;  %v12248_v60 = vsel %vm8783_vm14, 1.0, %v11859_v45 }
 0x4b3   :  { %8837 = vadd.xlane.f32.xlu1 %v8836_v53  ;;  %vm8786_vm1 = vcmp.eq.s32.totalorder %v12204_v37, %v8766_v8 }
 0x4b5   :  { %8518 = vmatpush1.bf16.msra.mxu0 %v11587_v27  ;;  %8722 = vmatpush1.bf16.msra.mxu1 %v11590_v12  ;;  %v12251_v27 = vsel %vm8784_vm15, 1.0, %v11859_v45  ;;  %v8767_v12 = vadd.s32 72, %v12035_v46 }
 0x4b6   :  { %8519 = vmatprep.subr.bf16.mxu0 %v11595_v13  ;;  %8723 = vmatprep.subr.bf16.mxu1 %v11598_v16  ;;  %v8768_v13 = vadd.s32 80, %v12035_v46  ;;  %v8842_v16 = vsel %vm8826_vm9, %v12248_v60, 0.0 }
 0x4b7   :  { %vm8787_vm2 = vcmp.eq.s32.totalorder %v12204_v37, %v8767_v12  ;;  %8843 = vadd.xlane.f32.xlu1 %v8842_v16 }
 0x4b8   :  { %vm8788_vm3 = vcmp.eq.s32.totalorder %v12204_v37, %v8768_v13 }
 0x4b9   :  { %8520 = vmatpush1.bf16.msra.mxu0 %v11593_v21  ;;  %8724 = vmatpush1.bf16.msra.mxu1 %v11596_v42  ;;  %v8845_v21 = vsel %vm8826_vm9, %v12251_v27, 0.0  ;;  %v12262_v42 = vsel %vm8785_vm0, 1.0, %v11859_v45 }
 0x4ba   :  { %8521 = vmatprep.subr.bf16.mxu0 %v11601_v9  ;;  %8725 = vmatprep.subr.bf16.mxu1 %v11604_v24  ;;  %v12265_v9 = vsel %vm8786_vm1, 1.0, %v11859_v45  ;;  %v8769_v24 = vadd.s32 88, %v12035_v46 }
 0x4bc   :  { %vm8789_vm4 = vcmp.eq.s32.totalorder %v12204_v37, %v8769_v24 }
 0x4bd   :  { %8522 = vmatpush1.bf16.msra.mxu0 %v11599_v25  ;;  %8726 = vmatpush1.bf16.msra.mxu1 %v11602_v22  ;;  %v8770_v25 = vadd.s32 96, %v12035_v46  ;;  %v8848_v22 = vsel %vm8826_vm9, %v12262_v42, 0.0 }
 0x4be   :  { %8523 = vmatprep.subr.bf16.mxu0 %v11607_v26  ;;  %8727 = vmatprep.subr.bf16.mxu1 %v11610_v28  ;;  %v8851_v26 = vsel %vm8826_vm9, %v12265_v9, 0.0  ;;  %v12276_v28 = vsel %vm8787_vm2, 1.0, %v11859_v45 }
 0x4bf   :  { %8849 = vadd.xlane.f32.xlu1 %v8848_v22  ;;  %vm8790_vm5 = vcmp.eq.s32.totalorder %v12204_v37, %v8770_v25 }
 0x4c1   :  { %8524 = vmatpush1.bf16.msra.mxu0 %v11605_v31  ;;  %8728 = vmatpush1.bf16.msra.mxu1 %v11608_v32  ;;  %v12279_v31 = vsel %vm8788_vm3, 1.0, %v11859_v45  ;;  %v8771_v32 = vadd.s32 104, %v12035_v46 }
 0x4c2   :  { %8525 = vmatprep.subr.bf16.mxu0 %v11613_v4  ;;  %8729 = vmatprep.subr.bf16.mxu1 %v11616_v0  ;;  %v8772_v4 = vadd.s32 112, %v12035_v46  ;;  %v8854_v0 = vsel %vm8826_vm9, %v12276_v28, 0.0 }
 0x4c3   :  { %vm8791_vm6 = vcmp.eq.s32.totalorder %v12204_v37, %v8771_v32  ;;  %8855 = vadd.xlane.f32.xlu1 %v8854_v0 }
 0x4c4   :  { %vm8792_vm7 = vcmp.eq.s32.totalorder %v12204_v37, %v8772_v4 }
 0x4c5   :  { %8526 = vmatpush1.bf16.msra.mxu0 %v11611_v33  ;;  %8730 = vmatpush1.bf16.msra.mxu1 %v11614_v34  ;;  %v8857_v33 = vsel %vm8826_vm9, %v12279_v31, 0.0  ;;  %v12290_v34 = vsel %vm8789_vm4, 1.0, %v11859_v45 }
 0x4c6   :  { %8527 = vmatprep.subr.bf16.mxu0 %v11619_v30  ;;  %8731 = vmatprep.subr.bf16.mxu1 %v11622_v23  ;;  %v12293_v30 = vsel %vm8790_vm5, 1.0, %v11859_v45  ;;  %v8773_v23 = vadd.s32 120, %v12035_v46 }
 0x4c9   :  { %8528 = vmatpush1.bf16.msra.mxu0 %v11617_v39  ;;  %8732 = vmatpush1.bf16.msra.mxu1 %v11620_v35  ;;  %v8860_v39 = vsel %vm8826_vm9, %v12290_v34, 0.0  ;;  %v8863_v35 = vsel %vm8826_vm9, %v12293_v30, 0.0 }
 0x4ca   :  { %8529 = vmatprep.subr.bf16.mxu0 %v11625_v36  ;;  %8733 = vmatprep.subr.bf16.mxu1 %v11628_v18  ;;  %v12303_v36 = vsel %vm8791_vm6, 1.0, %v11859_v45  ;;  %v12306_v18 = vsel %vm8792_vm7, 1.0, %v11859_v45 }
 0x4cb   :  { %8861 = vadd.xlane.f32.xlu1 %v8860_v39  ;;  %v8866_v38 = vsel %vm8826_vm9, %v12303_v36, 0.0 }
 0x4cd   :  { %8530 = vmatpush1.bf16.msra.mxu0 %v11623_v44  ;;  %8734 = vmatpush1.bf16.msra.mxu1 %v11626_v47  ;;  %v8869_v44 = vsel %vm8826_vm9, %v12306_v18, 0.0 }
 0x4ce   :  { %8531 = vmatprep.subr.bf16.mxu0 %v11631_v43  ;;  %8735 = vmatprep.subr.bf16.mxu1 %v11634_v58  ;;  %v7046_v58 = vld [vmem:[#allocation12] sm:$0xf] }
 0x4cf   :  { %8867 = vadd.xlane.f32.xlu1 %v8866_v38  ;;  %v7051_v48 = vrot.slane %v7046_v58, %v12040_v54  ;;  %v7055_v29 = vrot.slane %v7046_v58, %v966_v17  ;;  %v7063_v51 = vrot.slane %v7046_v58, %v974_v19 }
 0x4d1   :  { %8532 = vmatpush1.bf16.msra.mxu0 %v11629_v49  ;;  %8736 = vmatpush1.bf16.msra.mxu1 %v11632_v50  ;;  %v7059_v49 = vrot.slane %v7046_v58, %v970_v52 }
 0x4d4   :  { %8534 = vmatmul.mubr.bf16.vlgmr.msra.gmra.mrb[16].mxu0 %v12188_v62  ;;  %8738 = vmatmul.mubr.bf16.vlgmr.msra.gmra.mrb[16].mxu1 %v12188_v62  ;;  %v12211_v62 = vsel %vm8778_vm8, 1.0, %v11859_v45  ;;  %vm8793_vm8 = vcmp.eq.s32.totalorder %v12204_v37, %v8773_v23 }
 0x4d5   :  { %8543 = vmatprep.mubr.bf16.mxu0 %v6789_v55  ;;  %8747 = vmatprep.mubr.bf16.mxu1 %v6789_v55  ;;  %v8827_v10 = vsel %vm8826_vm9, %v12211_v62, 0.0  ;;  %v12314_v47 = vsel %vm8793_vm8, 1.0, %v11859_v45 }
 0x4d6   :  { %8828 = vadd.xlane.f32.xlu0 %v8827_v10  ;;  %v8872_v43 = vsel %vm8826_vm9, %v12314_v47, 0.0 }
 0x4d7   :  { %8873 = vadd.xlane.f32.xlu1 %v8872_v43 }
 0x4da   :  { %8831 = vadd.xlane.f32.xlu0 %v8830_v5 }
 0x4dc   :  { %8544 = vmatmul.mubr.bf16.gmra.mrb[20].mxu0 %v6788_v15  ;;  %8748 = vmatmul.mubr.bf16.gmra.mrb[20].mxu1 %v6788_v15 }
 0x4dd   :  { %8987 = vmatprep.mubr.f32.mxu0 %v11859_v45  ;;  %9148 = vmatprep.mubr.f32.mxu1 %v11859_v45 }
 0x4de   :  { %8840 = vadd.xlane.f32.xlu0 %v8839_v1 }
 0x4e2   :  { %8846 = vadd.xlane.f32.xlu0 %v8845_v21 }
 0x4e6   :  { %8852 = vadd.xlane.f32.xlu0 %v8851_v26 }
 0x4ea   :  { %8858 = vadd.xlane.f32.xlu0 %v8857_v33 }
 0x4ee   :  { %8864 = vadd.xlane.f32.xlu0 %v8863_v35 }
 0x4f2   :  { %8870 = vadd.xlane.f32.xlu0 %v8869_v44 }
 0x5a7   :  { %v8535_v50 = vpop.f32.mrb[16].mxu0  ;;  %v8739_v40 = vpop.f32.mrb[16].mxu1 }
 0x5a8   :  { %v8537_v55 = vpop.f32.mrb[17].mxu0  ;;  %v8741_v56 = vpop.f32.mrb[17].mxu1  ;;  %v10951_v14 = vadd.f32 %v8535_v50, %v7051_v48  ;;  %v10957_v11 = vadd.f32 %v8739_v40, %v7059_v49 }
 0x5a9   :  { %v8539_v15 = vpop.f32.mrb[18].mxu0  ;;  %v8743_v37 = vpop.f32.mrb[18].mxu1  ;;  %v10952_v6 = vadd.f32 %v8537_v55, %v7055_v29  ;;  %v10958_v52 = vadd.f32 %v8741_v56, %v7063_v51 }
 0x5aa   :  { %v10953_v59 = vadd.f32 %v8539_v15, %v7051_v48  ;;  %v10959_v20 = vadd.f32 %v8743_v37, %v7059_v49  ;;  %v8541_v10 = vpop.f32.mrb[19].mxu0  ;;  %v8745_v3 = vpop.f32.mrb[19].mxu1 }
 0x5ab   :  { %v10954_v5 = vadd.f32 %v8541_v10, %v7055_v29  ;;  %v10960_v61 = vadd.f32 %v8745_v3, %v7063_v51 }
 0x5ac   :  { %v10857_v57 = vpack.c.bf16 %v10953_v59, %v10951_v14  ;;  %v10861_v8 = vpack.c.bf16 %v10959_v20, %v10957_v11 }
 0x5ad   :  { %v10855_v17 = vpack.c.bf16 %v10954_v5, %v10952_v6  ;;  %v10859_v53 = vpack.c.bf16 %v10960_v61, %v10958_v52 }
 0x5af   :  { %v8545_v46 = vpop.f32.mrb[20].mxu0  ;;  %v8749_v19 = vpop.f32.mrb[20].mxu1  ;;  %10856 = vmatprep.subr.bf16.mxu0 %v10855_v17  ;;  %10860 = vmatprep.subr.bf16.mxu1 %v10859_v53 }
 0x5b0   :  { %v12325_v1 = vadd.f32 %v8545_v46, %v7051_v48  ;;  %v12327_v12 = vadd.f32 %v8749_v19, %v7059_v49  ;;  %v8547_v13 = vpop.f32.mrb[21].mxu0  ;;  %v8751_v16 = vpop.f32.mrb[21].mxu1  ;;  %10858 = vmatpush1.bf16.msra.mxu0 %v10857_v57  ;;  %10862 = vmatpush1.bf16.msra.mxu1 %v10861_v8 }
 0x5b1   :  { %v12329_v21 = vadd.f32 %v8547_v13, %v7055_v29  ;;  %v12331_v24 = vadd.f32 %v8751_v16, %v7063_v51  ;;  %v8549_v25 = vpop.f32.mrb[22].mxu0  ;;  %v8753_v22 = vpop.f32.mrb[22].mxu1 }
 0x5b2   :  { %v9341_v26 = vmul.f32 %v12325_v1, %v12325_v1  ;;  %v8550_v32 = vpop.f32.mrb[23].mxu0  ;;  %v8754_v4 = vpop.f32.mrb[23].mxu1  ;;  %v9343_v33 = vmul.f32 %v12327_v12, %v12327_v12 }
 0x5b3   :  { %v9342_v0 = vmul.f32 %v12329_v21, %v12329_v21  ;;  %10823 = vmatmul.mubr.msk.f32.vlgmr.msra.gmra.mrb[24].mxu0 %vm8826_vm9, %v12211_v62  ;;  %10839 = vmatmul.mubr.msk.f32.vlgmr.msra.gmra.mrb[24].mxu1 %vm8826_vm9, %v12211_v62  ;;  %v9344_v39 = vmul.f32 %v12331_v24, %v12331_v24 }
 0x5b4   :  { %8993 = vmatprep.mubr.f32.mxu0 %v11859_v45  ;;  %9154 = vmatprep.mubr.f32.mxu1 %v11859_v45 }
 0x5b5   :  { %v9345_v23 = vadd.f32 %v9342_v0, %v9341_v26 }
 0x5b7   :  { %10824 = vmatmul.mubr.msk.f32.gmra.mrb[26].mxu0 %vm8826_vm9, %v12224_v41  ;;  %10840 = vmatmul.mubr.msk.f32.gmra.mrb[26].mxu1 %vm8826_vm9, %v12224_v41  ;;  %v9346_v35 = vadd.f32 %v9345_v23, %v9343_v33  ;;  %v8829_v41 = vpop.xlane.xlu0 %8828 }
 0x5b8   :  { %8999 = vmatprep.mubr.f32.mxu0 %v11859_v45  ;;  %9160 = vmatprep.mubr.f32.mxu1 %v11859_v45 }
 0x5b9   :  { %v12353_v62 = vadd.f32 %v9346_v35, %v9344_v39 }
 0x5bb   :  { %10825 = vmatmul.mubr.msk.f32.gmra.mrb[28].mxu0 %vm8826_vm9, %v12227_v2  ;;  %10841 = vmatmul.mubr.msk.f32.gmra.mrb[28].mxu1 %vm8826_vm9, %v12227_v2  ;;  %v9245_v2 = vmax.f32 %v8829_v41, 1.0 }
 0x5bc   :  { %9005 = vmatprep.mubr.f32.mxu0 %v11859_v45  ;;  %9166 = vmatprep.mubr.f32.mxu1 %v11859_v45 }
 0x5bd   :  { %11635 = vrcp.f32 %v9245_v2 }
 0x5bf   :  { %10826 = vmatmul.mubr.msk.f32.gmra.mrb[30].mxu0 %vm8826_vm9, %v12234_v63  ;;  %10842 = vmatmul.mubr.msk.f32.gmra.mrb[30].mxu1 %vm8826_vm9, %v12234_v63  ;;  %v8832_v63 = vpop.xlane.xlu0 %8831 }
 0x5c0   :  { %9011 = vmatprep.mubr.f32.mxu0 %v11859_v45  ;;  %9172 = vmatprep.mubr.f32.mxu1 %v11859_v45 }
 0x5c3   :  { %10827 = vmatmul.mubr.msk.f32.gmra.mrb[32].mxu0 %vm8826_vm9, %v12237_v7  ;;  %10843 = vmatmul.mubr.msk.f32.gmra.mrb[32].mxu1 %vm8826_vm9, %v12237_v7  ;;  %v8835_v7 = vpop.xlane.xlu1 %8834 }
 0x5c4   :  { %9017 = vmatprep.mubr.f32.mxu0 %v11859_v45  ;;  %9178 = vmatprep.mubr.f32.mxu1 %v11859_v45 }
 0x5c7   :  { %10828 = vmatmul.mubr.msk.f32.gmra.mrb[34].mxu0 %vm8826_vm9, %v12248_v60  ;;  %10844 = vmatmul.mubr.msk.f32.gmra.mrb[34].mxu1 %vm8826_vm9, %v12248_v60  ;;  %v9246_v60 = vmax.f32 %v8832_v63, 1.0 }
 0x5c8   :  { %9023 = vmatprep.mubr.f32.mxu0 %v11859_v45  ;;  %9184 = vmatprep.mubr.f32.mxu1 %v11859_v45 }
 0x5c9   :  { %11637 = vrcp.f32 %v9246_v60 }
 0x5cb   :  { %10829 = vmatmul.mubr.msk.f32.gmra.mrb[36].mxu0 %vm8826_vm9, %v12251_v27  ;;  %10845 = vmatmul.mubr.msk.f32.gmra.mrb[36].mxu1 %vm8826_vm9, %v12251_v27  ;;  %v9247_v27 = vmax.f32 %v8835_v7, 1.0 }
 0x5cc   :  { %9029 = vmatprep.mubr.f32.mxu0 %v11859_v45  ;;  %9190 = vmatprep.mubr.f32.mxu1 %v11859_v45 }
 0x5cd   :  { %11639 = vrcp.f32 %v9247_v27 }
 0x5cf   :  { %10830 = vmatmul.mubr.msk.f32.gmra.mrb[38].mxu0 %vm8826_vm9, %v12262_v42  ;;  %10846 = vmatmul.mubr.msk.f32.gmra.mrb[38].mxu1 %vm8826_vm9, %v12262_v42  ;;  %v8838_v42 = vpop.xlane.xlu1 %8837 }
 0x5d0   :  { %9035 = vmatprep.mubr.f32.mxu0 %v11859_v45  ;;  %9196 = vmatprep.mubr.f32.mxu1 %v11859_v45 }
 0x5d3   :  { %10831 = vmatmul.mubr.msk.f32.gmra.mrb[40].mxu0 %vm8826_vm9, %v12265_v9  ;;  %10847 = vmatmul.mubr.msk.f32.gmra.mrb[40].mxu1 %vm8826_vm9, %v12265_v9  ;;  %v8841_v9 = vpop.xlane.xlu0 %8840 }
 0x5d4   :  { %9041 = vmatprep.mubr.f32.mxu0 %v11859_v45  ;;  %9202 = vmatprep.mubr.f32.mxu1 %v11859_v45 }
 0x5d7   :  { %10832 = vmatmul.mubr.msk.f32.gmra.mrb[42].mxu0 %vm8826_vm9, %v12276_v28  ;;  %10848 = vmatmul.mubr.msk.f32.gmra.mrb[42].mxu1 %vm8826_vm9, %v12276_v28  ;;  %v11636_v28 = vpop.eup %11635  ;;  %v8847_v50 = vpop.xlane.xlu0 %8846 }
 0x5d8   :  { %9047 = vmatprep.mubr.f32.mxu0 %v11859_v45  ;;  %9208 = vmatprep.mubr.f32.mxu1 %v11859_v45  ;;  %v9251_v19 = vmax.f32 %v8847_v50, 1.0 }
 0x5db   :  { %10833 = vmatmul.mubr.msk.f32.gmra.mrb[44].mxu0 %vm8826_vm9, %v12279_v31  ;;  %10849 = vmatmul.mubr.msk.f32.gmra.mrb[44].mxu1 %vm8826_vm9, %v12279_v31  ;;  %v8844_v31 = vpop.xlane.xlu1 %8843  ;;  %v8853_v35 = vpop.xlane.xlu0 %8852 }
 0x5dc   :  { %9053 = vmatprep.mubr.f32.mxu0 %v11859_v45  ;;  %9214 = vmatprep.mubr.f32.mxu1 %v11859_v45  ;;  %v9250_v58 = vmax.f32 %v8844_v31, 1.0 }
 0x5df   :  { %10834 = vmatmul.mubr.msk.f32.gmra.mrb[46].mxu0 %vm8826_vm9, %v12290_v34  ;;  %10850 = vmatmul.mubr.msk.f32.gmra.mrb[46].mxu1 %vm8826_vm9, %v12290_v34  ;;  %v8850_v3 = vpop.xlane.xlu1 %8849 }
 0x5e0   :  { %9059 = vmatprep.mubr.f32.mxu0 %v11859_v45  ;;  %9220 = vmatprep.mubr.f32.mxu1 %v11859_v45  ;;  %v9252_v25 = vmax.f32 %v8850_v3, 1.0 }
 0x5e3   :  { %10835 = vmatmul.mubr.msk.f32.gmra.mrb[48].mxu0 %vm8826_vm9, %v12293_v30  ;;  %10851 = vmatmul.mubr.msk.f32.gmra.mrb[48].mxu1 %vm8826_vm9, %v12293_v30 }
 0x5e4   :  { %9065 = vmatprep.mubr.f32.mxu0 %v11859_v45  ;;  %9226 = vmatprep.mubr.f32.mxu1 %v11859_v45 }
 0x5e7   :  { %10836 = vmatmul.mubr.msk.f32.gmra.mrb[50].mxu0 %vm8826_vm9, %v12303_v36  ;;  %10852 = vmatmul.mubr.msk.f32.gmra.mrb[50].mxu1 %vm8826_vm9, %v12303_v36  ;;  %v9249_v36 = vmax.f32 %v8841_v9, 1.0 }
 0x5e8   :  { %9071 = vmatprep.mubr.f32.mxu0 %v11859_v45  ;;  %9232 = vmatprep.mubr.f32.mxu1 %v11859_v45 }
 0x5eb   :  { %10837 = vmatmul.mubr.msk.f32.gmra.mrb[52].mxu0 %vm8826_vm9, %v12306_v18  ;;  %10853 = vmatmul.mubr.msk.f32.gmra.mrb[52].mxu1 %vm8826_vm9, %v12306_v18 }
 0x5ec   :  { %9077 = vmatprep.mubr.f32.mxu0 %v11859_v45  ;;  %9238 = vmatprep.mubr.f32.mxu1 %v11859_v45  ;;  %v9248_v45 = vmax.f32 %v8838_v42, 1.0 }
 0x5ee   :  { %11641 = vrcp.f32 %v9248_v45 }
 0x5ef   :  { %10838 = vmatmul.mubr.msk.f32.gmra.mrb[54].mxu0 %vm8826_vm9, %v12314_v47  ;;  %10854 = vmatmul.mubr.msk.f32.gmra.mrb[54].mxu1 %vm8826_vm9, %v12314_v47  ;;  %v11638_v47 = vpop.eup %11637  ;;  %11643 = vrcp.f32 %v9249_v36 }
 0x5f0   :  { %9558 = vmatprep.mubr.f32.mxu1 %v12329_v21  ;;  %9628 = vmatprep.mubr.f32.mxu0 %v12331_v24  ;;  %v11640_v11 = vpop.eup %11639  ;;  %11645 = vrcp.f32 %v9250_v58 }
 0x5f1   :  { %11647 = vrcp.f32 %v9251_v19 }
 0x5f2   :  { %11649 = vrcp.f32 %v9252_v25 }
 0x5f8   :  { %v11642_v26 = vpop.eup %11641 }
 0x5f9   :  { %v11644_v31 = vpop.eup %11643 }
 0x686   :  { %v8989_v34 = vpop.f32.mrb[24].mxu0  ;;  %v9150_v30 = vpop.f32.mrb[24].mxu1 }
 0x687   :  { %v9262_v18 = vmul.f32 %v11636_v28, %v8989_v34  ;;  %v8991_v38 = vpop.f32.mrb[25].mxu0  ;;  %v9152_v44 = vpop.f32.mrb[25].mxu1  ;;  %v9264_v49 = vmul.f32 %v11636_v28, %v9150_v30 }
 0x688   :  { %v9263_v43 = vmul.f32 %v11636_v28, %v8991_v38  ;;  %v9265_v55 = vmul.f32 %v11636_v28, %v9152_v44  ;;  %v8856_v38 = vpop.xlane.xlu1 %8855 }
 0x689   :  { %v9350_v48 = vmul.f32 %v9262_v18, %v9262_v18  ;;  %v9352_v6 = vmul.f32 %v9264_v49, %v9264_v49 }
 0x68a   :  { %v9351_v40 = vmul.f32 %v9263_v43, %v9263_v43  ;;  %v8995_v29 = vpop.f32.mrb[26].mxu0  ;;  %v9156_v51 = vpop.f32.mrb[26].mxu1  ;;  %v9353_v13 = vmul.f32 %v9265_v55, %v9265_v55 }
 0x68b   :  { %v9267_v56 = vmul.f32 %v11638_v47, %v8995_v29  ;;  %v9269_v15 = vmul.f32 %v11638_v47, %v9156_v51  ;;  %v8997_v37 = vpop.f32.mrb[27].mxu0  ;;  %v9158_v14 = vpop.f32.mrb[27].mxu1 }
 0x68c   :  { %v9414_v59 = vadd.f32 %v9351_v40, %v9350_v48  ;;  %v9268_v20 = vmul.f32 %v11638_v47, %v8997_v37  ;;  %v9270_v10 = vmul.f32 %v11638_v47, %v9158_v14  ;;  %v11646_v48 = vpop.eup %11645 }
 0x68d   :  { %v9354_v52 = vmul.f32 %v9267_v56, %v9267_v56  ;;  %v10865_v5 = vpack.c.bf16 %v9267_v56, %v9262_v18  ;;  %v10897_v61 = vpack.c.bf16 %v9269_v15, %v9264_v49  ;;  %v9356_v32 = vmul.f32 %v9269_v15, %v9269_v15  ;;  %v11648_v25 = vpop.eup %11647 }
 0x68e   :  { %v9355_v57 = vmul.f32 %v9268_v20, %v9268_v20  ;;  %v10863_v8 = vpack.c.bf16 %v9268_v20, %v9263_v43  ;;  %v10895_v17 = vpack.c.bf16 %v9270_v10, %v9265_v55  ;;  %v9001_v53 = vpop.f32.mrb[28].mxu0  ;;  %v9162_v46 = vpop.f32.mrb[28].mxu1  ;;  %v9415_v22 = vadd.f32 %v9414_v59, %v9352_v6 }
 0x68f   :  { %v9272_v16 = vmul.f32 %v11640_v11, %v9001_v53  ;;  %v9003_v21 = vpop.f32.mrb[29].mxu0  ;;  %v9164_v24 = vpop.f32.mrb[29].mxu1  ;;  %v9274_v23 = vmul.f32 %v11640_v11, %v9162_v46  ;;  %v9357_v41 = vmul.f32 %v9270_v10, %v9270_v10  ;;  %v9253_v55 = vmax.f32 %v8853_v35, 1.0 }
 0x690   :  { %v9419_v4 = vadd.f32 %v9355_v57, %v9354_v52  ;;  %10864 = vmatprep.subr.bf16.mxu1 %v10863_v8  ;;  %10896 = vmatprep.subr.bf16.mxu0 %v10895_v17  ;;  %v9273_v0 = vmul.f32 %v11640_v11, %v9003_v21  ;;  %v9416_v39 = vadd.f32 %v9415_v22, %v9353_v13 }
 0x691   :  { %v9358_v33 = vmul.f32 %v9272_v16, %v9272_v16  ;;  %10866 = vmatpush1.bf16.xpose.msra.mxu1 %v10865_v5  ;;  %10898 = vmatpush1.bf16.xpose.msra.mxu0 %v10897_v61  ;;  %v9275_v27 = vmul.f32 %v11640_v11, %v9164_v24  ;;  %v9360_v44 = vmul.f32 %v9274_v23, %v9274_v23  ;;  %v9254_v11 = vmax.f32 %v8856_v38, 1.0  ;;  %v8859_v61 = vpop.xlane.xlu0 %8858 }
 0x692   :  { %v9359_v2 = vmul.f32 %v9273_v0, %v9273_v0  ;;  %v9007_v63 = vpop.f32.mrb[30].mxu0  ;;  %v9168_v7 = vpop.f32.mrb[30].mxu1  ;;  %v9420_v60 = vadd.f32 %v9419_v4, %v9356_v32  ;;  %9417 = vadd.xlane.f32.xlu0 %v9416_v39  ;;  %11651 = vrcp.f32 %v9253_v55 }
 0x693   :  { %v9277_v42 = vmul.f32 %v11642_v26, %v9007_v63  ;;  %v9279_v45 = vmul.f32 %v11642_v26, %v9168_v7  ;;  %v9009_v9 = vpop.f32.mrb[31].mxu0  ;;  %v9170_v28 = vpop.f32.mrb[31].mxu1  ;;  %v9361_v56 = vmul.f32 %v9275_v27, %v9275_v27  ;;  %11653 = vrcp.f32 %v9254_v11 }
 0x694   :  { %v9424_v34 = vadd.f32 %v9359_v2, %v9358_v33  ;;  %v9278_v30 = vmul.f32 %v11642_v26, %v9009_v9  ;;  %v9280_v36 = vmul.f32 %v11642_v26, %v9170_v28  ;;  %v9421_v18 = vadd.f32 %v9420_v60, %v9357_v41  ;;  %v11650_v33 = vpop.eup %11649 }
 0x695   :  { %v9362_v47 = vmul.f32 %v9277_v42, %v9277_v42  ;;  %v10869_v43 = vpack.c.bf16 %v9277_v42, %v9272_v16  ;;  %v10901_v58 = vpack.c.bf16 %v9279_v45, %v9274_v23  ;;  %v9364_v20 = vmul.f32 %v9279_v45, %v9279_v45 }
 0x696   :  { %v9363_v49 = vmul.f32 %v9278_v30, %v9278_v30  ;;  %v10867_v50 = vpack.c.bf16 %v9278_v30, %v9273_v0  ;;  %v10899_v40 = vpack.c.bf16 %v9280_v36, %v9275_v27  ;;  %v9013_v29 = vpop.f32.mrb[32].mxu0  ;;  %v9174_v51 = vpop.f32.mrb[32].mxu1  ;;  %9422 = vadd.xlane.f32.xlu1 %v9421_v18  ;;  %v9425_v59 = vadd.f32 %v9424_v34, %v9360_v44 }
 0x697   :  { %v9282_v15 = vmul.f32 %v11644_v31, %v9013_v29  ;;  %v9176_v37 = vpop.f32.mrb[33].mxu1  ;;  %v9015_v14 = vpop.f32.mrb[33].mxu0  ;;  %v9284_v52 = vmul.f32 %v11644_v31, %v9174_v51  ;;  %v9365_v57 = vmul.f32 %v9280_v36, %v9280_v36  ;;  %v9255_v42 = vmax.f32 %v8859_v61, 1.0 }
 0x698   :  { %v9429_v10 = vadd.f32 %v9363_v49, %v9362_v47  ;;  %10868 = vmatprep.subr.bf16.mxu1 %v10867_v50  ;;  %10900 = vmatprep.subr.bf16.mxu0 %v10899_v40  ;;  %v9283_v3 = vmul.f32 %v11644_v31, %v9015_v14  ;;  %v9426_v5 = vadd.f32 %v9425_v59, %v9361_v56  ;;  %v8862_v0 = vpop.xlane.xlu1 %8861 }
 0x699   :  { %v9366_v6 = vmul.f32 %v9282_v15, %v9282_v15  ;;  %10902 = vmatpush1.bf16.xpose.msra.mxu0 %v10901_v58  ;;  %10870 = vmatpush1.bf16.xpose.msra.mxu1 %v10869_v43  ;;  %v9285_v19 = vmul.f32 %v11644_v31, %v9176_v37  ;;  %v9368_v23 = vmul.f32 %v9284_v52, %v9284_v52  ;;  %v9256_v34 = vmax.f32 %v8862_v0, 1.0  ;;  %v8865_v58 = vpop.xlane.xlu0 %8864 }
 0x69a   :  { %v9367_v8 = vmul.f32 %v9283_v3, %v9283_v3  ;;  %v9019_v17 = vpop.f32.mrb[34].mxu0  ;;  %v9180_v53 = vpop.f32.mrb[34].mxu1  ;;  %v9430_v46 = vadd.f32 %v9429_v10, %v9364_v20  ;;  %9427 = vadd.xlane.f32.xlu0 %v9426_v5  ;;  %11655 = vrcp.f32 %v9255_v42 }
 0x69b   :  { %v9287_v13 = vmul.f32 %v11646_v48, %v9019_v17  ;;  %v9289_v16 = vmul.f32 %v11646_v48, %v9180_v53  ;;  %v9021_v21 = vpop.f32.mrb[35].mxu0  ;;  %v9182_v24 = vpop.f32.mrb[35].mxu1  ;;  %v9369_v45 = vmul.f32 %v9285_v19, %v9285_v19  ;;  %11657 = vrcp.f32 %v9256_v34 }
 0x69c   :  { %v9434_v22 = vadd.f32 %v9367_v8, %v9366_v6  ;;  %v9288_v26 = vmul.f32 %v11646_v48, %v9021_v21  ;;  %v9290_v32 = vmul.f32 %v11646_v48, %v9182_v24  ;;  %v9431_v4 = vadd.f32 %v9430_v46, %v9365_v57  ;;  %v11652_v14 = vpop.eup %11651  ;;  %v8868_v57 = vpop.xlane.xlu1 %8867 }
 0x69d   :  { %v9370_v39 = vmul.f32 %v9287_v13, %v9287_v13  ;;  %v10873_v35 = vpack.c.bf16 %v9287_v13, %v9282_v15  ;;  %v10905_v41 = vpack.c.bf16 %v9289_v16, %v9284_v52  ;;  %v9372_v36 = vmul.f32 %v9289_v16, %v9289_v16  ;;  %v8871_v0 = vpop.xlane.xlu0 %8870 }
 0x69e   :  { %v9371_v2 = vmul.f32 %v9288_v26, %v9288_v26  ;;  %v10871_v63 = vpack.c.bf16 %v9288_v26, %v9283_v3  ;;  %v10903_v7 = vpack.c.bf16 %v9290_v32, %v9285_v19  ;;  %v9025_v60 = vpop.f32.mrb[36].mxu0  ;;  %v9186_v27 = vpop.f32.mrb[36].mxu1  ;;  %9432 = vadd.xlane.f32.xlu1 %v9431_v4  ;;  %v9435_v30 = vadd.f32 %v9434_v22, %v9368_v23 }
 0x69f   :  { %v9292_v9 = vmul.f32 %v11648_v25, %v9025_v60  ;;  %v9188_v28 = vpop.f32.mrb[37].mxu1  ;;  %v9027_v31 = vpop.f32.mrb[37].mxu0  ;;  %v9294_v47 = vmul.f32 %v11648_v25, %v9186_v27  ;;  %v9373_v48 = vmul.f32 %v9290_v32, %v9290_v32  ;;  %v9257_v13 = vmax.f32 %v8865_v58, 1.0 }
 0x6a0   :  { %v9439_v18 = vadd.f32 %v9371_v2, %v9370_v39  ;;  %10872 = vmatprep.subr.bf16.mxu1 %v10871_v63  ;;  %10904 = vmatprep.subr.bf16.mxu0 %v10903_v7  ;;  %v9293_v38 = vmul.f32 %v11648_v25, %v9027_v31  ;;  %v9436_v43 = vadd.f32 %v9435_v30, %v9369_v45  ;;  %v11654_v3 = vpop.eup %11653  ;;  %v9258_v39 = vmax.f32 %v8868_v57, 1.0 }
 0x6a1   :  { %v9374_v44 = vmul.f32 %v9292_v9, %v9292_v9  ;;  %10906 = vmatpush1.bf16.xpose.msra.mxu0 %v10905_v41  ;;  %10874 = vmatpush1.bf16.xpose.msra.mxu1 %v10873_v35  ;;  %v9295_v51 = vmul.f32 %v11648_v25, %v9188_v28  ;;  %v9376_v6 = vmul.f32 %v9294_v47, %v9294_v47  ;;  %11659 = vrcp.f32 %v9257_v13 }
 0x6a2   :  { %v9375_v49 = vmul.f32 %v9293_v38, %v9293_v38  ;;  %v9031_v50 = vpop.f32.mrb[38].mxu0  ;;  %v9192_v40 = vpop.f32.mrb[38].mxu1  ;;  %v9440_v29 = vadd.f32 %v9439_v18, %v9372_v36  ;;  %9437 = vadd.xlane.f32.xlu0 %v9436_v43  ;;  %v9259_v31 = vmax.f32 %v8871_v0, 1.0  ;;  %11661 = vrcp.f32 %v9258_v39 }
 0x6a3   :  { %v9297_v55 = vmul.f32 %v11650_v33, %v9031_v50  ;;  %v9299_v56 = vmul.f32 %v11650_v33, %v9192_v40  ;;  %v9033_v15 = vpop.f32.mrb[39].mxu0  ;;  %v9194_v37 = vpop.f32.mrb[39].mxu1  ;;  %v9377_v16 = vmul.f32 %v9295_v51, %v9295_v51 }
 0x6a4   :  { %v9444_v11 = vadd.f32 %v9375_v49, %v9374_v44  ;;  %v9298_v59 = vmul.f32 %v11650_v33, %v9033_v15  ;;  %v9300_v20 = vmul.f32 %v11650_v33, %v9194_v37  ;;  %v9441_v10 = vadd.f32 %v9440_v29, %v9373_v48  ;;  %v11656_v34 = vpop.eup %11655  ;;  %v8874_v49 = vpop.xlane.xlu1 %8873 }
 0x6a5   :  { %v9378_v52 = vmul.f32 %v9297_v55, %v9297_v55  ;;  %v10877_v5 = vpack.c.bf16 %v9297_v55, %v9292_v9  ;;  %v10909_v61 = vpack.c.bf16 %v9299_v56, %v9294_v47  ;;  %v9380_v26 = vmul.f32 %v9299_v56, %v9299_v56  ;;  %v11658_v44 = vpop.eup %11657 }
 0x6a6   :  { %v9379_v8 = vmul.f32 %v9298_v59, %v9298_v59  ;;  %v10875_v17 = vpack.c.bf16 %v9298_v59, %v9293_v38  ;;  %v10907_v53 = vpack.c.bf16 %v9300_v20, %v9295_v51  ;;  %v9037_v46 = vpop.f32.mrb[40].mxu0  ;;  %v9198_v19 = vpop.f32.mrb[40].mxu1  ;;  %9442 = vadd.xlane.f32.xlu1 %v9441_v10  ;;  %v9445_v22 = vadd.f32 %v9444_v11, %v9376_v6 }
 0x6a7   :  { %v9302_v21 = vmul.f32 %v11652_v14, %v9037_v46  ;;  %v9200_v24 = vpop.f32.mrb[41].mxu1  ;;  %v9039_v25 = vpop.f32.mrb[41].mxu0  ;;  %v9304_v23 = vmul.f32 %v11652_v14, %v9198_v19  ;;  %v9381_v41 = vmul.f32 %v9300_v20, %v9300_v20  ;;  %11663 = vrcp.f32 %v9259_v31 }
 0x6a8   :  { %v9449_v32 = vadd.f32 %v9379_v8, %v9378_v52  ;;  %10876 = vmatprep.subr.bf16.mxu1 %v10875_v17  ;;  %10908 = vmatprep.subr.bf16.mxu0 %v10907_v53  ;;  %v9303_v4 = vmul.f32 %v11652_v14, %v9039_v25  ;;  %v9446_v35 = vadd.f32 %v9445_v22, %v9377_v16  ;;  %v9260_v17 = vmax.f32 %v8874_v49, 1.0 }
 0x6a9   :  { %v9382_v33 = vmul.f32 %v9302_v21, %v9302_v21  ;;  %10910 = vmatpush1.bf16.xpose.msra.mxu0 %v10909_v61  ;;  %10878 = vmatpush1.bf16.xpose.msra.mxu1 %v10877_v5  ;;  %v9305_v27 = vmul.f32 %v11652_v14, %v9200_v24  ;;  %v9384_v47 = vmul.f32 %v9304_v23, %v9304_v23 }
 0x6aa   :  { %v9383_v2 = vmul.f32 %v9303_v4, %v9303_v4  ;;  %v9043_v63 = vpop.f32.mrb[42].mxu0  ;;  %v9204_v7 = vpop.f32.mrb[42].mxu1  ;;  %v9450_v60 = vadd.f32 %v9449_v32, %v9380_v26  ;;  %9447 = vadd.xlane.f32.xlu0 %v9446_v35  ;;  %11665 = vrcp.f32 %v9260_v17 }
 0x6ab   :  { %v9307_v42 = vmul.f32 %v11654_v3, %v9043_v63  ;;  %v9309_v45 = vmul.f32 %v11654_v3, %v9204_v7  ;;  %v9045_v9 = vpop.f32.mrb[43].mxu0  ;;  %v9206_v28 = vpop.f32.mrb[43].mxu1  ;;  %v9385_v56 = vmul.f32 %v9305_v27, %v9305_v27 }
 0x6ac   :  { %v9454_v30 = vadd.f32 %v9383_v2, %v9382_v33  ;;  %v9308_v36 = vmul.f32 %v11654_v3, %v9045_v9  ;;  %v9310_v18 = vmul.f32 %v11654_v3, %v9206_v28  ;;  %v9451_v38 = vadd.f32 %v9450_v60, %v9381_v41  ;;  %v11660_v24 = vpop.eup %11659 }
 0x6ad   :  { %v9386_v43 = vmul.f32 %v9307_v42, %v9307_v42  ;;  %v10881_v58 = vpack.c.bf16 %v9307_v42, %v9302_v21  ;;  %v10913_v48 = vpack.c.bf16 %v9309_v45, %v9304_v23  ;;  %v9388_v59 = vmul.f32 %v9309_v45, %v9309_v45  ;;  %v11662_v9 = vpop.eup %11661 }
 0x6ae   :  { %v9387_v50 = vmul.f32 %v9308_v36, %v9308_v36  ;;  %v10879_v40 = vpack.c.bf16 %v9308_v36, %v9303_v4  ;;  %v10911_v29 = vpack.c.bf16 %v9310_v18, %v9305_v27  ;;  %v9049_v51 = vpop.f32.mrb[44].mxu0  ;;  %v9210_v55 = vpop.f32.mrb[44].mxu1  ;;  %9452 = vadd.xlane.f32.xlu1 %v9451_v38  ;;  %v9455_v11 = vadd.f32 %v9454_v30, %v9384_v47 }
 0x6af   :  { %v9312_v15 = vmul.f32 %v11656_v34, %v9049_v51  ;;  %v9212_v37 = vpop.f32.mrb[45].mxu1  ;;  %v9051_v14 = vpop.f32.mrb[45].mxu0  ;;  %v9314_v6 = vmul.f32 %v11656_v34, %v9210_v55  ;;  %v9389_v5 = vmul.f32 %v9310_v18, %v9310_v18 }
 0x6b0   :  { %v9459_v20 = vadd.f32 %v9387_v50, %v9386_v43  ;;  %10880 = vmatprep.subr.bf16.mxu1 %v10879_v40  ;;  %10912 = vmatprep.subr.bf16.mxu0 %v10911_v29  ;;  %v9313_v10 = vmul.f32 %v11656_v34, %v9051_v14  ;;  %v9456_v52 = vadd.f32 %v9455_v11, %v9385_v56 }
 0x6b1   :  { %v9390_v3 = vmul.f32 %v9312_v15, %v9312_v15  ;;  %10914 = vmatpush1.bf16.xpose.msra.mxu0 %v10913_v48  ;;  %10882 = vmatpush1.bf16.xpose.msra.mxu1 %v10881_v58  ;;  %v9315_v46 = vmul.f32 %v11656_v34, %v9212_v37  ;;  %v9392_v4 = vmul.f32 %v9314_v6, %v9314_v6  ;;  %v11664_v48 = vpop.eup %11663 }
 0x6b2   :  { %v9391_v61 = vmul.f32 %v9313_v10, %v9313_v10  ;;  %v9055_v57 = vpop.f32.mrb[46].mxu0  ;;  %v9216_v8 = vpop.f32.mrb[46].mxu1  ;;  %v9460_v53 = vadd.f32 %v9459_v20, %v9388_v59  ;;  %9457 = vadd.xlane.f32.xlu0 %v9456_v52 }
 0x6b3   :  { %v9317_v19 = vmul.f32 %v11658_v44, %v9055_v57  ;;  %v9319_v13 = vmul.f32 %v11658_v44, %v9216_v8  ;;  %v9057_v16 = vpop.f32.mrb[47].mxu0  ;;  %v9218_v21 = vpop.f32.mrb[47].mxu1  ;;  %v9393_v7 = vmul.f32 %v9315_v46, %v9315_v46 }
 0x6b4   :  { %v9464_v25 = vadd.f32 %v9391_v61, %v9390_v3  ;;  %v9318_v22 = vmul.f32 %v11658_v44, %v9057_v16  ;;  %v9320_v26 = vmul.f32 %v11658_v44, %v9218_v21  ;;  %v9461_v32 = vadd.f32 %v9460_v53, %v9389_v5 }
 0x6b5   :  { %v9394_v0 = vmul.f32 %v9317_v19, %v9317_v19  ;;  %v10885_v33 = vpack.c.bf16 %v9317_v19, %v9312_v15  ;;  %v10917_v23 = vpack.c.bf16 %v9319_v13, %v9314_v6  ;;  %v9396_v28 = vmul.f32 %v9319_v13, %v9319_v13 }
 0x6b6   :  { %v9395_v39 = vmul.f32 %v9318_v22, %v9318_v22  ;;  %v10883_v35 = vpack.c.bf16 %v9318_v22, %v9313_v10  ;;  %v10915_v41 = vpack.c.bf16 %v9320_v26, %v9315_v46  ;;  %v9061_v2 = vpop.f32.mrb[48].mxu0  ;;  %v9222_v63 = vpop.f32.mrb[48].mxu1  ;;  %9462 = vadd.xlane.f32.xlu1 %v9461_v32  ;;  %v9465_v45 = vadd.f32 %v9464_v25, %v9392_v4 }
 0x6b7   :  { %v9322_v60 = vmul.f32 %v11660_v24, %v9061_v2  ;;  %v9224_v27 = vpop.f32.mrb[49].mxu1  ;;  %v9063_v42 = vpop.f32.mrb[49].mxu0  ;;  %v9324_v36 = vmul.f32 %v11660_v24, %v9222_v63  ;;  %v9397_v38 = vmul.f32 %v9320_v26, %v9320_v26 }
 0x6b8   :  { %v9469_v31 = vadd.f32 %v9395_v39, %v9394_v0  ;;  %10884 = vmatprep.subr.bf16.mxu1 %v10883_v35  ;;  %10916 = vmatprep.subr.bf16.mxu0 %v10915_v41  ;;  %v9323_v34 = vmul.f32 %v11660_v24, %v9063_v42  ;;  %v9466_v18 = vadd.f32 %v9465_v45, %v9393_v7  ;;  %v11666_v46 = vpop.eup %11665 }
 0x6b9   :  { %v9398_v30 = vmul.f32 %v9322_v60, %v9322_v60  ;;  %10918 = vmatpush1.bf16.xpose.msra.mxu0 %v10917_v23  ;;  %10886 = vmatpush1.bf16.xpose.msra.mxu1 %v10885_v33  ;;  %v9325_v49 = vmul.f32 %v11660_v24, %v9224_v27  ;;  %v9400_v14 = vmul.f32 %v9324_v36, %v9324_v36 }
 0x6ba   :  { %v9399_v44 = vmul.f32 %v9323_v34, %v9323_v34  ;;  %v9067_v47 = vpop.f32.mrb[50].mxu0  ;;  %v9228_v43 = vpop.f32.mrb[50].mxu1  ;;  %v9470_v58 = vadd.f32 %v9469_v31, %v9396_v28  ;;  %9467 = vadd.xlane.f32.xlu0 %v9466_v18 }
 0x6bb   :  { %v9327_v50 = vmul.f32 %v11662_v9, %v9067_v47  ;;  %v9329_v40 = vmul.f32 %v11662_v9, %v9228_v43  ;;  %v9069_v29 = vpop.f32.mrb[51].mxu0  ;;  %v9230_v51 = vpop.f32.mrb[51].mxu1  ;;  %v9401_v61 = vmul.f32 %v9325_v49, %v9325_v49 }
 0x6bc   :  { %v9474_v55 = vadd.f32 %v9399_v44, %v9398_v30  ;;  %v9328_v56 = vmul.f32 %v11662_v9, %v9069_v29  ;;  %v9330_v15 = vmul.f32 %v11662_v9, %v9230_v51  ;;  %v9471_v37 = vadd.f32 %v9470_v58, %v9397_v38 }
 0x6bd   :  { %v9402_v11 = vmul.f32 %v9327_v50, %v9327_v50  ;;  %v10889_v59 = vpack.c.bf16 %v9327_v50, %v9322_v60  ;;  %v10921_v20 = vpack.c.bf16 %v9329_v40, %v9324_v36  ;;  %v9404_v19 = vmul.f32 %v9329_v40, %v9329_v40 }
 0x6be   :  { %v9403_v10 = vmul.f32 %v9328_v56, %v9328_v56  ;;  %v10887_v3 = vpack.c.bf16 %v9328_v56, %v9323_v34  ;;  %v10919_v6 = vpack.c.bf16 %v9330_v15, %v9325_v49  ;;  %v9073_v52 = vpop.f32.mrb[52].mxu0  ;;  %v9234_v5 = vpop.f32.mrb[52].mxu1  ;;  %9472 = vadd.xlane.f32.xlu1 %v9471_v37  ;;  %v9475_v53 = vadd.f32 %v9474_v55, %v9400_v14 }
 0x6bf   :  { %v9332_v57 = vmul.f32 %v11664_v48, %v9073_v52  ;;  %v9075_v8 = vpop.f32.mrb[53].mxu0  ;;  %v9236_v17 = vpop.f32.mrb[53].mxu1  ;;  %v9334_v24 = vmul.f32 %v11664_v48, %v9234_v5  ;;  %v9405_v22 = vmul.f32 %v9330_v15, %v9330_v15 }
 0x6c0   :  { %v9479_v13 = vadd.f32 %v9403_v10, %v9402_v11  ;;  %v9333_v16 = vmul.f32 %v11664_v48, %v9075_v8  ;;  %10888 = vmatprep.subr.bf16.mxu1 %v10887_v3  ;;  %10920 = vmatprep.subr.bf16.mxu0 %v10919_v6  ;;  %v9476_v25 = vadd.f32 %v9475_v53, %v9401_v61 }
 0x6c1   :  { %v9406_v21 = vmul.f32 %v9332_v57, %v9332_v57  ;;  %10922 = vmatpush1.bf16.xpose.msra.mxu0 %v10921_v20  ;;  %10890 = vmatpush1.bf16.xpose.msra.mxu1 %v10889_v59  ;;  %v9335_v33 = vmul.f32 %v11664_v48, %v9236_v17  ;;  %v9408_v27 = vmul.f32 %v9334_v24, %v9334_v24 }
 0x6c2   :  { %v9407_v26 = vmul.f32 %v9333_v16, %v9333_v16  ;;  %v9079_v32 = vpop.f32.mrb[54].mxu0  ;;  %v9240_v4 = vpop.f32.mrb[54].mxu1  ;;  %v9480_v0 = vadd.f32 %v9479_v13, %v9404_v19  ;;  %9477 = vadd.xlane.f32.xlu0 %v9476_v25 }
 0x6c3   :  { %v9337_v23 = vmul.f32 %v11666_v46, %v9079_v32  ;;  %v9339_v39 = vmul.f32 %v11666_v46, %v9240_v4  ;;  %v9081_v35 = vpop.f32.mrb[55].mxu0  ;;  %v9242_v41 = vpop.f32.mrb[55].mxu1  ;;  %v9409_v30 = vmul.f32 %v9335_v33, %v9335_v33 }
 0x6c4   :  { %v9484_v2 = vadd.f32 %v9407_v26, %v9406_v21  ;;  %v9338_v63 = vmul.f32 %v11666_v46, %v9081_v35  ;;  %v9340_v7 = vmul.f32 %v11666_v46, %v9242_v41  ;;  %v9481_v60 = vadd.f32 %v9480_v0, %v9405_v22 }
 0x6c5   :  { %v9410_v42 = vmul.f32 %v9337_v23, %v9337_v23  ;;  %v10893_v45 = vpack.c.bf16 %v9337_v23, %v9332_v57  ;;  %v10925_v9 = vpack.c.bf16 %v9339_v39, %v9334_v24  ;;  %v9412_v18 = vmul.f32 %v9339_v39, %v9339_v39 }
 0x6c6   :  { %v9411_v28 = vmul.f32 %v9338_v63, %v9338_v63  ;;  %v10891_v31 = vpack.c.bf16 %v9338_v63, %v9333_v16  ;;  %v10923_v34 = vpack.c.bf16 %v9340_v7, %v9335_v33  ;;  %9482 = vadd.xlane.f32.xlu1 %v9481_v60  ;;  %v9485_v36 = vadd.f32 %v9484_v2, %v9408_v27 }
 0x6c7   :  { %v9413_v47 = vmul.f32 %v9340_v7, %v9340_v7 }
 0x6c8   :  { %v9489_v38 = vadd.f32 %v9411_v28, %v9410_v42  ;;  %10892 = vmatprep.subr.bf16.mxu1 %v10891_v31  ;;  %10924 = vmatprep.subr.bf16.mxu0 %v10923_v34  ;;  %v9486_v44 = vadd.f32 %v9485_v36, %v9409_v30 }
 0x6c9   :  { %10894 = vmatpush1.bf16.xpose.msra.mxu1 %v10893_v45  ;;  %10926 = vmatpush1.bf16.xpose.msra.mxu0 %v10925_v9 }
 0x6ca   :  { %v9490_v43 = vadd.f32 %v9489_v38, %v9412_v18  ;;  %9487 = vadd.xlane.f32.xlu0 %v9486_v44 }
 0x6cc   :  { %v9491_v58 = vadd.f32 %v9490_v43, %v9413_v47 }
 0x6ce   :  { %9492 = vadd.xlane.f32.xlu1 %v9491_v58  ;;  %9348 = vadd.xlane.f32.xlu0 %v12353_v62 }
 0x6d0   :  { %9559 = vmatmul.mubr.f32.vlgmr.msra.gmra.mrb[56].mxu1 %v12325_v1  ;;  %9629 = vmatmul.mubr.f32.vlgmr.msra.gmra.mrb[56].mxu0 %v12327_v12 }
 0x71f   :  { %v9418_v48 = vpop.xlane.xlu0 %9417 }
 0x720   :  { %9636 = vxpose.xlu1.b32.start [1/16] (narrow) %v9418_v48, 8 }
 0x723   :  { %v9423_v49 = vpop.xlane.xlu1 %9422 }
 0x724   :  { %9637 = vxpose.xlu1.b32.cont [2/16] (narrow) %v9423_v49, 8 }
 0x727   :  { %v9428_v50 = vpop.xlane.xlu0 %9427 }
 0x728   :  { %9638 = vxpose.xlu1.b32.cont [3/16] (narrow) %v9428_v50, 8 }
 0x72b   :  { %v9433_v40 = vpop.xlane.xlu1 %9432 }
 0x72c   :  { %9639 = vxpose.xlu1.b32.cont [4/16] (narrow) %v9433_v40, 8 }
 0x72f   :  { %v9438_v29 = vpop.xlane.xlu0 %9437 }
 0x730   :  { %9640 = vxpose.xlu1.b32.cont [5/16] (narrow) %v9438_v29, 8 }
 0x733   :  { %v9443_v51 = vpop.xlane.xlu1 %9442 }
 0x734   :  { %9641 = vxpose.xlu1.b32.cont [6/16] (narrow) %v9443_v51, 8 }
 0x737   :  { %v9448_v55 = vpop.xlane.xlu0 %9447 }
 0x738   :  { %9642 = vxpose.xlu1.b32.cont [7/16] (narrow) %v9448_v55, 8 }
 0x73b   :  { %v9453_v56 = vpop.xlane.xlu1 %9452 }
 0x73c   :  { %9643 = vxpose.xlu1.b32.cont [8/16] (narrow) %v9453_v56, 8 }
 0x73f   :  { %v9458_v62 = vpop.xlane.xlu0 %9457 }
 0x740   :  { %9644 = vxpose.xlu1.b32.cont [9/16] (narrow) %v9458_v62, 8 }
 0x743   :  { %v9463_v1 = vpop.xlane.xlu1 %9462 }
 0x744   :  { %9645 = vxpose.xlu1.b32.cont [10/16] (narrow) %v9463_v1, 8 }
 0x747   :  { %v9468_v12 = vpop.xlane.xlu0 %9467 }
 0x748   :  { %9646 = vxpose.xlu1.b32.cont [11/16] (narrow) %v9468_v12, 8 }
 0x74b   :  { %v9473_v15 = vpop.xlane.xlu1 %9472 }
 0x74c   :  { %9647 = vxpose.xlu1.b32.cont [12/16] (narrow) %v9473_v15, 8 }
 0x74f   :  { %v9478_v37 = vpop.xlane.xlu0 %9477 }
 0x750   :  { %9648 = vxpose.xlu1.b32.cont [13/16] (narrow) %v9478_v37, 8 }
 0x753   :  { %v9483_v14 = vpop.xlane.xlu1 %9482 }
 0x754   :  { %9649 = vxpose.xlu1.b32.cont [14/16] (narrow) %v9483_v14, 8 }
 0x757   :  { %v9488_v11 = vpop.xlane.xlu0 %9487 }
 0x758   :  { %9650 = vxpose.xlu1.b32.cont [15/16] (narrow) %v9488_v11, 8 }
 0x75b   :  { %v9493_v59 = vpop.xlane.xlu1 %9492  ;;  %v9349_v8 = vpop.xlane.xlu0 %9348 }
 0x75c   :  { %9651 = vxpose.xlu1.b32.end [16/16] (narrow) %v9493_v59, 8 }
 0x7a0   :  { %v9652_v20 = vpop.trf.xlu1 }
 0x7a1   :  { %v9671_v57 = vrot.slane %v9652_v20, %v12040_v54 }
 0x7a3   :  { %v9560_v10 = vpop.f32.mrb[56].mxu1  ;;  %v9630_v3 = vpop.f32.mrb[56].mxu0 }
 0x7a4   :  { %v9631_v6 = vadd.f32 %v9630_v3, %v9560_v10  ;;  %v9562_v52 = vpop.f32.mrb[57].mxu1  ;;  %v9632_v5 = vpop.f32.mrb[57].mxu0 }
 0x7a6   :  { %v9634_v61 = vmul.f32 2.0, %v9631_v6 }
 0x7a8   :  { %v9635_v17 = vsub.f32 %v9634_v61, %v9349_v8 }
 0x7aa   :  { %v9672_v53 = vsub.f32 %v9635_v17, %v9671_v57 }
 0x7ac   :  { %9673 = vst [vmem:[#allocation14] sm:$0xff] %v9672_v53 }
 0x7ad   :  { %11825 = shalt.err (!%p11822_p10)
}
 0x7ae   :  { %s11826_s30 = scalar_lea.hbm %s12462_s7, 128 }
 0x7af   :  { %p11827_p11 = scmp.ne.s32.totalorder %s12462_s7, %s11826_s30  ;;  %p11830_p12 = scmp.lt.u32.totalorder %s11826_s30, %s12462_s7 }
 0x7b1   :  { %p11832_p13 = pnand %p11830_p12, %p11827_p11 }
 0x7b3   :  { %11835 = shalt.err (!%p11832_p13)
}
 0x7b4   :  { %9683 = dma.vmem_to_hbm [thread:$0]  %s9681_s25, 128, %s12462_s7, [#allocation5]  }
 0x7b5   :  { %11844 = dma.done.wait [#allocation5], 128  }
 0x7b6   :  { %11845 = vsyncadd [#allocation5], 4294967168 }
 0x7b7   :  { %9687 = vsyncpa [#allocation4], 1 }
 0x7b8   :  { %9688 = vsyncpa [#allocation7], 1 }
 0x7b9   :  { %9689 = vsyncpa [#allocation10], 1 }
 0x7ba   :  { %9690 = vsyncpa [#allocation13], 1 }
 0x7bb   :  { %9691 = vsyncpa [#allocation5], 1 }

</bundles_post_ra>
